<compile_context>
chip_gen: v6e
topology: v6e:2x2x1
jax: 0.10.0
libtpu: 0.0.40
codegen_flags: <defaults>
</compile_context>

<pallas_src>
import jax
import jax.numpy as jnp
import numpy as np
from jax.experimental import pallas as pl
from jax.experimental.pallas import tpu as pltpu


# ----------------------------------------------------------------------------
# kernels
# ----------------------------------------------------------------------------
def _srl_distill_kernel(logits_ref, targets_ref, side_ref, inv_t_ref,
                        ce_out_ref, kd_out_ref, ce_acc, kd_acc):
    s = pl.program_id(1)

    @pl.when(s == 0)
    def _init():
        ce_acc[...] = jnp.zeros_like(ce_acc)
        kd_acc[...] = jnp.zeros_like(kd_acc)

    x = logits_ref[...].astype(jnp.float32)        # (TILE, T) student logits
    t = targets_ref[...].astype(jnp.float32)       # (TILE, T) teacher logits
    labels = side_ref[:, 0:1].astype(jnp.int32)    # (TILE, 1)
    ce_m = side_ref[:, 1:2]                        # (TILE, 1) {0,1}
    kd_m = side_ref[:, 2:3]                        # (TILE, 1) {0,1}
    inv_t = inv_t_ref[0]                           # scalar 1/temperature (SMEM)

    # ---- hard-label cross entropy (CrossEntropyLoss, reduction='mean') ----
    mx = jnp.max(x, axis=-1, keepdims=True)
    xm = x - mx
    lse = jnp.log(jnp.sum(jnp.exp(xm), axis=-1, keepdims=True)) + mx
    col = jax.lax.broadcasted_iota(jnp.int32, x.shape, 1)
    onehot = (col == labels).astype(jnp.float32)
    x_label = jnp.sum(x * onehot, axis=-1, keepdims=True)      # (TILE, 1)
    ce_acc[...] += (lse - x_label) * ce_m

    # ---- KD soft cross entropy at temperature ----
    # kd_row = lse(x/T) - sum(softmax(t/T) * x) / T   (no full-tile divides)
    lse_s = jnp.log(jnp.sum(jnp.exp(xm * inv_t), axis=-1, keepdims=True)) + mx * inv_t
    mt = jnp.max(t, axis=-1, keepdims=True)
    et = jnp.exp((t - mt) * inv_t)
    st = jnp.sum(et, axis=-1, keepdims=True)                   # (TILE, 1)
    sx = jnp.sum(et * x, axis=-1, keepdims=True) * inv_t       # (TILE, 1)
    kd_row = lse_s - sx * pl.reciprocal(st, approx=True)
    kd_acc[...] += kd_row * kd_m

    @pl.when(s == pl.num_programs(1) - 1)
    def _finalize():
        ce_tot = jnp.sum(ce_acc[...], keepdims=True)           # (1, 1)
        kd_tot = jnp.sum(kd_acc[...], keepdims=True)
        ce_out_ref[...] = jnp.broadcast_to(ce_tot, ce_out_ref.shape)
        kd_out_ref[...] = jnp.broadcast_to(kd_tot, kd_out_ref.shape)


def _srl_ce_kernel(logits_ref, side_ref, ce_out_ref, ce_acc):
    s = pl.program_id(1)

    @pl.when(s == 0)
    def _init():
        ce_acc[...] = jnp.zeros_like(ce_acc)

    x = logits_ref[...].astype(jnp.float32)
    labels = side_ref[:, 0:1].astype(jnp.int32)
    ce_m = side_ref[:, 1:2]

    mx = jnp.max(x, axis=-1, keepdims=True)
    lse = jnp.log(jnp.sum(jnp.exp(x - mx), axis=-1, keepdims=True)) + mx
    col = jax.lax.broadcasted_iota(jnp.int32, x.shape, 1)
    onehot = (col == labels).astype(jnp.float32)
    x_label = jnp.sum(x * onehot, axis=-1, keepdims=True)
    ce_acc[...] += (lse - x_label) * ce_m

    @pl.when(s == pl.num_programs(1) - 1)
    def _finalize():
        ce_out_ref[...] = jnp.broadcast_to(
            jnp.sum(ce_acc[...], keepdims=True), ce_out_ref.shape)


# ----------------------------------------------------------------------------
# tiling / grid helpers
# ----------------------------------------------------------------------------
def _round_up(x, m):
    return -(-x // m) * m


def _choose_tile(n_rows, n_cols, big_streams, budget_bytes=16 << 20):
    """Largest row tile whose double-buffered working set stays well under the
    scoped-VMEM default on every generation (v7x has only 64 MiB physical)."""
    per_row = big_streams * 2 * n_cols * 4        # f32 logits/targets, 2 buffers
    per_row += 2 * 3 * 4 + big_streams * 4        # side stream + accumulators
    cap = max(128, min(2048, budget_bytes // per_row))
    cap -= cap % 8
    return min(cap, _round_up(n_rows, 8))


def _grid_plan(n_rows, tile):
    steps = -(-n_rows // tile)
    shards = 2 if steps >= 2 else 1               # both TCs on v7x megacore
    steps = _round_up(steps, shards)
    return steps, shards


# ----------------------------------------------------------------------------
# pallas_call wrappers
# ----------------------------------------------------------------------------
def _call_distill(logits_rows, targets_rows, side_rows, inv_temp,
                  tile, shards, steps):
    _, T = logits_rows.shape
    sps = steps // shards                          # steps per shard
    row_map = lambda g, s: (g * sps + s, 0)
    out_block = pl.BlockSpec((8, 128), lambda g, s: (g, 0))
    out_shape = jax.ShapeDtypeStruct((shards * 8, 128), jnp.float32)

    return pl.pallas_call(
        _srl_distill_kernel,
        out_shape=(out_shape, out_shape),
        grid_spec=pltpu.PrefetchScalarGridSpec(
            num_scalar_prefetch=0,
            grid=(shards, sps),
            in_specs=[
                pl.BlockSpec((tile, T), row_map),                     # student
                pl.BlockSpec((tile, T), row_map),                     # teacher
                pl.BlockSpec((tile, 3), row_map),                     # side
                pl.BlockSpec(memory_space=pltpu.MemorySpace.SMEM),    # 1/T
            ],
            out_specs=(out_block, out_block),
            scratch_shapes=[pltpu.VMEM((tile, 1), jnp.float32),
                            pltpu.VMEM((tile, 1), jnp.float32)],
        ),
        compiler_params=pltpu.CompilerParams(
            dimension_semantics=("parallel", "arbitrary")),
    )(logits_rows, targets_rows, side_rows, inv_temp)


def _call_ce(logits_rows, side_rows, tile, shards, steps):
    _, T = logits_rows.shape
    sps = steps // shards
    row_map = lambda g, s: (g * sps + s, 0)

    return pl.pallas_call(
        _srl_ce_kernel,
        out_shape=jax.ShapeDtypeStruct((shards * 8, 128), jnp.float32),
        grid_spec=pltpu.PrefetchScalarGridSpec(
            num_scalar_prefetch=0,
            grid=(shards, sps),
            in_specs=[
                pl.BlockSpec((tile, T), row_map),
                pl.BlockSpec((tile, 3), row_map),
            ],
            out_specs=pl.BlockSpec((8, 128), lambda g, s: (g, 0)),
            scratch_shapes=[pltpu.VMEM((tile, 1), jnp.float32)],
        ),
        compiler_params=pltpu.CompilerParams(
            dimension_semantics=("parallel", "arbitrary")),
    )(logits_rows, side_rows)


# ----------------------------------------------------------------------------
# public wrapper (forward pass of SRLDistillLoss, crf assumed None)
# ----------------------------------------------------------------------------
def srl_distill_loss(logits, labels, attention_mask, targets,
                     temperature_scheduler):
    """logits/targets: (B,S,S,T); labels: (B,S,S) int; attention_mask: (B,S)."""
    B, S, _, T = logits.shape
    N = B * S * S
    has_kd = targets is not None

    mask = attention_mask.astype(bool)                       # (B, S)
    pm = mask[:, :, None] & mask[:, None, :]                 # (B, S, S) pairwise
    # supervised active set: mask[b,0] & mask[b,i] & mask[b,j]
    ce_mask = (pm & mask[:, 0:1][:, :, None]).reshape(N).astype(jnp.float32)
    # distill active set: pairwise token mask.
    # TODO(synk): upstream SRLDistillLoss indexes with attention_mask.view(-1),
    #             which is shape-inconsistent for 4-D SRL logits; the pairwise
    #             mask makes the selection well defined.
    kd_mask = pm.reshape(N).astype(jnp.float32)

    logits_rows = logits.reshape(N, T)                       # native dtype
    side = jnp.stack([labels.reshape(N).astype(jnp.float32), ce_mask, kd_mask],
                     axis=-1)                                # (N, 3)

    if has_kd:
        targets_rows = targets.reshape(N, T)
        # TODO(synk): upstream calls the scheduler on the active rows only;
        #             we pass the full (unpadded) flattened tensors, which is
        #             exact for constant schedulers like the one used here.
        temperature = temperature_scheduler(logits_rows, targets_rows)
        inv_temp = (1.0 / jnp.asarray(temperature, jnp.float32)).reshape(1)
    else:
        targets_rows = None
        inv_temp = None

    tile = _choose_tile(N, T, big_streams=2 if has_kd else 1)
    steps, shards = _grid_plan(N, tile)
    pad_n = steps * tile - N
    if pad_n:                                                # zero rows, masked out
        logits_rows = jnp.pad(logits_rows, ((0, pad_n), (0, 0)))
        side = jnp.pad(side, ((0, pad_n), (0, 0)))
        if has_kd:
            targets_rows = jnp.pad(targets_rows, ((0, pad_n), (0, 0)))

    # NOTE: a count of zero yields NaN, matching torch's mean over an empty set.
    ce_cnt = jnp.sum(ce_mask)
    if has_kd:
        ce_out, kd_out = _call_distill(logits_rows, targets_rows, side,
                                       inv_temp, tile, shards, steps)
        kd_cnt = jnp.sum(kd_mask)
        loss = jnp.sum(ce_out[::8, 0]) / ce_cnt + jnp.sum(kd_out[::8, 0]) / kd_cnt
    else:
        ce_out = _call_ce(logits_rows, side, tile, shards, steps)
        loss = jnp.sum(ce_out[::8, 0]) / ce_cnt
    # TODO(synk): CRF branch of SRLLoss/SRLDistillLoss (result.crf is not None)
    #             is not implemented; crf is assumed None here.
    return loss


# ----------------------------------------------------------------------------
# pure-JAX reference (eager mirror of the PyTorch forward) + test
# ----------------------------------------------------------------------------
def _reference_terms(logits, labels, attention_mask, targets, temperature):
    B, S, _, T = logits.shape
    mask = attention_mask.astype(bool)
    pm = mask[:, :, None] & mask[:, None, :]
    pm_flat = pm.reshape(B * S, S)
    index = pm_flat[:, 0]
    am = pm_flat[index]
    lg = logits.reshape(B * S, S, T)[index]
    lb = labels.reshape(B * S, S)[index]
    active = am.reshape(-1)
    a_logits = lg.reshape(-1, T)[active]
    a_labels = lb.reshape(-1)[active]
    logp = jax.nn.log_softmax(a_logits, axis=-1)
    ce = -jnp.mean(jnp.take_along_axis(
        logp, a_labels[:, None].astype(jnp.int32), axis=1))
    kd_active = pm.reshape(-1)
    s = logits.reshape(-1, T)[kd_active] / temperature
    t = targets.reshape(-1, T)[kd_active] / temperature
    p_t = jax.nn.softmax(t, axis=-1)
    kd = -jnp.mean(jnp.sum(p_t * jax.nn.log_softmax(s, axis=-1), axis=-1))
    return ce, kd


if __name__ == "__main__":
    key = jax.random.PRNGKey(0)
    B, S, T = 2, 16, 16  # batch, seq, num_tags  -> logits (B, S, S, T)
    k1, k2, k3 = jax.random.split(key, 3)

    logits = jax.random.normal(k1, (B, S, S, T), jnp.float32)
    targets = jax.random.normal(k2, (B, S, S, T), jnp.float32)  # teacher logits
    labels = jax.random.randint(k3, (B, S, S), 0, T, jnp.int32)
    lengths = jnp.array([S, 10])
    attention_mask = (jnp.arange(S)[None, :] < lengths[:, None]).astype(jnp.int32)

    # deterministic temperature scheduler (e.g. textbrewer constant scheduler)
    temperature_scheduler = lambda logits_s, logits_t: 2.0

    loss = srl_distill_loss(logits, labels, attention_mask, targets,
                            temperature_scheduler)
    loss = jax.block_until_ready(loss)

    ref_ce, ref_kd = _reference_terms(logits, labels, attention_mask, targets, 2.0)
    np.testing.assert_allclose(np.asarray(loss), np.asarray(ref_ce + ref_kd),
                               rtol=2e-3, atol=2e-3)

    # targets=None path (plain SRLLoss cross-entropy) uses the CE-only kernel.
    ce_only = jax.block_until_ready(
        srl_distill_loss(logits, labels, attention_mask, None,
                         temperature_scheduler))
    np.testing.assert_allclose(np.asarray(ce_only), np.asarray(ref_ce),
                               rtol=2e-3, atol=2e-3)

    print("KERNEL_OK")
</pallas_src>

<mosaic_0001>
module attributes {stable_mosaic.version = 11 : i64} {
  func.func @_srl_distill_kernel(%arg0: i32, %arg1: i32, %arg2: memref<512x16xf32, #tpu.memory_space<vmem>>, %arg3: memref<512x16xf32, #tpu.memory_space<vmem>>, %arg4: memref<512x3xf32, #tpu.memory_space<vmem>>, %arg5: memref<1xf32, #tpu.memory_space<smem>>, %arg6: memref<8x128xf32, #tpu.memory_space<vmem>>, %arg7: memref<8x128xf32, #tpu.memory_space<vmem>>, %arg8: memref<512x1xf32, #tpu.memory_space<vmem>>, %arg9: memref<512x1xf32, #tpu.memory_space<vmem>>) attributes {dimension_semantics = [#tpu.dimension_semantics<parallel>, #tpu.dimension_semantics<arbitrary>], iteration_bounds = array<i64: 1, 1>, scalar_prefetch = 0 : i64, scratch_operands = 2 : i64, tpu.core_type = #tpu.core_type<tc>, window_params = [{transform_indices = @transform_0, window_bounds = array<i64: 512, 16>}, {transform_indices = @transform_1, window_bounds = array<i64: 512, 16>}, {transform_indices = @transform_2, window_bounds = array<i64: 512, 3>}, {transform_indices = @transform_3, window_bounds = array<i64: 1>}, {transform_indices = @transform_4, window_bounds = array<i64: 8, 128>}, {transform_indices = @transform_5, window_bounds = array<i64: 8, 128>}]} {
    %c0_i32 = arith.constant 0 : i32
    %0 = arith.cmpi eq, %arg1, %c0_i32 : i32
    %1 = arith.extui %0 : i1 to i32
    %c0_i32_0 = arith.constant 0 : i32
    %2 = arith.cmpi ne, %1, %c0_i32_0 : i32
    scf.if %2 {
      %cst_25 = arith.constant 0.000000e+00 : f32
      %65 = vector.broadcast %cst_25 : f32 to vector<512x1xf32>
      %c0_26 = arith.constant 0 : index
      %c0_27 = arith.constant 0 : index
      %66 = vector.load %arg8[%c0_26, %c0_27] : memref<512x1xf32, #tpu.memory_space<vmem>>, vector<512x1xf32>
      tpu.vector_store %arg8[%c0_26, %c0_27], %65 {strides = array<i32>} : memref<512x1xf32, #tpu.memory_space<vmem>>, vector<512x1xf32>,
      %cst_28 = arith.constant 0.000000e+00 : f32
      %67 = vector.broadcast %cst_28 : f32 to vector<512x1xf32>
      %c0_29 = arith.constant 0 : index
      %c0_30 = arith.constant 0 : index
      %68 = vector.load %arg9[%c0_29, %c0_30] : memref<512x1xf32, #tpu.memory_space<vmem>>, vector<512x1xf32>
      tpu.vector_store %arg9[%c0_29, %c0_30], %67 {strides = array<i32>} : memref<512x1xf32, #tpu.memory_space<vmem>>, vector<512x1xf32>,
    } else {
    }
    %c0 = arith.constant 0 : index
    %c0_1 = arith.constant 0 : index
    %3 = vector.load %arg2[%c0, %c0_1] : memref<512x16xf32, #tpu.memory_space<vmem>>, vector<512x16xf32>
    %c0_2 = arith.constant 0 : index
    %c0_3 = arith.constant 0 : index
    %4 = vector.load %arg3[%c0_2, %c0_3] : memref<512x16xf32, #tpu.memory_space<vmem>>, vector<512x16xf32>
    %c0_4 = arith.constant 0 : index
    %c0_5 = arith.constant 0 : index
    %5 = vector.load %arg4[%c0_4, %c0_5] : memref<512x3xf32, #tpu.memory_space<vmem>>, vector<512x1xf32>
    %6 = arith.fptosi %5 : vector<512x1xf32> to vector<512x1xi32>
    %c0_6 = arith.constant 0 : index
    %c1 = arith.constant 1 : index
    %7 = vector.load %arg4[%c0_6, %c1] : memref<512x3xf32, #tpu.memory_space<vmem>>, vector<512x1xf32>
    %c0_7 = arith.constant 0 : index
    %c2 = arith.constant 2 : index
    %8 = vector.load %arg4[%c0_7, %c2] : memref<512x3xf32, #tpu.memory_space<vmem>>, vector<512x1xf32>
    %c0_8 = arith.constant 0 : index
    %9 = memref.load %arg5[%c0_8] : memref<1xf32, #tpu.memory_space<smem>>
    %cst = arith.constant dense<0xFF800000> : vector<512xf32>
    %10 = vector.multi_reduction <maximumf>, %3, %cst [1] : vector<512x16xf32> to vector<512xf32>
    %11 = vector.shape_cast %10 : vector<512xf32> to vector<512x1xf32>
    %12 = vector.broadcast %11 : vector<512x1xf32> to vector<512x16xf32>
    %13 = arith.subf %3, %12 : vector<512x16xf32>
    %14 = math.exp %13 : vector<512x16xf32>
    %cst_9 = arith.constant dense<0.000000e+00> : vector<512xf32>
    %15 = vector.multi_reduction <add>, %14, %cst_9 [1] : vector<512x16xf32> to vector<512xf32>
    %16 = vector.shape_cast %15 : vector<512xf32> to vector<512x1xf32>
    %17 = math.log %16 : vector<512x1xf32>
    %18 = arith.addf %17, %11 : vector<512x1xf32>
    %19 = tpu.iota {dimensions = array<i32: 1>} : vector<512x16xi32>
    %20 = vector.broadcast %6 : vector<512x1xi32> to vector<512x16xi32>
    %21 = arith.cmpi eq, %19, %20 : vector<512x16xi32>
    %22 = arith.extui %21 : vector<512x16xi1> to vector<512x16xi32>
    %23 = arith.sitofp %22 : vector<512x16xi32> to vector<512x16xf32>
    %24 = arith.mulf %3, %23 : vector<512x16xf32>
    %cst_10 = arith.constant dense<0.000000e+00> : vector<512xf32>
    %25 = vector.multi_reduction <add>, %24, %cst_10 [1] : vector<512x16xf32> to vector<512xf32>
    %26 = vector.shape_cast %25 : vector<512xf32> to vector<512x1xf32>
    %c0_11 = arith.constant 0 : index
    %c0_12 = arith.constant 0 : index
    %27 = vector.load %arg8[%c0_11, %c0_12] : memref<512x1xf32, #tpu.memory_space<vmem>>, vector<512x1xf32>
    %28 = arith.subf %18, %26 : vector<512x1xf32>
    %29 = arith.mulf %28, %7 : vector<512x1xf32>
    %30 = arith.addf %27, %29 : vector<512x1xf32>
    %c0_13 = arith.constant 0 : index
    %c0_14 = arith.constant 0 : index
    %31 = vector.load %arg8[%c0_13, %c0_14] : memref<512x1xf32, #tpu.memory_space<vmem>>, vector<512x1xf32>
    tpu.vector_store %arg8[%c0_13, %c0_14], %30 {strides = array<i32>} : memref<512x1xf32, #tpu.memory_space<vmem>>, vector<512x1xf32>,
    %32 = vector.broadcast %9 : f32 to vector<512x16xf32>
    %33 = arith.mulf %13, %32 : vector<512x16xf32>
    %34 = math.exp %33 : vector<512x16xf32>
    %cst_15 = arith.constant dense<0.000000e+00> : vector<512xf32>
    %35 = vector.multi_reduction <add>, %34, %cst_15 [1] : vector<512x16xf32> to vector<512xf32>
    %36 = vector.shape_cast %35 : vector<512xf32> to vector<512x1xf32>
    %37 = math.log %36 : vector<512x1xf32>
    %38 = vector.broadcast %9 : f32 to vector<512x1xf32>
    %39 = arith.mulf %11, %38 : vector<512x1xf32>
    %40 = arith.addf %37, %39 : vector<512x1xf32>
    %cst_16 = arith.constant dense<0xFF800000> : vector<512xf32>
    %41 = vector.multi_reduction <maximumf>, %4, %cst_16 [1] : vector<512x16xf32> to vector<512xf32>
    %42 = vector.shape_cast %41 : vector<512xf32> to vector<512x1xf32>
    %43 = vector.broadcast %42 : vector<512x1xf32> to vector<512x16xf32>
    %44 = arith.subf %4, %43 : vector<512x16xf32>
    %45 = vector.broadcast %9 : f32 to vector<512x16xf32>
    %46 = arith.mulf %44, %45 : vector<512x16xf32>
    %47 = math.exp %46 : vector<512x16xf32>
    %cst_17 = arith.constant dense<0.000000e+00> : vector<512xf32>
    %48 = vector.multi_reduction <add>, %47, %cst_17 [1] : vector<512x16xf32> to vector<512xf32>
    %49 = vector.shape_cast %48 : vector<512xf32> to vector<512x1xf32>
    %50 = arith.mulf %47, %3 : vector<512x16xf32>
    %cst_18 = arith.constant dense<0.000000e+00> : vector<512xf32>
    %51 = vector.multi_reduction <add>, %50, %cst_18 [1] : vector<512x16xf32> to vector<512xf32>
    %52 = vector.shape_cast %51 : vector<512xf32> to vector<512x1xf32>
    %53 = vector.broadcast %9 : f32 to vector<512x1xf32>
    %54 = arith.mulf %52, %53 : vector<512x1xf32>
    %55 = tpu.reciprocal %49 {approx = true} : vector<512x1xf32> -> vector<512x1xf32>
    %56 = arith.mulf %54, %55 : vector<512x1xf32>
    %57 = arith.subf %40, %56 : vector<512x1xf32>
    %c0_19 = arith.constant 0 : index
    %c0_20 = arith.constant 0 : index
    %58 = vector.load %arg9[%c0_19, %c0_20] : memref<512x1xf32, #tpu.memory_space<vmem>>, vector<512x1xf32>
    %59 = arith.mulf %57, %8 : vector<512x1xf32>
    %60 = arith.addf %58, %59 : vector<512x1xf32>
    %c0_21 = arith.constant 0 : index
    %c0_22 = arith.constant 0 : index
    %61 = vector.load %arg9[%c0_21, %c0_22] : memref<512x1xf32, #tpu.memory_space<vmem>>, vector<512x1xf32>
    tpu.vector_store %arg9[%c0_21, %c0_22], %60 {strides = array<i32>} : memref<512x1xf32, #tpu.memory_space<vmem>>, vector<512x1xf32>,
    %c0_i32_23 = arith.constant 0 : i32
    %62 = arith.cmpi eq, %arg1, %c0_i32_23 : i32
    %63 = arith.extui %62 : i1 to i32
    %c0_i32_24 = arith.constant 0 : i32
    %64 = arith.cmpi ne, %63, %c0_i32_24 : i32
    scf.if %64 {
      %c0_25 = arith.constant 0 : index
      %c0_26 = arith.constant 0 : index
      %65 = vector.load %arg8[%c0_25, %c0_26] : memref<512x1xf32, #tpu.memory_space<vmem>>, vector<512x1xf32>
      %66 = vector.shape_cast %65 : vector<512x1xf32> to vector<1x512x1xf32>
      %cst_27 = arith.constant dense<0.000000e+00> : vector<1xf32>
      %67 = vector.multi_reduction <add>, %66, %cst_27 [1, 2] : vector<1x512x1xf32> to vector<1xf32>
      %68 = vector.shape_cast %67 : vector<1xf32> to vector<1x1x1xf32>
      %69 = vector.extract %68[0, 0, 0] : f32 from vector<1x1x1xf32>
      %70 = vector.broadcast %69 : f32 to vector<1x1xf32>
      %c0_28 = arith.constant 0 : index
      %c0_29 = arith.constant 0 : index
      %71 = vector.load %arg9[%c0_28, %c0_29] : memref<512x1xf32, #tpu.memory_space<vmem>>, vector<512x1xf32>
      %72 = vector.shape_cast %71 : vector<512x1xf32> to vector<1x512x1xf32>
      %cst_30 = arith.constant dense<0.000000e+00> : vector<1xf32>
      %73 = vector.multi_reduction <add>, %72, %cst_30 [1, 2] : vector<1x512x1xf32> to vector<1xf32>
      %74 = vector.shape_cast %73 : vector<1xf32> to vector<1x1x1xf32>
      %75 = vector.extract %74[0, 0, 0] : f32 from vector<1x1x1xf32>
      %76 = vector.broadcast %75 : f32 to vector<1x1xf32>
      %77 = vector.shape_cast %70 : vector<1x1xf32> to vector<1x1xf32>
      %78 = vector.broadcast %77 : vector<1x1xf32> to vector<8x128xf32>
      %c0_31 = arith.constant 0 : index
      %c0_32 = arith.constant 0 : index
      %79 = vector.load %arg6[%c0_31, %c0_32] : memref<8x128xf32, #tpu.memory_space<vmem>>, vector<8x128xf32>
      tpu.vector_store %arg6[%c0_31, %c0_32], %78 {strides = array<i32>} : memref<8x128xf32, #tpu.memory_space<vmem>>, vector<8x128xf32>,
      %80 = vector.shape_cast %76 : vector<1x1xf32> to vector<1x1xf32>
      %81 = vector.broadcast %80 : vector<1x1xf32> to vector<8x128xf32>
      %c0_33 = arith.constant 0 : index
      %c0_34 = arith.constant 0 : index
      %82 = vector.load %arg7[%c0_33, %c0_34] : memref<8x128xf32, #tpu.memory_space<vmem>>, vector<8x128xf32>
      tpu.vector_store %arg7[%c0_33, %c0_34], %81 {strides = array<i32>} : memref<8x128xf32, #tpu.memory_space<vmem>>, vector<8x128xf32>,
    } else {
    }
    return
  }
  func.func @transform_0(%arg0: i32, %arg1: i32) -> (i32, i32) {
    %c1_i32 = arith.constant 1 : i32
    %0 = arith.muli %arg0, %c1_i32 : i32
    %1 = arith.addi %0, %arg1 : i32
    %c0_i32 = arith.constant 0 : i32
    %c0_i32_0 = arith.constant 0 : i32
    return %1, %c0_i32 : i32, i32
  }
  func.func @transform_1(%arg0: i32, %arg1: i32) -> (i32, i32) {
    %c1_i32 = arith.constant 1 : i32
    %0 = arith.muli %arg0, %c1_i32 : i32
    %1 = arith.addi %0, %arg1 : i32
    %c0_i32 = arith.constant 0 : i32
    %c0_i32_0 = arith.constant 0 : i32
    return %1, %c0_i32 : i32, i32
  }
  func.func @transform_2(%arg0: i32, %arg1: i32) -> (i32, i32) {
    %c1_i32 = arith.constant 1 : i32
    %0 = arith.muli %arg0, %c1_i32 : i32
    %1 = arith.addi %0, %arg1 : i32
    %c0_i32 = arith.constant 0 : i32
    %c0_i32_0 = arith.constant 0 : i32
    return %1, %c0_i32 : i32, i32
  }
  func.func @transform_3(%arg0: i32, %arg1: i32) -> i32 {
    %c0_i32 = arith.constant 0 : i32
    %c0_i32_0 = arith.constant 0 : i32
    return %c0_i32 : i32
  }
  func.func @transform_4(%arg0: i32, %arg1: i32) -> (i32, i32) {
    %c0_i32 = arith.constant 0 : i32
    %c0_i32_0 = arith.constant 0 : i32
    return %arg0, %c0_i32 : i32, i32
  }
  func.func @transform_5(%arg0: i32, %arg1: i32) -> (i32, i32) {
    %c0_i32 = arith.constant 0 : i32
    %c0_i32_0 = arith.constant 0 : i32
    return %arg0, %c0_i32 : i32, i32
  }
}

</mosaic_0001>

<bundles_post_ra>
// kernel: tpu_custom_call.1
= control target key start
LH: loop header
LB: loop body
LE: loop exit
PB: predicated region body
PF: predicated region fallthrough
CT: control target
= control target key end

     0   :  { %12 = vsyncpa [#allocation6], 0  ;;  %vm478_vm0 = vcmask 130048   ;;  %s11934_s0 = inlined_call_operand.vmem [shape: f32[512,16], index: 0, kind: input, shape index: {}]   ;;  %s11935_s1 = inlined_call_operand.vmem [shape: f32[512,16], index: 1, kind: input, shape index: {}]   ;;  %s11936_s2 = inlined_call_operand.vmem [shape: f32[512,3], index: 2, kind: input, shape index: {}]   ;;  %s11937_s3 = inlined_call_operand.<no memory space> [shape: f32[1], index: 3, kind: input, shape index: {}]   ;;  %s11938_s4 = inlined_call_operand.hbm [shape: f32[8,128], index: 4, kind: output, shape index: {0}]   ;;  %s11939_s5 = inlined_call_operand.hbm [shape: f32[8,128], index: 5, kind: output, shape index: {1}]  }
   0x1   :  { %v6557_v0 = vld [vmem:[%s11934_s0] sm:$0xff]  ;;  %v6562_v1 = vld [vmem:[%s11934_s0 + $0x10] sm:$0xff]  ;;  %v6567_v2 = vld [vmem:[%s11934_s0 + $0x8] sm:$0xff] }
   0x2   :  { %v479_v3 = vsel %vm478_vm0, %v6557_v0, -inf  ;;  %v485_v4 = vsel %vm478_vm0, %v6562_v1, -inf  ;;  %v6576_v5 = vld [vmem:[%s11934_s0 + $0x18] sm:$0xff]  ;;  %v482_v6 = vsel %vm478_vm0, %v6567_v2, -inf  ;;  %v6585_v8 = vld [vmem:[%s11934_s0 + $0x20] sm:$0xff]  ;;  %v6590_v9 = vld [vmem:[%s11934_s0 + $0x28] sm:$0xff] }
   0x3   :  { %480 = vmax.xlane.f32.xlu0 %v479_v3  ;;  %486 = vmax.xlane.f32.xlu1 %v485_v4  ;;  %v488_v7 = vsel %vm478_vm0, %v6576_v5, -inf  ;;  %v491_v10 = vsel %vm478_vm0, %v6585_v8, -inf  ;;  %v494_v11 = vsel %vm478_vm0, %v6590_v9, -inf  ;;  %v6599_v12 = vld [vmem:[%s11934_s0 + $0x30] sm:$0xff]  ;;  %v6604_v13 = vld [vmem:[%s11934_s0 + $0x38] sm:$0xff]  ;;  %v6613_v16 = vld [vmem:[%s11934_s0 + $0x40] sm:$0xff] }
   0x4   :  { %v497_v14 = vsel %vm478_vm0, %v6599_v12, -inf  ;;  %v500_v15 = vsel %vm478_vm0, %v6604_v13, -inf  ;;  %v6618_v17 = vld [vmem:[%s11934_s0 + $0x48] sm:$0xff]  ;;  %v503_v18 = vsel %vm478_vm0, %v6613_v16, -inf  ;;  %v6627_v20 = vld [vmem:[%s11934_s0 + $0x50] sm:$0xff]  ;;  %v6632_v21 = vld [vmem:[%s11934_s0 + $0x58] sm:$0xff] }
   0x5   :  { %v506_v19 = vsel %vm478_vm0, %v6618_v17, -inf  ;;  %v509_v22 = vsel %vm478_vm0, %v6627_v20, -inf  ;;  %v512_v23 = vsel %vm478_vm0, %v6632_v21, -inf  ;;  %v6641_v24 = vld [vmem:[%s11934_s0 + $0x60] sm:$0xff]  ;;  %v6646_v25 = vld [vmem:[%s11934_s0 + $0x68] sm:$0xff] }
   0x7   :  { %483 = vmax.xlane.f32.xlu0 %v482_v6  ;;  %489 = vmax.xlane.f32.xlu1 %v488_v7 }
   0xb   :  { %492 = vmax.xlane.f32.xlu0 %v491_v10  ;;  %495 = vmax.xlane.f32.xlu1 %v494_v11 }
   0xf   :  { %498 = vmax.xlane.f32.xlu0 %v497_v14  ;;  %501 = vmax.xlane.f32.xlu1 %v500_v15 }
  0x13   :  { %504 = vmax.xlane.f32.xlu0 %v503_v18  ;;  %507 = vmax.xlane.f32.xlu1 %v506_v19 }
  0x14   :  { %13 = vsyncpa [#allocation8], 0  ;;  %v515_v26 = vsel %vm478_vm0, %v6641_v24, -inf  ;;  %v518_v27 = vsel %vm478_vm0, %v6646_v25, -inf  ;;  %v6655_v28 = vld [vmem:[%s11934_s0 + $0x70] sm:$0xff]  ;;  %v6660_v29 = vld [vmem:[%s11934_s0 + $0x78] sm:$0xff] }
  0x15   :  { %v521_v30 = vsel %vm478_vm0, %v6655_v28, -inf  ;;  %v524_v31 = vsel %vm478_vm0, %v6660_v29, -inf  ;;  %v6669_v32 = vld [vmem:[%s11934_s0 + $0x80] sm:$0xff]  ;;  %v6674_v33 = vld [vmem:[%s11934_s0 + $0x88] sm:$0xff]  ;;  %v6683_v36 = vld [vmem:[%s11934_s0 + $0x90] sm:$0xff]  ;;  %s6520_s6 = smov 127  }
  0x16   :  { %v527_v34 = vsel %vm478_vm0, %v6669_v32, -inf  ;;  %v530_v35 = vsel %vm478_vm0, %v6674_v33, -inf  ;;  %v6688_v37 = vld [vmem:[%s11934_s0 + $0x98] sm:$0xff]  ;;  %v533_v38 = vsel %vm478_vm0, %v6683_v36, -inf  ;;  %v6697_v40 = vld [vmem:[%s11934_s0 + $0xa0] sm:$0xff]  ;;  %v6702_v41 = vld [vmem:[%s11934_s0 + $0xa8] sm:$0xff] }
  0x17   :  { %510 = vmax.xlane.f32.xlu0 %v509_v22  ;;  %513 = vmax.xlane.f32.xlu1 %v512_v23  ;;  %v536_v39 = vsel %vm478_vm0, %v6688_v37, -inf  ;;  %v539_v42 = vsel %vm478_vm0, %v6697_v40, -inf  ;;  %v542_v43 = vsel %vm478_vm0, %v6702_v41, -inf  ;;  %v6711_v44 = vld [vmem:[%s11934_s0 + $0xb0] sm:$0xff]  ;;  %v6716_v45 = vld [vmem:[%s11934_s0 + $0xb8] sm:$0xff]  ;;  %v6725_v48 = vld [vmem:[%s11934_s0 + $0xc0] sm:$0xff] }
  0x18   :  { %v545_v46 = vsel %vm478_vm0, %v6711_v44, -inf  ;;  %v548_v47 = vsel %vm478_vm0, %v6716_v45, -inf  ;;  %v6730_v49 = vld [vmem:[%s11934_s0 + $0xc8] sm:$0xff]  ;;  %v551_v50 = vsel %vm478_vm0, %v6725_v48, -inf  ;;  %v6739_v52 = vld [vmem:[%s11934_s0 + $0xd0] sm:$0xff]  ;;  %v6744_v53 = vld [vmem:[%s11934_s0 + $0xd8] sm:$0xff] }
  0x19   :  { %v554_v51 = vsel %vm478_vm0, %v6730_v49, -inf  ;;  %v557_v54 = vsel %vm478_vm0, %v6739_v52, -inf  ;;  %v560_v55 = vsel %vm478_vm0, %v6744_v53, -inf  ;;  %v6753_v56 = vld [vmem:[%s11934_s0 + $0xe0] sm:$0xff]  ;;  %v6758_v57 = vld [vmem:[%s11934_s0 + $0xe8] sm:$0xff]  ;;  %v6767_v60 = vld [vmem:[%s11934_s0 + $0xf0] sm:$0xff] }
  0x1a   :  { %v563_v58 = vsel %vm478_vm0, %v6753_v56, -inf  ;;  %v566_v59 = vsel %vm478_vm0, %v6758_v57, -inf  ;;  %v6772_v61 = vld [vmem:[%s11934_s0 + $0xf8] sm:$0xff]  ;;  %v569_v62 = vsel %vm478_vm0, %v6767_v60, -inf  ;;  %v6781_v3 = vld [vmem:[%s11934_s0 + $0x100] sm:$0xff]  ;;  %v6786_v4 = vld [vmem:[%s11934_s0 + $0x108] sm:$0xff] }
  0x1b   :  { %516 = vmax.xlane.f32.xlu0 %v515_v26  ;;  %519 = vmax.xlane.f32.xlu1 %v518_v27  ;;  %v572_v63 = vsel %vm478_vm0, %v6772_v61, -inf  ;;  %v575_v6 = vsel %vm478_vm0, %v6781_v3, -inf  ;;  %v578_v7 = vsel %vm478_vm0, %v6786_v4, -inf  ;;  %v6795_v10 = vld [vmem:[%s11934_s0 + $0x110] sm:$0xff]  ;;  %v6800_v11 = vld [vmem:[%s11934_s0 + $0x118] sm:$0xff]  ;;  %v6809_v18 = vld [vmem:[%s11934_s0 + $0x120] sm:$0xff] }
  0x1c   :  { %v581_v14 = vsel %vm478_vm0, %v6795_v10, -inf  ;;  %v584_v15 = vsel %vm478_vm0, %v6800_v11, -inf  ;;  %v6814_v19 = vld [vmem:[%s11934_s0 + $0x128] sm:$0xff]  ;;  %v587_v22 = vsel %vm478_vm0, %v6809_v18, -inf  ;;  %v6823_v26 = vld [vmem:[%s11934_s0 + $0x130] sm:$0xff]  ;;  %v6828_v27 = vld [vmem:[%s11934_s0 + $0x138] sm:$0xff] }
  0x1d   :  { %v590_v23 = vsel %vm478_vm0, %v6814_v19, -inf  ;;  %s6521_s27 = smov 126  }
  0x1f   :  { %522 = vmax.xlane.f32.xlu0 %v521_v30  ;;  %525 = vmax.xlane.f32.xlu1 %v524_v31  ;;  %v593_v30 = vsel %vm478_vm0, %v6823_v26, -inf  ;;  %v596_v31 = vsel %vm478_vm0, %v6828_v27, -inf }
  0x23   :  { %528 = vmax.xlane.f32.xlu0 %v527_v34  ;;  %531 = vmax.xlane.f32.xlu1 %v530_v35  ;;  %v6837_v34 = vld [vmem:[%s11934_s0 + $0x140] sm:$0xff]  ;;  %v6842_v35 = vld [vmem:[%s11934_s0 + $0x148] sm:$0xff] }
  0x27   :  { %534 = vmax.xlane.f32.xlu0 %v533_v38  ;;  %537 = vmax.xlane.f32.xlu1 %v536_v39  ;;  %v599_v38 = vsel %vm478_vm0, %v6837_v34, -inf  ;;  %v602_v39 = vsel %vm478_vm0, %v6842_v35, -inf }
  0x2b   :  { %540 = vmax.xlane.f32.xlu0 %v539_v42  ;;  %543 = vmax.xlane.f32.xlu1 %v542_v43  ;;  %v6851_v42 = vld [vmem:[%s11934_s0 + $0x150] sm:$0xff]  ;;  %v6856_v43 = vld [vmem:[%s11934_s0 + $0x158] sm:$0xff] }
  0x2f   :  { %546 = vmax.xlane.f32.xlu0 %v545_v46  ;;  %549 = vmax.xlane.f32.xlu1 %v548_v47  ;;  %v605_v46 = vsel %vm478_vm0, %v6851_v42, -inf  ;;  %v608_v47 = vsel %vm478_vm0, %v6856_v43, -inf }
  0x33   :  { %552 = vmax.xlane.f32.xlu0 %v551_v50  ;;  %555 = vmax.xlane.f32.xlu1 %v554_v51  ;;  %v6865_v50 = vld [vmem:[%s11934_s0 + $0x160] sm:$0xff]  ;;  %v6870_v51 = vld [vmem:[%s11934_s0 + $0x168] sm:$0xff] }
  0x37   :  { %558 = vmax.xlane.f32.xlu0 %v557_v54  ;;  %561 = vmax.xlane.f32.xlu1 %v560_v55  ;;  %v611_v54 = vsel %vm478_vm0, %v6865_v50, -inf  ;;  %v614_v55 = vsel %vm478_vm0, %v6870_v51, -inf }
  0x3b   :  { %564 = vmax.xlane.f32.xlu0 %v563_v58  ;;  %567 = vmax.xlane.f32.xlu1 %v566_v59  ;;  %v6879_v58 = vld [vmem:[%s11934_s0 + $0x170] sm:$0xff]  ;;  %v6884_v59 = vld [vmem:[%s11934_s0 + $0x178] sm:$0xff] }
  0x3f   :  { %570 = vmax.xlane.f32.xlu0 %v569_v62  ;;  %573 = vmax.xlane.f32.xlu1 %v572_v63  ;;  %v617_v62 = vsel %vm478_vm0, %v6879_v58, -inf  ;;  %v620_v63 = vsel %vm478_vm0, %v6884_v59, -inf }
  0x43   :  { %576 = vmax.xlane.f32.xlu0 %v575_v6  ;;  %579 = vmax.xlane.f32.xlu1 %v578_v7  ;;  %v6893_v6 = vld [vmem:[%s11934_s0 + $0x180] sm:$0xff]  ;;  %v6898_v7 = vld [vmem:[%s11934_s0 + $0x188] sm:$0xff] }
  0x47   :  { %582 = vmax.xlane.f32.xlu0 %v581_v14  ;;  %585 = vmax.xlane.f32.xlu1 %v584_v15  ;;  %v623_v14 = vsel %vm478_vm0, %v6893_v6, -inf  ;;  %v626_v15 = vsel %vm478_vm0, %v6898_v7, -inf }
  0x4b   :  { %588 = vmax.xlane.f32.xlu0 %v587_v22  ;;  %591 = vmax.xlane.f32.xlu1 %v590_v23  ;;  %v6907_v22 = vld [vmem:[%s11934_s0 + $0x190] sm:$0xff]  ;;  %v6912_v23 = vld [vmem:[%s11934_s0 + $0x198] sm:$0xff] }
  0x4f   :  { %594 = vmax.xlane.f32.xlu0 %v593_v30  ;;  %597 = vmax.xlane.f32.xlu1 %v596_v31  ;;  %v629_v30 = vsel %vm478_vm0, %v6907_v22, -inf  ;;  %v632_v31 = vsel %vm478_vm0, %v6912_v23, -inf }
  0x53   :  { %600 = vmax.xlane.f32.xlu0 %v599_v38  ;;  %603 = vmax.xlane.f32.xlu1 %v602_v39  ;;  %v6921_v38 = vld [vmem:[%s11934_s0 + $0x1a0] sm:$0xff]  ;;  %v6926_v39 = vld [vmem:[%s11934_s0 + $0x1a8] sm:$0xff] }
  0x57   :  { %606 = vmax.xlane.f32.xlu0 %v605_v46  ;;  %609 = vmax.xlane.f32.xlu1 %v608_v47  ;;  %v635_v46 = vsel %vm478_vm0, %v6921_v38, -inf  ;;  %v638_v47 = vsel %vm478_vm0, %v6926_v39, -inf }
  0x5b   :  { %612 = vmax.xlane.f32.xlu0 %v611_v54  ;;  %615 = vmax.xlane.f32.xlu1 %v614_v55  ;;  %v6935_v54 = vld [vmem:[%s11934_s0 + $0x1b0] sm:$0xff]  ;;  %v6940_v55 = vld [vmem:[%s11934_s0 + $0x1b8] sm:$0xff] }
  0x5c   :  { %12127 = vst [vmem:[#allocation11_spill] sm:$0xff] %v6935_v54  ;;  %12128 = vst [vmem:[#allocation12_spill] sm:$0xff] %v6940_v55 }
  0x5f   :  { %618 = vmax.xlane.f32.xlu0 %v617_v62  ;;  %621 = vmax.xlane.f32.xlu1 %v620_v63  ;;  %v641_v62 = vsel %vm478_vm0, %v6935_v54, -inf  ;;  %v644_v63 = vsel %vm478_vm0, %v6940_v55, -inf }
  0x63   :  { %624 = vmax.xlane.f32.xlu0 %v623_v14  ;;  %627 = vmax.xlane.f32.xlu1 %v626_v15  ;;  %v6949_v14 = vld [vmem:[%s11934_s0 + $0x1c0] sm:$0xff]  ;;  %v6954_v15 = vld [vmem:[%s11934_s0 + $0x1c8] sm:$0xff] }
  0x64   :  { %12129 = vst [vmem:[#allocation13_spill] sm:$0xff] %v6949_v14  ;;  %12130 = vst [vmem:[#allocation14_spill] sm:$0xff] %v6954_v15 }
  0x67   :  { %630 = vmax.xlane.f32.xlu0 %v629_v30  ;;  %633 = vmax.xlane.f32.xlu1 %v632_v31  ;;  %v647_v30 = vsel %vm478_vm0, %v6949_v14, -inf  ;;  %v650_v31 = vsel %vm478_vm0, %v6954_v15, -inf  ;;  %v6977_v15 = vld [vmem:[%s11934_s0 + $0x1e0] sm:$0xff]  ;;  %v6982_v14 = vld [vmem:[%s11934_s0 + $0x1e8] sm:$0xff] }
  0x68   :  { %12133 = vst [vmem:[#allocation17_spill] sm:$0xff] %v6977_v15  ;;  %12134 = vst [vmem:[#allocation18_spill] sm:$0xff] %v6982_v14 }
  0x6b   :  { %636 = vmax.xlane.f32.xlu0 %v635_v46  ;;  %639 = vmax.xlane.f32.xlu1 %v638_v47  ;;  %v6963_v46 = vld [vmem:[%s11934_s0 + $0x1d0] sm:$0xff]  ;;  %v6968_v47 = vld [vmem:[%s11934_s0 + $0x1d8] sm:$0xff] }
  0x6c   :  { %12131 = vst [vmem:[#allocation15_spill] sm:$0xff] %v6963_v46  ;;  %12132 = vst [vmem:[#allocation16_spill] sm:$0xff] %v6968_v47 }
  0x6f   :  { %642 = vmax.xlane.f32.xlu0 %v641_v62  ;;  %645 = vmax.xlane.f32.xlu1 %v644_v63  ;;  %v653_v62 = vsel %vm478_vm0, %v6963_v46, -inf  ;;  %v656_v63 = vsel %vm478_vm0, %v6968_v47, -inf  ;;  %v6991_v47 = vld [vmem:[%s11934_s0 + $0x1f0] sm:$0xff]  ;;  %v6996_v46 = vld [vmem:[%s11934_s0 + $0x1f8] sm:$0xff] }
  0x70   :  { %12135 = vst [vmem:[#allocation19_spill] sm:$0xff] %v6991_v47 }
  0x73   :  { %648 = vmax.xlane.f32.xlu0 %v647_v30  ;;  %651 = vmax.xlane.f32.xlu1 %v650_v31  ;;  %v659_v30 = vsel %vm478_vm0, %v6977_v15, -inf  ;;  %v662_v31 = vsel %vm478_vm0, %v6982_v14, -inf }
  0x77   :  { %654 = vmax.xlane.f32.xlu0 %v653_v62  ;;  %657 = vmax.xlane.f32.xlu1 %v656_v63  ;;  %v665_v62 = vsel %vm478_vm0, %v6991_v47, -inf  ;;  %v668_v63 = vsel %vm478_vm0, %v6996_v46, -inf }
  0x7b   :  { %660 = vmax.xlane.f32.xlu0 %v659_v30  ;;  %663 = vmax.xlane.f32.xlu1 %v662_v31 }
  0x7f   :  { %666 = vmax.xlane.f32.xlu0 %v665_v62  ;;  %669 = vmax.xlane.f32.xlu1 %v668_v63 }
  0x8c   :  { %v7002_v14 = vpop.xlane.xlu0 %480  ;;  %v7004_v15 = vpop.xlane.xlu1 %486 }
  0x8d   :  { %12136 = vst [vmem:[#allocation20_spill] sm:$0xff] %v7004_v15  ;;  %v7008_v55 = vsub.f32 %v6557_v0, %v7002_v14  ;;  %v7012_v30 = vsub.f32 %v6562_v1, %v7004_v15 }
  0x8f   :  { %12137 = vst [vmem:[#allocation21_spill] sm:$0xff] %v7008_v55  ;;  %12138 = vst [vmem:[#allocation22_spill] sm:$0xff] %v7012_v30  ;;  %v735_v31 = vmul.f32 1.442695, %v7008_v55  ;;  %v739_v47 = vmul.f32 1.442695, %v7012_v30 }
  0x90   :  { %v7016_v54 = vpop.xlane.xlu0 %483  ;;  %v7018_v62 = vpop.xlane.xlu1 %489 }
  0x91   :  { %12139 = vst [vmem:[#allocation23_spill] sm:$0xff] %v7018_v62  ;;  %5428 = vpow2.f32 %v735_v31  ;;  %v7022_v63 = vsub.f32 %v6567_v2, %v7016_v54  ;;  %v7026_v0 = vsub.f32 %v6576_v5, %v7018_v62 }
  0x92   :  { %5430 = vpow2.f32 %v739_v47 }
  0x93   :  { %12140 = vst [vmem:[#allocation24_spill] sm:$0xff] %v7022_v63  ;;  %12141 = vst [vmem:[#allocation25_spill] sm:$0xff] %v7026_v0  ;;  %v737_v1 = vmul.f32 1.442695, %v7022_v63  ;;  %v741_v55 = vmul.f32 1.442695, %v7026_v0 }
  0x94   :  { %v7030_v15 = vpop.xlane.xlu0 %492  ;;  %v7032_v30 = vpop.xlane.xlu1 %495 }
  0x95   :  { %12142 = vst [vmem:[#allocation26_spill] sm:$0xff] %v7030_v15  ;;  %12143 = vst [vmem:[#allocation27_spill] sm:$0xff] %v7032_v30  ;;  %5432 = vpow2.f32 %v737_v1  ;;  %v7036_v31 = vsub.f32 %v6585_v8, %v7030_v15  ;;  %v7040_v2 = vsub.f32 %v6590_v9, %v7032_v30 }
  0x96   :  { %5434 = vpow2.f32 %v741_v55 }
  0x97   :  { %12144 = vst [vmem:[#allocation28_spill] sm:$0xff] %v7036_v31  ;;  %12145 = vst [vmem:[#allocation29_spill] sm:$0xff] %v7040_v2  ;;  %v743_v5 = vmul.f32 1.442695, %v7036_v31  ;;  %v745_v47 = vmul.f32 1.442695, %v7040_v2 }
  0x98   :  { %v7044_v63 = vpop.xlane.xlu0 %498  ;;  %v7046_v0 = vpop.xlane.xlu1 %501 }
  0x99   :  { %12146 = vst [vmem:[#allocation30_spill] sm:$0xff] %v7044_v63  ;;  %12147 = vst [vmem:[#allocation31_spill] sm:$0xff] %v7046_v0  ;;  %5436 = vpow2.f32 %v743_v5  ;;  %v7050_v1 = vsub.f32 %v6599_v12, %v7044_v63  ;;  %v7054_v8 = vsub.f32 %v6604_v13, %v7046_v0 }
  0x9a   :  { %5438 = vpow2.f32 %v745_v47 }
  0x9b   :  { %12148 = vst [vmem:[#allocation32_spill] sm:$0xff] %v7050_v1  ;;  %12149 = vst [vmem:[#allocation33_spill] sm:$0xff] %v7054_v8  ;;  %v747_v9 = vmul.f32 1.442695, %v7050_v1  ;;  %v749_v55 = vmul.f32 1.442695, %v7054_v8 }
  0x9c   :  { %v7058_v31 = vpop.xlane.xlu0 %504  ;;  %v7060_v2 = vpop.xlane.xlu1 %507 }
  0x9d   :  { %12150 = vst [vmem:[#allocation34_spill] sm:$0xff] %v7058_v31  ;;  %12151 = vst [vmem:[#allocation35_spill] sm:$0xff] %v7060_v2  ;;  %5440 = vpow2.f32 %v747_v9  ;;  %v7064_v5 = vsub.f32 %v6613_v16, %v7058_v31  ;;  %v7068_v47 = vsub.f32 %v6618_v17, %v7060_v2 }
  0x9e   :  { %v5429_v12 = vpop.eup %5428  ;;  %5442 = vpow2.f32 %v749_v55 }
  0x9f   :  { %12152 = vst [vmem:[#allocation36_spill] sm:$0xff] %v7064_v5  ;;  %12153 = vst [vmem:[#allocation37_spill] sm:$0xff] %v7068_v47  ;;  %v5431_v13 = vpop.eup %5430  ;;  %v751_v1 = vmul.f32 1.442695, %v7064_v5  ;;  %v863_v8 = vsel %vm478_vm0, %v5429_v12, 0.0 }
  0xa0   :  { %v753_v0 = vmul.f32 1.442695, %v7068_v47  ;;  %864 = vadd.xlane.f32.xlu0 %v863_v8  ;;  %v7073_v63 = vpop.xlane.xlu0 %510  ;;  %v7075_v9 = vpop.xlane.xlu1 %513  ;;  %v869_v17 = vsel %vm478_vm0, %v5431_v13, 0.0 }
  0xa1   :  { %12154 = vst [vmem:[#allocation38_spill] sm:$0xff] %v7073_v63  ;;  %12155 = vst [vmem:[#allocation39_spill] sm:$0xff] %v7075_v9  ;;  %5444 = vpow2.f32 %v751_v1  ;;  %v7079_v16 = vsub.f32 %v6627_v20, %v7073_v63  ;;  %v7084_v5 = vsub.f32 %v6632_v21, %v7075_v9 }
  0xa2   :  { %v5433_v55 = vpop.eup %5432  ;;  %5446 = vpow2.f32 %v753_v0 }
  0xa3   :  { %12156 = vst [vmem:[#allocation40_spill] sm:$0xff] %v7079_v16  ;;  %12157 = vst [vmem:[#allocation41_spill] sm:$0xff] %v7084_v5  ;;  %v5435_v12 = vpop.eup %5434  ;;  %v755_v8 = vmul.f32 1.442695, %v7079_v16  ;;  %v866_v47 = vsel %vm478_vm0, %v5433_v55, 0.0 }
  0xa4   :  { %v757_v2 = vmul.f32 1.442695, %v7084_v5  ;;  %870 = vadd.xlane.f32.xlu0 %v869_v17  ;;  %867 = vadd.xlane.f32.xlu1 %v866_v47  ;;  %v7089_v1 = vpop.xlane.xlu0 %516  ;;  %v7091_v20 = vpop.xlane.xlu1 %519  ;;  %v872_v21 = vsel %vm478_vm0, %v5435_v12, 0.0 }
  0xa5   :  { %12158 = vst [vmem:[#allocation42_spill] sm:$0xff] %v7089_v1  ;;  %12159 = vst [vmem:[#allocation43_spill] sm:$0xff] %v7091_v20  ;;  %5448 = vpow2.f32 %v755_v8  ;;  %v7095_v0 = vsub.f32 %v6641_v24, %v7089_v1  ;;  %v7100_v55 = vsub.f32 %v6646_v25, %v7091_v20 }
  0xa6   :  { %v5437_v13 = vpop.eup %5436  ;;  %5450 = vpow2.f32 %v757_v2 }
  0xa7   :  { %12160 = vst [vmem:[#allocation44_spill] sm:$0xff] %v7095_v0  ;;  %12161 = vst [vmem:[#allocation45_spill] sm:$0xff] %v7100_v55  ;;  %v5439_v5 = vpop.eup %5438  ;;  %v759_v47 = vmul.f32 1.442695, %v7095_v0  ;;  %v875_v17 = vsel %vm478_vm0, %v5437_v13, 0.0 }
  0xa8   :  { %v761_v16 = vmul.f32 1.442695, %v7100_v55  ;;  %873 = vadd.xlane.f32.xlu1 %v872_v21  ;;  %876 = vadd.xlane.f32.xlu0 %v875_v17  ;;  %v7105_v8 = vpop.xlane.xlu0 %522  ;;  %v7107_v24 = vpop.xlane.xlu1 %525  ;;  %v878_v25 = vsel %vm478_vm0, %v5439_v5, 0.0 }
  0xa9   :  { %12162 = vst [vmem:[#allocation46_spill] sm:$0xff] %v7105_v8  ;;  %12163 = vst [vmem:[#allocation47_spill] sm:$0xff] %v7107_v24  ;;  %5452 = vpow2.f32 %v759_v47  ;;  %v7111_v2 = vsub.f32 %v6655_v28, %v7105_v8  ;;  %v7116_v13 = vsub.f32 %v6660_v29, %v7107_v24 }
  0xaa   :  { %v5441_v12 = vpop.eup %5440  ;;  %5454 = vpow2.f32 %v761_v16 }
  0xab   :  { %12164 = vst [vmem:[#allocation48_spill] sm:$0xff] %v7111_v2  ;;  %12165 = vst [vmem:[#allocation49_spill] sm:$0xff] %v7116_v13  ;;  %v5443_v55 = vpop.eup %5442  ;;  %v763_v21 = vmul.f32 1.442695, %v7111_v2  ;;  %v881_v17 = vsel %vm478_vm0, %v5441_v12, 0.0 }
  0xac   :  { %v765_v0 = vmul.f32 1.442695, %v7116_v13  ;;  %879 = vadd.xlane.f32.xlu1 %v878_v25  ;;  %882 = vadd.xlane.f32.xlu0 %v881_v17  ;;  %v7121_v47 = vpop.xlane.xlu0 %528  ;;  %v7123_v28 = vpop.xlane.xlu1 %531  ;;  %v884_v29 = vsel %vm478_vm0, %v5443_v55, 0.0 }
  0xad   :  { %12166 = vst [vmem:[#allocation50_spill] sm:$0xff] %v7121_v47  ;;  %12167 = vst [vmem:[#allocation51_spill] sm:$0xff] %v7123_v28  ;;  %5456 = vpow2.f32 %v763_v21  ;;  %v7127_v5 = vsub.f32 %v6669_v32, %v7121_v47  ;;  %v7132_v12 = vsub.f32 %v6674_v33, %v7123_v28 }
  0xae   :  { %v5445_v16 = vpop.eup %5444  ;;  %5458 = vpow2.f32 %v765_v0 }
  0xaf   :  { %12168 = vst [vmem:[#allocation52_spill] sm:$0xff] %v7127_v5  ;;  %12169 = vst [vmem:[#allocation53_spill] sm:$0xff] %v7132_v12  ;;  %v5447_v13 = vpop.eup %5446  ;;  %v767_v25 = vmul.f32 1.442695, %v7127_v5  ;;  %v887_v17 = vsel %vm478_vm0, %v5445_v16, 0.0 }
  0xb0   :  { %v769_v2 = vmul.f32 1.442695, %v7132_v12  ;;  %885 = vadd.xlane.f32.xlu1 %v884_v29  ;;  %888 = vadd.xlane.f32.xlu0 %v887_v17  ;;  %v7137_v21 = vpop.xlane.xlu0 %534  ;;  %v7139_v32 = vpop.xlane.xlu1 %537  ;;  %v890_v33 = vsel %vm478_vm0, %v5447_v13, 0.0 }
  0xb1   :  { %12170 = vst [vmem:[#allocation54_spill] sm:$0xff] %v7137_v21  ;;  %12171 = vst [vmem:[#allocation55_spill] sm:$0xff] %v7139_v32  ;;  %5460 = vpow2.f32 %v767_v25  ;;  %v7143_v0 = vsub.f32 %v6683_v36, %v7137_v21  ;;  %v7148_v16 = vsub.f32 %v6688_v37, %v7139_v32 }
  0xb2   :  { %v5449_v55 = vpop.eup %5448  ;;  %5462 = vpow2.f32 %v769_v2 }
  0xb3   :  { %12172 = vst [vmem:[#allocation56_spill] sm:$0xff] %v7143_v0  ;;  %12173 = vst [vmem:[#allocation57_spill] sm:$0xff] %v7148_v16  ;;  %v5451_v12 = vpop.eup %5450  ;;  %v771_v29 = vmul.f32 1.442695, %v7143_v0  ;;  %v893_v17 = vsel %vm478_vm0, %v5449_v55, 0.0 }
  0xb4   :  { %v773_v5 = vmul.f32 1.442695, %v7148_v16  ;;  %891 = vadd.xlane.f32.xlu1 %v890_v33  ;;  %894 = vadd.xlane.f32.xlu0 %v893_v17  ;;  %v7153_v25 = vpop.xlane.xlu0 %540  ;;  %v7155_v36 = vpop.xlane.xlu1 %543  ;;  %v896_v37 = vsel %vm478_vm0, %v5451_v12, 0.0 }
  0xb5   :  { %12174 = vst [vmem:[#allocation58_spill] sm:$0xff] %v7153_v25  ;;  %12175 = vst [vmem:[#allocation59_spill] sm:$0xff] %v7155_v36  ;;  %5464 = vpow2.f32 %v771_v29  ;;  %v7159_v2 = vsub.f32 %v6697_v40, %v7153_v25  ;;  %v7164_v55 = vsub.f32 %v6702_v41, %v7155_v36 }
  0xb6   :  { %v5453_v13 = vpop.eup %5452  ;;  %5466 = vpow2.f32 %v773_v5 }
  0xb7   :  { %12176 = vst [vmem:[#allocation60_spill] sm:$0xff] %v7159_v2  ;;  %12177 = vst [vmem:[#allocation61_spill] sm:$0xff] %v7164_v55  ;;  %v5455_v16 = vpop.eup %5454  ;;  %v775_v33 = vmul.f32 1.442695, %v7159_v2  ;;  %v899_v17 = vsel %vm478_vm0, %v5453_v13, 0.0 }
  0xb8   :  { %v777_v0 = vmul.f32 1.442695, %v7164_v55  ;;  %897 = vadd.xlane.f32.xlu1 %v896_v37  ;;  %900 = vadd.xlane.f32.xlu0 %v899_v17  ;;  %v7169_v29 = vpop.xlane.xlu0 %546  ;;  %v7171_v40 = vpop.xlane.xlu1 %549  ;;  %v902_v41 = vsel %vm478_vm0, %v5455_v16, 0.0 }
  0xb9   :  { %12178 = vst [vmem:[#allocation62_spill] sm:$0xff] %v7169_v29  ;;  %12179 = vst [vmem:[#allocation63_spill] sm:$0xff] %v7171_v40  ;;  %5468 = vpow2.f32 %v775_v33  ;;  %v7175_v5 = vsub.f32 %v6711_v44, %v7169_v29  ;;  %v7180_v13 = vsub.f32 %v6716_v45, %v7171_v40 }
  0xba   :  { %v5457_v12 = vpop.eup %5456  ;;  %5470 = vpow2.f32 %v777_v0 }
  0xbb   :  { %12180 = vst [vmem:[#allocation64_spill] sm:$0xff] %v7175_v5  ;;  %12181 = vst [vmem:[#allocation65_spill] sm:$0xff] %v7180_v13  ;;  %v5459_v55 = vpop.eup %5458  ;;  %v779_v37 = vmul.f32 1.442695, %v7175_v5  ;;  %v905_v17 = vsel %vm478_vm0, %v5457_v12, 0.0 }
  0xbc   :  { %v781_v2 = vmul.f32 1.442695, %v7180_v13  ;;  %903 = vadd.xlane.f32.xlu1 %v902_v41  ;;  %906 = vadd.xlane.f32.xlu0 %v905_v17  ;;  %v7185_v33 = vpop.xlane.xlu0 %552  ;;  %v7187_v44 = vpop.xlane.xlu1 %555  ;;  %v908_v45 = vsel %vm478_vm0, %v5459_v55, 0.0 }
  0xbd   :  { %12182 = vst [vmem:[#allocation66_spill] sm:$0xff] %v7185_v33  ;;  %12183 = vst [vmem:[#allocation67_spill] sm:$0xff] %v7187_v44  ;;  %5472 = vpow2.f32 %v779_v37  ;;  %v7191_v0 = vsub.f32 %v6725_v48, %v7185_v33  ;;  %v7196_v12 = vsub.f32 %v6730_v49, %v7187_v44 }
  0xbe   :  { %v5461_v16 = vpop.eup %5460  ;;  %5474 = vpow2.f32 %v781_v2 }
  0xbf   :  { %12184 = vst [vmem:[#allocation68_spill] sm:$0xff] %v7191_v0  ;;  %12185 = vst [vmem:[#allocation69_spill] sm:$0xff] %v7196_v12  ;;  %v5463_v13 = vpop.eup %5462  ;;  %v783_v41 = vmul.f32 1.442695, %v7191_v0  ;;  %v911_v17 = vsel %vm478_vm0, %v5461_v16, 0.0 }
  0xc0   :  { %v785_v5 = vmul.f32 1.442695, %v7196_v12  ;;  %909 = vadd.xlane.f32.xlu1 %v908_v45  ;;  %912 = vadd.xlane.f32.xlu0 %v911_v17  ;;  %v7201_v37 = vpop.xlane.xlu0 %558  ;;  %v7203_v48 = vpop.xlane.xlu1 %561  ;;  %v914_v49 = vsel %vm478_vm0, %v5463_v13, 0.0 }
  0xc1   :  { %12186 = vst [vmem:[#allocation70_spill] sm:$0xff] %v7201_v37  ;;  %12187 = vst [vmem:[#allocation71_spill] sm:$0xff] %v7203_v48  ;;  %5476 = vpow2.f32 %v783_v41  ;;  %v7207_v2 = vsub.f32 %v6739_v52, %v7201_v37  ;;  %v7212_v16 = vsub.f32 %v6744_v53, %v7203_v48 }
  0xc2   :  { %v5465_v55 = vpop.eup %5464  ;;  %5478 = vpow2.f32 %v785_v5 }
  0xc3   :  { %12188 = vst [vmem:[#allocation72_spill] sm:$0xff] %v7207_v2  ;;  %12189 = vst [vmem:[#allocation73_spill] sm:$0xff] %v7212_v16  ;;  %v5467_v12 = vpop.eup %5466  ;;  %v787_v45 = vmul.f32 1.442695, %v7207_v2  ;;  %v917_v17 = vsel %vm478_vm0, %v5465_v55, 0.0 }
  0xc4   :  { %v789_v0 = vmul.f32 1.442695, %v7212_v16  ;;  %915 = vadd.xlane.f32.xlu1 %v914_v49  ;;  %918 = vadd.xlane.f32.xlu0 %v917_v17  ;;  %v7217_v41 = vpop.xlane.xlu0 %564  ;;  %v7219_v52 = vpop.xlane.xlu1 %567  ;;  %v920_v53 = vsel %vm478_vm0, %v5467_v12, 0.0 }
  0xc5   :  { %12190 = vst [vmem:[#allocation74_spill] sm:$0xff] %v7217_v41  ;;  %12191 = vst [vmem:[#allocation75_spill] sm:$0xff] %v7219_v52  ;;  %5480 = vpow2.f32 %v787_v45  ;;  %v7223_v5 = vsub.f32 %v6753_v56, %v7217_v41  ;;  %v7228_v55 = vsub.f32 %v6758_v57, %v7219_v52 }
  0xc6   :  { %v5469_v13 = vpop.eup %5468  ;;  %5482 = vpow2.f32 %v789_v0 }
  0xc7   :  { %12192 = vst [vmem:[#allocation76_spill] sm:$0xff] %v7223_v5  ;;  %12193 = vst [vmem:[#allocation77_spill] sm:$0xff] %v7228_v55  ;;  %v5471_v16 = vpop.eup %5470  ;;  %v791_v49 = vmul.f32 1.442695, %v7223_v5  ;;  %v923_v17 = vsel %vm478_vm0, %v5469_v13, 0.0 }
  0xc8   :  { %v793_v2 = vmul.f32 1.442695, %v7228_v55  ;;  %921 = vadd.xlane.f32.xlu1 %v920_v53  ;;  %924 = vadd.xlane.f32.xlu0 %v923_v17  ;;  %v7233_v45 = vpop.xlane.xlu0 %570  ;;  %v7235_v56 = vpop.xlane.xlu1 %573  ;;  %v926_v57 = vsel %vm478_vm0, %v5471_v16, 0.0 }
  0xc9   :  { %12194 = vst [vmem:[#allocation78_spill] sm:$0xff] %v7233_v45  ;;  %12195 = vst [vmem:[#allocation79_spill] sm:$0xff] %v7235_v56  ;;  %5484 = vpow2.f32 %v791_v49  ;;  %v7239_v0 = vsub.f32 %v6767_v60, %v7233_v45  ;;  %v7244_v13 = vsub.f32 %v6772_v61, %v7235_v56 }
  0xca   :  { %v5473_v12 = vpop.eup %5472  ;;  %5486 = vpow2.f32 %v793_v2 }
  0xcb   :  { %12196 = vst [vmem:[#allocation80_spill] sm:$0xff] %v7239_v0  ;;  %12197 = vst [vmem:[#allocation81_spill] sm:$0xff] %v7244_v13  ;;  %v5475_v55 = vpop.eup %5474  ;;  %v795_v53 = vmul.f32 1.442695, %v7239_v0  ;;  %v929_v17 = vsel %vm478_vm0, %v5473_v12, 0.0 }
  0xcc   :  { %v797_v5 = vmul.f32 1.442695, %v7244_v13  ;;  %927 = vadd.xlane.f32.xlu1 %v926_v57  ;;  %930 = vadd.xlane.f32.xlu0 %v929_v17  ;;  %v7249_v49 = vpop.xlane.xlu0 %576  ;;  %v7251_v60 = vpop.xlane.xlu1 %579  ;;  %v932_v61 = vsel %vm478_vm0, %v5475_v55, 0.0 }
  0xcd   :  { %12198 = vst [vmem:[#allocation82_spill] sm:$0xff] %v7249_v49  ;;  %12199 = vst [vmem:[#allocation83_spill] sm:$0xff] %v7251_v60  ;;  %5488 = vpow2.f32 %v795_v53  ;;  %v7255_v2 = vsub.f32 %v6781_v3, %v7249_v49  ;;  %v7260_v12 = vsub.f32 %v6786_v4, %v7251_v60 }
  0xce   :  { %v5477_v16 = vpop.eup %5476  ;;  %5490 = vpow2.f32 %v797_v5 }
  0xcf   :  { %12200 = vst [vmem:[#allocation84_spill] sm:$0xff] %v7255_v2  ;;  %12201 = vst [vmem:[#allocation85_spill] sm:$0xff] %v7260_v12  ;;  %v5479_v13 = vpop.eup %5478  ;;  %v799_v57 = vmul.f32 1.442695, %v7255_v2  ;;  %v935_v17 = vsel %vm478_vm0, %v5477_v16, 0.0 }
  0xd0   :  { %v801_v0 = vmul.f32 1.442695, %v7260_v12  ;;  %933 = vadd.xlane.f32.xlu1 %v932_v61  ;;  %936 = vadd.xlane.f32.xlu0 %v935_v17  ;;  %v7265_v53 = vpop.xlane.xlu0 %582  ;;  %v7267_v3 = vpop.xlane.xlu1 %585  ;;  %v938_v4 = vsel %vm478_vm0, %v5479_v13, 0.0 }
  0xd1   :  { %12202 = vst [vmem:[#allocation86_spill] sm:$0xff] %v7265_v53  ;;  %12203 = vst [vmem:[#allocation87_spill] sm:$0xff] %v7267_v3  ;;  %5492 = vpow2.f32 %v799_v57  ;;  %v7271_v5 = vsub.f32 %v6795_v10, %v7265_v53  ;;  %v7276_v16 = vsub.f32 %v6800_v11, %v7267_v3 }
  0xd2   :  { %v5481_v55 = vpop.eup %5480  ;;  %5494 = vpow2.f32 %v801_v0 }
  0xd3   :  { %12204 = vst [vmem:[#allocation88_spill] sm:$0xff] %v7271_v5  ;;  %12205 = vst [vmem:[#allocation89_spill] sm:$0xff] %v7276_v16  ;;  %v5483_v12 = vpop.eup %5482  ;;  %v803_v61 = vmul.f32 1.442695, %v7271_v5  ;;  %v941_v17 = vsel %vm478_vm0, %v5481_v55, 0.0 }
  0xd4   :  { %v805_v2 = vmul.f32 1.442695, %v7276_v16  ;;  %939 = vadd.xlane.f32.xlu1 %v938_v4  ;;  %942 = vadd.xlane.f32.xlu0 %v941_v17  ;;  %v7281_v57 = vpop.xlane.xlu0 %588  ;;  %v7283_v10 = vpop.xlane.xlu1 %591  ;;  %v944_v11 = vsel %vm478_vm0, %v5483_v12, 0.0 }
  0xd5   :  { %12206 = vst [vmem:[#allocation90_spill] sm:$0xff] %v7281_v57  ;;  %12207 = vst [vmem:[#allocation91_spill] sm:$0xff] %v7283_v10  ;;  %5496 = vpow2.f32 %v803_v61  ;;  %v7287_v0 = vsub.f32 %v6809_v18, %v7281_v57  ;;  %v7292_v55 = vsub.f32 %v6814_v19, %v7283_v10 }
  0xd6   :  { %v5485_v13 = vpop.eup %5484  ;;  %5498 = vpow2.f32 %v805_v2 }
  0xd7   :  { %12208 = vst [vmem:[#allocation92_spill] sm:$0xff] %v7287_v0  ;;  %12209 = vst [vmem:[#allocation93_spill] sm:$0xff] %v7292_v55  ;;  %v5487_v16 = vpop.eup %5486  ;;  %v807_v4 = vmul.f32 1.442695, %v7287_v0  ;;  %v947_v17 = vsel %vm478_vm0, %v5485_v13, 0.0 }
  0xd8   :  { %v809_v5 = vmul.f32 1.442695, %v7292_v55  ;;  %945 = vadd.xlane.f32.xlu1 %v944_v11  ;;  %948 = vadd.xlane.f32.xlu0 %v947_v17  ;;  %v7297_v61 = vpop.xlane.xlu0 %594  ;;  %v7299_v18 = vpop.xlane.xlu1 %597  ;;  %v950_v19 = vsel %vm478_vm0, %v5487_v16, 0.0 }
  0xd9   :  { %12210 = vst [vmem:[#allocation94_spill] sm:$0xff] %v7297_v61  ;;  %12211 = vst [vmem:[#allocation95_spill] sm:$0xff] %v7299_v18  ;;  %5500 = vpow2.f32 %v807_v4  ;;  %v7303_v2 = vsub.f32 %v6823_v26, %v7297_v61  ;;  %v7308_v13 = vsub.f32 %v6828_v27, %v7299_v18 }
  0xda   :  { %v5489_v12 = vpop.eup %5488  ;;  %5502 = vpow2.f32 %v809_v5 }
  0xdb   :  { %12212 = vst [vmem:[#allocation96_spill] sm:$0xff] %v7303_v2  ;;  %12213 = vst [vmem:[#allocation97_spill] sm:$0xff] %v7308_v13  ;;  %v5491_v55 = vpop.eup %5490  ;;  %v811_v11 = vmul.f32 1.442695, %v7303_v2  ;;  %v953_v17 = vsel %vm478_vm0, %v5489_v12, 0.0 }
  0xdc   :  { %v813_v0 = vmul.f32 1.442695, %v7308_v13  ;;  %951 = vadd.xlane.f32.xlu1 %v950_v19  ;;  %954 = vadd.xlane.f32.xlu0 %v953_v17  ;;  %v7313_v4 = vpop.xlane.xlu0 %600  ;;  %v7315_v26 = vpop.xlane.xlu1 %603  ;;  %v956_v27 = vsel %vm478_vm0, %v5491_v55, 0.0 }
  0xdd   :  { %12214 = vst [vmem:[#allocation98_spill] sm:$0xff] %v7313_v4  ;;  %12215 = vst [vmem:[#allocation99_spill] sm:$0xff] %v7315_v26  ;;  %5504 = vpow2.f32 %v811_v11  ;;  %v7319_v5 = vsub.f32 %v6837_v34, %v7313_v4  ;;  %v7324_v12 = vsub.f32 %v6842_v35, %v7315_v26 }
  0xde   :  { %v5493_v16 = vpop.eup %5492  ;;  %5506 = vpow2.f32 %v813_v0 }
  0xdf   :  { %12216 = vst [vmem:[#allocation100_spill] sm:$0xff] %v7319_v5  ;;  %12217 = vst [vmem:[#allocation101_spill] sm:$0xff] %v7324_v12  ;;  %v5495_v13 = vpop.eup %5494  ;;  %v815_v19 = vmul.f32 1.442695, %v7319_v5  ;;  %v959_v17 = vsel %vm478_vm0, %v5493_v16, 0.0 }
  0xe0   :  { %v817_v2 = vmul.f32 1.442695, %v7324_v12  ;;  %957 = vadd.xlane.f32.xlu1 %v956_v27  ;;  %960 = vadd.xlane.f32.xlu0 %v959_v17  ;;  %v7329_v11 = vpop.xlane.xlu0 %606  ;;  %v7331_v34 = vpop.xlane.xlu1 %609  ;;  %v962_v35 = vsel %vm478_vm0, %v5495_v13, 0.0 }
  0xe1   :  { %12218 = vst [vmem:[#allocation102_spill] sm:$0xff] %v7329_v11  ;;  %12219 = vst [vmem:[#allocation103_spill] sm:$0xff] %v7331_v34  ;;  %5508 = vpow2.f32 %v815_v19  ;;  %v7335_v0 = vsub.f32 %v6851_v42, %v7329_v11  ;;  %v7340_v16 = vsub.f32 %v6856_v43, %v7331_v34 }
  0xe2   :  { %v5497_v55 = vpop.eup %5496  ;;  %5510 = vpow2.f32 %v817_v2 }
  0xe3   :  { %12220 = vst [vmem:[#allocation104_spill] sm:$0xff] %v7335_v0  ;;  %12221 = vst [vmem:[#allocation105_spill] sm:$0xff] %v7340_v16  ;;  %v5499_v12 = vpop.eup %5498  ;;  %v819_v27 = vmul.f32 1.442695, %v7335_v0  ;;  %v965_v17 = vsel %vm478_vm0, %v5497_v55, 0.0 }
  0xe4   :  { %v821_v5 = vmul.f32 1.442695, %v7340_v16  ;;  %963 = vadd.xlane.f32.xlu1 %v962_v35  ;;  %966 = vadd.xlane.f32.xlu0 %v965_v17  ;;  %v7345_v19 = vpop.xlane.xlu0 %612  ;;  %v7347_v42 = vpop.xlane.xlu1 %615  ;;  %v968_v43 = vsel %vm478_vm0, %v5499_v12, 0.0 }
  0xe5   :  { %12222 = vst [vmem:[#allocation106_spill] sm:$0xff] %v7345_v19  ;;  %12223 = vst [vmem:[#allocation107_spill] sm:$0xff] %v7347_v42  ;;  %5512 = vpow2.f32 %v819_v27  ;;  %v7351_v2 = vsub.f32 %v6865_v50, %v7345_v19  ;;  %v7356_v55 = vsub.f32 %v6870_v51, %v7347_v42 }
  0xe6   :  { %v5501_v13 = vpop.eup %5500  ;;  %5514 = vpow2.f32 %v821_v5 }
  0xe7   :  { %12224 = vst [vmem:[#allocation108_spill] sm:$0xff] %v7351_v2  ;;  %12225 = vst [vmem:[#allocation109_spill] sm:$0xff] %v7356_v55  ;;  %v5503_v16 = vpop.eup %5502  ;;  %v823_v35 = vmul.f32 1.442695, %v7351_v2  ;;  %v971_v17 = vsel %vm478_vm0, %v5501_v13, 0.0 }
  0xe8   :  { %v825_v0 = vmul.f32 1.442695, %v7356_v55  ;;  %969 = vadd.xlane.f32.xlu1 %v968_v43  ;;  %972 = vadd.xlane.f32.xlu0 %v971_v17  ;;  %v7361_v27 = vpop.xlane.xlu0 %618  ;;  %v7363_v50 = vpop.xlane.xlu1 %621  ;;  %v974_v51 = vsel %vm478_vm0, %v5503_v16, 0.0 }
  0xe9   :  { %12226 = vst [vmem:[#allocation110_spill] sm:$0xff] %v7361_v27  ;;  %12227 = vst [vmem:[#allocation111_spill] sm:$0xff] %v7363_v50  ;;  %5516 = vpow2.f32 %v823_v35  ;;  %v7367_v5 = vsub.f32 %v6879_v58, %v7361_v27  ;;  %v7372_v13 = vsub.f32 %v6884_v59, %v7363_v50 }
  0xea   :  { %v5505_v12 = vpop.eup %5504  ;;  %5518 = vpow2.f32 %v825_v0 }
  0xeb   :  { %12228 = vst [vmem:[#allocation112_spill] sm:$0xff] %v7367_v5  ;;  %12229 = vst [vmem:[#allocation113_spill] sm:$0xff] %v7372_v13  ;;  %v5507_v55 = vpop.eup %5506  ;;  %v827_v43 = vmul.f32 1.442695, %v7367_v5  ;;  %v977_v17 = vsel %vm478_vm0, %v5505_v12, 0.0 }
  0xec   :  { %v829_v2 = vmul.f32 1.442695, %v7372_v13  ;;  %975 = vadd.xlane.f32.xlu1 %v974_v51  ;;  %978 = vadd.xlane.f32.xlu0 %v977_v17  ;;  %v7377_v35 = vpop.xlane.xlu0 %624  ;;  %v7379_v58 = vpop.xlane.xlu1 %627  ;;  %v980_v59 = vsel %vm478_vm0, %v5507_v55, 0.0 }
  0xed   :  { %12230 = vst [vmem:[#allocation114_spill] sm:$0xff] %v7377_v35  ;;  %12231 = vst [vmem:[#allocation115_spill] sm:$0xff] %v7379_v58  ;;  %5520 = vpow2.f32 %v827_v43  ;;  %v7383_v0 = vsub.f32 %v6893_v6, %v7377_v35  ;;  %v7388_v12 = vsub.f32 %v6898_v7, %v7379_v58 }
  0xee   :  { %v5509_v16 = vpop.eup %5508  ;;  %5522 = vpow2.f32 %v829_v2 }
  0xef   :  { %12232 = vst [vmem:[#allocation116_spill] sm:$0xff] %v7383_v0  ;;  %12233 = vst [vmem:[#allocation117_spill] sm:$0xff] %v7388_v12  ;;  %v5511_v13 = vpop.eup %5510  ;;  %v831_v51 = vmul.f32 1.442695, %v7383_v0  ;;  %v983_v17 = vsel %vm478_vm0, %v5509_v16, 0.0 }
  0xf0   :  { %v833_v5 = vmul.f32 1.442695, %v7388_v12  ;;  %981 = vadd.xlane.f32.xlu1 %v980_v59  ;;  %984 = vadd.xlane.f32.xlu0 %v983_v17  ;;  %v7393_v43 = vpop.xlane.xlu0 %630  ;;  %v7395_v6 = vpop.xlane.xlu1 %633  ;;  %v986_v7 = vsel %vm478_vm0, %v5511_v13, 0.0 }
  0xf1   :  { %12234 = vst [vmem:[#allocation118_spill] sm:$0xff] %v7393_v43  ;;  %12235 = vst [vmem:[#allocation119_spill] sm:$0xff] %v7395_v6  ;;  %5524 = vpow2.f32 %v831_v51  ;;  %v7399_v2 = vsub.f32 %v6907_v22, %v7393_v43  ;;  %v7404_v16 = vsub.f32 %v6912_v23, %v7395_v6 }
  0xf2   :  { %v5513_v55 = vpop.eup %5512  ;;  %5526 = vpow2.f32 %v833_v5 }
  0xf3   :  { %12236 = vst [vmem:[#allocation120_spill] sm:$0xff] %v7399_v2  ;;  %12237 = vst [vmem:[#allocation121_spill] sm:$0xff] %v7404_v16  ;;  %v5515_v12 = vpop.eup %5514  ;;  %v835_v59 = vmul.f32 1.442695, %v7399_v2  ;;  %v989_v17 = vsel %vm478_vm0, %v5513_v55, 0.0 }
  0xf4   :  { %v837_v0 = vmul.f32 1.442695, %v7404_v16  ;;  %987 = vadd.xlane.f32.xlu1 %v986_v7  ;;  %990 = vadd.xlane.f32.xlu0 %v989_v17  ;;  %v7409_v51 = vpop.xlane.xlu0 %636  ;;  %v7411_v22 = vpop.xlane.xlu1 %639  ;;  %v992_v23 = vsel %vm478_vm0, %v5515_v12, 0.0 }
  0xf5   :  { %12238 = vst [vmem:[#allocation122_spill] sm:$0xff] %v7409_v51  ;;  %12239 = vst [vmem:[#allocation123_spill] sm:$0xff] %v7411_v22  ;;  %5528 = vpow2.f32 %v835_v59  ;;  %v7415_v5 = vsub.f32 %v6921_v38, %v7409_v51  ;;  %v7420_v55 = vsub.f32 %v6926_v39, %v7411_v22 }
  0xf6   :  { %v5517_v13 = vpop.eup %5516  ;;  %5530 = vpow2.f32 %v837_v0  ;;  %v12244_v0 = vld [vmem:[#allocation11_spill] sm:$0xff] }
  0xf7   :  { %12240 = vst [vmem:[#allocation124_spill] sm:$0xff] %v7415_v5  ;;  %12241 = vst [vmem:[#allocation125_spill] sm:$0xff] %v7420_v55  ;;  %v5519_v16 = vpop.eup %5518  ;;  %v839_v7 = vmul.f32 1.442695, %v7415_v5  ;;  %v995_v17 = vsel %vm478_vm0, %v5517_v13, 0.0  ;;  %v12246_v5 = vld [vmem:[#allocation12_spill] sm:$0xff] }
  0xf8   :  { %v841_v2 = vmul.f32 1.442695, %v7420_v55  ;;  %993 = vadd.xlane.f32.xlu1 %v992_v23  ;;  %996 = vadd.xlane.f32.xlu0 %v995_v17  ;;  %v7425_v59 = vpop.xlane.xlu0 %642  ;;  %v7427_v38 = vpop.xlane.xlu1 %645  ;;  %v998_v39 = vsel %vm478_vm0, %v5519_v16, 0.0 }
  0xf9   :  { %12242 = vst [vmem:[#allocation126_spill] sm:$0xff] %v7425_v59  ;;  %12243 = vst [vmem:[#allocation127_spill] sm:$0xff] %v7427_v38  ;;  %5532 = vpow2.f32 %v839_v7  ;;  %v7431_v12 = vsub.f32 %v12244_v0, %v7425_v59  ;;  %v7436_v13 = vsub.f32 %v12246_v5, %v7427_v38 }
  0xfa   :  { %v5521_v22 = vpop.eup %5520  ;;  %5534 = vpow2.f32 %v841_v2  ;;  %v12250_v2 = vld [vmem:[#allocation13_spill] sm:$0xff] }
  0xfb   :  { %12245 = vst [vmem:[#allocation11_spill] sm:$0xff] %v7431_v12  ;;  %12247 = vst [vmem:[#allocation12_spill] sm:$0xff] %v7436_v13  ;;  %v5523_v55 = vpop.eup %5522  ;;  %v843_v23 = vmul.f32 1.442695, %v7431_v12  ;;  %v1001_v17 = vsel %vm478_vm0, %v5521_v22, 0.0  ;;  %v12252_v12 = vld [vmem:[#allocation14_spill] sm:$0xff] }
  0xfc   :  { %v845_v51 = vmul.f32 1.442695, %v7436_v13  ;;  %999 = vadd.xlane.f32.xlu1 %v998_v39  ;;  %1002 = vadd.xlane.f32.xlu0 %v1001_v17  ;;  %v7441_v7 = vpop.xlane.xlu0 %648  ;;  %v7443_v0 = vpop.xlane.xlu1 %651  ;;  %v1004_v5 = vsel %vm478_vm0, %v5523_v55, 0.0 }
  0xfd   :  { %12248 = vst [vmem:[#allocation128_spill] sm:$0xff] %v7441_v7  ;;  %12249 = vst [vmem:[#allocation129_spill] sm:$0xff] %v7443_v0  ;;  %5536 = vpow2.f32 %v843_v23  ;;  %v7447_v16 = vsub.f32 %v12250_v2, %v7441_v7  ;;  %v7452_v22 = vsub.f32 %v12252_v12, %v7443_v0 }
  0xfe   :  { %v5525_v38 = vpop.eup %5524  ;;  %5538 = vpow2.f32 %v845_v51  ;;  %v12256_v51 = vld [vmem:[#allocation15_spill] sm:$0xff] }
  0xff   :  { %12251 = vst [vmem:[#allocation13_spill] sm:$0xff] %v7447_v16  ;;  %12253 = vst [vmem:[#allocation14_spill] sm:$0xff] %v7452_v22  ;;  %v5527_v13 = vpop.eup %5526  ;;  %v847_v39 = vmul.f32 1.442695, %v7447_v16  ;;  %v1007_v17 = vsel %vm478_vm0, %v5525_v38, 0.0  ;;  %v12258_v16 = vld [vmem:[#allocation16_spill] sm:$0xff] }
 0x100   :  { %v849_v59 = vmul.f32 1.442695, %v7452_v22  ;;  %1005 = vadd.xlane.f32.xlu1 %v1004_v5  ;;  %1008 = vadd.xlane.f32.xlu0 %v1007_v17  ;;  %v7457_v23 = vpop.xlane.xlu0 %654  ;;  %v7459_v2 = vpop.xlane.xlu1 %657  ;;  %v1010_v12 = vsel %vm478_vm0, %v5527_v13, 0.0 }
 0x101   :  { %12254 = vst [vmem:[#allocation130_spill] sm:$0xff] %v7457_v23  ;;  %12255 = vst [vmem:[#allocation131_spill] sm:$0xff] %v7459_v2  ;;  %5540 = vpow2.f32 %v847_v39  ;;  %v7463_v55 = vsub.f32 %v12256_v51, %v7457_v23  ;;  %v7468_v38 = vsub.f32 %v12258_v16, %v7459_v2 }
 0x102   :  { %v5529_v0 = vpop.eup %5528  ;;  %5542 = vpow2.f32 %v849_v59  ;;  %v12262_v59 = vld [vmem:[#allocation17_spill] sm:$0xff] }
 0x103   :  { %12257 = vst [vmem:[#allocation15_spill] sm:$0xff] %v7463_v55  ;;  %12259 = vst [vmem:[#allocation16_spill] sm:$0xff] %v7468_v38  ;;  %v5531_v22 = vpop.eup %5530  ;;  %v851_v5 = vmul.f32 1.442695, %v7463_v55  ;;  %v1013_v17 = vsel %vm478_vm0, %v5529_v0, 0.0  ;;  %v12264_v55 = vld [vmem:[#allocation18_spill] sm:$0xff] }
 0x104   :  { %v853_v7 = vmul.f32 1.442695, %v7468_v38  ;;  %1011 = vadd.xlane.f32.xlu1 %v1010_v12  ;;  %1014 = vadd.xlane.f32.xlu0 %v1013_v17  ;;  %v7473_v39 = vpop.xlane.xlu0 %660  ;;  %v7475_v51 = vpop.xlane.xlu1 %663  ;;  %v1016_v16 = vsel %vm478_vm0, %v5531_v22, 0.0 }
 0x105   :  { %12260 = vst [vmem:[#allocation132_spill] sm:$0xff] %v7473_v39  ;;  %12261 = vst [vmem:[#allocation133_spill] sm:$0xff] %v7475_v51  ;;  %5544 = vpow2.f32 %v851_v5  ;;  %v7479_v13 = vsub.f32 %v12262_v59, %v7473_v39  ;;  %v7484_v0 = vsub.f32 %v12264_v55, %v7475_v51 }
 0x106   :  { %v5533_v2 = vpop.eup %5532  ;;  %5546 = vpow2.f32 %v853_v7  ;;  %v12268_v7 = vld [vmem:[#allocation19_spill] sm:$0xff] }
 0x107   :  { %12263 = vst [vmem:[#allocation17_spill] sm:$0xff] %v7479_v13  ;;  %12265 = vst [vmem:[#allocation18_spill] sm:$0xff] %v7484_v0  ;;  %v5535_v38 = vpop.eup %5534  ;;  %v855_v12 = vmul.f32 1.442695, %v7479_v13  ;;  %v1019_v17 = vsel %vm478_vm0, %v5533_v2, 0.0 }
 0x108   :  { %v857_v23 = vmul.f32 1.442695, %v7484_v0  ;;  %1017 = vadd.xlane.f32.xlu1 %v1016_v16  ;;  %1020 = vadd.xlane.f32.xlu0 %v1019_v17  ;;  %v7489_v5 = vpop.xlane.xlu0 %666  ;;  %v7491_v59 = vpop.xlane.xlu1 %669  ;;  %v1022_v55 = vsel %vm478_vm0, %v5535_v38, 0.0  ;;  %v6518_v38 = vmov 0  }
 0x109   :  { %12266 = vst [vmem:[#allocation134_spill] sm:$0xff] %v7489_v5  ;;  %12267 = vst [vmem:[#allocation135_spill] sm:$0xff] %v7491_v59  ;;  %5548 = vpow2.f32 %v855_v12  ;;  %v7495_v22 = vsub.f32 %v12268_v7, %v7489_v5  ;;  %v7500_v2 = vsub.f32 %v6996_v46, %v7491_v59  ;;  %5427 = vset.pattern.permute.xlu1 %v6518_v38  ;;  %5426 = vset.pattern.permute.xlu0 %v6518_v38 }
 0x10a   :  { %v5537_v51 = vpop.eup %5536  ;;  %5550 = vpow2.f32 %v857_v23 }
 0x10b   :  { %12269 = vst [vmem:[#allocation19_spill] sm:$0xff] %v7495_v22  ;;  %12270 = vst [vmem:[#allocation136_spill] sm:$0xff] %v7500_v2  ;;  %v5539_v0 = vpop.eup %5538  ;;  %v859_v16 = vmul.f32 1.442695, %v7495_v22  ;;  %v1025_v17 = vsel %vm478_vm0, %v5537_v51, 0.0 }
 0x10c   :  { %v861_v13 = vmul.f32 1.442695, %v7500_v2  ;;  %1023 = vadd.xlane.f32.xlu1 %v1022_v55  ;;  %1026 = vadd.xlane.f32.xlu0 %v1025_v17  ;;  %v1028_v12 = vsel %vm478_vm0, %v5539_v0, 0.0 }
 0x10d   :  { %5552 = vpow2.f32 %v859_v16 }
 0x10e   :  { %v5541_v7 = vpop.eup %5540  ;;  %5554 = vpow2.f32 %v861_v13 }
 0x10f   :  { %v5543_v23 = vpop.eup %5542  ;;  %v1031_v46 = vsel %vm478_vm0, %v5541_v7, 0.0 }
 0x110   :  { %1029 = vadd.xlane.f32.xlu1 %v1028_v12  ;;  %1032 = vadd.xlane.f32.xlu0 %v1031_v46  ;;  %v1034_v22 = vsel %vm478_vm0, %v5543_v23, 0.0 }
 0x112   :  { %v5545_v51 = vpop.eup %5544 }
 0x113   :  { %v5547_v59 = vpop.eup %5546  ;;  %v1037_v55 = vsel %vm478_vm0, %v5545_v51, 0.0 }
 0x114   :  { %1035 = vadd.xlane.f32.xlu1 %v1034_v22  ;;  %1038 = vadd.xlane.f32.xlu0 %v1037_v55  ;;  %v1040_v0 = vsel %vm478_vm0, %v5547_v59, 0.0  ;;  %v350_v59 = vld [vmem:[%s11936_s2 + $0x8] sm:$0xff]  ;;  %v349_v22 = vld [vmem:[%s11936_s2] sm:$0xff] }
 0x115   :  { %v5290_v55 = vtrunc.f32 %v350_v59  ;;  %v352_v59 = vld [vmem:[%s11936_s2 + $0x18] sm:$0xff] }
 0x116   :  { %v5549_v16 = vpop.eup %5548  ;;  %v5294_v6 = vtrunc.f32 %v352_v59  ;;  %v364_v59 = vld [vmem:[%s11936_s2 + $0x78] sm:$0xff] }
 0x117   :  { %v5551_v13 = vpop.eup %5550  ;;  %v1043_v17 = vsel %vm478_vm0, %v5549_v16, 0.0  ;;  %v351_v16 = vld [vmem:[%s11936_s2 + $0x10] sm:$0xff] }
 0x118   :  { %1041 = vadd.xlane.f32.xlu1 %v1040_v0  ;;  %1044 = vadd.xlane.f32.xlu0 %v1043_v17  ;;  %v1046_v7 = vsel %vm478_vm0, %v5551_v13, 0.0  ;;  %v5288_v0 = vtrunc.f32 %v349_v22  ;;  %v358_v13 = vld [vmem:[%s11936_s2 + $0x48] sm:$0xff]  ;;  %v360_v22 = vld [vmem:[%s11936_s2 + $0x58] sm:$0xff]  ;;  %v5295_v58 = vcvt.f32.s32 %v5294_v6 }
 0x11a   :  { %v5553_v12 = vpop.eup %5552 }
 0x11b   :  { %v5555_v38 = vpop.eup %5554  ;;  %v1049_v23 = vsel %vm478_vm0, %v5553_v12, 0.0  ;;  %v5291_v12 = vcvt.f32.s32 %v5290_v55 }
 0x11c   :  { %1047 = vadd.xlane.f32.xlu1 %v1046_v7  ;;  %1050 = vadd.xlane.f32.xlu0 %v1049_v23  ;;  %v1052_v46 = vsel %vm478_vm0, %v5555_v38, 0.0  ;;  %v5292_v38 = vtrunc.f32 %v351_v16  ;;  %v5289_v23 = vcvt.f32.s32 %v5288_v0  ;;  %v5310_v16 = vtrunc.f32 %v360_v22  ;;  %v353_v0 = vld [vmem:[%s11936_s2 + $0x20] sm:$0xff] }
 0x11d   :  { %v5296_v35 = vtrunc.f32 %v353_v0  ;;  %v366_v0 = vld [vmem:[%s11936_s2 + $0x88] sm:$0xff] }
 0x11e   :  { %v5293_v39 = vcvt.f32.s32 %v5292_v38  ;;  %v5311_v38 = vcvt.f32.s32 %v5310_v16  ;;  %v355_v16 = vld [vmem:[%s11936_s2 + $0x30] sm:$0xff] }
 0x11f   :  { %v5297_v50 = vcvt.f32.s32 %v5296_v35  ;;  %v5300_v19 = vtrunc.f32 %v355_v16  ;;  %v370_v16 = vld [vmem:[%s11936_s2 + $0xa8] sm:$0xff] }
 0x120   :  { %1053 = vadd.xlane.f32.xlu1 %v1052_v46  ;;  %v5306_v46 = vtrunc.f32 %v358_v13  ;;  %v362_v13 = vld [vmem:[%s11936_s2 + $0x68] sm:$0xff] }
 0x121   :  { %v5301_v34 = vcvt.f32.s32 %v5300_v19 }
 0x122   :  { %v5307_v55 = vcvt.f32.s32 %v5306_v46  ;;  %v354_v46 = vld [vmem:[%s11936_s2 + $0x28] sm:$0xff] }
 0x123   :  { %v5298_v27 = vtrunc.f32 %v354_v46  ;;  %v368_v46 = vld [vmem:[%s11936_s2 + $0x98] sm:$0xff] }
 0x125   :  { %v5299_v42 = vcvt.f32.s32 %v5298_v27 }
 0x129   :  { %v7520_v51 = vpop.xlane.xlu0 %864 }
 0x12d   :  { %v7528_v17 = vpop.xlane.xlu1 %867  ;;  %v7530_v7 = vpop.xlane.xlu0 %870 }
 0x12e   :  { %5556 = vlog2.f32 %v7528_v17 }
 0x12f   :  { %5558 = vlog2.f32 %v7520_v51 }
 0x130   :  { %5560 = vlog2.f32 %v7530_v7 }
 0x131   :  { %1253 = vperm.xlu1 %5427, %v5291_v12   ;;  %v7538_v2 = vpop.xlane.xlu1 %873  ;;  %v7540_v5 = vpop.xlane.xlu0 %876 }
 0x132   :  { %1250 = vperm.xlu0 %5426, %v5289_v23   ;;  %v5314_v23 = vtrunc.f32 %v362_v13  ;;  %5562 = vlog2.f32 %v7538_v2 }
 0x133   :  { %5564 = vlog2.f32 %v7540_v5 }
 0x134   :  { %v5315_v6 = vcvt.f32.s32 %v5314_v23  ;;  %v356_v23 = vld [vmem:[%s11936_s2 + $0x38] sm:$0xff] }
 0x135   :  { %1256 = vperm.xlu1 %5427, %v5293_v39   ;;  %v7548_v43 = vpop.xlane.xlu1 %879  ;;  %v7550_v12 = vpop.xlane.xlu0 %882  ;;  %v5302_v11 = vtrunc.f32 %v356_v23  ;;  %v372_v23 = vld [vmem:[%s11936_s2 + $0xb8] sm:$0xff] }
 0x136   :  { %1277 = vperm.xlu0 %5426, %v5307_v55   ;;  %v5318_v55 = vtrunc.f32 %v364_v59  ;;  %5566 = vlog2.f32 %v7548_v43 }
 0x137   :  { %v5303_v26 = vcvt.f32.s32 %v5302_v11  ;;  %5568 = vlog2.f32 %v7550_v12 }
 0x138   :  { %v5319_v35 = vcvt.f32.s32 %v5318_v55  ;;  %v357_v55 = vld [vmem:[%s11936_s2 + $0x40] sm:$0xff] }
 0x139   :  { %1259 = vperm.xlu1 %5427, %v5295_v58   ;;  %v7558_v22 = vpop.xlane.xlu1 %885  ;;  %v7560_v39 = vpop.xlane.xlu0 %888  ;;  %v5304_v4 = vtrunc.f32 %v357_v55  ;;  %v374_v55 = vld [vmem:[%s11936_s2 + $0xc8] sm:$0xff] }
 0x13a   :  { %1283 = vperm.xlu0 %5426, %v5311_v38   ;;  %v5322_v38 = vtrunc.f32 %v366_v0  ;;  %5570 = vlog2.f32 %v7558_v22 }
 0x13b   :  { %v5305_v18 = vcvt.f32.s32 %v5304_v4  ;;  %v5557_v7 = vpop.eup %5556  ;;  %5572 = vlog2.f32 %v7560_v39 }
 0x13c   :  { %v5323_v27 = vcvt.f32.s32 %v5322_v38  ;;  %v359_v38 = vld [vmem:[%s11936_s2 + $0x50] sm:$0xff] }
 0x13d   :  { %1262 = vperm.xlu1 %5427, %v5297_v50   ;;  %v7568_v13 = vpop.xlane.xlu1 %891  ;;  %v7570_v58 = vpop.xlane.xlu0 %894  ;;  %v5308_v61 = vtrunc.f32 %v359_v38  ;;  %v376_v38 = vld [vmem:[%s11936_s2 + $0xd8] sm:$0xff] }
 0x13e   :  { %1289 = vperm.xlu0 %5426, %v5315_v6   ;;  %v5326_v6 = vtrunc.f32 %v368_v46  ;;  %5574 = vlog2.f32 %v7568_v13  ;;  %v12309_v13 = vld [vmem:[#allocation20_spill] sm:$0xff] }
 0x13f   :  { %v5309_v10 = vcvt.f32.s32 %v5308_v61  ;;  %5576 = vlog2.f32 %v7570_v58 }
 0x140   :  { %v5327_v19 = vcvt.f32.s32 %v5326_v6  ;;  %v361_v6 = vld [vmem:[%s11936_s2 + $0x60] sm:$0xff] }
 0x141   :  { %1265 = vperm.xlu1 %5427, %v5299_v42   ;;  %v7578_v59 = vpop.xlane.xlu1 %897  ;;  %v7580_v50 = vpop.xlane.xlu0 %900  ;;  %v5312_v57 = vtrunc.f32 %v361_v6  ;;  %v378_v6 = vld [vmem:[%s11936_s2 + $0xe8] sm:$0xff] }
 0x142   :  { %1295 = vperm.xlu0 %5426, %v5319_v35   ;;  %v5330_v35 = vtrunc.f32 %v370_v16  ;;  %5578 = vlog2.f32 %v7578_v59 }
 0x143   :  { %v5313_v3 = vcvt.f32.s32 %v5312_v57  ;;  %5580 = vlog2.f32 %v7580_v50  ;;  %v6261_v50 = vld [vmem:[%s11936_s2] sm:$0xff] }
 0x144   :  { %v5331_v11 = vcvt.f32.s32 %v5330_v35  ;;  %v363_v35 = vld [vmem:[%s11936_s2 + $0x70] sm:$0xff] }
 0x145   :  { %1268 = vperm.xlu1 %5427, %v5301_v34   ;;  %v7588_v0 = vpop.xlane.xlu1 %903  ;;  %v7590_v42 = vpop.xlane.xlu0 %906  ;;  %v5316_v53 = vtrunc.f32 %v363_v35  ;;  %v380_v35 = vld [vmem:[%s11936_s2 + $0xf8] sm:$0xff] }
 0x146   :  { %1301 = vperm.xlu0 %5426, %v5323_v27   ;;  %v5334_v27 = vtrunc.f32 %v372_v23  ;;  %5582 = vlog2.f32 %v7588_v0 }
 0x147   :  { %v5317_v60 = vcvt.f32.s32 %v5316_v53  ;;  %5584 = vlog2.f32 %v7590_v42 }
 0x148   :  { %v5335_v4 = vcvt.f32.s32 %v5334_v27  ;;  %v365_v27 = vld [vmem:[%s11936_s2 + $0x80] sm:$0xff] }
 0x149   :  { %1271 = vperm.xlu1 %5427, %v5303_v26   ;;  %v7598_v46 = vpop.xlane.xlu1 %909  ;;  %v7600_v34 = vpop.xlane.xlu0 %912  ;;  %v5320_v49 = vtrunc.f32 %v365_v27  ;;  %v382_v27 = vld [vmem:[%s11936_s2 + $0x108] sm:$0xff] }
 0x14a   :  { %1307 = vperm.xlu0 %5426, %v5327_v19   ;;  %v5338_v19 = vtrunc.f32 %v374_v55  ;;  %5586 = vlog2.f32 %v7598_v46 }
 0x14b   :  { %v5321_v56 = vcvt.f32.s32 %v5320_v49  ;;  %5588 = vlog2.f32 %v7600_v34  ;;  %v6265_v34 = vld [vmem:[%s11936_s2 + $0x28] sm:$0xff] }
 0x14c   :  { %v5339_v61 = vcvt.f32.s32 %v5338_v19  ;;  %v367_v19 = vld [vmem:[%s11936_s2 + $0x90] sm:$0xff] }
 0x14d   :  { %1274 = vperm.xlu1 %5427, %v5305_v18   ;;  %v7608_v16 = vpop.xlane.xlu1 %915  ;;  %v7610_v26 = vpop.xlane.xlu0 %918  ;;  %v5324_v45 = vtrunc.f32 %v367_v19  ;;  %v384_v19 = vld [vmem:[%s11936_s2 + $0x118] sm:$0xff] }
 0x14e   :  { %1313 = vperm.xlu0 %5426, %v5331_v11   ;;  %v5342_v11 = vtrunc.f32 %v376_v38 }
 0x14f   :  { %v5325_v52 = vcvt.f32.s32 %v5324_v45 }
 0x150   :  { %v5343_v57 = vcvt.f32.s32 %v5342_v11  ;;  %v369_v11 = vld [vmem:[%s11936_s2 + $0xa0] sm:$0xff] }
 0x151   :  { %1280 = vperm.xlu1 %5427, %v5309_v10   ;;  %v7618_v23 = vpop.xlane.xlu1 %921  ;;  %v7620_v18 = vpop.xlane.xlu0 %924  ;;  %v5328_v41 = vtrunc.f32 %v369_v11  ;;  %v386_v11 = vld [vmem:[%s11936_s2 + $0x128] sm:$0xff] }
 0x152   :  { %1319 = vperm.xlu0 %5426, %v5335_v4   ;;  %v5346_v4 = vtrunc.f32 %v378_v6 }
 0x153   :  { %v5329_v48 = vcvt.f32.s32 %v5328_v41 }
 0x154   :  { %v5347_v53 = vcvt.f32.s32 %v5346_v4  ;;  %v371_v4 = vld [vmem:[%s11936_s2 + $0xb0] sm:$0xff] }
 0x155   :  { %1286 = vperm.xlu1 %5427, %v5313_v3   ;;  %v7628_v55 = vpop.xlane.xlu1 %927  ;;  %v7630_v10 = vpop.xlane.xlu0 %930  ;;  %v5332_v37 = vtrunc.f32 %v371_v4  ;;  %v388_v4 = vld [vmem:[%s11936_s2 + $0x138] sm:$0xff] }
 0x156   :  { %1325 = vperm.xlu0 %5426, %v5339_v61   ;;  %v5350_v61 = vtrunc.f32 %v380_v35 }
 0x157   :  { %v5333_v44 = vcvt.f32.s32 %v5332_v37 }
 0x158   :  { %v5351_v49 = vcvt.f32.s32 %v5350_v61  ;;  %v373_v61 = vld [vmem:[%s11936_s2 + $0xc0] sm:$0xff] }
 0x159   :  { %1292 = vperm.xlu1 %5427, %v5317_v60   ;;  %v7638_v38 = vpop.xlane.xlu1 %933  ;;  %v7640_v3 = vpop.xlane.xlu0 %936  ;;  %v5336_v33 = vtrunc.f32 %v373_v61  ;;  %v390_v61 = vld [vmem:[%s11936_s2 + $0x148] sm:$0xff] }
 0x15a   :  { %1331 = vperm.xlu0 %5426, %v5343_v57   ;;  %v5354_v57 = vtrunc.f32 %v382_v27 }
 0x15b   :  { %v5337_v40 = vcvt.f32.s32 %v5336_v33 }
 0x15c   :  { %v5355_v45 = vcvt.f32.s32 %v5354_v57  ;;  %v375_v57 = vld [vmem:[%s11936_s2 + $0xd0] sm:$0xff] }
 0x15d   :  { %1298 = vperm.xlu1 %5427, %v5321_v56   ;;  %v7648_v6 = vpop.xlane.xlu1 %939  ;;  %v7650_v60 = vpop.xlane.xlu0 %942  ;;  %v5340_v29 = vtrunc.f32 %v375_v57  ;;  %v392_v57 = vld [vmem:[%s11936_s2 + $0x158] sm:$0xff] }
 0x15e   :  { %12271 = vst [vmem:[#allocation137_spill] sm:$0xff] %v7650_v60  ;;  %1337 = vperm.xlu0 %5426, %v5347_v53   ;;  %v5358_v53 = vtrunc.f32 %v384_v19 }
 0x15f   :  { %v5341_v36 = vcvt.f32.s32 %v5340_v29 }
 0x160   :  { %v5359_v41 = vcvt.f32.s32 %v5358_v53  ;;  %v377_v53 = vld [vmem:[%s11936_s2 + $0xe0] sm:$0xff] }
 0x161   :  { %1304 = vperm.xlu1 %5427, %v5325_v52   ;;  %v7658_v35 = vpop.xlane.xlu1 %945  ;;  %v7660_v56 = vpop.xlane.xlu0 %948 }
 0x162   :  { %12272 = vst [vmem:[#allocation138_spill] sm:$0xff] %v7658_v35  ;;  %12273 = vst [vmem:[#allocation139_spill] sm:$0xff] %v7660_v56  ;;  %1343 = vperm.xlu0 %5426, %v5351_v49   ;;  %v5362_v49 = vtrunc.f32 %v386_v11 }
 0x164   :  { %v5363_v37 = vcvt.f32.s32 %v5362_v49  ;;  %v379_v49 = vld [vmem:[%s11936_s2 + $0xf0] sm:$0xff] }
 0x165   :  { %1310 = vperm.xlu1 %5427, %v5329_v48   ;;  %v7668_v27 = vpop.xlane.xlu1 %951  ;;  %v7670_v52 = vpop.xlane.xlu0 %954 }
 0x166   :  { %12274 = vst [vmem:[#allocation140_spill] sm:$0xff] %v7668_v27  ;;  %12275 = vst [vmem:[#allocation141_spill] sm:$0xff] %v7670_v52  ;;  %1349 = vperm.xlu0 %5426, %v5355_v45   ;;  %v5366_v45 = vtrunc.f32 %v388_v4 }
 0x168   :  { %v5367_v33 = vcvt.f32.s32 %v5366_v45  ;;  %v381_v45 = vld [vmem:[%s11936_s2 + $0x100] sm:$0xff] }
 0x169   :  { %1316 = vperm.xlu1 %5427, %v5333_v44   ;;  %v7678_v19 = vpop.xlane.xlu1 %957  ;;  %v7680_v48 = vpop.xlane.xlu0 %960 }
 0x16a   :  { %12276 = vst [vmem:[#allocation142_spill] sm:$0xff] %v7678_v19  ;;  %12277 = vst [vmem:[#allocation143_spill] sm:$0xff] %v7680_v48  ;;  %1355 = vperm.xlu0 %5426, %v5359_v41   ;;  %v5344_v48 = vtrunc.f32 %v377_v53  ;;  %v5370_v41 = vtrunc.f32 %v390_v61  ;;  %v394_v53 = vld [vmem:[%s11936_s2 + $0x168] sm:$0xff] }
 0x16c   :  { %v5371_v29 = vcvt.f32.s32 %v5370_v41  ;;  %v383_v41 = vld [vmem:[%s11936_s2 + $0x110] sm:$0xff] }
 0x16d   :  { %1322 = vperm.xlu1 %5427, %v5337_v40   ;;  %v7688_v11 = vpop.xlane.xlu1 %963  ;;  %v7690_v44 = vpop.xlane.xlu0 %966 }
 0x16e   :  { %12278 = vst [vmem:[#allocation144_spill] sm:$0xff] %v7688_v11  ;;  %12279 = vst [vmem:[#allocation145_spill] sm:$0xff] %v7690_v44  ;;  %1361 = vperm.xlu0 %5426, %v5363_v37   ;;  %v5345_v11 = vcvt.f32.s32 %v5344_v48  ;;  %v5348_v44 = vtrunc.f32 %v379_v49  ;;  %v5374_v37 = vtrunc.f32 %v392_v57  ;;  %v396_v49 = vld [vmem:[%s11936_s2 + $0x178] sm:$0xff] }
 0x170   :  { %v5375_v48 = vcvt.f32.s32 %v5374_v37  ;;  %v385_v37 = vld [vmem:[%s11936_s2 + $0x120] sm:$0xff] }
 0x171   :  { %1328 = vperm.xlu1 %5427, %v5341_v36   ;;  %v7698_v4 = vpop.xlane.xlu1 %969  ;;  %v7700_v40 = vpop.xlane.xlu0 %972 }
 0x172   :  { %12280 = vst [vmem:[#allocation146_spill] sm:$0xff] %v7698_v4  ;;  %12281 = vst [vmem:[#allocation147_spill] sm:$0xff] %v7700_v40  ;;  %1367 = vperm.xlu0 %5426, %v5367_v33   ;;  %v5349_v4 = vcvt.f32.s32 %v5348_v44  ;;  %v5352_v40 = vtrunc.f32 %v381_v45  ;;  %v5378_v33 = vtrunc.f32 %v394_v53  ;;  %v398_v45 = vld [vmem:[%s11936_s2 + $0x188] sm:$0xff] }
 0x174   :  { %v5379_v44 = vcvt.f32.s32 %v5378_v33  ;;  %v387_v33 = vld [vmem:[%s11936_s2 + $0x130] sm:$0xff] }
 0x175   :  { %1334 = vperm.xlu1 %5427, %v5345_v11   ;;  %v7708_v61 = vpop.xlane.xlu1 %975  ;;  %v7710_v36 = vpop.xlane.xlu0 %978 }
 0x176   :  { %12282 = vst [vmem:[#allocation148_spill] sm:$0xff] %v7708_v61  ;;  %12283 = vst [vmem:[#allocation149_spill] sm:$0xff] %v7710_v36  ;;  %1373 = vperm.xlu0 %5426, %v5371_v29   ;;  %v5353_v61 = vcvt.f32.s32 %v5352_v40  ;;  %v5356_v36 = vtrunc.f32 %v383_v41  ;;  %v5382_v29 = vtrunc.f32 %v396_v49  ;;  %v400_v41 = vld [vmem:[%s11936_s2 + $0x198] sm:$0xff] }
 0x178   :  { %v5383_v40 = vcvt.f32.s32 %v5382_v29  ;;  %v389_v29 = vld [vmem:[%s11936_s2 + $0x140] sm:$0xff] }
 0x179   :  { %1340 = vperm.xlu1 %5427, %v5349_v4   ;;  %v7718_v57 = vpop.xlane.xlu1 %981  ;;  %v7720_v11 = vpop.xlane.xlu0 %984 }
 0x17a   :  { %12284 = vst [vmem:[#allocation150_spill] sm:$0xff] %v7718_v57  ;;  %12285 = vst [vmem:[#allocation151_spill] sm:$0xff] %v7720_v11  ;;  %1379 = vperm.xlu0 %5426, %v5375_v48   ;;  %v5357_v57 = vcvt.f32.s32 %v5356_v36  ;;  %v5360_v11 = vtrunc.f32 %v385_v37  ;;  %v5386_v48 = vtrunc.f32 %v398_v45  ;;  %v402_v37 = vld [vmem:[%s11936_s2 + $0x1a8] sm:$0xff] }
 0x17c   :  { %v5387_v36 = vcvt.f32.s32 %v5386_v48  ;;  %v391_v48 = vld [vmem:[%s11936_s2 + $0x150] sm:$0xff] }
 0x17d   :  { %1346 = vperm.xlu1 %5427, %v5353_v61   ;;  %v7728_v53 = vpop.xlane.xlu1 %987  ;;  %v7730_v4 = vpop.xlane.xlu0 %990 }
 0x17e   :  { %12286 = vst [vmem:[#allocation152_spill] sm:$0xff] %v7728_v53  ;;  %12287 = vst [vmem:[#allocation153_spill] sm:$0xff] %v7730_v4  ;;  %1385 = vperm.xlu0 %5426, %v5379_v44   ;;  %v5361_v53 = vcvt.f32.s32 %v5360_v11  ;;  %v5364_v4 = vtrunc.f32 %v387_v33  ;;  %v5390_v44 = vtrunc.f32 %v400_v41  ;;  %v404_v33 = vld [vmem:[%s11936_s2 + $0x1b8] sm:$0xff] }
 0x180   :  { %v5391_v11 = vcvt.f32.s32 %v5390_v44  ;;  %v393_v44 = vld [vmem:[%s11936_s2 + $0x160] sm:$0xff] }
 0x181   :  { %1352 = vperm.xlu1 %5427, %v5357_v57   ;;  %v7738_v49 = vpop.xlane.xlu1 %993  ;;  %v7740_v61 = vpop.xlane.xlu0 %996 }
 0x182   :  { %12288 = vst [vmem:[#allocation154_spill] sm:$0xff] %v7738_v49  ;;  %12289 = vst [vmem:[#allocation155_spill] sm:$0xff] %v7740_v61  ;;  %1391 = vperm.xlu0 %5426, %v5383_v40   ;;  %v5365_v49 = vcvt.f32.s32 %v5364_v4  ;;  %v5368_v61 = vtrunc.f32 %v389_v29  ;;  %v5394_v40 = vtrunc.f32 %v402_v37  ;;  %v406_v29 = vld [vmem:[%s11936_s2 + $0x1c8] sm:$0xff] }
 0x184   :  { %v5395_v4 = vcvt.f32.s32 %v5394_v40  ;;  %v395_v40 = vld [vmem:[%s11936_s2 + $0x170] sm:$0xff] }
 0x185   :  { %1358 = vperm.xlu1 %5427, %v5361_v53   ;;  %v7748_v45 = vpop.xlane.xlu1 %999  ;;  %v7750_v57 = vpop.xlane.xlu0 %1002 }
 0x186   :  { %12290 = vst [vmem:[#allocation156_spill] sm:$0xff] %v7748_v45  ;;  %12291 = vst [vmem:[#allocation157_spill] sm:$0xff] %v7750_v57  ;;  %1397 = vperm.xlu0 %5426, %v5387_v36   ;;  %v5369_v45 = vcvt.f32.s32 %v5368_v61  ;;  %v5372_v57 = vtrunc.f32 %v391_v48  ;;  %v5398_v36 = vtrunc.f32 %v404_v33  ;;  %v408_v48 = vld [vmem:[%s11936_s2 + $0x1d8] sm:$0xff] }
 0x188   :  { %v5399_v61 = vcvt.f32.s32 %v5398_v36  ;;  %v397_v36 = vld [vmem:[%s11936_s2 + $0x180] sm:$0xff] }
 0x189   :  { %1364 = vperm.xlu1 %5427, %v5365_v49   ;;  %v7758_v41 = vpop.xlane.xlu1 %1005  ;;  %v7760_v53 = vpop.xlane.xlu0 %1008 }
 0x18a   :  { %12292 = vst [vmem:[#allocation158_spill] sm:$0xff] %v7758_v41  ;;  %12293 = vst [vmem:[#allocation159_spill] sm:$0xff] %v7760_v53  ;;  %1403 = vperm.xlu0 %5426, %v5391_v11   ;;  %v5373_v41 = vcvt.f32.s32 %v5372_v57  ;;  %v5376_v53 = vtrunc.f32 %v393_v44  ;;  %v5402_v11 = vtrunc.f32 %v406_v29  ;;  %v410_v44 = vld [vmem:[%s11936_s2 + $0x1e8] sm:$0xff] }
 0x18c   :  { %v5403_v57 = vcvt.f32.s32 %v5402_v11  ;;  %v399_v11 = vld [vmem:[%s11936_s2 + $0x190] sm:$0xff] }
 0x18d   :  { %1370 = vperm.xlu1 %5427, %v5369_v45   ;;  %v7768_v37 = vpop.xlane.xlu1 %1011  ;;  %v7770_v49 = vpop.xlane.xlu0 %1014 }
 0x18e   :  { %12294 = vst [vmem:[#allocation160_spill] sm:$0xff] %v7768_v37  ;;  %12295 = vst [vmem:[#allocation161_spill] sm:$0xff] %v7770_v49  ;;  %1409 = vperm.xlu0 %5426, %v5395_v4   ;;  %v5377_v37 = vcvt.f32.s32 %v5376_v53  ;;  %v5380_v49 = vtrunc.f32 %v395_v40  ;;  %v5406_v4 = vtrunc.f32 %v408_v48  ;;  %v412_v40 = vld [vmem:[%s11936_s2 + $0x1f8] sm:$0xff] }
 0x190   :  { %v5407_v53 = vcvt.f32.s32 %v5406_v4  ;;  %v401_v4 = vld [vmem:[%s11936_s2 + $0x1a0] sm:$0xff] }
 0x191   :  { %1376 = vperm.xlu1 %5427, %v5373_v41   ;;  %v7778_v33 = vpop.xlane.xlu1 %1017  ;;  %v7780_v45 = vpop.xlane.xlu0 %1020 }
 0x192   :  { %12296 = vst [vmem:[#allocation162_spill] sm:$0xff] %v7778_v33  ;;  %12297 = vst [vmem:[#allocation163_spill] sm:$0xff] %v7780_v45  ;;  %1415 = vperm.xlu0 %5426, %v5399_v61   ;;  %v5381_v33 = vcvt.f32.s32 %v5380_v49  ;;  %v5384_v45 = vtrunc.f32 %v397_v36  ;;  %v5410_v61 = vtrunc.f32 %v410_v44 }
 0x194   :  { %v5411_v49 = vcvt.f32.s32 %v5410_v61 }
 0x195   :  { %1382 = vperm.xlu1 %5427, %v5377_v37   ;;  %v7788_v29 = vpop.xlane.xlu1 %1023  ;;  %v7790_v41 = vpop.xlane.xlu0 %1026 }
 0x196   :  { %12298 = vst [vmem:[#allocation164_spill] sm:$0xff] %v7788_v29  ;;  %12299 = vst [vmem:[#allocation165_spill] sm:$0xff] %v7790_v41  ;;  %1421 = vperm.xlu0 %5426, %v5403_v57   ;;  %v5385_v29 = vcvt.f32.s32 %v5384_v45  ;;  %v5388_v41 = vtrunc.f32 %v399_v11  ;;  %v5414_v57 = vtrunc.f32 %v412_v40  ;;  %v403_v45 = vld [vmem:[%s11936_s2 + $0x1b0] sm:$0xff] }
 0x197   :  { %v5396_v11 = vtrunc.f32 %v403_v45 }
 0x198   :  { %v5389_v19 = vcvt.f32.s32 %v5388_v41 }
 0x199   :  { %1388 = vperm.xlu1 %5427, %v5381_v33   ;;  %v7798_v48 = vpop.xlane.xlu1 %1029  ;;  %v7800_v37 = vpop.xlane.xlu0 %1032  ;;  %v5392_v33 = vtrunc.f32 %v401_v4 }
 0x19a   :  { %12300 = vst [vmem:[#allocation166_spill] sm:$0xff] %v7798_v48  ;;  %12301 = vst [vmem:[#allocation167_spill] sm:$0xff] %v7800_v37  ;;  %1427 = vperm.xlu0 %5426, %v5407_v53   ;;  %v5415_v48 = vcvt.f32.s32 %v5414_v57 }
 0x19b   :  { %v5393_v61 = vcvt.f32.s32 %v5392_v33 }
 0x19d   :  { %1394 = vperm.xlu1 %5427, %v5385_v29   ;;  %v7805_v36 = vpop.xlane.xlu1 %1035  ;;  %v7807_v44 = vpop.xlane.xlu0 %1038  ;;  %v405_v29 = vld [vmem:[%s11936_s2 + $0x1c0] sm:$0xff] }
 0x19e   :  { %12302 = vst [vmem:[#allocation168_spill] sm:$0xff] %v7805_v36  ;;  %12303 = vst [vmem:[#allocation169_spill] sm:$0xff] %v7807_v44  ;;  %1433 = vperm.xlu0 %5426, %v5411_v49   ;;  %v5397_v49 = vcvt.f32.s32 %v5396_v11  ;;  %v5400_v57 = vtrunc.f32 %v405_v29 }
 0x1a1   :  { %1400 = vperm.xlu1 %5427, %v5389_v19   ;;  %v7812_v53 = vpop.xlane.xlu1 %1041  ;;  %v7817_v40 = vpop.xlane.xlu0 %1044  ;;  %v407_v19 = vld [vmem:[%s11936_s2 + $0x1d0] sm:$0xff] }
 0x1a2   :  { %12304 = vst [vmem:[#allocation170_spill] sm:$0xff] %v7812_v53  ;;  %1439 = vperm.xlu0 %5426, %v5415_v48   ;;  %12305 = vst [vmem:[#allocation171_spill] sm:$0xff] %v7817_v40  ;;  %v5401_v48 = vcvt.f32.s32 %v5400_v57  ;;  %v5404_v45 = vtrunc.f32 %v407_v19  ;;  %v409_v40 = vld [vmem:[%s11936_s2 + $0x1e0] sm:$0xff]  ;;  %v1247_v53 = vlaneseq }
 0x1a3   :  { %v5408_v29 = vtrunc.f32 %v409_v40  ;;  %v6519_v40 = vmov 0.0  }
 0x1a4   :  { %v5405_v11 = vcvt.f32.s32 %v5404_v45  ;;  %v7838_v44 = vand.u32 127, %v1247_v53  ;;  %v6196_v53 = vld [vmem:[%s11934_s0 + $0x8] sm:$0xff] }
 0x1a5   :  { %1406 = vperm.xlu1 %5427, %v5393_v61   ;;  %v7819_v41 = vpop.xlane.xlu1 %1047  ;;  %v7824_v4 = vpop.xlane.xlu0 %1050  ;;  %v5409_v57 = vcvt.f32.s32 %v5408_v29 }
 0x1a6   :  { %12306 = vst [vmem:[#allocation172_spill] sm:$0xff] %v7819_v41  ;;  %12307 = vst [vmem:[#allocation173_spill] sm:$0xff] %v7824_v4  ;;  %v411_v4 = vld [vmem:[%s11936_s2 + $0x1f0] sm:$0xff] }
 0x1a7   :  { %v5412_v19 = vtrunc.f32 %v411_v4 }
 0x1a9   :  { %1412 = vperm.xlu1 %5427, %v5397_v49   ;;  %v7826_v33 = vpop.xlane.xlu1 %1053  ;;  %v5413_v45 = vcvt.f32.s32 %v5412_v19 }
 0x1aa   :  { %12308 = vst [vmem:[#allocation174_spill] sm:$0xff] %v7826_v33 }
 0x1ad   :  { %1418 = vperm.xlu1 %5427, %v5401_v48   ;;  %v1254_v61 = vpop.permute.xlu1 %1253  ;;  %v7831_v41 = vpop.permute.xlu0 %1250 }
 0x1ae   :  { %vm1442_vm1 = vcmp.eq.s32.totalorder %v7838_v44, %v1254_v61  ;;  %vm1441_vm7 = vcmp.eq.s32.totalorder %v7838_v44, %v7831_v41 }
 0x1af   :  { %v5225_v37 = vsel %vm1442_vm1, 1.0, %v6519_v40 }
 0x1b0   :  { %v1634_v4 = vmul.f32 %v6196_v53, %v5225_v37 }
 0x1b1   :  { %1424 = vperm.xlu1 %5427, %v5405_v11   ;;  %v1257_v49 = vpop.permute.xlu1 %1256  ;;  %v7836_v33 = vpop.permute.xlu0 %1277 }
 0x1b2   :  { %vm1443_vm2 = vcmp.eq.s32.totalorder %v7838_v44, %v1257_v49  ;;  %v1700_v61 = vsel %vm478_vm0, %v1634_v4, 0.0  ;;  %vm1450_vm15 = vcmp.eq.s32.totalorder %v7838_v44, %v7836_v33 }
 0x1b3   :  { %v5226_v29 = vsel %vm1443_vm2, 1.0, %v6519_v40  ;;  %v5233_v33 = vsel %vm1450_vm15, 1.0, %v6519_v40 }
 0x1b5   :  { %1430 = vperm.xlu1 %5427, %v5409_v57   ;;  %v7840_v48 = vpop.permute.xlu1 %1259  ;;  %v7842_v36 = vpop.permute.xlu0 %1283 }
 0x1b6   :  { %vm1444_vm9 = vcmp.eq.s32.totalorder %v7838_v44, %v7840_v48  ;;  %vm1452_vm2 = vcmp.eq.s32.totalorder %v7838_v44, %v7842_v36 }
 0x1b9   :  { %1436 = vperm.xlu1 %5427, %v5413_v45   ;;  %v1263_v11 = vpop.permute.xlu1 %1262  ;;  %v7846_v25 = vpop.permute.xlu0 %1289  ;;  %v6197_v45 = vld [vmem:[%s11934_s0 + $0x10] sm:$0xff] }
 0x1ba   :  { %vm1445_vm3 = vcmp.eq.s32.totalorder %v7838_v44, %v1263_v11  ;;  %v1635_v49 = vmul.f32 %v6197_v45, %v5226_v29  ;;  %v6198_v11 = vld [vmem:[%s11934_s0 + $0x20] sm:$0xff] }
 0x1bb   :  { %v5228_v52 = vsel %vm1445_vm3, 1.0, %v6519_v40 }
 0x1bc   :  { %v1703_v37 = vsel %vm478_vm0, %v1635_v49, 0.0  ;;  %v1637_v53 = vmul.f32 %v6198_v11, %v5228_v52 }
 0x1bd   :  { %v7853_v57 = vpop.permute.xlu1 %1265  ;;  %v7855_v19 = vpop.permute.xlu0 %1295 }
 0x1be   :  { %v1709_v45 = vsel %vm478_vm0, %v1637_v53, 0.0  ;;  %vm1446_vm11 = vcmp.eq.s32.totalorder %v7838_v44, %v7853_v57 }
 0x1c1   :  { %v1269_v32 = vpop.permute.xlu1 %1268  ;;  %v7863_v27 = vpop.permute.xlu0 %1301  ;;  %1701 = vadd.xlane.f32.xlu0 %v1700_v61 }
 0x1c2   :  { %vm1447_vm4 = vcmp.eq.s32.totalorder %v7838_v44, %v1269_v32  ;;  %v6199_v32 = vld [vmem:[%s11934_s0 + $0x30] sm:$0xff] }
 0x1c3   :  { %v5230_v4 = vsel %vm1447_vm4, 1.0, %v6519_v40  ;;  %vm1454_vm4 = vcmp.eq.s32.totalorder %v7838_v44, %v7846_v25 }
 0x1c4   :  { %v1639_v61 = vmul.f32 %v6199_v32, %v5230_v4 }
 0x1c5   :  { %v7871_v21 = vpop.permute.xlu1 %1271  ;;  %v7873_v29 = vpop.permute.xlu0 %1307  ;;  %1704 = vadd.xlane.f32.xlu0 %v1703_v37  ;;  %v6200_v37 = vld [vmem:[%s11934_s0 + $0x40] sm:$0xff] }
 0x1c6   :  { %v1715_v11 = vsel %vm478_vm0, %v1639_v61, 0.0  ;;  %vm1448_vm13 = vcmp.eq.s32.totalorder %v7838_v44, %v7871_v21 }
 0x1c9   :  { %v1275_v49 = vpop.permute.xlu1 %1274  ;;  %v7879_v56 = vpop.permute.xlu0 %1313  ;;  %1710 = vadd.xlane.f32.xlu0 %v1709_v45 }
 0x1ca   :  { %vm1449_vm5 = vcmp.eq.s32.totalorder %v7838_v44, %v1275_v49  ;;  %v6201_v49 = vld [vmem:[%s11934_s0 + $0x50] sm:$0xff] }
 0x1cb   :  { %v5232_v52 = vsel %vm1449_vm5, 1.0, %v6519_v40 }
 0x1cc   :  { %v1641_v53 = vmul.f32 %v6200_v37, %v5232_v52  ;;  %v6202_v37 = vld [vmem:[%s11934_s0 + $0x60] sm:$0xff] }
 0x1cd   :  { %v1281_v28 = vpop.permute.xlu1 %1280  ;;  %1716 = vadd.xlane.f32.xlu0 %v1715_v11  ;;  %v7888_v4 = vpop.permute.xlu0 %1319 }
 0x1ce   :  { %vm1451_vm6 = vcmp.eq.s32.totalorder %v7838_v44, %v1281_v28  ;;  %v1721_v45 = vsel %vm478_vm0, %v1641_v53, 0.0 }
 0x1cf   :  { %v5234_v32 = vsel %vm1451_vm6, 1.0, %v6519_v40  ;;  %vm1456_vm6 = vcmp.eq.s32.totalorder %v7838_v44, %v7855_v19 }
 0x1d0   :  { %v1643_v61 = vmul.f32 %v6201_v49, %v5234_v32  ;;  %v5224_v32 = vsel %vm1441_vm7, 1.0, %v6519_v40  ;;  %v5239_v19 = vsel %vm1456_vm6, 1.0, %v6519_v40 }
 0x1d1   :  { %v1287_v35 = vpop.permute.xlu1 %1286  ;;  %1722 = vadd.xlane.f32.xlu0 %v1721_v45  ;;  %v7899_v52 = vpop.permute.xlu0 %1325  ;;  %v6203_v45 = vld [vmem:[%s11934_s0 + $0x70] sm:$0xff] }
 0x1d2   :  { %vm1453_vm8 = vcmp.eq.s32.totalorder %v7838_v44, %v1287_v35  ;;  %v1727_v11 = vsel %vm478_vm0, %v1643_v61, 0.0 }
 0x1d3   :  { %v5236_v28 = vsel %vm1453_vm8, 1.0, %v6519_v40  ;;  %vm1458_vm8 = vcmp.eq.s32.totalorder %v7838_v44, %v7863_v27 }
 0x1d4   :  { %v1645_v53 = vmul.f32 %v6202_v37, %v5236_v28  ;;  %v6204_v28 = vld [vmem:[%s11934_s0] sm:$0xff] }
 0x1d5   :  { %v1293_v49 = vpop.permute.xlu1 %1292  ;;  %1728 = vadd.xlane.f32.xlu0 %v1727_v11  ;;  %v1633_v37 = vmul.f32 %v6204_v28, %v5224_v32  ;;  %v5227_v11 = vsel %vm1444_vm9, 1.0, %v6519_v40  ;;  %v7920_v48 = vpop.permute.xlu0 %1331  ;;  %v6205_v32 = vld [vmem:[%s11934_s0 + $0x80] sm:$0xff]  ;;  %v5229_v28 = vsel %vm1446_vm11, 1.0, %v6519_v40 }
 0x1d6   :  { %vm1455_vm10 = vcmp.eq.s32.totalorder %v7838_v44, %v1293_v49  ;;  %v1733_v41 = vsel %vm478_vm0, %v1645_v53, 0.0 }
 0x1d7   :  { %v5238_v35 = vsel %vm1455_vm10, 1.0, %v6519_v40  ;;  %vm1460_vm10 = vcmp.eq.s32.totalorder %v7838_v44, %v7873_v29 }
 0x1d8   :  { %v1647_v61 = vmul.f32 %v6203_v45, %v5238_v35  ;;  %v1697_v35 = vsel %vm478_vm0, %v1633_v37, 0.0 }
 0x1d9   :  { %v1299_v47 = vpop.permute.xlu1 %1298  ;;  %1734 = vadd.xlane.f32.xlu0 %v1733_v41  ;;  %v6206_v41 = vld [vmem:[%s11934_s0 + $0x18] sm:$0xff] }
 0x1da   :  { %vm1457_vm12 = vcmp.eq.s32.totalorder %v7838_v44, %v1299_v47  ;;  %v1739_v49 = vsel %vm478_vm0, %v1647_v61, 0.0  ;;  %v1636_v57 = vmul.f32 %v6206_v41, %v5227_v11  ;;  %v7937_v61 = vpop.permute.xlu0 %1337  ;;  %v6207_v11 = vld [vmem:[%s11934_s0 + $0x90] sm:$0xff] }
 0x1db   :  { %v5240_v53 = vsel %vm1457_vm12, 1.0, %v6519_v40  ;;  %vm1462_vm12 = vcmp.eq.s32.totalorder %v7838_v44, %v7879_v56 }
 0x1dc   :  { %v1649_v45 = vmul.f32 %v6205_v32, %v5240_v53  ;;  %v1706_v53 = vsel %vm478_vm0, %v1636_v57, 0.0  ;;  %v5245_v56 = vsel %vm1462_vm12, 1.0, %v6519_v40 }
 0x1dd   :  { %v1305_v60 = vpop.permute.xlu1 %1304  ;;  %1740 = vadd.xlane.f32.xlu0 %v1739_v49  ;;  %1698 = vadd.xlane.f32.xlu1 %v1697_v35  ;;  %v6208_v49 = vld [vmem:[%s11934_s0 + $0x28] sm:$0xff] }
 0x1de   :  { %vm1459_vm14 = vcmp.eq.s32.totalorder %v7838_v44, %v1305_v60  ;;  %v1745_v37 = vsel %vm478_vm0, %v1649_v45, 0.0  ;;  %v1638_v21 = vmul.f32 %v6208_v49, %v5229_v28  ;;  %v5231_v60 = vsel %vm1448_vm13, 1.0, %v6519_v40  ;;  %v6209_v28 = vld [vmem:[%s11934_s0 + $0xa0] sm:$0xff] }
 0x1df   :  { %v5242_v47 = vsel %vm1459_vm14, 1.0, %v6519_v40  ;;  %vm1464_vm14 = vcmp.eq.s32.totalorder %v7838_v44, %v7888_v4 }
 0x1e0   :  { %v1651_v32 = vmul.f32 %v6207_v11, %v5242_v47  ;;  %v1712_v57 = vsel %vm478_vm0, %v1638_v21, 0.0 }
 0x1e1   :  { %v1311_v35 = vpop.permute.xlu1 %1310  ;;  %1746 = vadd.xlane.f32.xlu0 %v1745_v37  ;;  %1707 = vadd.xlane.f32.xlu1 %v1706_v53  ;;  %v6210_v37 = vld [vmem:[%s11934_s0 + $0x38] sm:$0xff] }
 0x1e2   :  { %vm1461_vm1 = vcmp.eq.s32.totalorder %v7838_v44, %v1311_v35  ;;  %v1751_v41 = vsel %vm478_vm0, %v1651_v32, 0.0  ;;  %v1640_v53 = vmul.f32 %v6210_v37, %v5231_v60  ;;  %v7963_v32 = vpop.permute.xlu0 %1343  ;;  %v6211_v60 = vld [vmem:[%s11934_s0 + $0xb0] sm:$0xff] }
 0x1e3   :  { %v5244_v45 = vsel %vm1461_vm1, 1.0, %v6519_v40  ;;  %vm1466_vm1 = vcmp.eq.s32.totalorder %v7838_v44, %v7899_v52 }
 0x1e4   :  { %v1653_v47 = vmul.f32 %v6209_v28, %v5244_v45  ;;  %v1718_v35 = vsel %vm478_vm0, %v1640_v53, 0.0 }
 0x1e5   :  { %v1317_v11 = vpop.permute.xlu1 %1316  ;;  %1752 = vadd.xlane.f32.xlu0 %v1751_v41  ;;  %1713 = vadd.xlane.f32.xlu1 %v1712_v57  ;;  %v6212_v41 = vld [vmem:[%s11934_s0 + $0x48] sm:$0xff]  ;;  %v5235_v57 = vsel %vm1452_vm2, 1.0, %v6519_v40 }
 0x1e6   :  { %vm1463_vm3 = vcmp.eq.s32.totalorder %v7838_v44, %v1317_v11  ;;  %v1757_v21 = vsel %vm478_vm0, %v1653_v47, 0.0  ;;  %v1642_v36 = vmul.f32 %v6212_v41, %v5233_v33  ;;  %v7980_v37 = vpop.permute.xlu0 %1349  ;;  %v6213_v33 = vld [vmem:[%s11934_s0 + $0xc0] sm:$0xff] }
 0x1e7   :  { %v5246_v49 = vsel %vm1463_vm3, 1.0, %v6519_v40  ;;  %vm1468_vm3 = vcmp.eq.s32.totalorder %v7838_v44, %v7920_v48 }
 0x1e8   :  { %v1655_v45 = vmul.f32 %v6211_v60, %v5246_v49  ;;  %v1724_v11 = vsel %vm478_vm0, %v1642_v36, 0.0  ;;  %v5251_v48 = vsel %vm1468_vm3, 1.0, %v6519_v40 }
 0x1e9   :  { %v1323_v28 = vpop.permute.xlu1 %1322  ;;  %1758 = vadd.xlane.f32.xlu0 %v1757_v21  ;;  %1719 = vadd.xlane.f32.xlu1 %v1718_v35  ;;  %v6214_v21 = vld [vmem:[%s11934_s0 + $0x58] sm:$0xff]  ;;  %v5237_v35 = vsel %vm1454_vm4, 1.0, %v6519_v40 }
 0x1ea   :  { %vm1465_vm5 = vcmp.eq.s32.totalorder %v7838_v44, %v1323_v28  ;;  %v1763_v53 = vsel %vm478_vm0, %v1655_v45, 0.0  ;;  %v1644_v25 = vmul.f32 %v6214_v21, %v5235_v57  ;;  %v6215_v57 = vld [vmem:[%s11934_s0 + $0xd0] sm:$0xff] }
 0x1eb   :  { %v5248_v47 = vsel %vm1465_vm5, 1.0, %v6519_v40  ;;  %vm1470_vm5 = vcmp.eq.s32.totalorder %v7838_v44, %v7937_v61 }
 0x1ec   :  { %v1657_v49 = vmul.f32 %v6213_v33, %v5248_v47  ;;  %v1730_v36 = vsel %vm478_vm0, %v1644_v25, 0.0  ;;  %v6216_v47 = vld [vmem:[%s11934_s0 + $0x68] sm:$0xff]  ;;  %v8006_v33 = vpop.permute.xlu0 %1355 }
 0x1ed   :  { %v1329_v60 = vpop.permute.xlu1 %1328  ;;  %1764 = vadd.xlane.f32.xlu0 %v1763_v53  ;;  %1725 = vadd.xlane.f32.xlu1 %v1724_v11  ;;  %v1646_v53 = vmul.f32 %v6216_v47, %v5237_v35  ;;  %v6217_v35 = vld [vmem:[%s11934_s0 + $0xe0] sm:$0xff] }
 0x1ee   :  { %vm1467_vm7 = vcmp.eq.s32.totalorder %v7838_v44, %v1329_v60  ;;  %v1769_v41 = vsel %vm478_vm0, %v1657_v49, 0.0 }
 0x1ef   :  { %v5250_v45 = vsel %vm1467_vm7, 1.0, %v6519_v40  ;;  %v1736_v25 = vsel %vm478_vm0, %v1646_v53, 0.0  ;;  %vm1472_vm7 = vcmp.eq.s32.totalorder %v7838_v44, %v7963_v32 }
 0x1f0   :  { %v1659_v28 = vmul.f32 %v6215_v57, %v5250_v45  ;;  %v6218_v45 = vld [vmem:[%s11934_s0 + $0x78] sm:$0xff] }
 0x1f1   :  { %v1335_v11 = vpop.permute.xlu1 %1334  ;;  %1770 = vadd.xlane.f32.xlu0 %v1769_v41  ;;  %1731 = vadd.xlane.f32.xlu1 %v1730_v36  ;;  %v1648_v27 = vmul.f32 %v6218_v45, %v5239_v19  ;;  %v5241_v41 = vsel %vm1458_vm8, 1.0, %v6519_v40  ;;  %v6219_v19 = vld [vmem:[%s11934_s0 + $0xf0] sm:$0xff] }
 0x1f2   :  { %vm1469_vm9 = vcmp.eq.s32.totalorder %v7838_v44, %v1335_v11  ;;  %v1775_v21 = vsel %vm478_vm0, %v1659_v28, 0.0  ;;  %v8023_v28 = vpop.permute.xlu0 %1361 }
 0x1f3   :  { %v5252_v49 = vsel %vm1469_vm9, 1.0, %v6519_v40  ;;  %v1742_v53 = vsel %vm478_vm0, %v1648_v27, 0.0  ;;  %v6221_v27 = vld [vmem:[%s11934_s0 + $0x100] sm:$0xff]  ;;  %vm1474_vm9 = vcmp.eq.s32.totalorder %v7838_v44, %v7980_v37 }
 0x1f4   :  { %v1661_v60 = vmul.f32 %v6217_v35, %v5252_v49  ;;  %v6220_v49 = vld [vmem:[%s11934_s0 + $0x88] sm:$0xff]  ;;  %v5257_v37 = vsel %vm1474_vm9, 1.0, %v6519_v40 }
 0x1f5   :  { %v1341_v36 = vpop.permute.xlu1 %1340  ;;  %1776 = vadd.xlane.f32.xlu0 %v1775_v21  ;;  %1737 = vadd.xlane.f32.xlu1 %v1736_v25  ;;  %v1650_v29 = vmul.f32 %v6220_v49, %v5241_v41  ;;  %v5243_v21 = vsel %vm1460_vm10, 1.0, %v6519_v40 }
 0x1f6   :  { %vm1471_vm11 = vcmp.eq.s32.totalorder %v7838_v44, %v1341_v36  ;;  %v1781_v47 = vsel %vm478_vm0, %v1661_v60, 0.0  ;;  %v6222_v36 = vld [vmem:[%s11934_s0 + $0x98] sm:$0xff] }
 0x1f7   :  { %v5254_v57 = vsel %vm1471_vm11, 1.0, %v6519_v40  ;;  %v1748_v45 = vsel %vm478_vm0, %v1650_v29, 0.0  ;;  %v6223_v29 = vld [vmem:[%s11934_s0 + $0x110] sm:$0xff]  ;;  %vm1476_vm11 = vcmp.eq.s32.totalorder %v7838_v44, %v8006_v33 }
 0x1f8   :  { %v1663_v11 = vmul.f32 %v6219_v19, %v5254_v57  ;;  %v1652_v57 = vmul.f32 %v6222_v36, %v5243_v21 }
 0x1f9   :  { %v1347_v25 = vpop.permute.xlu1 %1346  ;;  %1782 = vadd.xlane.f32.xlu0 %v1781_v47  ;;  %1743 = vadd.xlane.f32.xlu1 %v1742_v53  ;;  %v8049_v53 = vpop.permute.xlu0 %1367 }
 0x1fa   :  { %vm1473_vm13 = vcmp.eq.s32.totalorder %v7838_v44, %v1347_v25  ;;  %v1787_v60 = vsel %vm478_vm0, %v1663_v11, 0.0  ;;  %v1754_v49 = vsel %vm478_vm0, %v1652_v57, 0.0  ;;  %v6224_v25 = vld [vmem:[%s11934_s0 + $0xa8] sm:$0xff]  ;;  %v6225_v57 = vld [vmem:[%s11934_s0 + $0x120] sm:$0xff] }
 0x1fb   :  { %v5256_v35 = vsel %vm1473_vm13, 1.0, %v6519_v40  ;;  %v1654_v4 = vmul.f32 %v6224_v25, %v5245_v56  ;;  %v6227_v25 = vld [vmem:[%s11934_s0 + $0x130] sm:$0xff]  ;;  %vm1478_vm13 = vcmp.eq.s32.totalorder %v7838_v44, %v8023_v28 }
 0x1fc   :  { %v1665_v41 = vmul.f32 %v6221_v27, %v5256_v35  ;;  %v5247_v35 = vsel %vm1464_vm14, 1.0, %v6519_v40 }
 0x1fd   :  { %v1353_v47 = vpop.permute.xlu1 %1352  ;;  %1788 = vadd.xlane.f32.xlu0 %v1787_v60  ;;  %1749 = vadd.xlane.f32.xlu1 %v1748_v45  ;;  %v8066_v27 = vpop.permute.xlu0 %1373  ;;  %v1760_v36 = vsel %vm478_vm0, %v1654_v4, 0.0 }
 0x1fe   :  { %vm1475_vm15 = vcmp.eq.s32.totalorder %v7838_v44, %v1353_v47  ;;  %v1793_v11 = vsel %vm478_vm0, %v1665_v41, 0.0  ;;  %v6226_v47 = vld [vmem:[%s11934_s0 + $0xb8] sm:$0xff] }
 0x1ff   :  { %v5258_v19 = vsel %vm1475_vm15, 1.0, %v6519_v40  ;;  %v1656_v52 = vmul.f32 %v6226_v47, %v5247_v35  ;;  %v6228_v35 = vld [vmem:[%s11934_s0 + $0xc8] sm:$0xff]  ;;  %v6229_v47 = vld [vmem:[%s11934_s0 + $0x140] sm:$0xff]  ;;  %vm1480_vm15 = vcmp.eq.s32.totalorder %v7838_v44, %v8049_v53 }
 0x200   :  { %v1667_v21 = vmul.f32 %v6223_v29, %v5258_v19  ;;  %v5249_v19 = vsel %vm1466_vm1, 1.0, %v6519_v40  ;;  %v5263_v53 = vsel %vm1480_vm15, 1.0, %v6519_v40 }
 0x201   :  { %v1359_v60 = vpop.permute.xlu1 %1358  ;;  %1794 = vadd.xlane.f32.xlu0 %v1793_v11  ;;  %1755 = vadd.xlane.f32.xlu1 %v1754_v49 }
 0x202   :  { %vm1477_vm2 = vcmp.eq.s32.totalorder %v7838_v44, %v1359_v60  ;;  %v1799_v41 = vsel %vm478_vm0, %v1667_v21, 0.0  ;;  %v1766_v21 = vsel %vm478_vm0, %v1656_v52, 0.0  ;;  %v1658_v60 = vmul.f32 %v6228_v35, %v5249_v19  ;;  %v6230_v19 = vld [vmem:[%s11934_s0 + $0xd8] sm:$0xff]  ;;  %v6231_v35 = vld [vmem:[%s11934_s0 + $0x150] sm:$0xff] }
 0x203   :  { %v5260_v45 = vsel %vm1477_vm2, 1.0, %v6519_v40  ;;  %v1660_v61 = vmul.f32 %v6230_v19, %v5251_v48  ;;  %v6232_v48 = vld [vmem:[%s11934_s0 + $0xe8] sm:$0xff]  ;;  %vm1482_vm2 = vcmp.eq.s32.totalorder %v7838_v44, %v8066_v27 }
 0x204   :  { %v1669_v56 = vmul.f32 %v6225_v57, %v5260_v45 }
 0x205   :  { %v1365_v11 = vpop.permute.xlu1 %1364  ;;  %1800 = vadd.xlane.f32.xlu0 %v1799_v41  ;;  %1761 = vadd.xlane.f32.xlu1 %v1760_v36  ;;  %v8092_v41 = vpop.permute.xlu0 %1379 }
 0x206   :  { %vm1479_vm4 = vcmp.eq.s32.totalorder %v7838_v44, %v1365_v11  ;;  %v1805_v29 = vsel %vm478_vm0, %v1669_v56, 0.0  ;;  %v1772_v56 = vsel %vm478_vm0, %v1658_v60, 0.0  ;;  %v5253_v11 = vsel %vm1470_vm5, 1.0, %v6519_v40 }
 0x207   :  { %v5262_v49 = vsel %vm1479_vm4, 1.0, %v6519_v40  ;;  %v1662_v32 = vmul.f32 %v6232_v48, %v5253_v11  ;;  %vm1484_vm4 = vcmp.eq.s32.totalorder %v7838_v44, %v8092_v41 }
 0x208   :  { %v1671_v4 = vmul.f32 %v6227_v25, %v5262_v49 }
 0x209   :  { %v1371_v45 = vpop.permute.xlu1 %1370  ;;  %1806 = vadd.xlane.f32.xlu0 %v1805_v29  ;;  %1767 = vadd.xlane.f32.xlu1 %v1766_v21  ;;  %v8109_v21 = vpop.permute.xlu0 %1385 }
 0x20a   :  { %vm1481_vm6 = vcmp.eq.s32.totalorder %v7838_v44, %v1371_v45  ;;  %v1811_v57 = vsel %vm478_vm0, %v1671_v4, 0.0  ;;  %v1778_v4 = vsel %vm478_vm0, %v1660_v61, 0.0  ;;  %v5255_v45 = vsel %vm1472_vm7, 1.0, %v6519_v40  ;;  %v6234_v61 = vld [vmem:[%s11934_s0 + $0xf8] sm:$0xff] }
 0x20b   :  { %v5264_v36 = vsel %vm1481_vm6, 1.0, %v6519_v40  ;;  %v1664_v11 = vmul.f32 %v6234_v61, %v5255_v45  ;;  %v5259_v45 = vsel %vm1476_vm11, 1.0, %v6519_v40  ;;  %vm1486_vm6 = vcmp.eq.s32.totalorder %v7838_v44, %v8109_v21 }
 0x20c   :  { %v1673_v52 = vmul.f32 %v6229_v47, %v5264_v36  ;;  %v1784_v47 = vsel %vm478_vm0, %v1662_v32, 0.0  ;;  %v6236_v32 = vld [vmem:[%s11934_s0 + $0x108] sm:$0xff]  ;;  %v5269_v21 = vsel %vm1486_vm6, 1.0, %v6519_v40 }
 0x20d   :  { %v1377_v49 = vpop.permute.xlu1 %1376  ;;  %1812 = vadd.xlane.f32.xlu0 %v1811_v57  ;;  %1773 = vadd.xlane.f32.xlu1 %v1772_v56  ;;  %v1666_v33 = vmul.f32 %v6236_v32, %v5257_v37  ;;  %v5261_v37 = vsel %vm1478_vm13, 1.0, %v6519_v40  ;;  %v6240_v32 = vld [vmem:[%s11934_s0 + $0x128] sm:$0xff] }
 0x20e   :  { %vm1483_vm8 = vcmp.eq.s32.totalorder %v7838_v44, %v1377_v49  ;;  %v1817_v25 = vsel %vm478_vm0, %v1673_v52, 0.0  ;;  %v6233_v52 = vld [vmem:[%s11934_s0 + $0x160] sm:$0xff] }
 0x20f   :  { %v5266_v29 = vsel %vm1483_vm8, 1.0, %v6519_v40 }
 0x210   :  { %v1675_v60 = vmul.f32 %v6231_v35, %v5266_v29  ;;  %v8135_v29 = vpop.permute.xlu0 %1391  ;;  %v1790_v35 = vsel %vm478_vm0, %v1664_v11, 0.0  ;;  %v6238_v11 = vld [vmem:[%s11934_s0 + $0x118] sm:$0xff] }
 0x211   :  { %v1383_v36 = vpop.permute.xlu1 %1382  ;;  %1818 = vadd.xlane.f32.xlu0 %v1817_v25  ;;  %1779 = vadd.xlane.f32.xlu1 %v1778_v4  ;;  %v1668_v28 = vmul.f32 %v6238_v11, %v5259_v45  ;;  %v6242_v11 = vld [vmem:[%s11934_s0 + $0x138] sm:$0xff]  ;;  %vm1488_vm8 = vcmp.eq.s32.totalorder %v7838_v44, %v8135_v29 }
 0x212   :  { %vm1485_vm10 = vcmp.eq.s32.totalorder %v7838_v44, %v1383_v36  ;;  %v1823_v56 = vsel %vm478_vm0, %v1675_v60, 0.0  ;;  %v6235_v60 = vld [vmem:[%s11934_s0 + $0x170] sm:$0xff]  ;;  %v1672_v27 = vmul.f32 %v6242_v11, %v5263_v53  ;;  %v5271_v29 = vsel %vm1488_vm8, 1.0, %v6519_v40 }
 0x213   :  { %v5268_v57 = vsel %vm1485_vm10, 1.0, %v6519_v40 }
 0x214   :  { %v1677_v19 = vmul.f32 %v6233_v52, %v5268_v57  ;;  %v1796_v52 = vsel %vm478_vm0, %v1666_v33, 0.0  ;;  %v1670_v33 = vmul.f32 %v6240_v32, %v5261_v37  ;;  %v6244_v32 = vld [vmem:[%s11934_s0 + $0x148] sm:$0xff] }
 0x215   :  { %v1389_v49 = vpop.permute.xlu1 %1388  ;;  %1824 = vadd.xlane.f32.xlu0 %v1823_v56  ;;  %1785 = vadd.xlane.f32.xlu1 %v1784_v47  ;;  %v8152_v56 = vpop.permute.xlu0 %1397 }
 0x216   :  { %vm1487_vm12 = vcmp.eq.s32.totalorder %v7838_v44, %v1389_v49  ;;  %v1829_v4 = vsel %vm478_vm0, %v1677_v19, 0.0  ;;  %v6237_v19 = vld [vmem:[%s11934_s0 + $0x180] sm:$0xff]  ;;  %vm1490_vm10 = vcmp.eq.s32.totalorder %v7838_v44, %v8152_v56 }
 0x217   :  { %v5270_v25 = vsel %vm1487_vm12, 1.0, %v6519_v40  ;;  %v5273_v56 = vsel %vm1490_vm10, 1.0, %v6519_v40 }
 0x218   :  { %v1679_v48 = vmul.f32 %v6235_v60, %v5270_v25  ;;  %v6239_v60 = vld [vmem:[%s11934_s0 + $0x190] sm:$0xff] }
 0x219   :  { %v1395_v36 = vpop.permute.xlu1 %1394  ;;  %1830 = vadd.xlane.f32.xlu0 %v1829_v4  ;;  %1791 = vadd.xlane.f32.xlu1 %v1790_v35  ;;  %v1802_v35 = vsel %vm478_vm0, %v1668_v28, 0.0  ;;  %v5265_v28 = vsel %vm1482_vm2, 1.0, %v6519_v40 }
 0x21a   :  { %vm1489_vm14 = vcmp.eq.s32.totalorder %v7838_v44, %v1395_v36  ;;  %v1835_v47 = vsel %vm478_vm0, %v1679_v48, 0.0  ;;  %v8178_v36 = vpop.permute.xlu0 %1403  ;;  %v1674_v41 = vmul.f32 %v6244_v32, %v5265_v28 }
 0x21b   :  { %v5272_v57 = vsel %vm1489_vm14, 1.0, %v6519_v40  ;;  %vm1492_vm12 = vcmp.eq.s32.totalorder %v7838_v44, %v8178_v36 }
 0x21c   :  { %v1681_v61 = vmul.f32 %v6237_v19, %v5272_v57  ;;  %v6241_v19 = vld [vmem:[%s11934_s0 + $0x1a0] sm:$0xff]  ;;  %v5275_v36 = vsel %vm1492_vm12, 1.0, %v6519_v40 }
 0x21d   :  { %v1401_v49 = vpop.permute.xlu1 %1400  ;;  %1836 = vadd.xlane.f32.xlu0 %v1835_v47  ;;  %1797 = vadd.xlane.f32.xlu1 %v1796_v52  ;;  %v1808_v52 = vsel %vm478_vm0, %v1670_v33, 0.0  ;;  %v5267_v33 = vsel %vm1484_vm4, 1.0, %v6519_v40 }
 0x21e   :  { %vm1491_vm1 = vcmp.eq.s32.totalorder %v7838_v44, %v1401_v49  ;;  %v1841_v4 = vsel %vm478_vm0, %v1681_v61, 0.0 }
 0x21f   :  { %v5274_v25 = vsel %vm1491_vm1, 1.0, %v6519_v40 }
 0x220   :  { %v1683_v48 = vmul.f32 %v6239_v60, %v5274_v25  ;;  %v8195_v25 = vpop.permute.xlu0 %1409  ;;  %v6243_v60 = vld [vmem:[%s11934_s0 + $0x1b0] sm:$0xff] }
 0x221   :  { %v1407_v45 = vpop.permute.xlu1 %1406  ;;  %1842 = vadd.xlane.f32.xlu0 %v1841_v4  ;;  %1803 = vadd.xlane.f32.xlu1 %v1802_v35  ;;  %v1814_v35 = vsel %vm478_vm0, %v1672_v27, 0.0  ;;  %vm1494_vm14 = vcmp.eq.s32.totalorder %v7838_v44, %v8195_v25  ;;  %v6254_v25 = vld [vmem:[%s11934_s0 + $0x1a8] sm:$0xff] }
 0x222   :  { %vm1493_vm3 = vcmp.eq.s32.totalorder %v7838_v44, %v1407_v45  ;;  %v1847_v47 = vsel %vm478_vm0, %v1683_v48, 0.0 }
 0x223   :  { %v5276_v57 = vsel %vm1493_vm3, 1.0, %v6519_v40 }
 0x224   :  { %v1685_v61 = vmul.f32 %v6241_v19, %v5276_v57  ;;  %v1416_v28 = vpop.permute.xlu0 %1415 }
 0x225   :  { %v1413_v37 = vpop.permute.xlu1 %1412  ;;  %1848 = vadd.xlane.f32.xlu0 %v1847_v47  ;;  %1809 = vadd.xlane.f32.xlu1 %v1808_v52  ;;  %v1820_v47 = vsel %vm478_vm0, %v1674_v41, 0.0  ;;  %v6245_v52 = vld [vmem:[%s11934_s0 + $0x1c0] sm:$0xff]  ;;  %vm1496_vm15 = vcmp.eq.s32.totalorder %v7838_v44, %v1416_v28 }
 0x226   :  { %vm1495_vm5 = vcmp.eq.s32.totalorder %v7838_v44, %v1413_v37  ;;  %v1853_v4 = vsel %vm478_vm0, %v1685_v61, 0.0  ;;  %v6246_v61 = vld [vmem:[%s11934_s0 + $0x158] sm:$0xff] }
 0x227   :  { %v5278_v49 = vsel %vm1495_vm5, 1.0, %v6519_v40  ;;  %v1676_v11 = vmul.f32 %v6246_v61, %v5267_v33  ;;  %vm92_vm5 = vcmask 7168  }
 0x228   :  { %v1687_v48 = vmul.f32 %v6243_v60, %v5278_v49  ;;  %93 = vst.msk [vmem:[#allocation2] sm:$0xff] %vm92_vm5, %v6519_v40  ;;  %94 = vst.msk [vmem:[#allocation2 + $0x8] sm:$0xff] %vm92_vm5, %v6519_v40 }
 0x229   :  { %v1419_v53 = vpop.permute.xlu1 %1418  ;;  %1854 = vadd.xlane.f32.xlu0 %v1853_v4  ;;  %1815 = vadd.xlane.f32.xlu1 %v1814_v35  ;;  %v1826_v4 = vsel %vm478_vm0, %v1676_v11, 0.0  ;;  %v6247_v35 = vld [vmem:[%s11934_s0 + $0x1d0] sm:$0xff]  ;;  %95 = vst.msk [vmem:[#allocation2 + $0x10] sm:$0xff] %vm92_vm5, %v6519_v40  ;;  %96 = vst.msk [vmem:[#allocation2 + $0x18] sm:$0xff] %vm92_vm5, %v6519_v40 }
 0x22a   :  { %vm1497_vm7 = vcmp.eq.s32.totalorder %v7838_v44, %v1419_v53  ;;  %v1859_v57 = vsel %vm478_vm0, %v1687_v48, 0.0  ;;  %v6248_v48 = vld [vmem:[%s11934_s0 + $0x168] sm:$0xff]  ;;  %v1422_v53 = vpop.permute.xlu0 %1421  ;;  %97 = vst.msk [vmem:[#allocation2 + $0x20] sm:$0xff] %vm92_vm5, %v6519_v40  ;;  %98 = vst.msk [vmem:[#allocation2 + $0x28] sm:$0xff] %vm92_vm5, %v6519_v40 }
 0x22b   :  { %v5280_v45 = vsel %vm1497_vm7, 1.0, %v6519_v40  ;;  %v1678_v32 = vmul.f32 %v6248_v48, %v5269_v21  ;;  %vm1498_vm1 = vcmp.eq.s32.totalorder %v7838_v44, %v1422_v53  ;;  %99 = vst.msk [vmem:[#allocation2 + $0x30] sm:$0xff] %vm92_vm5, %v6519_v40  ;;  %100 = vst.msk [vmem:[#allocation2 + $0x38] sm:$0xff] %vm92_vm5, %v6519_v40 }
 0x22c   :  { %v1689_v19 = vmul.f32 %v6245_v52, %v5280_v45  ;;  %101 = vst.msk [vmem:[#allocation2 + $0x40] sm:$0xff] %vm92_vm5, %v6519_v40  ;;  %102 = vst.msk [vmem:[#allocation2 + $0x48] sm:$0xff] %vm92_vm5, %v6519_v40 }
 0x22d   :  { %v1425_v27 = vpop.permute.xlu1 %1424  ;;  %1860 = vadd.xlane.f32.xlu0 %v1859_v57  ;;  %1821 = vadd.xlane.f32.xlu1 %v1820_v47  ;;  %v1832_v57 = vsel %vm478_vm0, %v1678_v32, 0.0  ;;  %v6249_v47 = vld [vmem:[%s11934_s0 + $0x1e0] sm:$0xff]  ;;  %103 = vst.msk [vmem:[#allocation2 + $0x50] sm:$0xff] %vm92_vm5, %v6519_v40  ;;  %104 = vst.msk [vmem:[#allocation2 + $0x58] sm:$0xff] %vm92_vm5, %v6519_v40 }
 0x22e   :  { %vm1499_vm9 = vcmp.eq.s32.totalorder %v7838_v44, %v1425_v27  ;;  %v1865_v49 = vsel %vm478_vm0, %v1689_v19, 0.0  ;;  %v6250_v19 = vld [vmem:[%s11934_s0 + $0x178] sm:$0xff]  ;;  %v1428_v48 = vpop.permute.xlu0 %1427  ;;  %105 = vst.msk [vmem:[#allocation2 + $0x60] sm:$0xff] %vm92_vm5, %v6519_v40  ;;  %106 = vst.msk [vmem:[#allocation2 + $0x68] sm:$0xff] %vm92_vm5, %v6519_v40 }
 0x22f   :  { %v5282_v37 = vsel %vm1499_vm9, 1.0, %v6519_v40  ;;  %v1680_v61 = vmul.f32 %v6250_v19, %v5271_v29  ;;  %v5279_v19 = vsel %vm1496_vm15, 1.0, %v6519_v40  ;;  %vm1500_vm2 = vcmp.eq.s32.totalorder %v7838_v44, %v1428_v48  ;;  %107 = vst.msk [vmem:[#allocation2 + $0x70] sm:$0xff] %vm92_vm5, %v6519_v40  ;;  %108 = vst.msk [vmem:[#allocation2 + $0x78] sm:$0xff] %vm92_vm5, %v6519_v40 }
 0x230   :  { %v1691_v60 = vmul.f32 %v6247_v35, %v5282_v37  ;;  %v6252_v35 = vld [vmem:[%s11934_s0 + $0x188] sm:$0xff]  ;;  %109 = vst.msk [vmem:[#allocation2 + $0x80] sm:$0xff] %vm92_vm5, %v6519_v40  ;;  %110 = vst.msk [vmem:[#allocation2 + $0x88] sm:$0xff] %vm92_vm5, %v6519_v40 }
 0x231   :  { %v1431_v41 = vpop.permute.xlu1 %1430  ;;  %1866 = vadd.xlane.f32.xlu0 %v1865_v49  ;;  %1827 = vadd.xlane.f32.xlu1 %v1826_v4  ;;  %v1838_v37 = vsel %vm478_vm0, %v1680_v61, 0.0  ;;  %v6251_v49 = vld [vmem:[%s11934_s0 + $0x1f0] sm:$0xff]  ;;  %111 = vst.msk [vmem:[#allocation2 + $0x90] sm:$0xff] %vm92_vm5, %v6519_v40  ;;  %112 = vst.msk [vmem:[#allocation2 + $0x98] sm:$0xff] %vm92_vm5, %v6519_v40 }
 0x232   :  { %vm1501_vm11 = vcmp.eq.s32.totalorder %v7838_v44, %v1431_v41  ;;  %v1871_v45 = vsel %vm478_vm0, %v1691_v60, 0.0  ;;  %v1682_v60 = vmul.f32 %v6252_v35, %v5273_v56  ;;  %v6253_v41 = vld [vmem:[%s11934_s0 + $0x198] sm:$0xff]  ;;  %113 = vst.msk [vmem:[#allocation2 + $0xa0] sm:$0xff] %vm92_vm5, %v6519_v40  ;;  %114 = vst.msk [vmem:[#allocation2 + $0xa8] sm:$0xff] %vm92_vm5, %v6519_v40 }
 0x233   :  { %v5284_v33 = vsel %vm1501_vm11, 1.0, %v6519_v40  ;;  %v6255_v56 = vld [vmem:[%s11934_s0 + $0x1b8] sm:$0xff]  ;;  %115 = vst.msk [vmem:[#allocation2 + $0xb0] sm:$0xff] %vm92_vm5, %v6519_v40  ;;  %116 = vst.msk [vmem:[#allocation2 + $0xb8] sm:$0xff] %vm92_vm5, %v6519_v40 }
 0x234   :  { %v1693_v52 = vmul.f32 %v6249_v47, %v5284_v33  ;;  %v1844_v29 = vsel %vm478_vm0, %v1682_v60, 0.0  ;;  %v1684_v33 = vmul.f32 %v6253_v41, %v5275_v36  ;;  %v1688_v28 = vmul.f32 %v6255_v56, %v5279_v19  ;;  %v6257_v60 = vld [vmem:[%s11934_s0 + $0x1d8] sm:$0xff]  ;;  %v6258_v41 = vld [vmem:[%s11934_s0 + $0x1e8] sm:$0xff]  ;;  %117 = vst.msk [vmem:[#allocation2 + $0xc0] sm:$0xff] %vm92_vm5, %v6519_v40  ;;  %118 = vst.msk [vmem:[#allocation2 + $0xc8] sm:$0xff] %vm92_vm5, %v6519_v40 }
 0x235   :  { %v1437_v11 = vpop.permute.xlu1 %1436  ;;  %1872 = vadd.xlane.f32.xlu0 %v1871_v45  ;;  %1833 = vadd.xlane.f32.xlu1 %v1832_v57  ;;  %v5277_v45 = vsel %vm1494_vm14, 1.0, %v6519_v40  ;;  %v1434_v57 = vpop.permute.xlu0 %1433  ;;  %119 = vst.msk [vmem:[#allocation2 + $0xd0] sm:$0xff] %vm92_vm5, %v6519_v40  ;;  %120 = vst.msk [vmem:[#allocation2 + $0xd8] sm:$0xff] %vm92_vm5, %v6519_v40 }
 0x236   :  { %vm1503_vm13 = vcmp.eq.s32.totalorder %v7838_v44, %v1437_v11  ;;  %v1877_v27 = vsel %vm478_vm0, %v1693_v52, 0.0  ;;  %v1850_v47 = vsel %vm478_vm0, %v1684_v33, 0.0  ;;  %v1686_v52 = vmul.f32 %v6254_v25, %v5277_v45  ;;  %121 = vst.msk [vmem:[#allocation2 + $0xe0] sm:$0xff] %vm92_vm5, %v6519_v40  ;;  %122 = vst.msk [vmem:[#allocation2 + $0xe8] sm:$0xff] %vm92_vm5, %v6519_v40  ;;  %v5559_v25 = vpop.eup %5558 }
 0x237   :  { %v5286_v21 = vsel %vm1503_vm13, 1.0, %v6519_v40  ;;  %v5281_v11 = vsel %vm1498_vm1, 1.0, %v6519_v40  ;;  %vm1502_vm3 = vcmp.eq.s32.totalorder %v7838_v44, %v1434_v57  ;;  %123 = vst.msk [vmem:[#allocation2 + $0xf0] sm:$0xff] %vm92_vm5, %v6519_v40  ;;  %124 = vst.msk [vmem:[#allocation2 + $0xf8] sm:$0xff] %vm92_vm5, %v6519_v40  ;;  %5590 = vlog2.f32 %v7608_v16 }
 0x238   :  { %v1695_v4 = vmul.f32 %v6251_v49, %v5286_v21  ;;  %v1856_v61 = vsel %vm478_vm0, %v1686_v52, 0.0  ;;  %v5283_v49 = vsel %vm1500_vm2, 1.0, %v6519_v40  ;;  %v5285_v48 = vsel %vm1502_vm3, 1.0, %v6519_v40  ;;  %125 = vst.msk [vmem:[#allocation2 + $0x100] sm:$0xff] %vm92_vm5, %v6519_v40  ;;  %126 = vst.msk [vmem:[#allocation2 + $0x108] sm:$0xff] %vm92_vm5, %v6519_v40 }
 0x239   :  { %1878 = vadd.xlane.f32.xlu0 %v1877_v27  ;;  %1839 = vadd.xlane.f32.xlu1 %v1838_v37  ;;  %v1440_v21 = vpop.permute.xlu0 %1439  ;;  %v1862_v27 = vsel %vm478_vm0, %v1688_v28, 0.0  ;;  %v6256_v37 = vld [vmem:[%s11934_s0 + $0x1c8] sm:$0xff]  ;;  %v1692_v36 = vmul.f32 %v6257_v60, %v5283_v49  ;;  %v1694_v33 = vmul.f32 %v6258_v41, %v5285_v48  ;;  %127 = vst.msk [vmem:[#allocation2 + $0x110] sm:$0xff] %vm92_vm5, %v6519_v40  ;;  %128 = vst.msk [vmem:[#allocation2 + $0x118] sm:$0xff] %vm92_vm5, %v6519_v40 }
 0x23a   :  { %v1883_v32 = vsel %vm478_vm0, %v1695_v4, 0.0  ;;  %v1690_v53 = vmul.f32 %v6256_v37, %v5281_v11  ;;  %vm1504_vm4 = vcmp.eq.s32.totalorder %v7838_v44, %v1440_v21  ;;  %v6259_v44 = vld [vmem:[%s11934_s0 + $0x1f8] sm:$0xff]  ;;  %129 = vst.msk [vmem:[#allocation2 + $0x120] sm:$0xff] %vm92_vm5, %v6519_v40  ;;  %130 = vst.msk [vmem:[#allocation2 + $0x128] sm:$0xff] %vm92_vm5, %v6519_v40  ;;  %v1058_v52 = vmul.f32 0.6931472, %v5557_v7 }
 0x23b   :  { %v5287_v45 = vsel %vm1504_vm4, 1.0, %v6519_v40  ;;  %v1880_v17 = vsel %vm478_vm0, %v1694_v33, 0.0  ;;  %131 = vst.msk [vmem:[#allocation2 + $0x130] sm:$0xff] %vm92_vm5, %v6519_v40  ;;  %132 = vst.msk [vmem:[#allocation2 + $0x138] sm:$0xff] %vm92_vm5, %v6519_v40 }
 0x23c   :  { %v1868_v35 = vsel %vm478_vm0, %v1690_v53, 0.0  ;;  %133 = vst.msk [vmem:[#allocation2 + $0x140] sm:$0xff] %vm92_vm5, %v6519_v40  ;;  %134 = vst.msk [vmem:[#allocation2 + $0x148] sm:$0xff] %vm92_vm5, %v6519_v40  ;;  %v1184_v12 = vadd.f32 %v1058_v52, %v7016_v54  ;;  %v6263_v52 = vld [vmem:[%s11936_s2 + $0x18] sm:$0xff] }
 0x23d   :  { %1884 = vadd.xlane.f32.xlu0 %v1883_v32  ;;  %1845 = vadd.xlane.f32.xlu1 %v1844_v29  ;;  %v1874_v29 = vsel %vm478_vm0, %v1692_v36, 0.0  ;;  %135 = vst.msk [vmem:[#allocation2 + $0x150] sm:$0xff] %vm92_vm5, %v6519_v40  ;;  %136 = vst.msk [vmem:[#allocation2 + $0x158] sm:$0xff] %vm92_vm5, %v6519_v40 }
 0x23e   :  { %137 = vst.msk [vmem:[#allocation2 + $0x160] sm:$0xff] %vm92_vm5, %v6519_v40  ;;  %138 = vst.msk [vmem:[#allocation2 + $0x168] sm:$0xff] %vm92_vm5, %v6519_v40 }
 0x23f   :  { %139 = vst.msk [vmem:[#allocation2 + $0x170] sm:$0xff] %vm92_vm5, %v6519_v40  ;;  %140 = vst.msk [vmem:[#allocation2 + $0x178] sm:$0xff] %vm92_vm5, %v6519_v40 }
 0x240   :  { %141 = vst.msk [vmem:[#allocation2 + $0x180] sm:$0xff] %vm92_vm5, %v6519_v40  ;;  %142 = vst.msk [vmem:[#allocation2 + $0x188] sm:$0xff] %vm92_vm5, %v6519_v40 }
 0x241   :  { %1851 = vadd.xlane.f32.xlu1 %v1850_v47  ;;  %v8309_v47 = vmul.f32 %v6259_v44, %v5287_v45  ;;  %143 = vst.msk [vmem:[#allocation2 + $0x190] sm:$0xff] %vm92_vm5, %v6519_v40  ;;  %144 = vst.msk [vmem:[#allocation2 + $0x198] sm:$0xff] %vm92_vm5, %v6519_v40 }
 0x242   :  { %145 = vst.msk [vmem:[#allocation2 + $0x1a0] sm:$0xff] %vm92_vm5, %v6519_v40  ;;  %146 = vst.msk [vmem:[#allocation2 + $0x1a8] sm:$0xff] %vm92_vm5, %v6519_v40 }
 0x243   :  { %147 = vst.msk [vmem:[#allocation2 + $0x1b0] sm:$0xff] %vm92_vm5, %v6519_v40  ;;  %148 = vst.msk [vmem:[#allocation2 + $0x1b8] sm:$0xff] %vm92_vm5, %v6519_v40  ;;  %v1886_v5 = vsel %vm478_vm0, %v8309_v47, 0.0 }
 0x244   :  { %149 = vst.msk [vmem:[#allocation2 + $0x1c0] sm:$0xff] %vm92_vm5, %v6519_v40  ;;  %150 = vst.msk [vmem:[#allocation2 + $0x1c8] sm:$0xff] %vm92_vm5, %v6519_v40 }
 0x245   :  { %1857 = vadd.xlane.f32.xlu1 %v1856_v61  ;;  %151 = vst.msk [vmem:[#allocation2 + $0x1d0] sm:$0xff] %vm92_vm5, %v6519_v40  ;;  %152 = vst.msk [vmem:[#allocation2 + $0x1d8] sm:$0xff] %vm92_vm5, %v6519_v40  ;;  %v1056_v61 = vmul.f32 0.6931472, %v5559_v25 }
 0x246   :  { %153 = vst.msk [vmem:[#allocation2 + $0x1e0] sm:$0xff] %vm92_vm5, %v6519_v40  ;;  %154 = vst.msk [vmem:[#allocation2 + $0x1e8] sm:$0xff] %vm92_vm5, %v6519_v40 }
 0x247   :  { %155 = vst.msk [vmem:[#allocation2 + $0x1f0] sm:$0xff] %vm92_vm5, %v6519_v40  ;;  %156 = vst.msk [vmem:[#allocation2 + $0x1f8] sm:$0xff] %vm92_vm5, %v6519_v40  ;;  %v1183_v39 = vadd.f32 %v1056_v61, %v7002_v14 }
 0x248   :  { %157 = vst.msk [vmem:[#allocation3] sm:$0xff] %vm92_vm5, %v6519_v40  ;;  %158 = vst.msk [vmem:[#allocation3 + $0x8] sm:$0xff] %vm92_vm5, %v6519_v40 }
 0x249   :  { %1863 = vadd.xlane.f32.xlu1 %v1862_v27  ;;  %159 = vst.msk [vmem:[#allocation3 + $0x10] sm:$0xff] %vm92_vm5, %v6519_v40  ;;  %160 = vst.msk [vmem:[#allocation3 + $0x18] sm:$0xff] %vm92_vm5, %v6519_v40 }
 0x24a   :  { %v8285_v4 = vpop.xlane.xlu0 %1701  ;;  %161 = vst.msk [vmem:[#allocation3 + $0x20] sm:$0xff] %vm92_vm5, %v6519_v40  ;;  %162 = vst.msk [vmem:[#allocation3 + $0x28] sm:$0xff] %vm92_vm5, %v6519_v40 }
 0x24b   :  { %163 = vst.msk [vmem:[#allocation3 + $0x30] sm:$0xff] %vm92_vm5, %v6519_v40  ;;  %164 = vst.msk [vmem:[#allocation3 + $0x38] sm:$0xff] %vm92_vm5, %v6519_v40  ;;  %v1954_v22 = vsub.f32 %v1184_v12, %v8285_v4  ;;  %v6260_v4 = vld [vmem:[%s11936_s2 + $0x8] sm:$0xff] }
 0x24c   :  { %165 = vst.msk [vmem:[#allocation3 + $0x40] sm:$0xff] %vm92_vm5, %v6519_v40  ;;  %166 = vst.msk [vmem:[#allocation3 + $0x48] sm:$0xff] %vm92_vm5, %v6519_v40  ;;  %v12310_v12 = vld [vmem:[#allocation30_spill] sm:$0xff] }
 0x24d   :  { %1869 = vadd.xlane.f32.xlu1 %v1868_v35  ;;  %167 = vst.msk [vmem:[#allocation3 + $0x50] sm:$0xff] %vm92_vm5, %v6519_v40  ;;  %168 = vst.msk [vmem:[#allocation3 + $0x58] sm:$0xff] %vm92_vm5, %v6519_v40  ;;  %v2018_v36 = vmul.f32 %v6260_v4, %v1954_v22 }
 0x24e   :  { %v8294_v32 = vpop.xlane.xlu0 %1704  ;;  %169 = vst.msk [vmem:[#allocation3 + $0x60] sm:$0xff] %vm92_vm5, %v6519_v40  ;;  %170 = vst.msk [vmem:[#allocation3 + $0x68] sm:$0xff] %vm92_vm5, %v6519_v40 }
 0x24f   :  { %171 = vst.msk [vmem:[#allocation3 + $0x70] sm:$0xff] %vm92_vm5, %v6519_v40  ;;  %172 = vst.msk [vmem:[#allocation3 + $0x78] sm:$0xff] %vm92_vm5, %v6519_v40 }
 0x250   :  { %173 = vst.msk [vmem:[#allocation3 + $0x80] sm:$0xff] %vm92_vm5, %v6519_v40  ;;  %174 = vst.msk [vmem:[#allocation3 + $0x88] sm:$0xff] %vm92_vm5, %v6519_v40 }
 0x251   :  { %1875 = vadd.xlane.f32.xlu1 %v1874_v29  ;;  %175 = vst.msk [vmem:[#allocation3 + $0x90] sm:$0xff] %vm92_vm5, %v6519_v40  ;;  %176 = vst.msk [vmem:[#allocation3 + $0x98] sm:$0xff] %vm92_vm5, %v6519_v40 }
 0x252   :  { %v8303_v57 = vpop.xlane.xlu0 %1710  ;;  %177 = vst.msk [vmem:[#allocation3 + $0xa0] sm:$0xff] %vm92_vm5, %v6519_v40  ;;  %178 = vst.msk [vmem:[#allocation3 + $0xa8] sm:$0xff] %vm92_vm5, %v6519_v40 }
 0x253   :  { %179 = vst.msk [vmem:[#allocation3 + $0xb0] sm:$0xff] %vm92_vm5, %v6519_v40  ;;  %180 = vst.msk [vmem:[#allocation3 + $0xb8] sm:$0xff] %vm92_vm5, %v6519_v40 }
 0x254   :  { %181 = vst.msk [vmem:[#allocation3 + $0xc0] sm:$0xff] %vm92_vm5, %v6519_v40  ;;  %182 = vst.msk [vmem:[#allocation3 + $0xc8] sm:$0xff] %vm92_vm5, %v6519_v40 }
 0x255   :  { %1881 = vadd.xlane.f32.xlu1 %v1880_v17  ;;  %183 = vst.msk [vmem:[#allocation3 + $0xd0] sm:$0xff] %vm92_vm5, %v6519_v40  ;;  %184 = vst.msk [vmem:[#allocation3 + $0xd8] sm:$0xff] %vm92_vm5, %v6519_v40 }
 0x256   :  { %v8313_v51 = vpop.xlane.xlu0 %1716  ;;  %185 = vst.msk [vmem:[#allocation3 + $0xe0] sm:$0xff] %vm92_vm5, %v6519_v40  ;;  %186 = vst.msk [vmem:[#allocation3 + $0xe8] sm:$0xff] %vm92_vm5, %v6519_v40 }
 0x257   :  { %187 = vst.msk [vmem:[#allocation3 + $0xf0] sm:$0xff] %vm92_vm5, %v6519_v40  ;;  %188 = vst.msk [vmem:[#allocation3 + $0xf8] sm:$0xff] %vm92_vm5, %v6519_v40 }
 0x258   :  { %189 = vst.msk [vmem:[#allocation3 + $0x100] sm:$0xff] %vm92_vm5, %v6519_v40  ;;  %190 = vst.msk [vmem:[#allocation3 + $0x108] sm:$0xff] %vm92_vm5, %v6519_v40 }
 0x259   :  { %191 = vst.msk [vmem:[#allocation3 + $0x110] sm:$0xff] %vm92_vm5, %v6519_v40  ;;  %192 = vst.msk [vmem:[#allocation3 + $0x118] sm:$0xff] %vm92_vm5, %v6519_v40  ;;  %1887 = vadd.xlane.f32.xlu1 %v1886_v5  ;;  %v6262_v5 = vld [vmem:[%s11936_s2 + $0x10] sm:$0xff] }
 0x25a   :  { %193 = vst.msk [vmem:[#allocation3 + $0x120] sm:$0xff] %vm92_vm5, %v6519_v40  ;;  %194 = vst.msk [vmem:[#allocation3 + $0x128] sm:$0xff] %vm92_vm5, %v6519_v40  ;;  %v8575_v2 = vpop.xlane.xlu0 %1722 }
 0x25b   :  { %195 = vst.msk [vmem:[#allocation3 + $0x130] sm:$0xff] %vm92_vm5, %v6519_v40  ;;  %196 = vst.msk [vmem:[#allocation3 + $0x138] sm:$0xff] %vm92_vm5, %v6519_v40 }
 0x25c   :  { %197 = vst.msk [vmem:[#allocation3 + $0x140] sm:$0xff] %vm92_vm5, %v6519_v40  ;;  %198 = vst.msk [vmem:[#allocation3 + $0x148] sm:$0xff] %vm92_vm5, %v6519_v40 }
 0x25d   :  { %199 = vst.msk [vmem:[#allocation3 + $0x150] sm:$0xff] %vm92_vm5, %v6519_v40  ;;  %200 = vst.msk [vmem:[#allocation3 + $0x158] sm:$0xff] %vm92_vm5, %v6519_v40 }
 0x25e   :  { %201 = vst.msk [vmem:[#allocation3 + $0x160] sm:$0xff] %vm92_vm5, %v6519_v40  ;;  %202 = vst.msk [vmem:[#allocation3 + $0x168] sm:$0xff] %vm92_vm5, %v6519_v40  ;;  %v8579_v19 = vpop.xlane.xlu0 %1728 }
 0x25f   :  { %203 = vst.msk [vmem:[#allocation3 + $0x170] sm:$0xff] %vm92_vm5, %v6519_v40  ;;  %204 = vst.msk [vmem:[#allocation3 + $0x178] sm:$0xff] %vm92_vm5, %v6519_v40 }
 0x260   :  { %205 = vst.msk [vmem:[#allocation3 + $0x180] sm:$0xff] %vm92_vm5, %v6519_v40  ;;  %206 = vst.msk [vmem:[#allocation3 + $0x188] sm:$0xff] %vm92_vm5, %v6519_v40 }
 0x261   :  { %207 = vst.msk [vmem:[#allocation3 + $0x190] sm:$0xff] %vm92_vm5, %v6519_v40  ;;  %208 = vst.msk [vmem:[#allocation3 + $0x198] sm:$0xff] %vm92_vm5, %v6519_v40 }
 0x262   :  { %209 = vst.msk [vmem:[#allocation3 + $0x1a0] sm:$0xff] %vm92_vm5, %v6519_v40  ;;  %210 = vst.msk [vmem:[#allocation3 + $0x1a8] sm:$0xff] %vm92_vm5, %v6519_v40  ;;  %v8584_v28 = vpop.xlane.xlu0 %1734 }
 0x263   :  { %211 = vst.msk [vmem:[#allocation3 + $0x1b0] sm:$0xff] %vm92_vm5, %v6519_v40  ;;  %212 = vst.msk [vmem:[#allocation3 + $0x1b8] sm:$0xff] %vm92_vm5, %v6519_v40 }
 0x264   :  { %213 = vst.msk [vmem:[#allocation3 + $0x1c0] sm:$0xff] %vm92_vm5, %v6519_v40  ;;  %214 = vst.msk [vmem:[#allocation3 + $0x1c8] sm:$0xff] %vm92_vm5, %v6519_v40 }
 0x265   :  { %215 = vst.msk [vmem:[#allocation3 + $0x1d0] sm:$0xff] %vm92_vm5, %v6519_v40  ;;  %216 = vst.msk [vmem:[#allocation3 + $0x1d8] sm:$0xff] %vm92_vm5, %v6519_v40 }
 0x266   :  { %217 = vst.msk [vmem:[#allocation3 + $0x1e0] sm:$0xff] %vm92_vm5, %v6519_v40  ;;  %218 = vst.msk [vmem:[#allocation3 + $0x1e8] sm:$0xff] %vm92_vm5, %v6519_v40  ;;  %v8591_v49 = vpop.xlane.xlu0 %1740  ;;  %v1699_v58 = vpop.xlane.xlu1 %1698 }
 0x267   :  { %219 = vst.msk [vmem:[#allocation3 + $0x1f0] sm:$0xff] %vm92_vm5, %v6519_v40  ;;  %220 = vst.msk [vmem:[#allocation3 + $0x1f8] sm:$0xff] %vm92_vm5, %v6519_v40  ;;  %v5561_v40 = vpop.eup %5560  ;;  %v1953_v60 = vsub.f32 %v1183_v39, %v1699_v58  ;;  %v6264_v39 = vld [vmem:[%s11936_s2 + $0x20] sm:$0xff]  ;;  %5592 = vlog2.f32 %v7610_v26  ;;  %v6267_v26 = vld [vmem:[%s11936_s2 + $0x38] sm:$0xff] }
 0x268   :  { %v5563_v56 = vpop.eup %5562  ;;  %v1060_v43 = vmul.f32 0.6931472, %v5561_v40  ;;  %5594 = vlog2.f32 %v7618_v23 }
 0x269   :  { %v5565_v11 = vpop.eup %5564  ;;  %v1062_v21 = vmul.f32 0.6931472, %v5563_v56  ;;  %v2017_v29 = vmul.f32 %v6261_v50, %v1953_v60  ;;  %5596 = vlog2.f32 %v7620_v18  ;;  %v6269_v18 = vld [vmem:[%s11936_s2 + $0x48] sm:$0xff] }
 0x26a   :  { %v5567_v27 = vpop.eup %5566  ;;  %v1064_v37 = vmul.f32 0.6931472, %v5565_v11  ;;  %v1185_v53 = vadd.f32 %v1060_v43, %v12309_v13  ;;  %v8604_v44 = vpop.xlane.xlu0 %1746  ;;  %2147 = vrot.lane.b32.xlu1 %v2018_v36, %s6520_s6  ;;  %5598 = vlog2.f32 %v7628_v55 }
 0x26b   :  { %v5569_v35 = vpop.eup %5568  ;;  %v1066_v48 = vmul.f32 0.6931472, %v5567_v27  ;;  %v1186_v41 = vadd.f32 %v1062_v21, %v7018_v62  ;;  %2145 = vrot.lane.b32.xlu0 %v2017_v29, %s6520_s6  ;;  %v6266_v29 = vld [vmem:[%s11936_s2 + $0x30] sm:$0xff]  ;;  %5600 = vlog2.f32 %v7630_v10  ;;  %v6271_v10 = vld [vmem:[%s11936_s2 + $0x58] sm:$0xff] }
 0x26c   :  { %v1955_v59 = vsub.f32 %v1185_v53, %v8294_v32  ;;  %v5571_v33 = vpop.eup %5570  ;;  %v1068_v45 = vmul.f32 0.6931472, %v5569_v35  ;;  %v1187_v17 = vadd.f32 %v1064_v37, %v7030_v15  ;;  %v1708_v32 = vpop.xlane.xlu1 %1707  ;;  %v12311_v35 = vld [vmem:[#allocation31_spill] sm:$0xff]  ;;  %5602 = vlog2.f32 %v7638_v38 }
 0x26d   :  { %v5573_v0 = vpop.eup %5572  ;;  %v1956_v47 = vsub.f32 %v1186_v41, %v1708_v32  ;;  %v1070_v42 = vmul.f32 0.6931472, %v5571_v33  ;;  %v1188_v61 = vadd.f32 %v1066_v48, %v7032_v30  ;;  %v12312_v32 = vld [vmem:[#allocation35_spill] sm:$0xff]  ;;  %5604 = vlog2.f32 %v7640_v3  ;;  %v6273_v3 = vld [vmem:[%s11936_s2 + $0x68] sm:$0xff] }
 0x26e   :  { %v2019_v7 = vmul.f32 %v6262_v5, %v1955_v59  ;;  %v1957_v25 = vsub.f32 %v1187_v17, %v8303_v57  ;;  %v5575_v56 = vpop.eup %5574  ;;  %v1072_v43 = vmul.f32 0.6931472, %v5573_v0  ;;  %v1189_v11 = vadd.f32 %v1068_v45, %v12310_v12  ;;  %v8619_v22 = vpop.xlane.xlu0 %1752  ;;  %v329_v12 = vld [vmem:[%s11935_s1 + $0x160] sm:$0xff]  ;;  %v330_v30 = vld [vmem:[%s11935_s1 + $0x168] sm:$0xff] }
 0x26f   :  { %v2020_v40 = vmul.f32 %v6263_v52, %v1956_v47  ;;  %v5577_v21 = vpop.eup %5576  ;;  %v1074_v53 = vmul.f32 0.6931472, %v5575_v56  ;;  %v1190_v60 = vadd.f32 %v1070_v42, %v12311_v35  ;;  %v6268_v52 = vld [vmem:[%s11936_s2 + $0x40] sm:$0xff]  ;;  %5606 = vlog2.f32 %v7648_v6  ;;  %v327_v35 = vld [vmem:[%s11935_s1 + $0x150] sm:$0xff] }
 0x270   :  { %2149 = vrot.lane.b32.xlu1 %v2019_v7, %s6520_s6  ;;  %v1714_v57 = vpop.xlane.xlu1 %1713  ;;  %v2021_v27 = vmul.f32 %v6264_v39, %v1957_v25  ;;  %v1959_v37 = vsub.f32 %v1189_v11, %v8313_v51  ;;  %v5579_v4 = vpop.eup %5578  ;;  %v1076_v36 = vmul.f32 0.6931472, %v5577_v21  ;;  %v1191_v59 = vadd.f32 %v1072_v43, %v7058_v31  ;;  %v9634_v31 = vld [vmem:[%s11935_s1 + $0x140] sm:$0xff] }
 0x271   :  { %v1958_v46 = vsub.f32 %v1188_v61, %v1714_v57  ;;  %2151 = vrot.lane.b32.xlu0 %v2020_v40, %s6520_s6  ;;  %v5581_v50 = vpop.eup %5580  ;;  %v1078_v45 = vmul.f32 0.6931472, %v5579_v4  ;;  %v1192_v0 = vadd.f32 %v1074_v53, %v12312_v32  ;;  %v9616_v32 = vld [vmem:[%s11935_s1 + $0x130] sm:$0xff] }
 0x272   :  { %v8634_v48 = vpop.xlane.xlu0 %1758  ;;  %v2023_v41 = vmul.f32 %v6266_v29, %v1959_v37  ;;  %v1961_v33 = vsub.f32 %v1191_v59, %v8575_v2  ;;  %v5583_v47 = vpop.eup %5582  ;;  %v1080_v5 = vmul.f32 0.6931472, %v5581_v50  ;;  %v1193_v7 = vadd.f32 %v1076_v36, %v7073_v63  ;;  %v6270_v37 = vld [vmem:[%s11936_s2 + $0x50] sm:$0xff]  ;;  %v6272_v29 = vld [vmem:[%s11936_s2 + $0x60] sm:$0xff] }
 0x273   :  { %v2022_v58 = vmul.f32 %v6265_v34, %v1958_v46  ;;  %v5585_v42 = vpop.eup %5584  ;;  %v1082_v56 = vmul.f32 0.6931472, %v5583_v47  ;;  %v1194_v11 = vadd.f32 %v1078_v45, %v7075_v9  ;;  %v9580_v9 = vld [vmem:[%s11935_s1 + $0x110] sm:$0xff]  ;;  %v9598_v63 = vld [vmem:[%s11935_s1 + $0x120] sm:$0xff] }
 0x274   :  { %2153 = vrot.lane.b32.xlu1 %v2021_v27, %s6520_s6  ;;  %v1720_v51 = vpop.xlane.xlu1 %1719  ;;  %v2025_v40 = vmul.f32 %v6268_v52, %v1961_v33  ;;  %v1963_v61 = vsub.f32 %v1193_v7, %v8579_v19  ;;  %v5587_v57 = vpop.eup %5586  ;;  %v1084_v21 = vmul.f32 0.6931472, %v5585_v42  ;;  %v1195_v46 = vadd.f32 %v1080_v5, %v7089_v1  ;;  %v12313_v5 = vld [vmem:[#allocation137_spill] sm:$0xff]  ;;  %v12314_v7 = vld [vmem:[#allocation50_spill] sm:$0xff]  ;;  %v6274_v52 = vld [vmem:[%s11936_s2 + $0x70] sm:$0xff] }
 0x275   :  { %v1960_v16 = vsub.f32 %v1190_v60, %v1720_v51  ;;  %2155 = vrot.lane.b32.xlu0 %v2022_v58, %s6520_s6  ;;  %v5589_v27 = vpop.eup %5588  ;;  %v1086_v58 = vmul.f32 0.6931472, %v5587_v57  ;;  %v1196_v4 = vadd.f32 %v1082_v56, %v7091_v20  ;;  %5608 = vlog2.f32 %v12313_v5  ;;  %v12316_v57 = vld [vmem:[#allocation51_spill] sm:$0xff]  ;;  %v9562_v1 = vld [vmem:[%s11935_s1 + $0x100] sm:$0xff] }
 0x276   :  { %v8649_v25 = vpop.xlane.xlu0 %1764  ;;  %v2027_v53 = vmul.f32 %v6270_v37, %v1963_v61  ;;  %v1965_v34 = vsub.f32 %v1195_v46, %v8584_v28  ;;  %v5591_v36 = vpop.eup %5590  ;;  %v1088_v59 = vmul.f32 0.6931472, %v5589_v27  ;;  %v1197_v51 = vadd.f32 %v1084_v21, %v7105_v8  ;;  %v12317_v27 = vld [vmem:[#allocation139_spill] sm:$0xff]  ;;  %v9526_v8 = vld [vmem:[%s11935_s1 + $0xe0] sm:$0xff] }
 0x277   :  { %v2024_v17 = vmul.f32 %v6267_v26, %v1960_v16  ;;  %v5593_v16 = vpop.eup %5592  ;;  %v1090_v45 = vmul.f32 0.6931472, %v5591_v36  ;;  %v9544_v20 = vld [vmem:[%s11935_s1 + $0xf0] sm:$0xff] }
 0x278   :  { %2157 = vrot.lane.b32.xlu1 %v2023_v41, %s6520_s6  ;;  %v1726_v2 = vpop.xlane.xlu1 %1725  ;;  %v2029_v41 = vmul.f32 %v6272_v29, %v1965_v34  ;;  %v1967_v33 = vsub.f32 %v1197_v51, %v8591_v49  ;;  %v1092_v47 = vmul.f32 0.6931472, %v5593_v16  ;;  %v6277_v51 = vld [vmem:[%s11936_s2 + $0x88] sm:$0xff]  ;;  %v12320_v16 = vld [vmem:[#allocation55_spill] sm:$0xff] }
 0x279   :  { %v1962_v23 = vsub.f32 %v1192_v0, %v1726_v2  ;;  %2159 = vrot.lane.b32.xlu0 %v2024_v17, %s6520_s6  ;;  %v1198_v17 = vadd.f32 %v1086_v58, %v7107_v24  ;;  %v5595_v0 = vpop.eup %5594  ;;  %v1199_v2 = vadd.f32 %v1088_v59, %v12314_v7  ;;  %v1200_v21 = vadd.f32 %v1090_v45, %v12316_v57  ;;  %v12319_v59 = vld [vmem:[#allocation140_spill] sm:$0xff]  ;;  %v12322_v45 = vld [vmem:[#allocation58_spill] sm:$0xff]  ;;  %v9508_v24 = vld [vmem:[%s11935_s1 + $0xd0] sm:$0xff] }
 0x27a   :  { %v8664_v39 = vpop.xlane.xlu0 %1770  ;;  %v1094_v56 = vmul.f32 0.6931472, %v5595_v0 }
 0x27b   :  { %v2026_v43 = vmul.f32 %v6269_v18, %v1962_v23  ;;  %v5597_v23 = vpop.eup %5596  ;;  %v1969_v61 = vsub.f32 %v1199_v2, %v8604_v44  ;;  %v12315_v18 = vld [vmem:[#allocation138_spill] sm:$0xff] }
 0x27c   :  { %2161 = vrot.lane.b32.xlu1 %v2025_v40, %s6520_s6  ;;  %v1732_v19 = vpop.xlane.xlu1 %1731  ;;  %v2031_v40 = vmul.f32 %v6274_v52, %v1967_v33  ;;  %5610 = vlog2.f32 %v12315_v18  ;;  %v5599_v46 = vpop.eup %5598  ;;  %v12321_v33 = vld [vmem:[#allocation141_spill] sm:$0xff] }
 0x27d   :  { %v1964_v55 = vsub.f32 %v1194_v11, %v1732_v19  ;;  %2163 = vrot.lane.b32.xlu0 %v2026_v43, %s6520_s6  ;;  %v6275_v43 = vld [vmem:[%s11936_s2 + $0x78] sm:$0xff]  ;;  %v1096_v19 = vmul.f32 0.6931472, %v5597_v23  ;;  %5612 = vlog2.f32 %v12317_v27  ;;  %v5601_v34 = vpop.eup %5600  ;;  %v1098_v36 = vmul.f32 0.6931472, %v5599_v46  ;;  %v12323_v23 = vld [vmem:[#allocation142_spill] sm:$0xff] }
 0x27e   :  { %v8679_v50 = vpop.xlane.xlu0 %1776  ;;  %5614 = vlog2.f32 %v12319_v59  ;;  %v5603_v29 = vpop.eup %5602 }
 0x27f   :  { %v2028_v60 = vmul.f32 %v6271_v10, %v1964_v55  ;;  %v12318_v55 = vld [vmem:[#allocation54_spill] sm:$0xff]  ;;  %v6276_v10 = vld [vmem:[%s11936_s2 + $0x80] sm:$0xff]  ;;  %5616 = vlog2.f32 %v12321_v33 }
 0x280   :  { %2165 = vrot.lane.b32.xlu1 %v2027_v53, %s6520_s6  ;;  %v1738_v28 = vpop.xlane.xlu1 %1737  ;;  %v1201_v37 = vadd.f32 %v1092_v47, %v12318_v55  ;;  %v6278_v47 = vld [vmem:[%s11936_s2 + $0x90] sm:$0xff]  ;;  %5618 = vlog2.f32 %v12323_v23  ;;  %v9490_v55 = vld [vmem:[%s11935_s1 + $0xc0] sm:$0xff] }
 0x281   :  { %v1966_v38 = vsub.f32 %v1196_v4, %v1738_v28  ;;  %2167 = vrot.lane.b32.xlu0 %v2028_v60, %s6520_s6  ;;  %v2033_v60 = vmul.f32 %v6276_v10, %v1969_v61  ;;  %v12327_v10 = vld [vmem:[#allocation144_spill] sm:$0xff]  ;;  %v3179_v7 = vsel %vm478_vm0, %v9490_v55, -inf }
 0x282   :  { %v8694_v42 = vpop.xlane.xlu0 %1782  ;;  %v1971_v4 = vsub.f32 %v1201_v37, %v8619_v22  ;;  %v6280_v37 = vld [vmem:[%s11936_s2 + $0xa0] sm:$0xff] }
 0x283   :  { %v2030_v26 = vmul.f32 %v6273_v3, %v1966_v38  ;;  %v1202_v38 = vadd.f32 %v1094_v56, %v12320_v16  ;;  %v1203_v3 = vadd.f32 %v1096_v19, %v12322_v45 }
 0x284   :  { %2169 = vrot.lane.b32.xlu1 %v2029_v41, %s6520_s6  ;;  %v1744_v49 = vpop.xlane.xlu1 %1743  ;;  %v1100_v41 = vmul.f32 0.6931472, %v5601_v34  ;;  %v2035_v5 = vmul.f32 %v6278_v47, %v1971_v4 }
 0x285   :  { %v1968_v6 = vsub.f32 %v1198_v17, %v1744_v49  ;;  %2171 = vrot.lane.b32.xlu0 %v2030_v26, %s6520_s6  ;;  %v5605_v17 = vpop.eup %5604  ;;  %v1973_v2 = vsub.f32 %v1203_v3, %v8634_v48  ;;  %v1102_v49 = vmul.f32 0.6931472, %v5603_v29  ;;  %v12330_v29 = vld [vmem:[#allocation66_spill] sm:$0xff] }
 0x286   :  { %v8709_v53 = vpop.xlane.xlu0 %1788  ;;  %v5607_v56 = vpop.eup %5606  ;;  %v1104_v18 = vmul.f32 0.6931472, %v5605_v17  ;;  %v6282_v17 = vld [vmem:[%s11936_s2 + $0xb0] sm:$0xff] }
 0x287   :  { %v2032_v11 = vmul.f32 %v6275_v43, %v1968_v6  ;;  %v6279_v6 = vld [vmem:[%s11936_s2 + $0x98] sm:$0xff]  ;;  %v12325_v43 = vld [vmem:[#allocation143_spill] sm:$0xff]  ;;  %v5609_v19 = vpop.eup %5608 }
 0x288   :  { %2173 = vrot.lane.b32.xlu1 %v2031_v40, %s6520_s6  ;;  %v1750_v44 = vpop.xlane.xlu1 %1749  ;;  %v12324_v40 = vld [vmem:[#allocation59_spill] sm:$0xff]  ;;  %5620 = vlog2.f32 %v12325_v43  ;;  %v12334_v43 = vld [vmem:[#allocation70_spill] sm:$0xff] }
 0x289   :  { %v1970_v58 = vsub.f32 %v1200_v21, %v1750_v44  ;;  %2175 = vrot.lane.b32.xlu0 %v2032_v11, %s6520_s6  ;;  %v1204_v61 = vadd.f32 %v1098_v36, %v12324_v40  ;;  %v12326_v11 = vld [vmem:[#allocation62_spill] sm:$0xff]  ;;  %v2037_v44 = vmul.f32 %v6280_v37, %v1973_v2  ;;  %5622 = vlog2.f32 %v12327_v10  ;;  %v12328_v36 = vld [vmem:[#allocation63_spill] sm:$0xff]  ;;  %v6284_v37 = vld [vmem:[%s11936_s2 + $0xc0] sm:$0xff] }
 0x28a   :  { %v8724_v26 = vpop.xlane.xlu0 %1794  ;;  %v1205_v21 = vadd.f32 %v1100_v41, %v12326_v11  ;;  %v1206_v59 = vadd.f32 %v1102_v49, %v12328_v36  ;;  %v1207_v41 = vadd.f32 %v1104_v18, %v12330_v29  ;;  %v12331_v2 = vld [vmem:[#allocation146_spill] sm:$0xff]  ;;  %v6283_v49 = vld [vmem:[%s11936_s2 + $0xb8] sm:$0xff]  ;;  %v12333_v18 = vld [vmem:[#allocation147_spill] sm:$0xff] }
 0x28b   :  { %v2034_v28 = vmul.f32 %v6277_v51, %v1970_v58  ;;  %v1106_v58 = vmul.f32 0.6931472, %v5607_v56  ;;  %v5611_v51 = vpop.eup %5610  ;;  %v12335_v10 = vld [vmem:[#allocation148_spill] sm:$0xff]  ;;  %v9472_v11 = vld [vmem:[%s11935_s1 + $0xa8] sm:$0xff] }
 0x28c   :  { %2177 = vrot.lane.b32.xlu1 %v2033_v60, %s6520_s6  ;;  %v1756_v22 = vpop.xlane.xlu1 %1755  ;;  %v1975_v34 = vsub.f32 %v1205_v21, %v8649_v25  ;;  %v6281_v60 = vld [vmem:[%s11936_s2 + $0xa8] sm:$0xff]  ;;  %v5613_v3 = vpop.eup %5612  ;;  %v1977_v47 = vsub.f32 %v1207_v41, %v8664_v39  ;;  %v12337_v41 = vld [vmem:[#allocation149_spill] sm:$0xff]  ;;  %v3170_v45 = vsel %vm478_vm0, %v9472_v11, -inf }
 0x28d   :  { %v1972_v0 = vsub.f32 %v1202_v38, %v1756_v22  ;;  %2179 = vrot.lane.b32.xlu0 %v2034_v28, %s6520_s6  ;;  %v1108_v28 = vmul.f32 0.6931472, %v5609_v19  ;;  %v12329_v38 = vld [vmem:[#allocation145_spill] sm:$0xff]  ;;  %v1112_v56 = vmul.f32 0.6931472, %v5613_v3 }
 0x28e   :  { %v8739_v46 = vpop.xlane.xlu0 %1800  ;;  %5624 = vlog2.f32 %v12329_v38 }
 0x28f   :  { %v2036_v52 = vmul.f32 %v6279_v6, %v1972_v0  ;;  %v2039_v0 = vmul.f32 %v6282_v17, %v1975_v34  ;;  %5626 = vlog2.f32 %v12331_v2  ;;  %v12332_v6 = vld [vmem:[#allocation67_spill] sm:$0xff]  ;;  %v1209_v21 = vadd.f32 %v1108_v28, %v12334_v43  ;;  %v9454_v43 = vld [vmem:[%s11935_s1 + $0x98] sm:$0xff] }
 0x290   :  { %2181 = vrot.lane.b32.xlu1 %v2035_v5, %s6520_s6  ;;  %v1762_v48 = vpop.xlane.xlu1 %1761  ;;  %v1110_v5 = vmul.f32 0.6931472, %v5611_v51  ;;  %5628 = vlog2.f32 %v12333_v18  ;;  %v3164_v29 = vsel %vm478_vm0, %v9454_v43, -inf }
 0x291   :  { %v1974_v27 = vsub.f32 %v1204_v61, %v1762_v48  ;;  %2183 = vrot.lane.b32.xlu0 %v2036_v52, %s6520_s6  ;;  %v1208_v52 = vadd.f32 %v1106_v58, %v12332_v6  ;;  %v5615_v61 = vpop.eup %5614  ;;  %v1979_v34 = vsub.f32 %v1209_v21, %v8679_v50  ;;  %5630 = vlog2.f32 %v12335_v10 }
 0x292   :  { %v8754_v33 = vpop.xlane.xlu0 %1806  ;;  %v5617_v19 = vpop.eup %5616  ;;  %v1114_v58 = vmul.f32 0.6931472, %v5615_v61  ;;  %5632 = vlog2.f32 %v12337_v41 }
 0x293   :  { %v2038_v4 = vmul.f32 %v6281_v60, %v1974_v27  ;;  %v6285_v60 = vld [vmem:[%s11936_s2 + $0xc8] sm:$0xff]  ;;  %v5619_v28 = vpop.eup %5618  ;;  %v1116_v38 = vmul.f32 0.6931472, %v5617_v19  ;;  %v12341_v19 = vld [vmem:[#allocation151_spill] sm:$0xff] }
 0x294   :  { %2185 = vrot.lane.b32.xlu1 %v2037_v44, %s6520_s6  ;;  %v1768_v25 = vpop.xlane.xlu1 %1767  ;;  %v2041_v44 = vmul.f32 %v6284_v37, %v1977_v47  ;;  %v6286_v47 = vld [vmem:[%s11936_s2 + $0xd0] sm:$0xff] }
 0x295   :  { %v1976_v22 = vsub.f32 %v1206_v59, %v1768_v25  ;;  %2187 = vrot.lane.b32.xlu0 %v2038_v4, %s6520_s6  ;;  %v12336_v59 = vld [vmem:[#allocation71_spill] sm:$0xff]  ;;  %v12338_v25 = vld [vmem:[#allocation74_spill] sm:$0xff]  ;;  %v5621_v17 = vpop.eup %5620 }
 0x296   :  { %v8769_v48 = vpop.xlane.xlu0 %1812  ;;  %v1210_v51 = vadd.f32 %v1110_v5, %v12336_v59  ;;  %v1211_v3 = vadd.f32 %v1112_v56, %v12338_v25  ;;  %v2043_v5 = vmul.f32 %v6286_v47, %v1979_v34  ;;  %v12340_v56 = vld [vmem:[#allocation75_spill] sm:$0xff]  ;;  %v5623_v21 = vpop.eup %5622  ;;  %v12345_v47 = vld [vmem:[#allocation153_spill] sm:$0xff] }
 0x297   :  { %v2040_v23 = vmul.f32 %v6283_v49, %v1976_v22  ;;  %v1118_v49 = vmul.f32 0.6931472, %v5619_v28  ;;  %v1212_v18 = vadd.f32 %v1114_v58, %v12340_v56  ;;  %v12343_v28 = vld [vmem:[#allocation152_spill] sm:$0xff] }
 0x298   :  { %2189 = vrot.lane.b32.xlu1 %v2039_v0, %s6520_s6  ;;  %v1774_v39 = vpop.xlane.xlu1 %1773  ;;  %v1981_v2 = vsub.f32 %v1211_v3, %v8694_v42  ;;  %v12344_v3 = vld [vmem:[#allocation79_spill] sm:$0xff] }
 0x299   :  { %v1978_v27 = vsub.f32 %v1208_v52, %v1774_v39  ;;  %2191 = vrot.lane.b32.xlu0 %v2040_v23, %s6520_s6  ;;  %v12339_v23 = vld [vmem:[#allocation150_spill] sm:$0xff]  ;;  %v6287_v52 = vld [vmem:[%s11936_s2 + $0xd8] sm:$0xff]  ;;  %v1120_v39 = vmul.f32 0.6931472, %v5621_v17 }
 0x29a   :  { %v8784_v22 = vpop.xlane.xlu0 %1818  ;;  %5634 = vlog2.f32 %v12339_v23 }
 0x29b   :  { %v2042_v4 = vmul.f32 %v6285_v60, %v1978_v27  ;;  %5636 = vlog2.f32 %v12341_v19  ;;  %v12342_v27 = vld [vmem:[#allocation78_spill] sm:$0xff]  ;;  %v5625_v34 = vpop.eup %5624  ;;  %v6288_v60 = vld [vmem:[%s11936_s2 + $0xe0] sm:$0xff] }
 0x29c   :  { %2193 = vrot.lane.b32.xlu1 %v2041_v44, %s6520_s6  ;;  %v1780_v50 = vpop.xlane.xlu1 %1779  ;;  %v1213_v37 = vadd.f32 %v1116_v38, %v12342_v27  ;;  %v2045_v58 = vmul.f32 %v6288_v60, %v1981_v2  ;;  %5638 = vlog2.f32 %v12343_v28  ;;  %v6289_v38 = vld [vmem:[%s11936_s2 + $0xe8] sm:$0xff]  ;;  %v5627_v17 = vpop.eup %5626  ;;  %v12349_v28 = vld [vmem:[#allocation155_spill] sm:$0xff] }
 0x29d   :  { %v1980_v0 = vsub.f32 %v1210_v51, %v1780_v50  ;;  %2195 = vrot.lane.b32.xlu0 %v2042_v4, %s6520_s6  ;;  %v1122_v51 = vmul.f32 0.6931472, %v5623_v21  ;;  %v1214_v50 = vadd.f32 %v1118_v49, %v12344_v3  ;;  %5640 = vlog2.f32 %v12345_v47  ;;  %v9436_v27 = vld [vmem:[%s11935_s1 + $0x88] sm:$0xff] }
 0x29e   :  { %v8799_v44 = vpop.xlane.xlu0 %1824  ;;  %v1983_v4 = vsub.f32 %v1213_v37, %v8709_v53  ;;  %v5629_v53 = vpop.eup %5628  ;;  %v1126_v19 = vmul.f32 0.6931472, %v5627_v17  ;;  %v12347_v37 = vld [vmem:[#allocation154_spill] sm:$0xff]  ;;  %v6292_v17 = vld [vmem:[%s11936_s2 + $0x100] sm:$0xff]  ;;  %v3158_v25 = vsel %vm478_vm0, %v9436_v27, -inf }
 0x29f   :  { %v2044_v61 = vmul.f32 %v6287_v52, %v1980_v0  ;;  %v1124_v0 = vmul.f32 0.6931472, %v5625_v34  ;;  %5642 = vlog2.f32 %v12347_v37  ;;  %v12348_v34 = vld [vmem:[#allocation83_spill] sm:$0xff]  ;;  %v5631_v60 = vpop.eup %5630 }
 0x2a0   :  { %2197 = vrot.lane.b32.xlu1 %v2043_v5, %s6520_s6  ;;  %v1786_v42 = vpop.xlane.xlu1 %1785  ;;  %v12346_v5 = vld [vmem:[#allocation82_spill] sm:$0xff]  ;;  %5644 = vlog2.f32 %v12349_v28 }
 0x2a1   :  { %v1982_v10 = vsub.f32 %v1212_v18, %v1786_v42  ;;  %2199 = vrot.lane.b32.xlu0 %v2044_v61, %s6520_s6  ;;  %v1215_v23 = vadd.f32 %v1120_v39, %v12346_v5  ;;  %v6290_v18 = vld [vmem:[%s11936_s2 + $0xf0] sm:$0xff]  ;;  %v6291_v39 = vld [vmem:[%s11936_s2 + $0xf8] sm:$0xff] }
 0x2a2   :  { %v8815_v52 = vpop.xlane.xlu0 %1830  ;;  %v2047_v49 = vmul.f32 %v6290_v18, %v1983_v4  ;;  %v12352_v18 = vld [vmem:[#allocation87_spill] sm:$0xff] }
 0x2a3   :  { %v2046_v41 = vmul.f32 %v6289_v38, %v1982_v10  ;;  %v1985_v21 = vsub.f32 %v1215_v23, %v8724_v26  ;;  %v1216_v10 = vadd.f32 %v1122_v51, %v12348_v34  ;;  %v12350_v38 = vld [vmem:[#allocation86_spill] sm:$0xff]  ;;  %v5633_v26 = vpop.eup %5632  ;;  %v1130_v23 = vmul.f32 0.6931472, %v5631_v60 }
 0x2a4   :  { %2201 = vrot.lane.b32.xlu1 %v2045_v58, %s6520_s6  ;;  %v1792_v2 = vpop.xlane.xlu1 %1791  ;;  %v1128_v58 = vmul.f32 0.6931472, %v5629_v53 }
 0x2a5   :  { %v1984_v61 = vsub.f32 %v1214_v50, %v1792_v2  ;;  %2203 = vrot.lane.b32.xlu0 %v2046_v41, %s6520_s6  ;;  %v1217_v41 = vadd.f32 %v1124_v0, %v12350_v38  ;;  %v2049_v47 = vmul.f32 %v6292_v17, %v1985_v21  ;;  %v12351_v2 = vld [vmem:[#allocation156_spill] sm:$0xff]  ;;  %v6293_v0 = vld [vmem:[%s11936_s2 + $0x108] sm:$0xff] }
 0x2a6   :  { %5646 = vlog2.f32 %v12351_v2  ;;  %v8836_v53 = vpop.xlane.xlu0 %1836  ;;  %v9418_v38 = vld [vmem:[%s11935_s1 + $0x78] sm:$0xff] }
 0x2a7   :  { %v2048_v42 = vmul.f32 %v6291_v39, %v1984_v61  ;;  %v1987_v51 = vsub.f32 %v1217_v41, %v8739_v46  ;;  %v5635_v37 = vpop.eup %5634  ;;  %v1132_v39 = vmul.f32 0.6931472, %v5633_v26  ;;  %v6294_v41 = vld [vmem:[%s11936_s2 + $0x110] sm:$0xff]  ;;  %v12355_v26 = vld [vmem:[#allocation158_spill] sm:$0xff]  ;;  %v3152_v5 = vsel %vm478_vm0, %v9418_v38, -inf }
 0x2a8   :  { %2205 = vrot.lane.b32.xlu1 %v2047_v49, %s6520_s6  ;;  %v1798_v4 = vpop.xlane.xlu1 %1797  ;;  %v1218_v49 = vadd.f32 %v1126_v19, %v12352_v18  ;;  %v5637_v60 = vpop.eup %5636 }
 0x2a9   :  { %v1986_v50 = vsub.f32 %v1216_v10, %v1798_v4  ;;  %2207 = vrot.lane.b32.xlu0 %v2048_v42, %s6520_s6  ;;  %v12353_v42 = vld [vmem:[#allocation157_spill] sm:$0xff]  ;;  %v12354_v10 = vld [vmem:[#allocation90_spill] sm:$0xff]  ;;  %v2051_v4 = vmul.f32 %v6294_v41, %v1987_v51 }
 0x2aa   :  { %5648 = vlog2.f32 %v12353_v42  ;;  %v1219_v21 = vadd.f32 %v1128_v58, %v12354_v10  ;;  %v6295_v58 = vld [vmem:[%s11936_s2 + $0x118] sm:$0xff]  ;;  %v12358_v42 = vld [vmem:[#allocation94_spill] sm:$0xff] }
 0x2ab   :  { %v2050_v61 = vmul.f32 %v6293_v0, %v1986_v50  ;;  %v1134_v50 = vmul.f32 0.6931472, %v5635_v37  ;;  %5650 = vlog2.f32 %v12355_v26  ;;  %v5639_v0 = vpop.eup %5638  ;;  %v8858_v37 = vpop.xlane.xlu0 %1842  ;;  %v12359_v26 = vld [vmem:[#allocation160_spill] sm:$0xff] }
 0x2ac   :  { %2209 = vrot.lane.b32.xlu1 %v2049_v47, %s6520_s6  ;;  %v1804_v46 = vpop.xlane.xlu1 %1803  ;;  %v1989_v19 = vsub.f32 %v1219_v21, %v8754_v33  ;;  %v12356_v47 = vld [vmem:[#allocation91_spill] sm:$0xff]  ;;  %v5641_v33 = vpop.eup %5640  ;;  %v1138_v41 = vmul.f32 0.6931472, %v5639_v0 }
 0x2ad   :  { %v1988_v28 = vsub.f32 %v1218_v49, %v1804_v46  ;;  %2211 = vrot.lane.b32.xlu0 %v2050_v61, %s6520_s6  ;;  %v1220_v2 = vadd.f32 %v1130_v23, %v12356_v47  ;;  %v1136_v49 = vmul.f32 0.6931472, %v5637_v60  ;;  %v12357_v61 = vld [vmem:[#allocation159_spill] sm:$0xff]  ;;  %v1221_v46 = vadd.f32 %v1132_v39, %v12358_v42  ;;  %v6297_v39 = vld [vmem:[%s11936_s2 + $0x128] sm:$0xff] }
 0x2ae   :  { %5652 = vlog2.f32 %v12357_v61  ;;  %v12362_v42 = vld [vmem:[#allocation98_spill] sm:$0xff] }
 0x2af   :  { %v2052_v17 = vmul.f32 %v6295_v58, %v1988_v28  ;;  %v6296_v28 = vld [vmem:[%s11936_s2 + $0x120] sm:$0xff]  ;;  %v1991_v60 = vsub.f32 %v1221_v46, %v8769_v48  ;;  %5654 = vlog2.f32 %v12359_v26  ;;  %v12360_v58 = vld [vmem:[#allocation95_spill] sm:$0xff]  ;;  %v1223_v47 = vadd.f32 %v1136_v49, %v12362_v42  ;;  %v8879_v26 = vpop.xlane.xlu0 %1848  ;;  %v6299_v49 = vld [vmem:[%s11936_s2 + $0x138] sm:$0xff] }
 0x2b0   :  { %2213 = vrot.lane.b32.xlu1 %v2051_v4, %s6520_s6  ;;  %v1810_v51 = vpop.xlane.xlu1 %1809  ;;  %v2053_v23 = vmul.f32 %v6296_v28, %v1989_v19  ;;  %v1222_v61 = vadd.f32 %v1134_v50, %v12360_v58  ;;  %v6298_v46 = vld [vmem:[%s11936_s2 + $0x130] sm:$0xff]  ;;  %v12366_v42 = vld [vmem:[#allocation102_spill] sm:$0xff] }
 0x2b1   :  { %v1990_v21 = vsub.f32 %v1220_v2, %v1810_v51  ;;  %2215 = vrot.lane.b32.xlu0 %v2052_v17, %s6520_s6  ;;  %v5643_v2 = vpop.eup %5642  ;;  %v1140_v51 = vmul.f32 0.6931472, %v5641_v33  ;;  %v12361_v17 = vld [vmem:[#allocation161_spill] sm:$0xff]  ;;  %v1993_v50 = vsub.f32 %v1223_v47, %v8784_v22  ;;  %v12363_v33 = vld [vmem:[#allocation162_spill] sm:$0xff] }
 0x2b2   :  { %5656 = vlog2.f32 %v12361_v17  ;;  %v5645_v48 = vpop.eup %5644  ;;  %v1142_v28 = vmul.f32 0.6931472, %v5643_v2 }
 0x2b3   :  { %v2054_v4 = vmul.f32 %v6297_v39, %v1990_v21  ;;  %v2055_v21 = vmul.f32 %v6298_v46, %v1991_v60  ;;  %5658 = vlog2.f32 %v12363_v33  ;;  %v12364_v39 = vld [vmem:[#allocation99_spill] sm:$0xff]  ;;  %v1144_v17 = vmul.f32 0.6931472, %v5645_v48  ;;  %v6300_v46 = vld [vmem:[%s11936_s2 + $0x140] sm:$0xff]  ;;  %v12367_v48 = vld [vmem:[#allocation164_spill] sm:$0xff] }
 0x2b4   :  { %2217 = vrot.lane.b32.xlu1 %v2053_v23, %s6520_s6  ;;  %v1816_v19 = vpop.xlane.xlu1 %1815  ;;  %v1225_v60 = vadd.f32 %v1140_v51, %v12366_v42  ;;  %v6301_v51 = vld [vmem:[%s11936_s2 + $0x148] sm:$0xff] }
 0x2b5   :  { %v1992_v0 = vsub.f32 %v1222_v61, %v1816_v19  ;;  %2219 = vrot.lane.b32.xlu0 %v2054_v4, %s6520_s6  ;;  %v1224_v61 = vadd.f32 %v1138_v41, %v12364_v39  ;;  %v5647_v4 = vpop.eup %5646  ;;  %v12365_v19 = vld [vmem:[#allocation163_spill] sm:$0xff]  ;;  %v12370_v42 = vld [vmem:[#allocation106_spill] sm:$0xff] }
 0x2b6   :  { %5660 = vlog2.f32 %v12365_v19  ;;  %v1995_v41 = vsub.f32 %v1225_v60, %v8799_v44  ;;  %v1146_v33 = vmul.f32 0.6931472, %v5647_v4  ;;  %v1227_v39 = vadd.f32 %v1144_v17, %v12370_v42  ;;  %v8901_v4 = vpop.xlane.xlu0 %1854  ;;  %v6303_v17 = vld [vmem:[%s11936_s2 + $0x158] sm:$0xff]  ;;  %v12374_v42 = vld [vmem:[#allocation110_spill] sm:$0xff] }
 0x2b7   :  { %v2056_v23 = vmul.f32 %v6299_v49, %v1992_v0  ;;  %v5649_v47 = vpop.eup %5648  ;;  %v2057_v0 = vmul.f32 %v6300_v46, %v1993_v50  ;;  %5662 = vlog2.f32 %v12367_v48  ;;  %v12368_v49 = vld [vmem:[#allocation103_spill] sm:$0xff]  ;;  %v12371_v48 = vld [vmem:[#allocation166_spill] sm:$0xff] }
 0x2b8   :  { %2221 = vrot.lane.b32.xlu1 %v2055_v21, %s6520_s6  ;;  %v1822_v22 = vpop.xlane.xlu1 %1821  ;;  %v1226_v19 = vadd.f32 %v1142_v28, %v12368_v49 }
 0x2b9   :  { %v1994_v2 = vsub.f32 %v1224_v61, %v1822_v22  ;;  %2223 = vrot.lane.b32.xlu0 %v2056_v23, %s6520_s6  ;;  %v5651_v61 = vpop.eup %5650  ;;  %v1148_v22 = vmul.f32 0.6931472, %v5649_v47  ;;  %v12369_v23 = vld [vmem:[#allocation165_spill] sm:$0xff]  ;;  %v1997_v47 = vsub.f32 %v1227_v39, %v8815_v52 }
 0x2ba   :  { %5664 = vlog2.f32 %v12369_v23  ;;  %v1150_v46 = vmul.f32 0.6931472, %v5651_v61  ;;  %v6304_v61 = vld [vmem:[%s11936_s2 + $0x160] sm:$0xff] }
 0x2bb   :  { %v2058_v21 = vmul.f32 %v6301_v51, %v1994_v2  ;;  %v5653_v44 = vpop.eup %5652  ;;  %v6302_v2 = vld [vmem:[%s11936_s2 + $0x150] sm:$0xff]  ;;  %5666 = vlog2.f32 %v12371_v48  ;;  %v1229_v49 = vadd.f32 %v1148_v22, %v12374_v42  ;;  %v8922_v48 = vpop.xlane.xlu0 %1860  ;;  %v6305_v22 = vld [vmem:[%s11936_s2 + $0x168] sm:$0xff] }
 0x2bc   :  { %2225 = vrot.lane.b32.xlu1 %v2057_v0, %s6520_s6  ;;  %v1828_v50 = vpop.xlane.xlu1 %1827  ;;  %v2059_v28 = vmul.f32 %v6302_v2, %v1995_v41  ;;  %v12372_v51 = vld [vmem:[#allocation107_spill] sm:$0xff]  ;;  %v12378_v42 = vld [vmem:[#allocation114_spill] sm:$0xff] }
 0x2bd   :  { %v1996_v60 = vsub.f32 %v1226_v19, %v1828_v50  ;;  %2227 = vrot.lane.b32.xlu0 %v2058_v21, %s6520_s6  ;;  %v1228_v23 = vadd.f32 %v1146_v33, %v12372_v51  ;;  %v5655_v19 = vpop.eup %5654  ;;  %v1152_v50 = vmul.f32 0.6931472, %v5653_v44  ;;  %v12373_v21 = vld [vmem:[#allocation167_spill] sm:$0xff]  ;;  %v1999_v33 = vsub.f32 %v1229_v49, %v8836_v53  ;;  %v12375_v44 = vld [vmem:[#allocation168_spill] sm:$0xff]  ;;  %v9400_v51 = vld [vmem:[%s11935_s1 + $0x68] sm:$0xff] }
 0x2be   :  { %5668 = vlog2.f32 %v12373_v21  ;;  %v1154_v2 = vmul.f32 0.6931472, %v5655_v19  ;;  %v3146_v10 = vsel %vm478_vm0, %v9400_v51, -inf }
 0x2bf   :  { %v2060_v0 = vmul.f32 %v6303_v17, %v1996_v60  ;;  %v5657_v52 = vpop.eup %5656  ;;  %v2061_v60 = vmul.f32 %v6304_v61, %v1997_v47  ;;  %5670 = vlog2.f32 %v12375_v44  ;;  %v12376_v17 = vld [vmem:[#allocation111_spill] sm:$0xff]  ;;  %v1231_v47 = vadd.f32 %v1152_v50, %v12378_v42  ;;  %v6307_v50 = vld [vmem:[%s11936_s2 + $0x178] sm:$0xff]  ;;  %v12382_v42 = vld [vmem:[#allocation118_spill] sm:$0xff] }
 0x2c0   :  { %2229 = vrot.lane.b32.xlu1 %v2059_v28, %s6520_s6  ;;  %v1834_v41 = vpop.xlane.xlu1 %1833  ;;  %v1156_v21 = vmul.f32 0.6931472, %v5657_v52  ;;  %v6306_v61 = vld [vmem:[%s11936_s2 + $0x170] sm:$0xff]  ;;  %v12379_v52 = vld [vmem:[#allocation170_spill] sm:$0xff] }
 0x2c1   :  { %v1998_v39 = vsub.f32 %v1228_v23, %v1834_v41  ;;  %2231 = vrot.lane.b32.xlu0 %v2060_v0, %s6520_s6  ;;  %v1230_v23 = vadd.f32 %v1150_v46, %v12376_v17  ;;  %v5659_v0 = vpop.eup %5658  ;;  %v12377_v41 = vld [vmem:[#allocation169_spill] sm:$0xff]  ;;  %v2001_v46 = vsub.f32 %v1231_v47, %v8858_v37 }
 0x2c2   :  { %5672 = vlog2.f32 %v12377_v41  ;;  %v1158_v44 = vmul.f32 0.6931472, %v5659_v0  ;;  %v1233_v17 = vadd.f32 %v1156_v21, %v12382_v42  ;;  %v8944_v0 = vpop.xlane.xlu0 %1866  ;;  %v6309_v21 = vld [vmem:[%s11936_s2 + $0x188] sm:$0xff] }
 0x2c3   :  { %v2062_v28 = vmul.f32 %v6305_v22, %v1998_v39  ;;  %v5661_v49 = vpop.eup %5660  ;;  %v2063_v39 = vmul.f32 %v6306_v61, %v1999_v33  ;;  %5674 = vlog2.f32 %v12379_v52  ;;  %v12380_v22 = vld [vmem:[#allocation115_spill] sm:$0xff]  ;;  %v12383_v52 = vld [vmem:[#allocation172_spill] sm:$0xff]  ;;  %v12386_v42 = vld [vmem:[#allocation122_spill] sm:$0xff] }
 0x2c4   :  { %2233 = vrot.lane.b32.xlu1 %v2061_v60, %s6520_s6  ;;  %v1840_v53 = vpop.xlane.xlu1 %1839  ;;  %v1232_v41 = vadd.f32 %v1154_v2, %v12380_v22 }
 0x2c5   :  { %v2000_v19 = vsub.f32 %v1230_v23, %v1840_v53  ;;  %2235 = vrot.lane.b32.xlu0 %v2062_v28, %s6520_s6  ;;  %v5663_v23 = vpop.eup %5662  ;;  %v1160_v53 = vmul.f32 0.6931472, %v5661_v49  ;;  %v12381_v28 = vld [vmem:[#allocation171_spill] sm:$0xff]  ;;  %v2003_v49 = vsub.f32 %v1233_v17, %v8879_v26 }
 0x2c6   :  { %5676 = vlog2.f32 %v12381_v28  ;;  %v1162_v61 = vmul.f32 0.6931472, %v5663_v23  ;;  %v6310_v23 = vld [vmem:[%s11936_s2 + $0x190] sm:$0xff] }
 0x2c7   :  { %v2064_v60 = vmul.f32 %v6307_v50, %v2000_v19  ;;  %v5665_v37 = vpop.eup %5664  ;;  %v6308_v19 = vld [vmem:[%s11936_s2 + $0x180] sm:$0xff]  ;;  %5678 = vlog2.f32 %v12383_v52  ;;  %v12384_v50 = vld [vmem:[#allocation119_spill] sm:$0xff]  ;;  %v1235_v22 = vadd.f32 %v1160_v53, %v12386_v42  ;;  %v1873_v52 = vpop.xlane.xlu0 %1872  ;;  %v6311_v53 = vld [vmem:[%s11936_s2 + $0x198] sm:$0xff] }
 0x2c8   :  { %2237 = vrot.lane.b32.xlu1 %v2063_v39, %s6520_s6  ;;  %v1846_v33 = vpop.xlane.xlu1 %1845  ;;  %v2065_v2 = vmul.f32 %v6308_v19, %v2001_v46  ;;  %v1234_v28 = vadd.f32 %v1158_v44, %v12384_v50 }
 0x2c9   :  { %v2002_v47 = vsub.f32 %v1232_v41, %v1846_v33  ;;  %2239 = vrot.lane.b32.xlu0 %v2064_v60, %s6520_s6  ;;  %v5667_v41 = vpop.eup %5666  ;;  %v1164_v33 = vmul.f32 0.6931472, %v5665_v37  ;;  %v12385_v60 = vld [vmem:[#allocation173_spill] sm:$0xff]  ;;  %v2005_v44 = vsub.f32 %v1235_v22, %v8901_v4  ;;  %v12387_v37 = vld [vmem:[#allocation174_spill] sm:$0xff] }
 0x2ca   :  { %5680 = vlog2.f32 %v12385_v60  ;;  %v1166_v19 = vmul.f32 0.6931472, %v5667_v41  ;;  %v6312_v22 = vld [vmem:[%s11936_s2 + $0x1a0] sm:$0xff] }
 0x2cb   :  { %v2066_v39 = vmul.f32 %v6309_v21, %v2002_v47  ;;  %v5669_v26 = vpop.eup %5668  ;;  %v2067_v47 = vmul.f32 %v6310_v23, %v2003_v49  ;;  %5682 = vlog2.f32 %v12387_v37  ;;  %v12388_v21 = vld [vmem:[#allocation123_spill] sm:$0xff]  ;;  %v2069_v41 = vmul.f32 %v6312_v22, %v2005_v44  ;;  %v1879_v50 = vpop.xlane.xlu0 %1878 }
 0x2cc   :  { %2241 = vrot.lane.b32.xlu1 %v2065_v2, %s6520_s6  ;;  %v1852_v46 = vpop.xlane.xlu1 %1851  ;;  %v5671_v60 = vpop.eup %5670 }
 0x2cd   :  { %v2004_v17 = vsub.f32 %v1234_v28, %v1852_v46  ;;  %2243 = vrot.lane.b32.xlu0 %v2066_v39, %s6520_s6  ;;  %v1236_v28 = vadd.f32 %v1162_v61, %v12388_v21  ;;  %v1168_v39 = vmul.f32 0.6931472, %v5669_v26  ;;  %v12389_v46 = vld [vmem:[#allocation126_spill] sm:$0xff]  ;;  %v1170_v37 = vmul.f32 0.6931472, %v5671_v60  ;;  %v12390_v26 = vld [vmem:[#allocation127_spill] sm:$0xff] }
 0x2ce   :  { %v1237_v42 = vadd.f32 %v1164_v33, %v12389_v46  ;;  %v6313_v61 = vld [vmem:[%s11936_s2 + $0x1a8] sm:$0xff] }
 0x2cf   :  { %v2068_v2 = vmul.f32 %v6311_v53, %v2004_v17  ;;  %v5673_v23 = vpop.eup %5672 }
 0x2d0   :  { %2245 = vrot.lane.b32.xlu1 %v2067_v47, %s6520_s6  ;;  %v1858_v49 = vpop.xlane.xlu1 %1857  ;;  %v2007_v17 = vsub.f32 %v1237_v42, %v8922_v48  ;;  %v1238_v47 = vadd.f32 %v1166_v19, %v12390_v26  ;;  %v5675_v53 = vpop.eup %5674  ;;  %v1172_v46 = vmul.f32 0.6931472, %v5673_v23  ;;  %v6314_v42 = vld [vmem:[%s11936_s2 + $0x1b0] sm:$0xff] }
 0x2d1   :  { %v2006_v4 = vsub.f32 %v1236_v28, %v1858_v49  ;;  %2247 = vrot.lane.b32.xlu0 %v2068_v2, %s6520_s6  ;;  %v12391_v28 = vld [vmem:[#allocation128_spill] sm:$0xff]  ;;  %v1174_v19 = vmul.f32 0.6931472, %v5675_v53 }
 0x2d2   :  { %v1239_v49 = vadd.f32 %v1168_v39, %v12391_v28  ;;  %v2071_v48 = vmul.f32 %v6314_v42, %v2007_v17  ;;  %v6315_v39 = vld [vmem:[%s11936_s2 + $0x1b8] sm:$0xff] }
 0x2d3   :  { %v2070_v33 = vmul.f32 %v6313_v61, %v2006_v4  ;;  %v5677_v21 = vpop.eup %5676  ;;  %v12392_v4 = vld [vmem:[#allocation129_spill] sm:$0xff] }
 0x2d4   :  { %2249 = vrot.lane.b32.xlu1 %v2069_v41, %s6520_s6  ;;  %v1864_v2 = vpop.xlane.xlu1 %1863  ;;  %v2009_v60 = vsub.f32 %v1239_v49, %v8944_v0  ;;  %v1240_v22 = vadd.f32 %v1170_v37, %v12392_v4  ;;  %v5679_v41 = vpop.eup %5678  ;;  %v1176_v61 = vmul.f32 0.6931472, %v5677_v21  ;;  %v6316_v0 = vld [vmem:[%s11936_s2 + $0x1c0] sm:$0xff]  ;;  %v6317_v21 = vld [vmem:[%s11936_s2 + $0x1c8] sm:$0xff]  ;;  %v12394_v37 = vld [vmem:[#allocation131_spill] sm:$0xff] }
 0x2d5   :  { %v2008_v44 = vsub.f32 %v1238_v47, %v1864_v2  ;;  %2251 = vrot.lane.b32.xlu0 %v2070_v33, %s6520_s6  ;;  %v12393_v47 = vld [vmem:[#allocation130_spill] sm:$0xff]  ;;  %v1178_v49 = vmul.f32 0.6931472, %v5679_v41  ;;  %v1242_v42 = vadd.f32 %v1174_v19, %v12394_v37  ;;  %v12415_v37 = vld [vmem:[#allocation52_spill] sm:$0xff] }
 0x2d6   :  { %v1241_v2 = vadd.f32 %v1172_v46, %v12393_v47  ;;  %v2073_v17 = vmul.f32 %v6316_v0, %v2009_v60  ;;  %v6318_v60 = vld [vmem:[%s11936_s2 + $0x1d0] sm:$0xff]  ;;  %v12396_v0 = vld [vmem:[#allocation133_spill] sm:$0xff] }
 0x2d7   :  { %v2072_v23 = vmul.f32 %v6315_v39, %v2008_v44  ;;  %v5681_v28 = vpop.eup %5680  ;;  %v1885_v44 = vpop.xlane.xlu0 %1884 }
 0x2d8   :  { %2253 = vrot.lane.b32.xlu1 %v2071_v48, %s6520_s6  ;;  %v1870_v33 = vpop.xlane.xlu1 %1869  ;;  %v2011_v53 = vsub.f32 %v1241_v2, %v1873_v52  ;;  %v5683_v48 = vpop.eup %5682  ;;  %v1180_v39 = vmul.f32 0.6931472, %v5681_v28  ;;  %v1889_v52 = vld [vmem:[#allocation2] sm:$0xff]  ;;  %v6319_v28 = vld [vmem:[%s11936_s2 + $0x1d8] sm:$0xff] }
 0x2d9   :  { %v2010_v26 = vsub.f32 %v1240_v22, %v1870_v33  ;;  %2255 = vrot.lane.b32.xlu0 %v2072_v23, %s6520_s6  ;;  %v12395_v22 = vld [vmem:[#allocation132_spill] sm:$0xff] }
 0x2da   :  { %v1243_v33 = vadd.f32 %v1176_v61, %v12395_v22  ;;  %v2075_v41 = vmul.f32 %v6318_v60, %v2011_v53  ;;  %v1892_v53 = vld [vmem:[#allocation2 + $0x18] sm:$0xff] }
 0x2db   :  { %v2074_v46 = vmul.f32 %v6317_v21, %v2010_v26  ;;  %v1182_v26 = vmul.f32 0.6931472, %v5683_v48  ;;  %v12397_v21 = vld [vmem:[#allocation134_spill] sm:$0xff] }
 0x2dc   :  { %2257 = vrot.lane.b32.xlu1 %v2073_v17, %s6520_s6  ;;  %v1876_v23 = vpop.xlane.xlu1 %1875  ;;  %v2013_v2 = vsub.f32 %v1243_v33, %v1879_v50  ;;  %v1244_v17 = vadd.f32 %v1178_v49, %v12396_v0  ;;  %v6320_v50 = vld [vmem:[%s11936_s2 + $0x1e0] sm:$0xff] }
 0x2dd   :  { %v2012_v47 = vsub.f32 %v1242_v42, %v1876_v23  ;;  %2259 = vrot.lane.b32.xlu0 %v2074_v46, %s6520_s6  ;;  %v2146_v61 = vpop.permute.xlu0 %2145  ;;  %v1245_v42 = vadd.f32 %v1180_v39, %v12397_v21  ;;  %v12412_v0 = vld [vmem:[#allocation45_spill] sm:$0xff] }
 0x2de   :  { %v2337_v23 = vadd.f32 %v2146_v61, %v1889_v52  ;;  %v2077_v48 = vmul.f32 %v6320_v50, %v2013_v2  ;;  %v12398_v52 = vld [vmem:[#allocation135_spill] sm:$0xff]  ;;  %v1894_v61 = vld [vmem:[#allocation2 + $0x28] sm:$0xff]  ;;  %v1896_v50 = vld [vmem:[#allocation2 + $0x38] sm:$0xff] }
 0x2df   :  { %v2076_v19 = vmul.f32 %v6319_v28, %v2012_v47  ;;  %v2015_v33 = vsub.f32 %v1245_v42, %v1885_v44  ;;  %v6321_v47 = vld [vmem:[%s11936_s2 + $0x1e8] sm:$0xff]  ;;  %v1246_v60 = vadd.f32 %v1182_v26, %v12398_v52  ;;  %v6322_v44 = vld [vmem:[%s11936_s2 + $0x1f0] sm:$0xff] }
 0x2e0   :  { %2261 = vrot.lane.b32.xlu1 %v2075_v41, %s6520_s6  ;;  %v1882_v46 = vpop.xlane.xlu1 %1881  ;;  %2402 = vst.msk [vmem:[#allocation2] sm:$0xff] %vm92_vm5, %v2337_v23  ;;  %v1910_v52 = vld [vmem:[#allocation2 + $0xa8] sm:$0xff] }
 0x2e1   :  { %v2014_v22 = vsub.f32 %v1244_v17, %v1882_v46  ;;  %2263 = vrot.lane.b32.xlu0 %v2076_v19, %s6520_s6  ;;  %v2079_v2 = vmul.f32 %v6322_v44, %v2015_v33  ;;  %v1890_v17 = vld [vmem:[#allocation2 + $0x8] sm:$0xff] }
 0x2e3   :  { %v2078_v49 = vmul.f32 %v6321_v47, %v2014_v22  ;;  %v2152_v39 = vpop.permute.xlu0 %2151  ;;  %v6323_v22 = vld [vmem:[%s11936_s2 + $0x1f8] sm:$0xff] }
 0x2e4   :  { %v2340_v41 = vadd.f32 %v2152_v39, %v1892_v53  ;;  %2265 = vrot.lane.b32.xlu1 %v2077_v48, %s6520_s6  ;;  %v1888_v28 = vpop.xlane.xlu1 %1887  ;;  %v1891_v48 = vld [vmem:[#allocation2 + $0x10] sm:$0xff] }
 0x2e5   :  { %v2016_v19 = vsub.f32 %v1246_v60, %v1888_v28  ;;  %2267 = vrot.lane.b32.xlu0 %v2078_v49, %s6520_s6  ;;  %v1898_v60 = vld [vmem:[#allocation2 + $0x48] sm:$0xff]  ;;  %v1893_v28 = vld [vmem:[#allocation2 + $0x20] sm:$0xff] }
 0x2e6   :  { %2405 = vst.msk [vmem:[#allocation2 + $0x18] sm:$0xff] %vm92_vm5, %v2340_v41  ;;  %v9038_v41 = vstv %s11937_s3 }
 0x2e7   :  { %v2080_v26 = vmul.f32 %v6323_v22, %v2016_v19  ;;  %v2156_v42 = vpop.permute.xlu0 %2155  ;;  %v12399_v19 = vld [vmem:[#allocation24_spill] sm:$0xff] }
 0x2e8   :  { %v2342_v23 = vadd.f32 %v2156_v42, %v1894_v61  ;;  %2269 = vrot.lane.b32.xlu1 %v2079_v2, %s6520_s6  ;;  %v2148_v46 = vpop.permute.xlu1 %2147  ;;  %v2468_v61 = vmul.f32 %v9038_v41, %v12399_v19  ;;  %v12400_v42 = vld [vmem:[#allocation21_spill] sm:$0xff] }
 0x2e9   :  { %v2338_v53 = vadd.f32 %v2148_v46, %v1890_v17  ;;  %2271 = vrot.lane.b32.xlu0 %v2080_v26, %s6520_s6  ;;  %v1900_v26 = vld [vmem:[#allocation2 + $0x58] sm:$0xff]  ;;  %v1895_v46 = vld [vmem:[#allocation2 + $0x30] sm:$0xff] }
 0x2ea   :  { %2407 = vst.msk [vmem:[#allocation2 + $0x28] sm:$0xff] %vm92_vm5, %v2342_v23  ;;  %v2467_v23 = vmul.f32 %v9038_v41, %v12400_v42  ;;  %v12403_v42 = vld [vmem:[#allocation28_spill] sm:$0xff] }
 0x2eb   :  { %2403 = vst.msk [vmem:[#allocation2 + $0x8] sm:$0xff] %vm92_vm5, %v2338_v53  ;;  %v2160_v33 = vpop.permute.xlu0 %2159  ;;  %v12401_v53 = vld [vmem:[#allocation22_spill] sm:$0xff] }
 0x2ec   :  { %v2344_v47 = vadd.f32 %v2160_v33, %v1896_v50  ;;  %v2150_v49 = vpop.permute.xlu1 %2149  ;;  %v2469_v50 = vmul.f32 %v9038_v41, %v12401_v53  ;;  %v2531_v19 = vmul.f32 1.442695, %v2467_v23  ;;  %v2471_v53 = vmul.f32 %v9038_v41, %v12403_v42 }
 0x2ed   :  { %v2339_v39 = vadd.f32 %v2150_v49, %v1891_v48  ;;  %v2533_v48 = vmul.f32 1.442695, %v2468_v61 }
 0x2ee   :  { %2409 = vst.msk [vmem:[#allocation2 + $0x38] sm:$0xff] %vm92_vm5, %v2344_v47 }
 0x2ef   :  { %2404 = vst.msk [vmem:[#allocation2 + $0x10] sm:$0xff] %vm92_vm5, %v2339_v39  ;;  %v2164_v44 = vpop.permute.xlu0 %2163  ;;  %5684 = vpow2.f32 %v2533_v48  ;;  %v12405_v48 = vld [vmem:[#allocation32_spill] sm:$0xff] }
 0x2f0   :  { %v2346_v2 = vadd.f32 %v2164_v44, %v1898_v60  ;;  %v2154_v17 = vpop.permute.xlu1 %2153  ;;  %v1902_v60 = vld [vmem:[#allocation2 + $0x68] sm:$0xff]  ;;  %5686 = vpow2.f32 %v2531_v19  ;;  %v2473_v42 = vmul.f32 %v9038_v41, %v12405_v48 }
 0x2f1   :  { %v2341_v22 = vadd.f32 %v2154_v17, %v1893_v28  ;;  %v12402_v28 = vld [vmem:[#allocation25_spill] sm:$0xff] }
 0x2f2   :  { %2411 = vst.msk [vmem:[#allocation2 + $0x48] sm:$0xff] %vm92_vm5, %v2346_v2  ;;  %v2470_v44 = vmul.f32 %v9038_v41, %v12402_v28  ;;  %v1897_v17 = vld [vmem:[#allocation2 + $0x40] sm:$0xff]  ;;  %v2535_v2 = vmul.f32 1.442695, %v2469_v50  ;;  %v2539_v50 = vmul.f32 1.442695, %v2471_v53 }
 0x2f3   :  { %2406 = vst.msk [vmem:[#allocation2 + $0x20] sm:$0xff] %vm92_vm5, %v2341_v22  ;;  %v2168_v33 = vpop.permute.xlu0 %2167  ;;  %v12407_v53 = vld [vmem:[#allocation36_spill] sm:$0xff] }
 0x2f4   :  { %v2348_v47 = vadd.f32 %v2168_v33, %v1900_v26  ;;  %v2158_v49 = vpop.permute.xlu1 %2157  ;;  %v2537_v23 = vmul.f32 1.442695, %v2470_v44  ;;  %5688 = vpow2.f32 %v2535_v2  ;;  %v12406_v44 = vld [vmem:[#allocation33_spill] sm:$0xff]  ;;  %v2543_v2 = vmul.f32 1.442695, %v2473_v42  ;;  %v12409_v42 = vld [vmem:[#allocation40_spill] sm:$0xff] }
 0x2f5   :  { %v2343_v39 = vadd.f32 %v2158_v49, %v1895_v46  ;;  %v1904_v46 = vld [vmem:[#allocation2 + $0x78] sm:$0xff]  ;;  %v12404_v49 = vld [vmem:[#allocation29_spill] sm:$0xff]  ;;  %v2475_v48 = vmul.f32 %v9038_v41, %v12407_v53  ;;  %v2477_v53 = vmul.f32 %v9038_v41, %v12409_v42 }
 0x2f6   :  { %2413 = vst.msk [vmem:[#allocation2 + $0x58] sm:$0xff] %vm92_vm5, %v2348_v47  ;;  %v2472_v28 = vmul.f32 %v9038_v41, %v12404_v49  ;;  %v1899_v47 = vld [vmem:[#allocation2 + $0x50] sm:$0xff]  ;;  %5690 = vpow2.f32 %v2537_v23  ;;  %v2474_v49 = vmul.f32 %v9038_v41, %v12406_v44 }
 0x2f7   :  { %2408 = vst.msk [vmem:[#allocation2 + $0x30] sm:$0xff] %vm92_vm5, %v2343_v39  ;;  %v2172_v61 = vpop.permute.xlu0 %2171  ;;  %5692 = vpow2.f32 %v2539_v50  ;;  %v2547_v50 = vmul.f32 1.442695, %v2475_v48  ;;  %v1905_v48 = vld [vmem:[#allocation2 + $0x80] sm:$0xff] }
 0x2f8   :  { %v2350_v22 = vadd.f32 %v2172_v61, %v1902_v60  ;;  %v2162_v26 = vpop.permute.xlu1 %2161  ;;  %v2541_v19 = vmul.f32 1.442695, %v2472_v28  ;;  %v2545_v23 = vmul.f32 1.442695, %v2474_v49  ;;  %v12408_v28 = vld [vmem:[#allocation37_spill] sm:$0xff] }
 0x2f9   :  { %v2345_v33 = vadd.f32 %v2162_v26, %v1897_v17  ;;  %v1906_v26 = vld [vmem:[#allocation2 + $0x88] sm:$0xff]  ;;  %v2476_v44 = vmul.f32 %v9038_v41, %v12408_v28 }
 0x2fa   :  { %2415 = vst.msk [vmem:[#allocation2 + $0x68] sm:$0xff] %vm92_vm5, %v2350_v22  ;;  %v1901_v22 = vld [vmem:[#allocation2 + $0x60] sm:$0xff]  ;;  %5694 = vpow2.f32 %v2541_v19 }
 0x2fb   :  { %2410 = vst.msk [vmem:[#allocation2 + $0x40] sm:$0xff] %vm92_vm5, %v2345_v33  ;;  %v2176_v39 = vpop.permute.xlu0 %2175  ;;  %5696 = vpow2.f32 %v2543_v2  ;;  %v2549_v28 = vmul.f32 1.442695, %v2476_v44 }
 0x2fc   :  { %v2352_v60 = vadd.f32 %v2176_v39, %v1904_v46  ;;  %v2166_v61 = vpop.permute.xlu1 %2165  ;;  %5698 = vpow2.f32 %v2545_v23 }
 0x2fd   :  { %v2347_v17 = vadd.f32 %v2166_v61, %v1899_v47  ;;  %v1908_v61 = vld [vmem:[#allocation2 + $0x98] sm:$0xff]  ;;  %5700 = vpow2.f32 %v2547_v50  ;;  %v1907_v50 = vld [vmem:[#allocation2 + $0x90] sm:$0xff] }
 0x2fe   :  { %2417 = vst.msk [vmem:[#allocation2 + $0x78] sm:$0xff] %vm92_vm5, %v2352_v60  ;;  %v1903_v60 = vld [vmem:[#allocation2 + $0x70] sm:$0xff]  ;;  %5702 = vpow2.f32 %v2549_v28 }
 0x2ff   :  { %2412 = vst.msk [vmem:[#allocation2 + $0x50] sm:$0xff] %vm92_vm5, %v2347_v17  ;;  %v2180_v33 = vpop.permute.xlu0 %2179 }
 0x300   :  { %v2354_v46 = vadd.f32 %v2180_v33, %v1906_v26  ;;  %v2170_v39 = vpop.permute.xlu1 %2169  ;;  %v5685_v26 = vpop.eup %5684 }
 0x301   :  { %v2349_v47 = vadd.f32 %v2170_v39, %v1901_v22  ;;  %v12410_v39 = vld [vmem:[#allocation41_spill] sm:$0xff]  ;;  %v5687_v42 = vpop.eup %5686 }
 0x302   :  { %2419 = vst.msk [vmem:[#allocation2 + $0x88] sm:$0xff] %vm92_vm5, %v2354_v46  ;;  %v2478_v19 = vmul.f32 %v9038_v41, %v12410_v39  ;;  %v12411_v46 = vld [vmem:[#allocation44_spill] sm:$0xff]  ;;  %v5689_v21 = vpop.eup %5688 }
 0x303   :  { %2414 = vst.msk [vmem:[#allocation2 + $0x60] sm:$0xff] %vm92_vm5, %v2349_v47  ;;  %v2184_v17 = vpop.permute.xlu0 %2183  ;;  %v2479_v2 = vmul.f32 %v9038_v41, %v12411_v46  ;;  %v2551_v47 = vmul.f32 1.442695, %v2477_v53  ;;  %v5691_v53 = vpop.eup %5690 }
 0x304   :  { %v2356_v33 = vadd.f32 %v2184_v17, %v1908_v61  ;;  %v2174_v22 = vpop.permute.xlu1 %2173  ;;  %v2662_v17 = vsel %vm478_vm0, %v5685_v26, 0.0  ;;  %v2553_v23 = vmul.f32 1.442695, %v2478_v19  ;;  %v2659_v19 = vsel %vm478_vm0, %v5687_v42, 0.0  ;;  %v5693_v28 = vpop.eup %5692 }
 0x305   :  { %v2351_v49 = vadd.f32 %v2174_v22, %v1903_v60  ;;  %v1912_v22 = vld [vmem:[#allocation2 + $0xb8] sm:$0xff]  ;;  %v2555_v46 = vmul.f32 1.442695, %v2479_v2  ;;  %5704 = vpow2.f32 %v2551_v47 }
 0x306   :  { %2421 = vst.msk [vmem:[#allocation2 + $0x98] sm:$0xff] %vm92_vm5, %v2356_v33  ;;  %v2480_v33 = vmul.f32 %v9038_v41, %v12412_v0  ;;  %5706 = vpow2.f32 %v2553_v23  ;;  %v2668_v23 = vsel %vm478_vm0, %v5691_v53, 0.0  ;;  %v1911_v53 = vld [vmem:[#allocation2 + $0xb0] sm:$0xff] }
 0x307   :  { %2416 = vst.msk [vmem:[#allocation2 + $0x70] sm:$0xff] %vm92_vm5, %v2351_v49  ;;  %v2188_v61 = vpop.permute.xlu0 %2187  ;;  %v12413_v49 = vld [vmem:[#allocation48_spill] sm:$0xff]  ;;  %5708 = vpow2.f32 %v2555_v46 }
 0x308   :  { %v2358_v39 = vadd.f32 %v2188_v61, %v1910_v52  ;;  %2663 = vadd.xlane.f32.xlu0 %v2662_v17  ;;  %v2178_v60 = vpop.permute.xlu1 %2177  ;;  %v2481_v26 = vmul.f32 %v9038_v41, %v12413_v49  ;;  %v1914_v17 = vld [vmem:[#allocation2 + $0xc8] sm:$0xff]  ;;  %v2557_v47 = vmul.f32 1.442695, %v2480_v33  ;;  %v5695_v49 = vpop.eup %5694 }
 0x309   :  { %v2353_v44 = vadd.f32 %v2178_v60, %v1905_v48  ;;  %v2665_v48 = vsel %vm478_vm0, %v5689_v21, 0.0  ;;  %v2483_v21 = vmul.f32 %v9038_v41, %v12415_v37  ;;  %v5697_v46 = vpop.eup %5696  ;;  %v12417_v37 = vld [vmem:[#allocation56_spill] sm:$0xff] }
 0x30a   :  { %2423 = vst.msk [vmem:[#allocation2 + $0xa8] sm:$0xff] %vm92_vm5, %v2358_v39  ;;  %v12414_v39 = vld [vmem:[#allocation49_spill] sm:$0xff]  ;;  %v2559_v42 = vmul.f32 1.442695, %v2481_v26  ;;  %v1916_v26 = vld [vmem:[#allocation2 + $0xd8] sm:$0xff]  ;;  %5710 = vpow2.f32 %v2557_v47 }
 0x30b   :  { %2418 = vst.msk [vmem:[#allocation2 + $0x80] sm:$0xff] %vm92_vm5, %v2353_v44  ;;  %v2192_v52 = vpop.permute.xlu0 %2191  ;;  %v2482_v60 = vmul.f32 %v9038_v41, %v12414_v39  ;;  %v1909_v44 = vld [vmem:[#allocation2 + $0xa0] sm:$0xff]  ;;  %v5699_v39 = vpop.eup %5698 }
 0x30c   :  { %v2360_v2 = vadd.f32 %v2192_v52, %v1912_v22  ;;  %2660 = vadd.xlane.f32.xlu1 %v2659_v19  ;;  %2666 = vadd.xlane.f32.xlu0 %v2665_v48  ;;  %v2182_v0 = vpop.permute.xlu1 %2181  ;;  %v12416_v19 = vld [vmem:[#allocation53_spill] sm:$0xff]  ;;  %5712 = vpow2.f32 %v2559_v42 }
 0x30d   :  { %v2355_v61 = vadd.f32 %v2182_v0, %v1907_v50  ;;  %v2671_v50 = vsel %vm478_vm0, %v5693_v28, 0.0  ;;  %v2484_v48 = vmul.f32 %v9038_v41, %v12416_v19  ;;  %v2561_v0 = vmul.f32 1.442695, %v2482_v60  ;;  %v1918_v19 = vld [vmem:[#allocation2 + $0xe8] sm:$0xff] }
 0x30e   :  { %2425 = vst.msk [vmem:[#allocation2 + $0xb8] sm:$0xff] %vm92_vm5, %v2360_v2  ;;  %v2563_v28 = vmul.f32 1.442695, %v2483_v21  ;;  %v1913_v21 = vld [vmem:[#allocation2 + $0xc0] sm:$0xff] }
 0x30f   :  { %2420 = vst.msk [vmem:[#allocation2 + $0x90] sm:$0xff] %vm92_vm5, %v2355_v61  ;;  %v2196_v22 = vpop.permute.xlu0 %2195  ;;  %v2485_v61 = vmul.f32 %v9038_v41, %v12417_v37  ;;  %v2565_v60 = vmul.f32 1.442695, %v2484_v48  ;;  %5714 = vpow2.f32 %v2561_v0  ;;  %v12418_v37 = vld [vmem:[#allocation57_spill] sm:$0xff]  ;;  %v2680_v48 = vsel %vm478_vm0, %v5699_v39, 0.0 }
 0x310   :  { %v2362_v33 = vadd.f32 %v2196_v22, %v1914_v17  ;;  %2669 = vadd.xlane.f32.xlu1 %v2668_v23  ;;  %2672 = vadd.xlane.f32.xlu0 %v2671_v50  ;;  %v2186_v52 = vpop.permute.xlu1 %2185  ;;  %v2674_v22 = vsel %vm478_vm0, %v5695_v49, 0.0  ;;  %v2677_v23 = vsel %vm478_vm0, %v5697_v46, 0.0  ;;  %v2486_v42 = vmul.f32 %v9038_v41, %v12418_v37  ;;  %v12419_v49 = vld [vmem:[#allocation60_spill] sm:$0xff] }
 0x311   :  { %v2357_v2 = vadd.f32 %v2186_v52, %v1909_v44  ;;  %v5701_v44 = vpop.eup %5700  ;;  %5716 = vpow2.f32 %v2563_v28  ;;  %v2487_v46 = vmul.f32 %v9038_v41, %v12419_v49 }
 0x312   :  { %2427 = vst.msk [vmem:[#allocation2 + $0xc8] sm:$0xff] %vm92_vm5, %v2362_v33  ;;  %v2567_v33 = vmul.f32 1.442695, %v2485_v61  ;;  %5718 = vpow2.f32 %v2565_v60  ;;  %v2569_v28 = vmul.f32 1.442695, %v2486_v42 }
 0x313   :  { %2422 = vst.msk [vmem:[#allocation2 + $0xa0] sm:$0xff] %vm92_vm5, %v2357_v2  ;;  %v2200_v17 = vpop.permute.xlu0 %2199  ;;  %v5703_v2 = vpop.eup %5702  ;;  %v2571_v49 = vmul.f32 1.442695, %v2487_v46 }
 0x314   :  { %v2364_v50 = vadd.f32 %v2200_v17, %v1916_v26  ;;  %2675 = vadd.xlane.f32.xlu1 %v2674_v22  ;;  %2678 = vadd.xlane.f32.xlu0 %v2677_v23  ;;  %v2190_v47 = vpop.permute.xlu1 %2189  ;;  %v5705_v0 = vpop.eup %5704  ;;  %v1920_v23 = vld [vmem:[#allocation2 + $0xf8] sm:$0xff]  ;;  %5720 = vpow2.f32 %v2567_v33  ;;  %v2686_v60 = vsel %vm478_vm0, %v5703_v2, 0.0 }
 0x315   :  { %v2359_v52 = vadd.f32 %v2190_v47, %v1911_v53  ;;  %v2683_v53 = vsel %vm478_vm0, %v5701_v44, 0.0  ;;  %v12420_v47 = vld [vmem:[#allocation61_spill] sm:$0xff]  ;;  %v12421_v44 = vld [vmem:[#allocation64_spill] sm:$0xff]  ;;  %5722 = vpow2.f32 %v2569_v28 }
 0x316   :  { %2429 = vst.msk [vmem:[#allocation2 + $0xd8] sm:$0xff] %vm92_vm5, %v2364_v50  ;;  %v5707_v50 = vpop.eup %5706  ;;  %v2488_v37 = vmul.f32 %v9038_v41, %v12420_v47  ;;  %v12423_v47 = vld [vmem:[#allocation68_spill] sm:$0xff]  ;;  %5724 = vpow2.f32 %v2571_v49 }
 0x317   :  { %2424 = vst.msk [vmem:[#allocation2 + $0xb0] sm:$0xff] %vm92_vm5, %v2359_v52  ;;  %v2204_v26 = vpop.permute.xlu0 %2203  ;;  %v1915_v52 = vld [vmem:[#allocation2 + $0xd0] sm:$0xff]  ;;  %v5709_v39 = vpop.eup %5708 }
 0x318   :  { %v2366_v61 = vadd.f32 %v2204_v26, %v1918_v19  ;;  %2681 = vadd.xlane.f32.xlu1 %v2680_v48  ;;  %2684 = vadd.xlane.f32.xlu0 %v2683_v53  ;;  %v2194_v17 = vpop.permute.xlu1 %2193  ;;  %v2489_v19 = vmul.f32 %v9038_v41, %v12421_v44  ;;  %v12422_v48 = vld [vmem:[#allocation65_spill] sm:$0xff]  ;;  %v2573_v46 = vmul.f32 1.442695, %v2488_v37  ;;  %v2491_v44 = vmul.f32 %v9038_v41, %v12423_v47  ;;  %v5711_v2 = vpop.eup %5710 }
 0x319   :  { %v2361_v22 = vadd.f32 %v2194_v17, %v1913_v21  ;;  %v2689_v21 = vsel %vm478_vm0, %v5705_v0, 0.0  ;;  %v2490_v53 = vmul.f32 %v9038_v41, %v12422_v48  ;;  %v1922_v17 = vld [vmem:[#allocation2 + $0x108] sm:$0xff]  ;;  %v1924_v48 = vld [vmem:[#allocation2 + $0x118] sm:$0xff]  ;;  %v12424_v47 = vld [vmem:[#allocation69_spill] sm:$0xff] }
 0x31a   :  { %2431 = vst.msk [vmem:[#allocation2 + $0xe8] sm:$0xff] %vm92_vm5, %v2366_v61  ;;  %v2575_v0 = vmul.f32 1.442695, %v2489_v19  ;;  %5726 = vpow2.f32 %v2573_v46  ;;  %v2492_v49 = vmul.f32 %v9038_v41, %v12424_v47  ;;  %v1919_v19 = vld [vmem:[#allocation2 + $0xf0] sm:$0xff] }
 0x31b   :  { %2426 = vst.msk [vmem:[#allocation2 + $0xc0] sm:$0xff] %vm92_vm5, %v2361_v22  ;;  %v2208_v26 = vpop.permute.xlu0 %2207  ;;  %v1917_v22 = vld [vmem:[#allocation2 + $0xe0] sm:$0xff]  ;;  %v2577_v37 = vmul.f32 1.442695, %v2490_v53  ;;  %v2698_v53 = vsel %vm478_vm0, %v5711_v2, 0.0 }
 0x31c   :  { %v2368_v33 = vadd.f32 %v2208_v26, %v1920_v23  ;;  %2687 = vadd.xlane.f32.xlu1 %v2686_v60  ;;  %2690 = vadd.xlane.f32.xlu0 %v2689_v21  ;;  %v2198_v42 = vpop.permute.xlu1 %2197  ;;  %v2692_v26 = vsel %vm478_vm0, %v5707_v50, 0.0  ;;  %v2695_v60 = vsel %vm478_vm0, %v5709_v39, 0.0  ;;  %5728 = vpow2.f32 %v2575_v0  ;;  %v12425_v50 = vld [vmem:[#allocation72_spill] sm:$0xff] }
 0x31d   :  { %v2363_v61 = vadd.f32 %v2198_v42, %v1915_v52  ;;  %v5713_v52 = vpop.eup %5712  ;;  %v2493_v39 = vmul.f32 %v9038_v41, %v12425_v50  ;;  %5730 = vpow2.f32 %v2577_v37  ;;  %v2581_v0 = vmul.f32 1.442695, %v2492_v49 }
 0x31e   :  { %2433 = vst.msk [vmem:[#allocation2 + $0xf8] sm:$0xff] %vm92_vm5, %v2368_v33  ;;  %v2579_v33 = vmul.f32 1.442695, %v2491_v44 }
 0x31f   :  { %2428 = vst.msk [vmem:[#allocation2 + $0xd0] sm:$0xff] %vm92_vm5, %v2363_v61  ;;  %v2212_v23 = vpop.permute.xlu0 %2211  ;;  %v5715_v61 = vpop.eup %5714  ;;  %v2583_v50 = vmul.f32 1.442695, %v2493_v39 }
 0x320   :  { %v2370_v21 = vadd.f32 %v2212_v23, %v1922_v17  ;;  %2693 = vadd.xlane.f32.xlu1 %v2692_v26  ;;  %2696 = vadd.xlane.f32.xlu0 %v2695_v60  ;;  %v2202_v28 = vpop.permute.xlu1 %2201  ;;  %v5717_v46 = vpop.eup %5716  ;;  %v1926_v60 = vld [vmem:[#allocation2 + $0x128] sm:$0xff]  ;;  %5732 = vpow2.f32 %v2579_v33  ;;  %v2704_v37 = vsel %vm478_vm0, %v5715_v61, 0.0 }
 0x321   :  { %v2365_v42 = vadd.f32 %v2202_v28, %v1917_v22  ;;  %v2701_v22 = vsel %vm478_vm0, %v5713_v52, 0.0  ;;  %v12426_v28 = vld [vmem:[#allocation73_spill] sm:$0xff]  ;;  %v12427_v52 = vld [vmem:[#allocation76_spill] sm:$0xff]  ;;  %5734 = vpow2.f32 %v2581_v0 }
 0x322   :  { %2435 = vst.msk [vmem:[#allocation2 + $0x108] sm:$0xff] %vm92_vm5, %v2370_v21  ;;  %v5719_v21 = vpop.eup %5718  ;;  %v2494_v47 = vmul.f32 %v9038_v41, %v12426_v28  ;;  %v12429_v28 = vld [vmem:[#allocation80_spill] sm:$0xff]  ;;  %5736 = vpow2.f32 %v2583_v50 }
 0x323   :  { %2430 = vst.msk [vmem:[#allocation2 + $0xe0] sm:$0xff] %vm92_vm5, %v2365_v42  ;;  %v2216_v17 = vpop.permute.xlu0 %2215  ;;  %v1921_v42 = vld [vmem:[#allocation2 + $0x100] sm:$0xff]  ;;  %v5721_v2 = vpop.eup %5720 }
 0x324   :  { %v2372_v44 = vadd.f32 %v2216_v17, %v1924_v48  ;;  %2699 = vadd.xlane.f32.xlu1 %v2698_v53  ;;  %2702 = vadd.xlane.f32.xlu0 %v2701_v22  ;;  %v2206_v23 = vpop.permute.xlu1 %2205  ;;  %v2495_v48 = vmul.f32 %v9038_v41, %v12427_v52  ;;  %v12428_v53 = vld [vmem:[#allocation77_spill] sm:$0xff]  ;;  %v2585_v39 = vmul.f32 1.442695, %v2494_v47  ;;  %v2497_v52 = vmul.f32 %v9038_v41, %v12429_v28  ;;  %v5723_v61 = vpop.eup %5722 }
 0x325   :  { %v2367_v26 = vadd.f32 %v2206_v23, %v1919_v19  ;;  %v2707_v19 = vsel %vm478_vm0, %v5717_v46, 0.0  ;;  %v2496_v22 = vmul.f32 %v9038_v41, %v12428_v53  ;;  %v1928_v23 = vld [vmem:[#allocation2 + $0x138] sm:$0xff]  ;;  %v1930_v53 = vld [vmem:[#allocation2 + $0x148] sm:$0xff]  ;;  %v12430_v28 = vld [vmem:[#allocation81_spill] sm:$0xff] }
 0x326   :  { %2437 = vst.msk [vmem:[#allocation2 + $0x118] sm:$0xff] %vm92_vm5, %v2372_v44  ;;  %v2587_v46 = vmul.f32 1.442695, %v2495_v48  ;;  %5738 = vpow2.f32 %v2585_v39  ;;  %v2498_v50 = vmul.f32 %v9038_v41, %v12430_v28  ;;  %v1925_v48 = vld [vmem:[#allocation2 + $0x120] sm:$0xff] }
 0x327   :  { %2432 = vst.msk [vmem:[#allocation2 + $0xf0] sm:$0xff] %vm92_vm5, %v2367_v26  ;;  %v2220_v17 = vpop.permute.xlu0 %2219  ;;  %v1923_v26 = vld [vmem:[#allocation2 + $0x110] sm:$0xff]  ;;  %v2589_v47 = vmul.f32 1.442695, %v2496_v22  ;;  %v2716_v22 = vsel %vm478_vm0, %v5723_v61, 0.0 }
 0x328   :  { %v2374_v33 = vadd.f32 %v2220_v17, %v1926_v60  ;;  %2705 = vadd.xlane.f32.xlu1 %v2704_v37  ;;  %2708 = vadd.xlane.f32.xlu0 %v2707_v19  ;;  %v2210_v49 = vpop.permute.xlu1 %2209  ;;  %v2710_v17 = vsel %vm478_vm0, %v5719_v21, 0.0  ;;  %v2713_v37 = vsel %vm478_vm0, %v5721_v2, 0.0  ;;  %5740 = vpow2.f32 %v2587_v46  ;;  %v12431_v21 = vld [vmem:[#allocation84_spill] sm:$0xff] }
 0x329   :  { %v2369_v44 = vadd.f32 %v2210_v49, %v1921_v42  ;;  %v5725_v42 = vpop.eup %5724  ;;  %v2499_v2 = vmul.f32 %v9038_v41, %v12431_v21  ;;  %5742 = vpow2.f32 %v2589_v47  ;;  %v2593_v46 = vmul.f32 1.442695, %v2498_v50 }
 0x32a   :  { %2439 = vst.msk [vmem:[#allocation2 + $0x128] sm:$0xff] %vm92_vm5, %v2374_v33  ;;  %v2591_v33 = vmul.f32 1.442695, %v2497_v52 }
 0x32b   :  { %2434 = vst.msk [vmem:[#allocation2 + $0x100] sm:$0xff] %vm92_vm5, %v2369_v44  ;;  %v2224_v60 = vpop.permute.xlu0 %2223  ;;  %v5727_v44 = vpop.eup %5726  ;;  %v2595_v21 = vmul.f32 1.442695, %v2499_v2 }
 0x32c   :  { %v2376_v19 = vadd.f32 %v2224_v60, %v1928_v23  ;;  %2711 = vadd.xlane.f32.xlu1 %v2710_v17  ;;  %2714 = vadd.xlane.f32.xlu0 %v2713_v37  ;;  %v2214_v0 = vpop.permute.xlu1 %2213  ;;  %v5729_v39 = vpop.eup %5728  ;;  %v1932_v37 = vld [vmem:[#allocation2 + $0x158] sm:$0xff]  ;;  %5744 = vpow2.f32 %v2591_v33  ;;  %v2722_v47 = vsel %vm478_vm0, %v5727_v44, 0.0 }
 0x32d   :  { %v2371_v49 = vadd.f32 %v2214_v0, %v1923_v26  ;;  %v2719_v26 = vsel %vm478_vm0, %v5725_v42, 0.0  ;;  %v12432_v0 = vld [vmem:[#allocation85_spill] sm:$0xff]  ;;  %v12433_v42 = vld [vmem:[#allocation88_spill] sm:$0xff]  ;;  %5746 = vpow2.f32 %v2593_v46 }
 0x32e   :  { %2441 = vst.msk [vmem:[#allocation2 + $0x138] sm:$0xff] %vm92_vm5, %v2376_v19  ;;  %v5731_v19 = vpop.eup %5730  ;;  %v2500_v28 = vmul.f32 %v9038_v41, %v12432_v0  ;;  %v12435_v0 = vld [vmem:[#allocation92_spill] sm:$0xff]  ;;  %5748 = vpow2.f32 %v2595_v21 }
 0x32f   :  { %2436 = vst.msk [vmem:[#allocation2 + $0x110] sm:$0xff] %vm92_vm5, %v2371_v49  ;;  %v2228_v23 = vpop.permute.xlu0 %2227  ;;  %v1927_v49 = vld [vmem:[#allocation2 + $0x130] sm:$0xff]  ;;  %v5733_v61 = vpop.eup %5732 }
 0x330   :  { %v2378_v52 = vadd.f32 %v2228_v23, %v1930_v53  ;;  %2717 = vadd.xlane.f32.xlu1 %v2716_v22  ;;  %2720 = vadd.xlane.f32.xlu0 %v2719_v26  ;;  %v2218_v60 = vpop.permute.xlu1 %2217  ;;  %v2501_v53 = vmul.f32 %v9038_v41, %v12433_v42  ;;  %v12434_v22 = vld [vmem:[#allocation89_spill] sm:$0xff]  ;;  %v2597_v2 = vmul.f32 1.442695, %v2500_v28  ;;  %v2503_v42 = vmul.f32 %v9038_v41, %v12435_v0  ;;  %v5735_v44 = vpop.eup %5734 }
 0x331   :  { %v2373_v17 = vadd.f32 %v2218_v60, %v1925_v48  ;;  %v2725_v48 = vsel %vm478_vm0, %v5729_v39, 0.0  ;;  %v2502_v26 = vmul.f32 %v9038_v41, %v12434_v22  ;;  %v1934_v60 = vld [vmem:[#allocation2 + $0x168] sm:$0xff]  ;;  %v1936_v22 = vld [vmem:[#allocation2 + $0x178] sm:$0xff]  ;;  %v12436_v0 = vld [vmem:[#allocation93_spill] sm:$0xff] }
 0x332   :  { %2443 = vst.msk [vmem:[#allocation2 + $0x148] sm:$0xff] %vm92_vm5, %v2378_v52  ;;  %v2599_v39 = vmul.f32 1.442695, %v2501_v53  ;;  %5750 = vpow2.f32 %v2597_v2  ;;  %v2504_v21 = vmul.f32 %v9038_v41, %v12436_v0  ;;  %v1931_v53 = vld [vmem:[#allocation2 + $0x150] sm:$0xff] }
 0x333   :  { %2438 = vst.msk [vmem:[#allocation2 + $0x120] sm:$0xff] %vm92_vm5, %v2373_v17  ;;  %v2232_v23 = vpop.permute.xlu0 %2231  ;;  %v1929_v17 = vld [vmem:[#allocation2 + $0x140] sm:$0xff]  ;;  %v2601_v28 = vmul.f32 1.442695, %v2502_v26  ;;  %v2734_v26 = vsel %vm478_vm0, %v5735_v44, 0.0 }
 0x334   :  { %v2380_v33 = vadd.f32 %v2232_v23, %v1932_v37  ;;  %2723 = vadd.xlane.f32.xlu1 %v2722_v47  ;;  %2726 = vadd.xlane.f32.xlu0 %v2725_v48  ;;  %v2222_v50 = vpop.permute.xlu1 %2221  ;;  %v2728_v23 = vsel %vm478_vm0, %v5731_v19, 0.0  ;;  %v2731_v47 = vsel %vm478_vm0, %v5733_v61, 0.0  ;;  %5752 = vpow2.f32 %v2599_v39  ;;  %v12437_v19 = vld [vmem:[#allocation96_spill] sm:$0xff] }
 0x335   :  { %v2375_v52 = vadd.f32 %v2222_v50, %v1927_v49  ;;  %v5737_v49 = vpop.eup %5736  ;;  %v2505_v61 = vmul.f32 %v9038_v41, %v12437_v19  ;;  %5754 = vpow2.f32 %v2601_v28  ;;  %v2605_v39 = vmul.f32 1.442695, %v2504_v21 }
 0x336   :  { %2445 = vst.msk [vmem:[#allocation2 + $0x158] sm:$0xff] %vm92_vm5, %v2380_v33  ;;  %v2603_v33 = vmul.f32 1.442695, %v2503_v42 }
 0x337   :  { %2440 = vst.msk [vmem:[#allocation2 + $0x130] sm:$0xff] %vm92_vm5, %v2375_v52  ;;  %v2236_v37 = vpop.permute.xlu0 %2235  ;;  %v5739_v52 = vpop.eup %5738  ;;  %v2607_v19 = vmul.f32 1.442695, %v2505_v61 }
 0x338   :  { %v2382_v48 = vadd.f32 %v2236_v37, %v1934_v60  ;;  %2729 = vadd.xlane.f32.xlu1 %v2728_v23  ;;  %2732 = vadd.xlane.f32.xlu0 %v2731_v47  ;;  %v2226_v46 = vpop.permute.xlu1 %2225  ;;  %v5741_v2 = vpop.eup %5740  ;;  %v1938_v47 = vld [vmem:[#allocation2 + $0x188] sm:$0xff]  ;;  %5756 = vpow2.f32 %v2603_v33  ;;  %v2740_v28 = vsel %vm478_vm0, %v5739_v52, 0.0 }
 0x339   :  { %v2377_v50 = vadd.f32 %v2226_v46, %v1929_v17  ;;  %v2737_v17 = vsel %vm478_vm0, %v5737_v49, 0.0  ;;  %v12438_v46 = vld [vmem:[#allocation97_spill] sm:$0xff]  ;;  %v12439_v49 = vld [vmem:[#allocation100_spill] sm:$0xff]  ;;  %5758 = vpow2.f32 %v2605_v39 }
 0x33a   :  { %2447 = vst.msk [vmem:[#allocation2 + $0x168] sm:$0xff] %vm92_vm5, %v2382_v48  ;;  %v5743_v48 = vpop.eup %5742  ;;  %v2506_v0 = vmul.f32 %v9038_v41, %v12438_v46  ;;  %v12441_v46 = vld [vmem:[#allocation104_spill] sm:$0xff]  ;;  %5760 = vpow2.f32 %v2607_v19 }
 0x33b   :  { %2442 = vst.msk [vmem:[#allocation2 + $0x140] sm:$0xff] %vm92_vm5, %v2377_v50  ;;  %v2240_v60 = vpop.permute.xlu0 %2239  ;;  %v1933_v50 = vld [vmem:[#allocation2 + $0x160] sm:$0xff]  ;;  %v5745_v44 = vpop.eup %5744 }
 0x33c   :  { %v2384_v42 = vadd.f32 %v2240_v60, %v1936_v22  ;;  %2735 = vadd.xlane.f32.xlu1 %v2734_v26  ;;  %2738 = vadd.xlane.f32.xlu0 %v2737_v17  ;;  %v2230_v37 = vpop.permute.xlu1 %2229  ;;  %v2507_v22 = vmul.f32 %v9038_v41, %v12439_v49  ;;  %v12440_v26 = vld [vmem:[#allocation101_spill] sm:$0xff]  ;;  %v2609_v61 = vmul.f32 1.442695, %v2506_v0  ;;  %v2509_v49 = vmul.f32 %v9038_v41, %v12441_v46  ;;  %v5747_v52 = vpop.eup %5746 }
 0x33d   :  { %v2379_v23 = vadd.f32 %v2230_v37, %v1931_v53  ;;  %v2743_v53 = vsel %vm478_vm0, %v5741_v2, 0.0  ;;  %v2508_v17 = vmul.f32 %v9038_v41, %v12440_v26  ;;  %v1940_v37 = vld [vmem:[#allocation2 + $0x198] sm:$0xff]  ;;  %v1942_v26 = vld [vmem:[#allocation2 + $0x1a8] sm:$0xff]  ;;  %v12442_v46 = vld [vmem:[#allocation105_spill] sm:$0xff] }
 0x33e   :  { %2449 = vst.msk [vmem:[#allocation2 + $0x178] sm:$0xff] %vm92_vm5, %v2384_v42  ;;  %v2611_v2 = vmul.f32 1.442695, %v2507_v22  ;;  %5762 = vpow2.f32 %v2609_v61  ;;  %v2510_v19 = vmul.f32 %v9038_v41, %v12442_v46  ;;  %v1937_v22 = vld [vmem:[#allocation2 + $0x180] sm:$0xff] }
 0x33f   :  { %2444 = vst.msk [vmem:[#allocation2 + $0x150] sm:$0xff] %vm92_vm5, %v2379_v23  ;;  %v2244_v60 = vpop.permute.xlu0 %2243  ;;  %v1935_v23 = vld [vmem:[#allocation2 + $0x170] sm:$0xff]  ;;  %v2613_v0 = vmul.f32 1.442695, %v2508_v17  ;;  %v2752_v17 = vsel %vm478_vm0, %v5747_v52, 0.0 }
 0x340   :  { %v2386_v33 = vadd.f32 %v2244_v60, %v1938_v47  ;;  %2741 = vadd.xlane.f32.xlu1 %v2740_v28  ;;  %2744 = vadd.xlane.f32.xlu0 %v2743_v53  ;;  %v2234_v21 = vpop.permute.xlu1 %2233  ;;  %v2746_v60 = vsel %vm478_vm0, %v5743_v48, 0.0  ;;  %v2749_v28 = vsel %vm478_vm0, %v5745_v44, 0.0  ;;  %5764 = vpow2.f32 %v2611_v2  ;;  %v12443_v48 = vld [vmem:[#allocation108_spill] sm:$0xff] }
 0x341   :  { %v2381_v42 = vadd.f32 %v2234_v21, %v1933_v50  ;;  %v5749_v50 = vpop.eup %5748  ;;  %v2511_v44 = vmul.f32 %v9038_v41, %v12443_v48  ;;  %5766 = vpow2.f32 %v2613_v0  ;;  %v2617_v2 = vmul.f32 1.442695, %v2510_v19 }
 0x342   :  { %2451 = vst.msk [vmem:[#allocation2 + $0x188] sm:$0xff] %vm92_vm5, %v2386_v33  ;;  %v2615_v33 = vmul.f32 1.442695, %v2509_v49 }
 0x343   :  { %2446 = vst.msk [vmem:[#allocation2 + $0x160] sm:$0xff] %vm92_vm5, %v2381_v42  ;;  %v2248_v47 = vpop.permute.xlu0 %2247  ;;  %v5751_v42 = vpop.eup %5750  ;;  %v2619_v48 = vmul.f32 1.442695, %v2511_v44 }
 0x344   :  { %v2388_v53 = vadd.f32 %v2248_v47, %v1940_v37  ;;  %2747 = vadd.xlane.f32.xlu1 %v2746_v60  ;;  %2750 = vadd.xlane.f32.xlu0 %v2749_v28  ;;  %v2238_v39 = vpop.permute.xlu1 %2237  ;;  %v5753_v61 = vpop.eup %5752  ;;  %v1944_v28 = vld [vmem:[#allocation2 + $0x1b8] sm:$0xff]  ;;  %5768 = vpow2.f32 %v2615_v33 }
 0x345   :  { %v2383_v21 = vadd.f32 %v2238_v39, %v1935_v23  ;;  %v2755_v23 = vsel %vm478_vm0, %v5749_v50, 0.0  ;;  %v12444_v39 = vld [vmem:[#allocation109_spill] sm:$0xff]  ;;  %v12445_v50 = vld [vmem:[#allocation112_spill] sm:$0xff]  ;;  %v2761_v0 = vsel %vm478_vm0, %v5753_v61, 0.0  ;;  %5770 = vpow2.f32 %v2617_v2 }
 0x346   :  { %2453 = vst.msk [vmem:[#allocation2 + $0x198] sm:$0xff] %vm92_vm5, %v2388_v53  ;;  %v5755_v53 = vpop.eup %5754  ;;  %v2512_v46 = vmul.f32 %v9038_v41, %v12444_v39  ;;  %v12447_v39 = vld [vmem:[#allocation116_spill] sm:$0xff]  ;;  %5772 = vpow2.f32 %v2619_v48 }
 0x347   :  { %2448 = vst.msk [vmem:[#allocation2 + $0x170] sm:$0xff] %vm92_vm5, %v2383_v21  ;;  %v2252_v37 = vpop.permute.xlu0 %2251  ;;  %v1939_v21 = vld [vmem:[#allocation2 + $0x190] sm:$0xff]  ;;  %v5757_v52 = vpop.eup %5756 }
 0x348   :  { %v2390_v49 = vadd.f32 %v2252_v37, %v1942_v26  ;;  %2753 = vadd.xlane.f32.xlu1 %v2752_v17  ;;  %2756 = vadd.xlane.f32.xlu0 %v2755_v23  ;;  %v2242_v47 = vpop.permute.xlu1 %2241  ;;  %v2513_v26 = vmul.f32 %v9038_v41, %v12445_v50  ;;  %v12446_v17 = vld [vmem:[#allocation113_spill] sm:$0xff]  ;;  %v2621_v44 = vmul.f32 1.442695, %v2512_v46  ;;  %v2515_v50 = vmul.f32 %v9038_v41, %v12447_v39  ;;  %v5759_v61 = vpop.eup %5758 }
 0x349   :  { %v2385_v60 = vadd.f32 %v2242_v47, %v1937_v22  ;;  %v2758_v22 = vsel %vm478_vm0, %v5751_v42, 0.0  ;;  %v2514_v23 = vmul.f32 %v9038_v41, %v12446_v17  ;;  %v1946_v47 = vld [vmem:[#allocation2 + $0x1c8] sm:$0xff]  ;;  %v1948_v17 = vld [vmem:[#allocation2 + $0x1d8] sm:$0xff]  ;;  %v12448_v39 = vld [vmem:[#allocation117_spill] sm:$0xff] }
 0x34a   :  { %2455 = vst.msk [vmem:[#allocation2 + $0x1a8] sm:$0xff] %vm92_vm5, %v2390_v49  ;;  %v2623_v42 = vmul.f32 1.442695, %v2513_v26  ;;  %5774 = vpow2.f32 %v2621_v44  ;;  %v2516_v48 = vmul.f32 %v9038_v41, %v12448_v39  ;;  %v1943_v26 = vld [vmem:[#allocation2 + $0x1b0] sm:$0xff] }
 0x34b   :  { %2450 = vst.msk [vmem:[#allocation2 + $0x180] sm:$0xff] %vm92_vm5, %v2385_v60  ;;  %v2256_v37 = vpop.permute.xlu0 %2255  ;;  %v1941_v60 = vld [vmem:[#allocation2 + $0x1a0] sm:$0xff]  ;;  %v2625_v46 = vmul.f32 1.442695, %v2514_v23 }
 0x34c   :  { %v2392_v33 = vadd.f32 %v2256_v37, %v1944_v28  ;;  %2762 = vadd.xlane.f32.xlu0 %v2761_v0  ;;  %2759 = vadd.xlane.f32.xlu1 %v2758_v22  ;;  %v2246_v19 = vpop.permute.xlu1 %2245  ;;  %v2767_v37 = vsel %vm478_vm0, %v5757_v52, 0.0  ;;  %v2764_v0 = vsel %vm478_vm0, %v5755_v53, 0.0  ;;  %5776 = vpow2.f32 %v2623_v42  ;;  %v12449_v52 = vld [vmem:[#allocation120_spill] sm:$0xff] }
 0x34d   :  { %v2387_v49 = vadd.f32 %v2246_v19, %v1939_v21  ;;  %v5761_v21 = vpop.eup %5760  ;;  %v2517_v53 = vmul.f32 %v9038_v41, %v12449_v52  ;;  %5778 = vpow2.f32 %v2625_v46  ;;  %v2629_v42 = vmul.f32 1.442695, %v2516_v48 }
 0x34e   :  { %2457 = vst.msk [vmem:[#allocation2 + $0x1b8] sm:$0xff] %vm92_vm5, %v2392_v33  ;;  %v2627_v33 = vmul.f32 1.442695, %v2515_v50  ;;  %v2773_v23 = vsel %vm478_vm0, %v5761_v21, 0.0 }
 0x34f   :  { %2452 = vst.msk [vmem:[#allocation2 + $0x190] sm:$0xff] %vm92_vm5, %v2387_v49  ;;  %v2260_v28 = vpop.permute.xlu0 %2259  ;;  %v5763_v49 = vpop.eup %5762  ;;  %v2631_v52 = vmul.f32 1.442695, %v2517_v53 }
 0x350   :  { %v2394_v22 = vadd.f32 %v2260_v28, %v1946_v47  ;;  %2768 = vadd.xlane.f32.xlu0 %v2767_v37  ;;  %2765 = vadd.xlane.f32.xlu1 %v2764_v0  ;;  %v2250_v2 = vpop.permute.xlu1 %2249  ;;  %v5765_v44 = vpop.eup %5764  ;;  %v1950_v0 = vld [vmem:[#allocation2 + $0x1e8] sm:$0xff]  ;;  %5780 = vpow2.f32 %v2627_v33 }
 0x351   :  { %v2389_v19 = vadd.f32 %v2250_v2, %v1941_v60  ;;  %v2770_v60 = vsel %vm478_vm0, %v5759_v61, 0.0  ;;  %v12450_v2 = vld [vmem:[#allocation121_spill] sm:$0xff]  ;;  %v12451_v61 = vld [vmem:[#allocation124_spill] sm:$0xff]  ;;  %v2779_v46 = vsel %vm478_vm0, %v5765_v44, 0.0  ;;  %5782 = vpow2.f32 %v2629_v42 }
 0x352   :  { %2459 = vst.msk [vmem:[#allocation2 + $0x1c8] sm:$0xff] %vm92_vm5, %v2394_v22  ;;  %v5767_v22 = vpop.eup %5766  ;;  %v2518_v39 = vmul.f32 %v9038_v41, %v12450_v2  ;;  %v12453_v2 = vld [vmem:[#allocation11_spill] sm:$0xff]  ;;  %5784 = vpow2.f32 %v2631_v52 }
 0x353   :  { %2454 = vst.msk [vmem:[#allocation2 + $0x1a0] sm:$0xff] %vm92_vm5, %v2389_v19  ;;  %v2264_v47 = vpop.permute.xlu0 %2263  ;;  %v1945_v19 = vld [vmem:[#allocation2 + $0x1c0] sm:$0xff]  ;;  %v5769_v21 = vpop.eup %5768 }
 0x354   :  { %v2396_v50 = vadd.f32 %v2264_v47, %v1948_v17  ;;  %2774 = vadd.xlane.f32.xlu0 %v2773_v23  ;;  %2771 = vadd.xlane.f32.xlu1 %v2770_v60  ;;  %v2254_v28 = vpop.permute.xlu1 %2253  ;;  %v2519_v17 = vmul.f32 %v9038_v41, %v12451_v61  ;;  %v12452_v23 = vld [vmem:[#allocation125_spill] sm:$0xff]  ;;  %v2633_v53 = vmul.f32 1.442695, %v2518_v39  ;;  %v2521_v61 = vmul.f32 %v9038_v41, %v12453_v2  ;;  %v5771_v44 = vpop.eup %5770 }
 0x355   :  { %v2391_v37 = vadd.f32 %v2254_v28, %v1943_v26  ;;  %v2776_v26 = vsel %vm478_vm0, %v5763_v49, 0.0  ;;  %v2520_v60 = vmul.f32 %v9038_v41, %v12452_v23  ;;  %v1952_v28 = vld [vmem:[#allocation2 + $0x1f8] sm:$0xff] }
 0x356   :  { %2461 = vst.msk [vmem:[#allocation2 + $0x1d8] sm:$0xff] %vm92_vm5, %v2396_v50  ;;  %v2635_v49 = vmul.f32 1.442695, %v2519_v17  ;;  %5786 = vpow2.f32 %v2633_v53  ;;  %v12454_v23 = vld [vmem:[#allocation12_spill] sm:$0xff]  ;;  %v1949_v17 = vld [vmem:[#allocation2 + $0x1e0] sm:$0xff] }
 0x357   :  { %2456 = vst.msk [vmem:[#allocation2 + $0x1b0] sm:$0xff] %vm92_vm5, %v2391_v37  ;;  %v2268_v47 = vpop.permute.xlu0 %2267  ;;  %v1947_v37 = vld [vmem:[#allocation2 + $0x1d0] sm:$0xff]  ;;  %v2637_v39 = vmul.f32 1.442695, %v2520_v60  ;;  %v2522_v52 = vmul.f32 %v9038_v41, %v12454_v23  ;;  %v2788_v60 = vsel %vm478_vm0, %v5771_v44, 0.0 }
 0x358   :  { %v2398_v33 = vadd.f32 %v2268_v47, %v1950_v0  ;;  %2780 = vadd.xlane.f32.xlu0 %v2779_v46  ;;  %2777 = vadd.xlane.f32.xlu1 %v2776_v26  ;;  %v2258_v48 = vpop.permute.xlu1 %2257  ;;  %v2785_v47 = vsel %vm478_vm0, %v5769_v21, 0.0  ;;  %v2782_v46 = vsel %vm478_vm0, %v5767_v22, 0.0  ;;  %5788 = vpow2.f32 %v2635_v49  ;;  %v12455_v21 = vld [vmem:[#allocation13_spill] sm:$0xff] }
 0x359   :  { %v2393_v50 = vadd.f32 %v2258_v48, %v1945_v19  ;;  %v5773_v19 = vpop.eup %5772  ;;  %v2523_v22 = vmul.f32 %v9038_v41, %v12455_v21  ;;  %5790 = vpow2.f32 %v2637_v39 }
 0x35a   :  { %2463 = vst.msk [vmem:[#allocation2 + $0x1e8] sm:$0xff] %vm92_vm5, %v2398_v33  ;;  %v2639_v33 = vmul.f32 1.442695, %v2521_v61 }
 0x35b   :  { %2458 = vst.msk [vmem:[#allocation2 + $0x1c0] sm:$0xff] %vm92_vm5, %v2393_v50  ;;  %v2272_v0 = vpop.permute.xlu0 %2271  ;;  %v5775_v50 = vpop.eup %5774 }
 0x35c   :  { %v2400_v26 = vadd.f32 %v2272_v0, %v1952_v28  ;;  %2786 = vadd.xlane.f32.xlu0 %v2785_v47  ;;  %2783 = vadd.xlane.f32.xlu1 %v2782_v46  ;;  %v2262_v42 = vpop.permute.xlu1 %2261  ;;  %v2791_v28 = vsel %vm478_vm0, %v5773_v19, 0.0  ;;  %v5777_v2 = vpop.eup %5776  ;;  %5792 = vpow2.f32 %v2639_v33  ;;  %v2641_v0 = vmul.f32 1.442695, %v2522_v52  ;;  %v12456_v47 = vld [vmem:[#allocation14_spill] sm:$0xff]  ;;  %v1951_v46 = vld [vmem:[#allocation2 + $0x1f0] sm:$0xff]  ;;  %v12458_v33 = vld [vmem:[#allocation16_spill] sm:$0xff] }
 0x35d   :  { %v2395_v48 = vadd.f32 %v2262_v42, %v1947_v37  ;;  %v5779_v37 = vpop.eup %5778  ;;  %v2524_v49 = vmul.f32 %v9038_v41, %v12456_v47  ;;  %v2643_v42 = vmul.f32 1.442695, %v2523_v22  ;;  %v2797_v44 = vsel %vm478_vm0, %v5777_v2, 0.0 }
 0x35e   :  { %2465 = vst.msk [vmem:[#allocation2 + $0x1f8] sm:$0xff] %vm92_vm5, %v2400_v26  ;;  %v5781_v26 = vpop.eup %5780  ;;  %v2794_v23 = vsel %vm478_vm0, %v5775_v50, 0.0  ;;  %v2526_v52 = vmul.f32 %v9038_v41, %v12458_v33  ;;  %5794 = vpow2.f32 %v2641_v0  ;;  %v2800_v50 = vsel %vm478_vm0, %v5779_v37, 0.0  ;;  %v12460_v0 = vld [vmem:[#allocation18_spill] sm:$0xff] }
 0x35f   :  { %2460 = vst.msk [vmem:[#allocation2 + $0x1d0] sm:$0xff] %vm92_vm5, %v2395_v48  ;;  %v12457_v48 = vld [vmem:[#allocation15_spill] sm:$0xff]  ;;  %v2645_v21 = vmul.f32 1.442695, %v2524_v49  ;;  %5796 = vpow2.f32 %v2643_v42  ;;  %v2803_v2 = vsel %vm478_vm0, %v5781_v26, 0.0  ;;  %v2528_v49 = vmul.f32 %v9038_v41, %v12460_v0 }
 0x360   :  { %2792 = vadd.xlane.f32.xlu0 %v2791_v28  ;;  %2789 = vadd.xlane.f32.xlu1 %v2788_v60  ;;  %v2266_v53 = vpop.permute.xlu1 %2265  ;;  %v2525_v19 = vmul.f32 %v9038_v41, %v12457_v48  ;;  %v12459_v28 = vld [vmem:[#allocation17_spill] sm:$0xff]  ;;  %v5783_v60 = vpop.eup %5782  ;;  %v2649_v47 = vmul.f32 1.442695, %v2526_v52 }
 0x361   :  { %v2397_v61 = vadd.f32 %v2266_v53, %v1949_v17  ;;  %v2527_v22 = vmul.f32 %v9038_v41, %v12459_v28  ;;  %5798 = vpow2.f32 %v2645_v21  ;;  %v2806_v26 = vsel %vm478_vm0, %v5783_v60, 0.0 }
 0x362   :  { %v2647_v53 = vmul.f32 1.442695, %v2525_v19 }
 0x363   :  { %2462 = vst.msk [vmem:[#allocation2 + $0x1e0] sm:$0xff] %vm92_vm5, %v2397_v61  ;;  %v5785_v61 = vpop.eup %5784 }
 0x364   :  { %2798 = vadd.xlane.f32.xlu0 %v2797_v44  ;;  %2795 = vadd.xlane.f32.xlu1 %v2794_v23  ;;  %v2270_v39 = vpop.permute.xlu1 %2269  ;;  %v5787_v48 = vpop.eup %5786  ;;  %5800 = vpow2.f32 %v2647_v53  ;;  %v12461_v44 = vld [vmem:[#allocation19_spill] sm:$0xff]  ;;  %v2809_v19 = vsel %vm478_vm0, %v5785_v61, 0.0 }
 0x365   :  { %v2399_v17 = vadd.f32 %v2270_v39, %v1951_v46  ;;  %v2651_v46 = vmul.f32 1.442695, %v2527_v22  ;;  %v2529_v42 = vmul.f32 %v9038_v41, %v12461_v44  ;;  %v5789_v23 = vpop.eup %5788  ;;  %5802 = vpow2.f32 %v2649_v47 }
 0x366   :  { %v5791_v37 = vpop.eup %5790  ;;  %v2653_v39 = vmul.f32 1.442695, %v2528_v49  ;;  %v2815_v28 = vsel %vm478_vm0, %v5789_v23, 0.0  ;;  %v2812_v22 = vsel %vm478_vm0, %v5787_v48, 0.0 }
 0x367   :  { %2464 = vst.msk [vmem:[#allocation2 + $0x1f0] sm:$0xff] %vm92_vm5, %v2399_v17  ;;  %5804 = vpow2.f32 %v2651_v46  ;;  %v2655_v52 = vmul.f32 1.442695, %v2529_v42  ;;  %v12462_v17 = vld [vmem:[#allocation136_spill] sm:$0xff] }
 0x368   :  { %2804 = vadd.xlane.f32.xlu0 %v2803_v2  ;;  %2801 = vadd.xlane.f32.xlu1 %v2800_v50  ;;  %v2530_v21 = vmul.f32 %v9038_v41, %v12462_v17  ;;  %5806 = vpow2.f32 %v2653_v39  ;;  %v2818_v50 = vsel %vm478_vm0, %v5791_v37, 0.0 }
 0x369   :  { %v5793_v33 = vpop.eup %5792  ;;  %5808 = vpow2.f32 %v2655_v52 }
 0x36a   :  { %v2657_v53 = vmul.f32 1.442695, %v2530_v21  ;;  %v2821_v2 = vsel %vm478_vm0, %v5793_v33, 0.0  ;;  %v9292_v33 = vld [vmem:[%s11935_s1] sm:$0xff] }
 0x36b   :  { %v5795_v60 = vpop.eup %5794 }
 0x36c   :  { %2810 = vadd.xlane.f32.xlu0 %v2809_v19  ;;  %2807 = vadd.xlane.f32.xlu1 %v2806_v26  ;;  %v5797_v61 = vpop.eup %5796  ;;  %5810 = vpow2.f32 %v2657_v53  ;;  %v2824_v0 = vsel %vm478_vm0, %v5795_v60, 0.0  ;;  %v9306_v60 = vld [vmem:[%s11935_s1 + $0x8] sm:$0xff] }
 0x36d   :  { %v2827_v46 = vsel %vm478_vm0, %v5797_v61, 0.0  ;;  %v9316_v61 = vld [vmem:[%s11935_s1 + $0x20] sm:$0xff] }
 0x36e   :  { %v5799_v47 = vpop.eup %5798 }
 0x36f   :  { %v2830_v19 = vsel %vm478_vm0, %v5799_v47, 0.0  ;;  %v9321_v47 = vld [vmem:[%s11935_s1 + $0x18] sm:$0xff] }
 0x370   :  { %2816 = vadd.xlane.f32.xlu0 %v2815_v28  ;;  %2813 = vadd.xlane.f32.xlu1 %v2812_v22  ;;  %v3107_v28 = vsel %vm478_vm0, %v9292_v33, -inf  ;;  %v9301_v22 = vld [vmem:[%s11935_s1 + $0x10] sm:$0xff] }
 0x371   :  { %v5801_v49 = vpop.eup %5800 }
 0x372   :  { %v5803_v48 = vpop.eup %5802  ;;  %v2833_v42 = vsel %vm478_vm0, %v5801_v49, 0.0  ;;  %v9330_v49 = vld [vmem:[%s11935_s1 + $0x30] sm:$0xff] }
 0x373   :  { %v2836_v37 = vsel %vm478_vm0, %v5803_v48, 0.0  ;;  %v9335_v48 = vld [vmem:[%s11935_s1 + $0x28] sm:$0xff] }
 0x374   :  { %2822 = vadd.xlane.f32.xlu0 %v2821_v2  ;;  %2819 = vadd.xlane.f32.xlu1 %v2818_v50  ;;  %v5805_v44 = vpop.eup %5804  ;;  %v3113_v2 = vsel %vm478_vm0, %v9301_v22, -inf  ;;  %v3110_v50 = vsel %vm478_vm0, %v9306_v60, -inf }
 0x375   :  { %v5807_v26 = vpop.eup %5806  ;;  %v2839_v23 = vsel %vm478_vm0, %v5805_v44, 0.0 }
 0x376   :  { %v5809_v39 = vpop.eup %5808  ;;  %v2842_v17 = vsel %vm478_vm0, %v5807_v26, 0.0  ;;  %v9346_v26 = vld [vmem:[%s11935_s1 + $0x38] sm:$0xff] }
 0x377   :  { %v2845_v52 = vsel %vm478_vm0, %v5809_v39, 0.0 }
 0x378   :  { %2828 = vadd.xlane.f32.xlu0 %v2827_v46  ;;  %2825 = vadd.xlane.f32.xlu1 %v2824_v0  ;;  %v3119_v46 = vsel %vm478_vm0, %v9316_v61, -inf  ;;  %v3116_v0 = vsel %vm478_vm0, %v9321_v47, -inf }
 0x379   :  { %v5811_v21 = vpop.eup %5810 }
 0x37a   :  { %v2848_v53 = vsel %vm478_vm0, %v5811_v21, 0.0  ;;  %v9364_v21 = vld [vmem:[%s11935_s1 + $0x48] sm:$0xff] }
 0x37c   :  { %2834 = vadd.xlane.f32.xlu0 %v2833_v42  ;;  %2831 = vadd.xlane.f32.xlu1 %v2830_v19  ;;  %v3125_v42 = vsel %vm478_vm0, %v9330_v49, -inf  ;;  %v3122_v19 = vsel %vm478_vm0, %v9335_v48, -inf }
 0x380   :  { %2840 = vadd.xlane.f32.xlu0 %v2839_v23  ;;  %2837 = vadd.xlane.f32.xlu1 %v2836_v37  ;;  %v9351_v23 = vld [vmem:[%s11935_s1 + $0x40] sm:$0xff] }
 0x384   :  { %2846 = vadd.xlane.f32.xlu0 %v2845_v52  ;;  %2843 = vadd.xlane.f32.xlu1 %v2842_v17  ;;  %v3128_v52 = vsel %vm478_vm0, %v9346_v26, -inf  ;;  %v3131_v17 = vsel %vm478_vm0, %v9351_v23, -inf }
 0x388   :  { %3108 = vmax.xlane.f32.xlu0 %v3107_v28  ;;  %2849 = vadd.xlane.f32.xlu1 %v2848_v53  ;;  %v9369_v28 = vld [vmem:[%s11935_s1 + $0x50] sm:$0xff] }
 0x38c   :  { %3114 = vmax.xlane.f32.xlu0 %v3113_v2  ;;  %3111 = vmax.xlane.f32.xlu1 %v3110_v50  ;;  %v3134_v50 = vsel %vm478_vm0, %v9364_v21, -inf }
 0x390   :  { %3120 = vmax.xlane.f32.xlu0 %v3119_v46  ;;  %3117 = vmax.xlane.f32.xlu1 %v3116_v0  ;;  %v3137_v46 = vsel %vm478_vm0, %v9369_v28, -inf  ;;  %v9382_v0 = vld [vmem:[%s11935_s1 + $0x58] sm:$0xff] }
 0x391   :  { %v9337_v44 = vpop.xlane.xlu0 %2663 }
 0x394   :  { %3126 = vmax.xlane.f32.xlu0 %v3125_v42  ;;  %3123 = vmax.xlane.f32.xlu1 %v3122_v19  ;;  %v9387_v42 = vld [vmem:[%s11935_s1 + $0x60] sm:$0xff] }
 0x395   :  { %v9353_v37 = vpop.xlane.xlu0 %2666  ;;  %v9355_v39 = vpop.xlane.xlu1 %2660  ;;  %v3143_v4 = vsel %vm478_vm0, %v9387_v42, -inf }
 0x398   :  { %3129 = vmax.xlane.f32.xlu1 %v3128_v52  ;;  %3132 = vmax.xlane.f32.xlu0 %v3131_v17  ;;  %v3140_v17 = vsel %vm478_vm0, %v9382_v0, -inf }
 0x399   :  { %v9371_v53 = vpop.xlane.xlu0 %2672  ;;  %v9373_v2 = vpop.xlane.xlu1 %2669 }
 0x39a   :  { %12463 = vst [vmem:[#allocation20_spill] sm:$0xff] %v9371_v53 }
 0x39c   :  { %3135 = vmax.xlane.f32.xlu1 %v3134_v50  ;;  %3138 = vmax.xlane.f32.xlu0 %v3137_v46  ;;  %v9405_v50 = vld [vmem:[%s11935_s1 + $0x70] sm:$0xff] }
 0x39d   :  { %v9389_v19 = vpop.xlane.xlu0 %2678  ;;  %v9391_v52 = vpop.xlane.xlu1 %2675  ;;  %v3149_v18 = vsel %vm478_vm0, %v9405_v50, -inf }
 0x39e   :  { %12464 = vst [vmem:[#allocation137_spill] sm:$0xff] %v9389_v19  ;;  %12465 = vst [vmem:[#allocation138_spill] sm:$0xff] %v9391_v52  ;;  %v328_v19 = vld [vmem:[%s11935_s1 + $0x158] sm:$0xff] }
 0x3a0   :  { %3141 = vmax.xlane.f32.xlu1 %v3140_v17  ;;  %3144 = vmax.xlane.f32.xlu0 %v3143_v4  ;;  %v9423_v17 = vld [vmem:[%s11935_s1 + $0x80] sm:$0xff] }
 0x3a1   :  { %v9407_v46 = vpop.xlane.xlu0 %2684  ;;  %v9409_v58 = vpop.xlane.xlu1 %2681  ;;  %v3155_v3 = vsel %vm478_vm0, %v9423_v17, -inf }
 0x3a2   :  { %12466 = vst [vmem:[#allocation139_spill] sm:$0xff] %v9407_v46  ;;  %12467 = vst [vmem:[#allocation140_spill] sm:$0xff] %v9409_v58  ;;  %v9655_v58 = vld [vmem:[%s11935_s1 + $0x148] sm:$0xff] }
 0x3a4   :  { %3147 = vmax.xlane.f32.xlu1 %v3146_v10  ;;  %3150 = vmax.xlane.f32.xlu0 %v3149_v18  ;;  %v9441_v10 = vld [vmem:[%s11935_s1 + $0x90] sm:$0xff] }
 0x3a5   :  { %v9425_v4 = vpop.xlane.xlu0 %2690  ;;  %v9427_v34 = vpop.xlane.xlu1 %2687  ;;  %v3161_v59 = vsel %vm478_vm0, %v9441_v10, -inf }
 0x3a6   :  { %12468 = vst [vmem:[#allocation141_spill] sm:$0xff] %v9425_v4  ;;  %12469 = vst [vmem:[#allocation142_spill] sm:$0xff] %v9427_v34 }
 0x3a8   :  { %3153 = vmax.xlane.f32.xlu1 %v3152_v5  ;;  %3156 = vmax.xlane.f32.xlu0 %v3155_v3  ;;  %v9459_v5 = vld [vmem:[%s11935_s1 + $0xa0] sm:$0xff] }
 0x3a9   :  { %v9443_v18 = vpop.xlane.xlu0 %2696  ;;  %v9445_v56 = vpop.xlane.xlu1 %2693  ;;  %v3167_v36 = vsel %vm478_vm0, %v9459_v5, -inf }
 0x3aa   :  { %12470 = vst [vmem:[#allocation143_spill] sm:$0xff] %v9443_v18  ;;  %12471 = vst [vmem:[#allocation144_spill] sm:$0xff] %v9445_v56 }
 0x3ac   :  { %3159 = vmax.xlane.f32.xlu1 %v3158_v25  ;;  %3162 = vmax.xlane.f32.xlu0 %v3161_v59  ;;  %v9477_v25 = vld [vmem:[%s11935_s1 + $0xb0] sm:$0xff] }
 0x3ad   :  { %v9461_v3 = vpop.xlane.xlu0 %2702  ;;  %v9463_v6 = vpop.xlane.xlu1 %2699  ;;  %v3173_v16 = vsel %vm478_vm0, %v9477_v25, -inf }
 0x3ae   :  { %12472 = vst [vmem:[#allocation145_spill] sm:$0xff] %v9461_v3  ;;  %12473 = vst [vmem:[#allocation146_spill] sm:$0xff] %v9463_v6 }
 0x3b0   :  { %3165 = vmax.xlane.f32.xlu1 %v3164_v29  ;;  %3168 = vmax.xlane.f32.xlu0 %v3167_v36  ;;  %v9495_v29 = vld [vmem:[%s11935_s1 + $0xb8] sm:$0xff] }
 0x3b1   :  { %v9479_v59 = vpop.xlane.xlu0 %2708  ;;  %v9481_v40 = vpop.xlane.xlu1 %2705 }
 0x3b2   :  { %12474 = vst [vmem:[#allocation147_spill] sm:$0xff] %v9479_v59  ;;  %12475 = vst [vmem:[#allocation148_spill] sm:$0xff] %v9481_v40  ;;  %v3176_v59 = vsel %vm478_vm0, %v9495_v29, -inf }
 0x3b4   :  { %3171 = vmax.xlane.f32.xlu1 %v3170_v45  ;;  %3174 = vmax.xlane.f32.xlu0 %v3173_v16  ;;  %v9513_v45 = vld [vmem:[%s11935_s1 + $0xc8] sm:$0xff] }
 0x3b5   :  { %v9497_v36 = vpop.xlane.xlu0 %2714  ;;  %v9499_v57 = vpop.xlane.xlu1 %2711  ;;  %v3182_v40 = vsel %vm478_vm0, %v9513_v45, -inf }
 0x3b6   :  { %12476 = vst [vmem:[#allocation149_spill] sm:$0xff] %v9497_v36  ;;  %12477 = vst [vmem:[#allocation150_spill] sm:$0xff] %v9499_v57  ;;  %v3185_v57 = vsel %vm478_vm0, %v9508_v24, -inf }
 0x3b8   :  { %3180 = vmax.xlane.f32.xlu0 %v3179_v7  ;;  %3177 = vmax.xlane.f32.xlu1 %v3176_v59  ;;  %v9531_v7 = vld [vmem:[%s11935_s1 + $0xd8] sm:$0xff] }
 0x3b9   :  { %v9515_v16 = vpop.xlane.xlu0 %2720  ;;  %v9517_v36 = vpop.xlane.xlu1 %2717  ;;  %v3188_v3 = vsel %vm478_vm0, %v9531_v7, -inf }
 0x3ba   :  { %12478 = vst [vmem:[#allocation151_spill] sm:$0xff] %v9515_v16  ;;  %12479 = vst [vmem:[#allocation152_spill] sm:$0xff] %v9517_v36  ;;  %v3191_v16 = vsel %vm478_vm0, %v9526_v8, -inf }
 0x3bc   :  { %3186 = vmax.xlane.f32.xlu0 %v3185_v57  ;;  %3183 = vmax.xlane.f32.xlu1 %v3182_v40  ;;  %v9549_v57 = vld [vmem:[%s11935_s1 + $0xe8] sm:$0xff] }
 0x3bd   :  { %v9533_v59 = vpop.xlane.xlu0 %2726  ;;  %v9535_v36 = vpop.xlane.xlu1 %2723  ;;  %v3194_v6 = vsel %vm478_vm0, %v9549_v57, -inf }
 0x3be   :  { %12480 = vst [vmem:[#allocation153_spill] sm:$0xff] %v9533_v59  ;;  %12481 = vst [vmem:[#allocation154_spill] sm:$0xff] %v9535_v36  ;;  %v3197_v59 = vsel %vm478_vm0, %v9544_v20, -inf }
 0x3c0   :  { %3192 = vmax.xlane.f32.xlu0 %v3191_v16  ;;  %3189 = vmax.xlane.f32.xlu1 %v3188_v3  ;;  %v9567_v16 = vld [vmem:[%s11935_s1 + $0xf8] sm:$0xff] }
 0x3c1   :  { %v9551_v40 = vpop.xlane.xlu0 %2732  ;;  %v9553_v36 = vpop.xlane.xlu1 %2729  ;;  %v3200_v18 = vsel %vm478_vm0, %v9567_v16, -inf }
 0x3c2   :  { %12482 = vst [vmem:[#allocation155_spill] sm:$0xff] %v9551_v40  ;;  %12483 = vst [vmem:[#allocation156_spill] sm:$0xff] %v9553_v36  ;;  %v3203_v40 = vsel %vm478_vm0, %v9562_v1, -inf }
 0x3c4   :  { %3198 = vmax.xlane.f32.xlu0 %v3197_v59  ;;  %3195 = vmax.xlane.f32.xlu1 %v3194_v6  ;;  %v9585_v59 = vld [vmem:[%s11935_s1 + $0x108] sm:$0xff] }
 0x3c5   :  { %v9569_v3 = vpop.xlane.xlu0 %2738  ;;  %v9571_v36 = vpop.xlane.xlu1 %2735  ;;  %v3206_v56 = vsel %vm478_vm0, %v9585_v59, -inf }
 0x3c6   :  { %12484 = vst [vmem:[#allocation157_spill] sm:$0xff] %v9569_v3  ;;  %12485 = vst [vmem:[#allocation158_spill] sm:$0xff] %v9571_v36  ;;  %v3209_v3 = vsel %vm478_vm0, %v9580_v9, -inf }
 0x3c8   :  { %3204 = vmax.xlane.f32.xlu0 %v3203_v40  ;;  %3201 = vmax.xlane.f32.xlu1 %v3200_v18  ;;  %v9603_v40 = vld [vmem:[%s11935_s1 + $0x118] sm:$0xff] }
 0x3c9   :  { %v9587_v6 = vpop.xlane.xlu0 %2744  ;;  %v9589_v36 = vpop.xlane.xlu1 %2741  ;;  %v3212_v4 = vsel %vm478_vm0, %v9603_v40, -inf }
 0x3ca   :  { %12486 = vst [vmem:[#allocation159_spill] sm:$0xff] %v9587_v6  ;;  %12487 = vst [vmem:[#allocation160_spill] sm:$0xff] %v9589_v36  ;;  %v3215_v6 = vsel %vm478_vm0, %v9598_v63, -inf }
 0x3cc   :  { %3210 = vmax.xlane.f32.xlu0 %v3209_v3  ;;  %3207 = vmax.xlane.f32.xlu1 %v3206_v56  ;;  %v9621_v3 = vld [vmem:[%s11935_s1 + $0x128] sm:$0xff] }
 0x3cd   :  { %v9605_v18 = vpop.xlane.xlu0 %2750  ;;  %v9607_v36 = vpop.xlane.xlu1 %2747  ;;  %v3218_v34 = vsel %vm478_vm0, %v9621_v3, -inf }
 0x3ce   :  { %12488 = vst [vmem:[#allocation161_spill] sm:$0xff] %v9605_v18  ;;  %12489 = vst [vmem:[#allocation162_spill] sm:$0xff] %v9607_v36  ;;  %v3221_v18 = vsel %vm478_vm0, %v9616_v32, -inf }
 0x3d0   :  { %3216 = vmax.xlane.f32.xlu0 %v3215_v6  ;;  %3213 = vmax.xlane.f32.xlu1 %v3212_v4  ;;  %v9639_v6 = vld [vmem:[%s11935_s1 + $0x138] sm:$0xff] }
 0x3d1   :  { %v9623_v56 = vpop.xlane.xlu0 %2756  ;;  %v9625_v36 = vpop.xlane.xlu1 %2753  ;;  %v3224_v46 = vsel %vm478_vm0, %v9639_v6, -inf }
 0x3d2   :  { %12490 = vst [vmem:[#allocation163_spill] sm:$0xff] %v9623_v56  ;;  %12491 = vst [vmem:[#allocation164_spill] sm:$0xff] %v9625_v36  ;;  %v3227_v56 = vsel %vm478_vm0, %v9634_v31, -inf }
 0x3d4   :  { %3222 = vmax.xlane.f32.xlu0 %v3221_v18  ;;  %3219 = vmax.xlane.f32.xlu1 %v3218_v34 }
 0x3d5   :  { %v9641_v4 = vpop.xlane.xlu0 %2762  ;;  %v9643_v36 = vpop.xlane.xlu1 %2759 }
 0x3d6   :  { %12492 = vst [vmem:[#allocation165_spill] sm:$0xff] %v9641_v4  ;;  %12493 = vst [vmem:[#allocation166_spill] sm:$0xff] %v9643_v36  ;;  %v3233_v36 = vsel %vm478_vm0, %v327_v35, -inf  ;;  %v3230_v4 = vsel %vm478_vm0, %v9655_v58, -inf  ;;  %v3236_v35 = vsel %vm478_vm0, %v328_v19, -inf  ;;  %v333_v19 = vld [vmem:[%s11935_s1 + $0x180] sm:$0xff] }
 0x3d8   :  { %3228 = vmax.xlane.f32.xlu0 %v3227_v56  ;;  %3225 = vmax.xlane.f32.xlu1 %v3224_v46 }
 0x3d9   :  { %v9657_v34 = vpop.xlane.xlu0 %2768  ;;  %v9659_v18 = vpop.xlane.xlu1 %2765 }
 0x3da   :  { %12494 = vst [vmem:[#allocation167_spill] sm:$0xff] %v9657_v34  ;;  %12495 = vst [vmem:[#allocation168_spill] sm:$0xff] %v9659_v18  ;;  %v3239_v18 = vsel %vm478_vm0, %v329_v12, -inf  ;;  %v331_v34 = vld [vmem:[%s11935_s1 + $0x170] sm:$0xff]  ;;  %v3242_v12 = vsel %vm478_vm0, %v330_v30, -inf }
 0x3db   :  { %v335_v30 = vld [vmem:[%s11935_s1 + $0x190] sm:$0xff] }
 0x3dc   :  { %3234 = vmax.xlane.f32.xlu0 %v3233_v36  ;;  %3231 = vmax.xlane.f32.xlu1 %v3230_v4 }
 0x3dd   :  { %v9670_v46 = vpop.xlane.xlu0 %2774  ;;  %v9672_v56 = vpop.xlane.xlu1 %2771 }
 0x3de   :  { %12496 = vst [vmem:[#allocation169_spill] sm:$0xff] %v9670_v46  ;;  %12497 = vst [vmem:[#allocation170_spill] sm:$0xff] %v9672_v56  ;;  %v3245_v56 = vsel %vm478_vm0, %v331_v34, -inf  ;;  %v332_v46 = vld [vmem:[%s11935_s1 + $0x178] sm:$0xff] }
 0x3df   :  { %v3248_v34 = vsel %vm478_vm0, %v332_v46, -inf  ;;  %v337_v46 = vld [vmem:[%s11935_s1 + $0x1a0] sm:$0xff] }
 0x3e0   :  { %3240 = vmax.xlane.f32.xlu0 %v3239_v18  ;;  %3237 = vmax.xlane.f32.xlu1 %v3236_v35 }
 0x3e1   :  { %v9682_v36 = vpop.xlane.xlu0 %2780  ;;  %v9684_v4 = vpop.xlane.xlu1 %2777 }
 0x3e2   :  { %12498 = vst [vmem:[#allocation171_spill] sm:$0xff] %v9682_v36  ;;  %12499 = vst [vmem:[#allocation172_spill] sm:$0xff] %v9684_v4  ;;  %v3251_v4 = vsel %vm478_vm0, %v333_v19, -inf  ;;  %v334_v36 = vld [vmem:[%s11935_s1 + $0x188] sm:$0xff] }
 0x3e3   :  { %v3254_v19 = vsel %vm478_vm0, %v334_v36, -inf  ;;  %v339_v36 = vld [vmem:[%s11935_s1 + $0x1b0] sm:$0xff] }
 0x3e4   :  { %3246 = vmax.xlane.f32.xlu0 %v3245_v56  ;;  %3243 = vmax.xlane.f32.xlu1 %v3242_v12 }
 0x3e5   :  { %v9694_v18 = vpop.xlane.xlu0 %2786  ;;  %v9696_v35 = vpop.xlane.xlu1 %2783 }
 0x3e6   :  { %12500 = vst [vmem:[#allocation173_spill] sm:$0xff] %v9694_v18  ;;  %12501 = vst [vmem:[#allocation174_spill] sm:$0xff] %v9696_v35  ;;  %v3257_v35 = vsel %vm478_vm0, %v335_v30, -inf  ;;  %v336_v18 = vld [vmem:[%s11935_s1 + $0x198] sm:$0xff] }
 0x3e7   :  { %v3260_v30 = vsel %vm478_vm0, %v336_v18, -inf  ;;  %v341_v18 = vld [vmem:[%s11935_s1 + $0x1c0] sm:$0xff] }
 0x3e8   :  { %3252 = vmax.xlane.f32.xlu0 %v3251_v4  ;;  %3249 = vmax.xlane.f32.xlu1 %v3248_v34 }
 0x3e9   :  { %v9706_v56 = vpop.xlane.xlu0 %2792  ;;  %v9708_v12 = vpop.xlane.xlu1 %2789 }
 0x3ea   :  { %12502 = vst [vmem:[#allocation24_spill] sm:$0xff] %v9706_v56  ;;  %12503 = vst [vmem:[#allocation21_spill] sm:$0xff] %v9708_v12  ;;  %v3263_v12 = vsel %vm478_vm0, %v337_v46, -inf  ;;  %v338_v56 = vld [vmem:[%s11935_s1 + $0x1a8] sm:$0xff] }
 0x3eb   :  { %v3266_v46 = vsel %vm478_vm0, %v338_v56, -inf  ;;  %v343_v56 = vld [vmem:[%s11935_s1 + $0x1d0] sm:$0xff] }
 0x3ec   :  { %3258 = vmax.xlane.f32.xlu0 %v3257_v35  ;;  %3255 = vmax.xlane.f32.xlu1 %v3254_v19 }
 0x3ed   :  { %v9718_v4 = vpop.xlane.xlu0 %2798  ;;  %v9720_v34 = vpop.xlane.xlu1 %2795 }
 0x3ee   :  { %12504 = vst [vmem:[#allocation22_spill] sm:$0xff] %v9718_v4  ;;  %12505 = vst [vmem:[#allocation25_spill] sm:$0xff] %v9720_v34  ;;  %v3269_v34 = vsel %vm478_vm0, %v339_v36, -inf  ;;  %v340_v4 = vld [vmem:[%s11935_s1 + $0x1b8] sm:$0xff] }
 0x3ef   :  { %v3272_v36 = vsel %vm478_vm0, %v340_v4, -inf  ;;  %v344_v4 = vld [vmem:[%s11935_s1 + $0x1d8] sm:$0xff] }
 0x3f0   :  { %3264 = vmax.xlane.f32.xlu0 %v3263_v12  ;;  %3261 = vmax.xlane.f32.xlu1 %v3260_v30 }
 0x3f1   :  { %v9730_v35 = vpop.xlane.xlu0 %2804  ;;  %v9732_v19 = vpop.xlane.xlu1 %2801 }
 0x3f2   :  { %12506 = vst [vmem:[#allocation28_spill] sm:$0xff] %v9730_v35  ;;  %12507 = vst [vmem:[#allocation29_spill] sm:$0xff] %v9732_v19  ;;  %v3275_v19 = vsel %vm478_vm0, %v341_v18, -inf  ;;  %v342_v35 = vld [vmem:[%s11935_s1 + $0x1c8] sm:$0xff] }
 0x3f3   :  { %v3278_v18 = vsel %vm478_vm0, %v342_v35, -inf }
 0x3f4   :  { %3270 = vmax.xlane.f32.xlu0 %v3269_v34  ;;  %3267 = vmax.xlane.f32.xlu1 %v3266_v46 }
 0x3f5   :  { %v9742_v12 = vpop.xlane.xlu0 %2810  ;;  %v9744_v30 = vpop.xlane.xlu1 %2807 }
 0x3f6   :  { %12508 = vst [vmem:[#allocation32_spill] sm:$0xff] %v9742_v12  ;;  %12509 = vst [vmem:[#allocation33_spill] sm:$0xff] %v9744_v30  ;;  %v3281_v30 = vsel %vm478_vm0, %v343_v56, -inf }
 0x3f8   :  { %3276 = vmax.xlane.f32.xlu0 %v3275_v19  ;;  %3273 = vmax.xlane.f32.xlu1 %v3272_v36  ;;  %v3284_v19 = vsel %vm478_vm0, %v344_v4, -inf }
 0x3f9   :  { %v9754_v34 = vpop.xlane.xlu0 %2816  ;;  %v9756_v46 = vpop.xlane.xlu1 %2813 }
 0x3fa   :  { %12510 = vst [vmem:[#allocation36_spill] sm:$0xff] %v9754_v34  ;;  %12511 = vst [vmem:[#allocation37_spill] sm:$0xff] %v9756_v46 }
 0x3fc   :  { %3282 = vmax.xlane.f32.xlu0 %v3281_v30  ;;  %3279 = vmax.xlane.f32.xlu1 %v3278_v18 }
 0x3fd   :  { %v9763_v12 = vpop.xlane.xlu0 %2822  ;;  %v9765_v15 = vpop.xlane.xlu1 %2819 }
 0x3fe   :  { %12512 = vst [vmem:[#allocation40_spill] sm:$0xff] %v9763_v12  ;;  %12513 = vst [vmem:[#allocation41_spill] sm:$0xff] %v9765_v15 }
 0x400   :  { %3285 = vmax.xlane.f32.xlu1 %v3284_v19 }
 0x401   :  { %v9768_v36 = vpop.xlane.xlu0 %2828  ;;  %v9770_v34 = vpop.xlane.xlu1 %2825 }
 0x402   :  { %12514 = vst [vmem:[#allocation44_spill] sm:$0xff] %v9768_v36  ;;  %12515 = vst [vmem:[#allocation45_spill] sm:$0xff] %v9770_v34 }
 0x405   :  { %v9772_v56 = vpop.xlane.xlu0 %2834  ;;  %v9774_v35 = vpop.xlane.xlu1 %2831 }
 0x406   :  { %12516 = vst [vmem:[#allocation48_spill] sm:$0xff] %v9772_v56  ;;  %12517 = vst [vmem:[#allocation49_spill] sm:$0xff] %v9774_v35 }
 0x409   :  { %v9776_v46 = vpop.xlane.xlu0 %2840  ;;  %v9778_v52 = vpop.xlane.xlu1 %2837 }
 0x40a   :  { %12518 = vst [vmem:[#allocation52_spill] sm:$0xff] %v9776_v46  ;;  %12519 = vst [vmem:[#allocation53_spill] sm:$0xff] %v9778_v52 }
 0x40d   :  { %v9780_v30 = vpop.xlane.xlu0 %2846  ;;  %v9782_v18 = vpop.xlane.xlu1 %2843 }
 0x40e   :  { %12520 = vst [vmem:[#allocation56_spill] sm:$0xff] %v9780_v30  ;;  %12521 = vst [vmem:[#allocation57_spill] sm:$0xff] %v9782_v18 }
 0x411   :  { %v3109_v12 = vpop.xlane.xlu0 %3108  ;;  %v9784_v15 = vpop.xlane.xlu1 %2849 }
 0x412   :  { %12522 = vst [vmem:[#allocation60_spill] sm:$0xff] %v9784_v15  ;;  %v3299_v4 = vsub.f32 %v9292_v33, %v3109_v12 }
 0x414   :  { %v3363_v19 = vmul.f32 %v3299_v4, %v9038_v41 }
 0x415   :  { %v3115_v36 = vpop.xlane.xlu0 %3114  ;;  %v3112_v34 = vpop.xlane.xlu1 %3111 }
 0x416   :  { %v3427_v56 = vmul.f32 1.442695, %v3363_v19  ;;  %v3301_v35 = vsub.f32 %v9301_v22, %v3115_v36  ;;  %v3300_v46 = vsub.f32 %v9306_v60, %v3112_v34 }
 0x418   :  { %5812 = vpow2.f32 %v3427_v56  ;;  %v3365_v52 = vmul.f32 %v3301_v35, %v9038_v41  ;;  %v3364_v30 = vmul.f32 %v3300_v46, %v9038_v41 }
 0x419   :  { %v3121_v18 = vpop.xlane.xlu0 %3120  ;;  %v3118_v53 = vpop.xlane.xlu1 %3117 }
 0x41a   :  { %v3431_v62 = vmul.f32 1.442695, %v3365_v52  ;;  %v3429_v15 = vmul.f32 1.442695, %v3364_v30  ;;  %v3303_v33 = vsub.f32 %v9316_v61, %v3121_v18  ;;  %v3302_v12 = vsub.f32 %v9321_v47, %v3118_v53 }
 0x41c   :  { %5814 = vpow2.f32 %v3431_v62  ;;  %v3367_v4 = vmul.f32 %v3303_v33, %v9038_v41  ;;  %v3366_v22 = vmul.f32 %v3302_v12, %v9038_v41 }
 0x41d   :  { %5816 = vpow2.f32 %v3429_v15  ;;  %v3127_v60 = vpop.xlane.xlu0 %3126  ;;  %v3124_v34 = vpop.xlane.xlu1 %3123 }
 0x41e   :  { %v3435_v36 = vmul.f32 1.442695, %v3367_v4  ;;  %v3433_v56 = vmul.f32 1.442695, %v3366_v22  ;;  %v3305_v46 = vsub.f32 %v9330_v49, %v3127_v60  ;;  %v3304_v35 = vsub.f32 %v9335_v48, %v3124_v34 }
 0x420   :  { %5818 = vpow2.f32 %v3435_v36  ;;  %v3369_v52 = vmul.f32 %v3305_v46, %v9038_v41  ;;  %v3368_v61 = vmul.f32 %v3304_v35, %v9038_v41 }
 0x421   :  { %5820 = vpow2.f32 %v3433_v56  ;;  %v3130_v62 = vpop.xlane.xlu1 %3129  ;;  %v3133_v47 = vpop.xlane.xlu0 %3132 }
 0x422   :  { %v3439_v53 = vmul.f32 1.442695, %v3369_v52  ;;  %v3437_v30 = vmul.f32 1.442695, %v3368_v61  ;;  %v3306_v15 = vsub.f32 %v9346_v26, %v3130_v62  ;;  %v3307_v18 = vsub.f32 %v9351_v23, %v3133_v47 }
 0x424   :  { %5822 = vpow2.f32 %v3439_v53  ;;  %v3370_v19 = vmul.f32 %v3306_v15, %v9038_v41  ;;  %v3371_v49 = vmul.f32 %v3307_v18, %v9038_v41 }
 0x425   :  { %v5813_v48 = vpop.eup %5812  ;;  %5824 = vpow2.f32 %v3437_v30  ;;  %v3136_v33 = vpop.xlane.xlu1 %3135 }
 0x426   :  { %v3139_v12 = vpop.xlane.xlu0 %3138  ;;  %v3441_v4 = vmul.f32 1.442695, %v3370_v19  ;;  %v3443_v22 = vmul.f32 1.442695, %v3371_v49  ;;  %v3555_v60 = vsel %vm478_vm0, %v5813_v48, 0.0  ;;  %v3308_v34 = vsub.f32 %v9364_v21, %v3136_v33 }
 0x427   :  { %3556 = vadd.xlane.f32.xlu0 %v3555_v60  ;;  %v3309_v26 = vsub.f32 %v9369_v28, %v3139_v12  ;;  %v6324_v12 = vld [vmem:[%s11934_s0] sm:$0xff] }
 0x428   :  { %5826 = vpow2.f32 %v3441_v4  ;;  %v3372_v23 = vmul.f32 %v3308_v34, %v9038_v41  ;;  %v3747_v4 = vmul.f32 %v6324_v12, %v5813_v48 }
 0x429   :  { %v5815_v36 = vpop.eup %5814  ;;  %5828 = vpow2.f32 %v3443_v22  ;;  %v3373_v56 = vmul.f32 %v3309_v26, %v9038_v41  ;;  %v3142_v46 = vpop.xlane.xlu1 %3141 }
 0x42a   :  { %v3145_v35 = vpop.xlane.xlu0 %3144  ;;  %v5817_v52 = vpop.eup %5816  ;;  %v3445_v61 = vmul.f32 1.442695, %v3372_v23  ;;  %v3561_v62 = vsel %vm478_vm0, %v5815_v36, 0.0  ;;  %v3310_v47 = vsub.f32 %v9382_v0, %v3142_v46  ;;  %v3811_v48 = vsel %vm478_vm0, %v3747_v4, 0.0  ;;  %v6326_v4 = vld [vmem:[%s11934_s0 + $0x10] sm:$0xff] }
 0x42b   :  { %3562 = vadd.xlane.f32.xlu0 %v3561_v62  ;;  %v3558_v21 = vsel %vm478_vm0, %v5817_v52, 0.0  ;;  %v3447_v28 = vmul.f32 1.442695, %v3373_v56  ;;  %v3311_v30 = vsub.f32 %v9387_v42, %v3145_v35 }
 0x42c   :  { %5830 = vpow2.f32 %v3445_v61  ;;  %3559 = vadd.xlane.f32.xlu1 %v3558_v21  ;;  %v3374_v53 = vmul.f32 %v3310_v47, %v9038_v41 }
 0x42d   :  { %v9814_v15 = vpop.eup %5818  ;;  %v3148_v18 = vpop.xlane.xlu1 %3147  ;;  %5832 = vpow2.f32 %v3447_v28  ;;  %v3375_v42 = vmul.f32 %v3311_v30, %v9038_v41  ;;  %v6325_v30 = vld [vmem:[%s11934_s0 + $0x8] sm:$0xff] }
 0x42e   :  { %v5821_v19 = vpop.eup %5820  ;;  %v3567_v49 = vsel %vm478_vm0, %v9814_v15, 0.0  ;;  %v3151_v33 = vpop.xlane.xlu0 %3150  ;;  %v3449_v22 = vmul.f32 1.442695, %v3374_v53  ;;  %v3312_v60 = vsub.f32 %v9400_v51, %v3148_v18  ;;  %v3748_v18 = vmul.f32 %v6325_v30, %v5817_v52 }
 0x42f   :  { %3568 = vadd.xlane.f32.xlu0 %v3567_v49  ;;  %v3564_v0 = vsel %vm478_vm0, %v5821_v19, 0.0  ;;  %v3451_v61 = vmul.f32 1.442695, %v3375_v42  ;;  %v3313_v62 = vsub.f32 %v9405_v50, %v3151_v33 }
 0x430   :  { %3565 = vadd.xlane.f32.xlu1 %v3564_v0  ;;  %5834 = vpow2.f32 %v3449_v22  ;;  %v3376_v51 = vmul.f32 %v3312_v60, %v9038_v41  ;;  %v3749_v22 = vmul.f32 %v6326_v4, %v5815_v36  ;;  %v3814_v52 = vsel %vm478_vm0, %v3748_v18, 0.0 }
 0x431   :  { %v9824_v34 = vpop.eup %5822  ;;  %v3154_v35 = vpop.xlane.xlu1 %3153  ;;  %5836 = vpow2.f32 %v3451_v61  ;;  %v3377_v0 = vmul.f32 %v3313_v62, %v9038_v41  ;;  %v6327_v62 = vld [vmem:[%s11934_s0 + $0x18] sm:$0xff] }
 0x432   :  { %v9826_v26 = vpop.eup %5824  ;;  %v3573_v23 = vsel %vm478_vm0, %v9824_v34, 0.0  ;;  %v3157_v56 = vpop.xlane.xlu0 %3156  ;;  %v3453_v50 = vmul.f32 1.442695, %v3376_v51  ;;  %v3817_v61 = vsel %vm478_vm0, %v3749_v22, 0.0  ;;  %v3314_v51 = vsub.f32 %v9418_v38, %v3154_v35  ;;  %v6328_v35 = vld [vmem:[%s11934_s0 + $0x20] sm:$0xff] }
 0x433   :  { %3574 = vadd.xlane.f32.xlu0 %v3573_v23  ;;  %v3570_v46 = vsel %vm478_vm0, %v9826_v26, 0.0  ;;  %v3455_v23 = vmul.f32 1.442695, %v3377_v0  ;;  %v3751_v0 = vmul.f32 %v6328_v35, %v9814_v15  ;;  %v6329_v15 = vld [vmem:[%s11934_s0 + $0x28] sm:$0xff] }
 0x434   :  { %3571 = vadd.xlane.f32.xlu1 %v3570_v46  ;;  %5838 = vpow2.f32 %v3453_v50  ;;  %v3315_v50 = vsub.f32 %v9423_v17, %v3157_v56  ;;  %v3378_v38 = vmul.f32 %v3314_v51, %v9038_v41 }
 0x435   :  { %v9835_v47 = vpop.eup %5826  ;;  %v9846_v49 = vpop.xlane.xlu1 %3159  ;;  %5840 = vpow2.f32 %v3455_v23 }
 0x436   :  { %v9837_v21 = vpop.eup %5828  ;;  %v3576_v28 = vsel %vm478_vm0, %v9835_v47, 0.0  ;;  %v9841_v53 = vpop.xlane.xlu0 %3162  ;;  %v3379_v17 = vmul.f32 %v3315_v50, %v9038_v41  ;;  %v3457_v23 = vmul.f32 1.442695, %v3378_v38  ;;  %v3316_v38 = vsub.f32 %v9436_v27, %v9846_v49  ;;  %v6331_v49 = vld [vmem:[%s11934_s0 + $0x38] sm:$0xff] }
 0x437   :  { %3812 = vadd.xlane.f32.xlu0 %v3811_v48  ;;  %v3579_v33 = vsel %vm478_vm0, %v9837_v21, 0.0 }
 0x438   :  { %3577 = vadd.xlane.f32.xlu1 %v3576_v28  ;;  %v3750_v28 = vmul.f32 %v6327_v62, %v5821_v19  ;;  %v3459_v51 = vmul.f32 1.442695, %v3379_v17  ;;  %5842 = vpow2.f32 %v3457_v23  ;;  %v3380_v27 = vmul.f32 %v3316_v38, %v9038_v41 }
 0x439   :  { %v9851_v12 = vpop.eup %5830  ;;  %v9859_v60 = vpop.xlane.xlu1 %3165  ;;  %v3754_v23 = vmul.f32 %v6331_v49, %v9835_v47 }
 0x43a   :  { %v9856_v42 = vpop.xlane.xlu0 %3168  ;;  %v3582_v46 = vsel %vm478_vm0, %v9851_v12, 0.0  ;;  %v9863_v48 = vpop.eup %5832  ;;  %v3820_v19 = vsel %vm478_vm0, %v3750_v28, 0.0  ;;  %5844 = vpow2.f32 %v3459_v51  ;;  %v3461_v51 = vmul.f32 1.442695, %v3380_v27 }
 0x43b   :  { %3580 = vadd.xlane.f32.xlu0 %v3579_v33  ;;  %v3585_v18 = vsel %vm478_vm0, %v9863_v48, 0.0 }
 0x43c   :  { %3815 = vadd.xlane.f32.xlu1 %v3814_v52  ;;  %5846 = vpow2.f32 %v3461_v51 }
 0x43d   :  { %v9872_v30 = vpop.xlane.xlu1 %3171  ;;  %v9877_v33 = vpop.eup %5834 }
 0x43e   :  { %v9867_v36 = vpop.xlane.xlu0 %3174  ;;  %v3588_v22 = vsel %vm478_vm0, %v9877_v33, 0.0  ;;  %v9892_v52 = vpop.eup %5836 }
 0x43f   :  { %3583 = vadd.xlane.f32.xlu0 %v3582_v46  ;;  %v3823_v46 = vsel %vm478_vm0, %v3751_v0, 0.0  ;;  %v3591_v62 = vsel %vm478_vm0, %v9892_v52, 0.0  ;;  %v3321_v51 = vsub.f32 %v9477_v25, %v9867_v36  ;;  %v6334_v25 = vld [vmem:[%s11934_s0 + $0x50] sm:$0xff] }
 0x440   :  { %3818 = vadd.xlane.f32.xlu1 %v3817_v61  ;;  %v3752_v61 = vmul.f32 %v6329_v15, %v9826_v26  ;;  %v3757_v36 = vmul.f32 %v6334_v25, %v9863_v48  ;;  %v6335_v48 = vld [vmem:[%s11934_s0 + $0x58] sm:$0xff] }
 0x441   :  { %v9885_v4 = vpop.xlane.xlu1 %3177  ;;  %v9901_v28 = vpop.eup %5838 }
 0x442   :  { %v9890_v56 = vpop.xlane.xlu0 %3180  ;;  %v3826_v0 = vsel %vm478_vm0, %v3752_v61, 0.0  ;;  %v9918_v17 = vpop.eup %5840 }
 0x443   :  { %3586 = vadd.xlane.f32.xlu0 %v3585_v18  ;;  %v6330_v18 = vld [vmem:[%s11934_s0 + $0x30] sm:$0xff]  ;;  %v3597_v15 = vsel %vm478_vm0, %v9918_v17, 0.0 }
 0x444   :  { %3821 = vadd.xlane.f32.xlu1 %v3820_v19  ;;  %v3753_v50 = vmul.f32 %v6330_v18, %v9824_v34  ;;  %v3594_v19 = vsel %vm478_vm0, %v9901_v28, 0.0  ;;  %v345_v18 = vld [vmem:[%s11935_s1 + $0x1e0] sm:$0xff] }
 0x445   :  { %v9909_v35 = vpop.xlane.xlu1 %3183 }
 0x446   :  { %v9911_v26 = vpop.xlane.xlu0 %3186  ;;  %v3829_v34 = vsel %vm478_vm0, %v3753_v50, 0.0  ;;  %v3832_v50 = vsel %vm478_vm0, %v3754_v23, 0.0  ;;  %v3324_v25 = vsub.f32 %v9513_v45, %v9909_v35 }
 0x447   :  { %3589 = vadd.xlane.f32.xlu0 %v3588_v22  ;;  %v3317_v22 = vsub.f32 %v9441_v10, %v9841_v53  ;;  %v3318_v53 = vsub.f32 %v9454_v43, %v9859_v60  ;;  %v3287_v43 = vsel %vm478_vm0, %v345_v18, -inf  ;;  %v347_v18 = vld [vmem:[%s11935_s1 + $0x1f0] sm:$0xff] }
 0x448   :  { %3824 = vadd.xlane.f32.xlu1 %v3823_v46  ;;  %v3388_v45 = vmul.f32 %v3324_v25, %v9038_v41 }
 0x449   :  { %v9926_v46 = vpop.xlane.xlu1 %3189  ;;  %v3381_v10 = vmul.f32 %v3317_v22, %v9038_v41  ;;  %v3382_v60 = vmul.f32 %v3318_v53, %v9038_v41  ;;  %v9950_v22 = vpop.eup %5842 }
 0x44a   :  { %v9933_v61 = vpop.xlane.xlu0 %3192 }
 0x44b   :  { %3592 = vadd.xlane.f32.xlu0 %v3591_v62  ;;  %v6332_v62 = vld [vmem:[%s11934_s0 + $0x40] sm:$0xff]  ;;  %v3463_v38 = vmul.f32 1.442695, %v3381_v10  ;;  %v3465_v23 = vmul.f32 1.442695, %v3382_v60  ;;  %v3600_v10 = vsel %vm478_vm0, %v9950_v22, 0.0 }
 0x44c   :  { %3827 = vadd.xlane.f32.xlu1 %v3826_v0  ;;  %v3755_v47 = vmul.f32 %v6332_v62, %v9837_v21  ;;  %v3319_v0 = vsub.f32 %v9459_v5, %v9856_v42  ;;  %v3320_v42 = vsub.f32 %v9472_v11, %v9872_v30 }
 0x44d   :  { %v9948_v21 = vpop.xlane.xlu1 %3195  ;;  %5848 = vpow2.f32 %v3463_v38 }
 0x44e   :  { %v9956_v49 = vpop.xlane.xlu0 %3198  ;;  %v3383_v5 = vmul.f32 %v3319_v0, %v9038_v41  ;;  %5850 = vpow2.f32 %v3465_v23  ;;  %v3385_v0 = vmul.f32 %v3321_v51, %v9038_v41 }
 0x44f   :  { %3595 = vadd.xlane.f32.xlu0 %v3594_v19  ;;  %v3835_v19 = vsel %vm478_vm0, %v3755_v47, 0.0  ;;  %v3384_v47 = vmul.f32 %v3320_v42, %v9038_v41 }
 0x450   :  { %3830 = vadd.xlane.f32.xlu1 %v3829_v34  ;;  %v6333_v34 = vld [vmem:[%s11934_s0 + $0x48] sm:$0xff]  ;;  %v3467_v11 = vmul.f32 1.442695, %v3383_v5  ;;  %v3758_v5 = vmul.f32 %v6335_v48, %v9877_v33  ;;  %v348_v33 = vld [vmem:[%s11935_s1 + $0x1f8] sm:$0xff] }
 0x451   :  { %v3756_v27 = vmul.f32 %v6333_v34, %v9851_v12  ;;  %v346_v12 = vld [vmem:[%s11935_s1 + $0x1e8] sm:$0xff]  ;;  %v9971_v62 = vpop.xlane.xlu1 %3201  ;;  %v3469_v60 = vmul.f32 1.442695, %v3384_v47  ;;  %v3841_v34 = vsel %vm478_vm0, %v3757_v36, 0.0  ;;  %v6336_v36 = vld [vmem:[%s11934_s0 + $0x60] sm:$0xff] }
 0x452   :  { %v3290_v38 = vsel %vm478_vm0, %v346_v12, -inf  ;;  %5852 = vpow2.f32 %v3467_v11  ;;  %v3844_v51 = vsel %vm478_vm0, %v3758_v5, 0.0 }
 0x453   :  { %3598 = vadd.xlane.f32.xlu0 %v3597_v15  ;;  %v9961_v15 = vpop.eup %5844  ;;  %v3838_v53 = vsel %vm478_vm0, %v3756_v27, 0.0  ;;  %5854 = vpow2.f32 %v3469_v60 }
 0x454   :  { %3833 = vadd.xlane.f32.xlu1 %v3832_v50  ;;  %v3603_v30 = vsel %vm478_vm0, %v9961_v15, 0.0  ;;  %v9979_v50 = vpop.xlane.xlu0 %3204  ;;  %v9993_v23 = vpop.eup %5846 }
 0x455   :  { %v9991_v27 = vpop.xlane.xlu1 %3207  ;;  %v3606_v12 = vsel %vm478_vm0, %v9993_v23, 0.0 }
 0x457   :  { %3288 = vmax.xlane.f32.xlu0 %v3287_v43  ;;  %v3293_v43 = vsel %vm478_vm0, %v347_v18, -inf }
 0x458   :  { %3836 = vadd.xlane.f32.xlu1 %v3835_v19  ;;  %v3322_v19 = vsub.f32 %v9495_v29, %v9885_v4  ;;  %v9999_v42 = vpop.xlane.xlu0 %3210  ;;  %v3323_v29 = vsub.f32 %v9490_v55, %v9890_v56 }
 0x459   :  { %v10012_v11 = vpop.xlane.xlu1 %3213 }
 0x45a   :  { %v3386_v4 = vmul.f32 %v3322_v19, %v9038_v41  ;;  %v3387_v55 = vmul.f32 %v3323_v29, %v9038_v41 }
 0x45b   :  { %3839 = vadd.xlane.f32.xlu0 %v3838_v53  ;;  %v10004_v53 = vpop.eup %5848 }
 0x45c   :  { %3601 = vadd.xlane.f32.xlu1 %v3600_v10  ;;  %v3471_v10 = vmul.f32 1.442695, %v3385_v0  ;;  %v3473_v56 = vmul.f32 1.442695, %v3386_v4  ;;  %v10017_v47 = vpop.xlane.xlu0 %3216  ;;  %v10019_v18 = vpop.eup %5850  ;;  %v3475_v60 = vmul.f32 1.442695, %v3387_v55  ;;  %v3325_v0 = vsub.f32 %v9508_v24, %v9911_v26 }
 0x45d   :  { %v3612_v19 = vsel %vm478_vm0, %v10019_v18, 0.0  ;;  %v10034_v48 = vpop.xlane.xlu1 %3219  ;;  %v3477_v4 = vmul.f32 1.442695, %v3388_v45 }
 0x45e   :  { %5856 = vpow2.f32 %v3471_v10  ;;  %v3389_v26 = vmul.f32 %v3325_v0, %v9038_v41  ;;  %v6340_v0 = vld [vmem:[%s11934_s0 + $0x80] sm:$0xff] }
 0x45f   :  { %3604 = vadd.xlane.f32.xlu0 %v3603_v30  ;;  %v3609_v30 = vsel %vm478_vm0, %v10004_v53, 0.0  ;;  %5858 = vpow2.f32 %v3473_v56 }
 0x460   :  { %3291 = vmax.xlane.f32.xlu1 %v3290_v38  ;;  %v3296_v38 = vsel %vm478_vm0, %v348_v33, -inf  ;;  %v10037_v35 = vpop.xlane.xlu0 %3222  ;;  %5860 = vpow2.f32 %v3475_v60  ;;  %v3479_v56 = vmul.f32 1.442695, %v3389_v26 }
 0x461   :  { %v10056_v55 = vpop.xlane.xlu1 %3225  ;;  %5862 = vpow2.f32 %v3477_v4 }
 0x462   :  { %5864 = vpow2.f32 %v3479_v56  ;;  %v6342_v56 = vld [vmem:[%s11934_s0 + $0x90] sm:$0xff] }
 0x463   :  { %3294 = vmax.xlane.f32.xlu0 %v3293_v43  ;;  %v3759_v43 = vmul.f32 %v6336_v36, %v9892_v52  ;;  %v6337_v52 = vld [vmem:[%s11934_s0 + $0x68] sm:$0xff] }
 0x464   :  { %3842 = vadd.xlane.f32.xlu1 %v3841_v34  ;;  %v10032_v34 = vpop.eup %5852  ;;  %v3760_v24 = vmul.f32 %v6337_v52, %v9901_v28  ;;  %v6338_v28 = vld [vmem:[%s11934_s0 + $0x70] sm:$0xff] }
 0x465   :  { %v3847_v5 = vsel %vm478_vm0, %v3759_v43, 0.0  ;;  %v3615_v10 = vsel %vm478_vm0, %v10032_v34, 0.0  ;;  %v10047_v29 = vpop.eup %5854  ;;  %v3761_v33 = vmul.f32 %v6338_v28, %v9918_v17  ;;  %v6339_v17 = vld [vmem:[%s11934_s0 + $0x78] sm:$0xff]  ;;  %v10081_v45 = vpop.xlane.xlu1 %3231 }
 0x467   :  { %3845 = vadd.xlane.f32.xlu0 %v3844_v51  ;;  %v3850_v51 = vsel %vm478_vm0, %v3760_v24, 0.0  ;;  %v3853_v36 = vsel %vm478_vm0, %v3761_v33, 0.0 }
 0x468   :  { %3607 = vadd.xlane.f32.xlu1 %v3606_v12  ;;  %v3326_v12 = vsub.f32 %v9531_v7, %v9926_v46  ;;  %v10062_v7 = vpop.xlane.xlu0 %3228 }
 0x469   :  { %v10100_v28 = vpop.xlane.xlu1 %3237 }
 0x46a   :  { %v3390_v25 = vmul.f32 %v3326_v12, %v9038_v41 }
 0x46b   :  { %3610 = vadd.xlane.f32.xlu0 %v3609_v30  ;;  %v3327_v30 = vsub.f32 %v9526_v8, %v9933_v61  ;;  %v10064_v46 = vpop.eup %5856  ;;  %v3762_v8 = vmul.f32 %v6339_v17, %v9950_v22  ;;  %v3328_v22 = vsub.f32 %v9549_v57, %v9948_v21  ;;  %v6341_v21 = vld [vmem:[%s11934_s0 + $0x88] sm:$0xff] }
 0x46c   :  { %3297 = vmax.xlane.f32.xlu1 %v3296_v38  ;;  %v3618_v38 = vsel %vm478_vm0, %v10047_v29, 0.0  ;;  %v3621_v43 = vsel %vm478_vm0, %v10064_v46, 0.0  ;;  %v10075_v60 = vpop.eup %5858  ;;  %v10085_v52 = vpop.xlane.xlu0 %3234 }
 0x46d   :  { %v3391_v61 = vmul.f32 %v3327_v30, %v9038_v41  ;;  %v3856_v24 = vsel %vm478_vm0, %v3762_v8, 0.0  ;;  %v3624_v4 = vsel %vm478_vm0, %v10075_v60, 0.0  ;;  %v3392_v57 = vmul.f32 %v3328_v22, %v9038_v41  ;;  %v6344_v22 = vld [vmem:[%s11934_s0 + $0xa0] sm:$0xff] }
 0x46e   :  { %v3765_v30 = vmul.f32 %v6342_v56, %v10004_v53  ;;  %v3331_v8 = vsub.f32 %v9562_v1, %v9979_v50  ;;  %v6343_v1 = vld [vmem:[%s11934_s0 + $0x98] sm:$0xff] }
 0x46f   :  { %3613 = vadd.xlane.f32.xlu0 %v3612_v19  ;;  %v3763_v19 = vmul.f32 %v6340_v0, %v9961_v15  ;;  %v3483_v26 = vmul.f32 1.442695, %v3391_v61  ;;  %v10092_v15 = vpop.eup %5860  ;;  %v10121_v0 = vpop.xlane.xlu1 %3243  ;;  %v3766_v50 = vmul.f32 %v6343_v1, %v10019_v18 }
 0x470   :  { %3848 = vadd.xlane.f32.xlu1 %v3847_v5  ;;  %v3481_v5 = vmul.f32 1.442695, %v3390_v25  ;;  %v10105_v33 = vpop.xlane.xlu0 %3240  ;;  %v10113_v25 = vpop.eup %5862 }
 0x471   :  { %v3859_v12 = vsel %vm478_vm0, %v3763_v19, 0.0  ;;  %v10118_v61 = vpop.eup %5864  ;;  %v3395_v19 = vmul.f32 %v3331_v8, %v9038_v41  ;;  %v3868_v18 = vsel %vm478_vm0, %v3766_v50, 0.0 }
 0x472   :  { %5866 = vpow2.f32 %v3481_v5  ;;  %v3633_v5 = vsel %vm478_vm0, %v10118_v61, 0.0 }
 0x473   :  { %3616 = vadd.xlane.f32.xlu0 %v3615_v10  ;;  %v3329_v10 = vsub.f32 %v9544_v20, %v9956_v49  ;;  %5868 = vpow2.f32 %v3483_v26  ;;  %v3627_v49 = vsel %vm478_vm0, %v10092_v15, 0.0 }
 0x474   :  { %3851 = vadd.xlane.f32.xlu1 %v3850_v51  ;;  %v3764_v51 = vmul.f32 %v6341_v21, %v9993_v23  ;;  %v3330_v23 = vsub.f32 %v9567_v16, %v9971_v62  ;;  %v3630_v16 = vsel %vm478_vm0, %v10113_v25, 0.0  ;;  %v10126_v62 = vpop.xlane.xlu0 %3246  ;;  %v3333_v21 = vsub.f32 %v9580_v9, %v9999_v42 }
 0x475   :  { %v3393_v20 = vmul.f32 %v3329_v10, %v9038_v41  ;;  %v3332_v10 = vsub.f32 %v9585_v59, %v9991_v27 }
 0x476   :  { %v3394_v53 = vmul.f32 %v3330_v23, %v9038_v41  ;;  %v3397_v42 = vmul.f32 %v3333_v21, %v9038_v41 }
 0x477   :  { %3619 = vadd.xlane.f32.xlu0 %v3618_v38  ;;  %v3485_v38 = vmul.f32 1.442695, %v3392_v57  ;;  %v3487_v17 = vmul.f32 1.442695, %v3393_v20  ;;  %v3491_v57 = vmul.f32 1.442695, %v3395_v19  ;;  %v3396_v59 = vmul.f32 %v3332_v10, %v9038_v41 }
 0x478   :  { %3854 = vadd.xlane.f32.xlu1 %v3853_v36  ;;  %v3862_v36 = vsel %vm478_vm0, %v3764_v51, 0.0  ;;  %v3489_v26 = vmul.f32 1.442695, %v3394_v53  ;;  %v10148_v51 = vpop.xlane.xlu0 %3252  ;;  %v3495_v53 = vmul.f32 1.442695, %v3397_v42 }
 0x479   :  { %5870 = vpow2.f32 %v3485_v38 }
 0x47a   :  { %5872 = vpow2.f32 %v3487_v17  ;;  %v3334_v17 = vsub.f32 %v9603_v40, %v10012_v11  ;;  %v6347_v11 = vld [vmem:[%s11934_s0 + $0xb8] sm:$0xff] }
 0x47b   :  { %3622 = vadd.xlane.f32.xlu0 %v3621_v43  ;;  %v3865_v43 = vsel %vm478_vm0, %v3765_v30, 0.0  ;;  %5874 = vpow2.f32 %v3489_v26  ;;  %v6346_v30 = vld [vmem:[%s11934_s0 + $0xb0] sm:$0xff]  ;;  %v3770_v19 = vmul.f32 %v6347_v11, %v10075_v60  ;;  %v3336_v60 = vsub.f32 %v9621_v3, %v10034_v48 }
 0x47c   :  { %3857 = vadd.xlane.f32.xlu1 %v3856_v24  ;;  %v3767_v24 = vmul.f32 %v6344_v22, %v10032_v34  ;;  %5876 = vpow2.f32 %v3491_v57  ;;  %v3769_v38 = vmul.f32 %v6346_v30, %v10064_v46  ;;  %v3398_v50 = vmul.f32 %v3334_v17, %v9038_v41 }
 0x47d   :  { %v3880_v57 = vsel %vm478_vm0, %v3770_v19, 0.0  ;;  %v3338_v30 = vsub.f32 %v9639_v6, %v10056_v55  ;;  %v3339_v6 = vsub.f32 %v9634_v31, %v10062_v7 }
 0x47e   :  { %v3871_v34 = vsel %vm478_vm0, %v3767_v24, 0.0  ;;  %v3877_v46 = vsel %vm478_vm0, %v3769_v38, 0.0  ;;  %v6348_v24 = vld [vmem:[%s11934_s0 + $0xc0] sm:$0xff]  ;;  %v3497_v10 = vmul.f32 1.442695, %v3398_v50 }
 0x47f   :  { %3625 = vadd.xlane.f32.xlu0 %v3624_v4  ;;  %v10141_v4 = vpop.eup %5866  ;;  %v3771_v26 = vmul.f32 %v6348_v24, %v10092_v15  ;;  %v3400_v15 = vmul.f32 %v3336_v60, %v9038_v41  ;;  %v3402_v55 = vmul.f32 %v3338_v30, %v9038_v41  ;;  %v3403_v7 = vmul.f32 %v3339_v6, %v9038_v41 }
 0x480   :  { %3860 = vadd.xlane.f32.xlu1 %v3859_v12  ;;  %v10144_v12 = vpop.xlane.xlu1 %3249  ;;  %v10150_v20 = vpop.eup %5868  ;;  %v3636_v27 = vsel %vm478_vm0, %v10141_v4, 0.0 }
 0x481   :  { %v3639_v56 = vsel %vm478_vm0, %v10150_v20, 0.0 }
 0x483   :  { %3628 = vadd.xlane.f32.xlu0 %v3627_v49  ;;  %v6345_v49 = vld [vmem:[%s11934_s0 + $0xa8] sm:$0xff] }
 0x484   :  { %3863 = vadd.xlane.f32.xlu1 %v3862_v36  ;;  %v3768_v9 = vmul.f32 %v6345_v49, %v10047_v29  ;;  %v10167_v23 = vpop.xlane.xlu1 %3255  ;;  %v3493_v36 = vmul.f32 1.442695, %v3396_v59  ;;  %v10171_v29 = vpop.xlane.xlu0 %3258 }
 0x486   :  { %v10173_v8 = vpop.eup %5870  ;;  %5878 = vpow2.f32 %v3493_v36 }
 0x487   :  { %3631 = vadd.xlane.f32.xlu0 %v3630_v16  ;;  %v3335_v16 = vsub.f32 %v9598_v63, %v10017_v47  ;;  %v10178_v1 = vpop.eup %5872  ;;  %v3642_v40 = vsel %vm478_vm0, %v10173_v8, 0.0  ;;  %5880 = vpow2.f32 %v3495_v53 }
 0x488   :  { %3866 = vadd.xlane.f32.xlu1 %v3865_v43  ;;  %v3874_v43 = vsel %vm478_vm0, %v3768_v9, 0.0  ;;  %v3645_v47 = vsel %vm478_vm0, %v10178_v1, 0.0  ;;  %v10193_v22 = vpop.xlane.xlu0 %3264  ;;  %5882 = vpow2.f32 %v3497_v10 }
 0x489   :  { %v3399_v63 = vmul.f32 %v3335_v16, %v9038_v41 }
 0x48b   :  { %3634 = vadd.xlane.f32.xlu0 %v3633_v5  ;;  %v10188_v5 = vpop.xlane.xlu1 %3261  ;;  %v3499_v21 = vmul.f32 1.442695, %v3399_v63  ;;  %v3505_v63 = vmul.f32 1.442695, %v3402_v55 }
 0x48c   :  { %3869 = vadd.xlane.f32.xlu1 %v3868_v18  ;;  %v10201_v18 = vpop.eup %5874  ;;  %v10214_v48 = vpop.xlane.xlu0 %3270 }
 0x48d   :  { %v10206_v59 = vpop.eup %5876  ;;  %v3648_v3 = vsel %vm478_vm0, %v10201_v18, 0.0  ;;  %5884 = vpow2.f32 %v3499_v21  ;;  %v3507_v21 = vmul.f32 1.442695, %v3403_v7 }
 0x48e   :  { %v3651_v42 = vsel %vm478_vm0, %v10206_v59, 0.0 }
 0x48f   :  { %3637 = vadd.xlane.f32.xlu0 %v3636_v27  ;;  %v3883_v27 = vsel %vm478_vm0, %v3771_v26, 0.0  ;;  %v10209_v49 = vpop.xlane.xlu1 %3267 }
 0x490   :  { %3872 = vadd.xlane.f32.xlu1 %v3871_v34  ;;  %v3337_v34 = vsub.f32 %v9616_v32, %v10037_v35  ;;  %v6349_v32 = vld [vmem:[%s11934_s0 + $0xc8] sm:$0xff]  ;;  %v10234_v16 = vpop.xlane.xlu0 %3276 }
 0x491   :  { %v3772_v35 = vmul.f32 %v6349_v32, %v10113_v25  ;;  %v6350_v25 = vld [vmem:[%s11934_s0 + $0xd0] sm:$0xff] }
 0x492   :  { %v3401_v9 = vmul.f32 %v3337_v34, %v9038_v41  ;;  %v3773_v17 = vmul.f32 %v6350_v25, %v10118_v61  ;;  %v6351_v61 = vld [vmem:[%s11934_s0 + $0xd8] sm:$0xff]  ;;  %v6356_v25 = vld [vmem:[%s11934_s0 + $0xf0] sm:$0xff] }
 0x493   :  { %3640 = vadd.xlane.f32.xlu0 %v3639_v56  ;;  %v3501_v56 = vmul.f32 1.442695, %v3400_v15  ;;  %v10225_v38 = vpop.eup %5878  ;;  %v3886_v36 = vsel %vm478_vm0, %v3772_v35, 0.0  ;;  %v3774_v11 = vmul.f32 %v6351_v61, %v10141_v4  ;;  %v6352_v4 = vld [vmem:[%s11934_s0 + $0xe0] sm:$0xff] }
 0x494   :  { %3875 = vadd.xlane.f32.xlu1 %v3874_v43  ;;  %v10232_v43 = vpop.xlane.xlu1 %3273  ;;  %v3503_v53 = vmul.f32 1.442695, %v3401_v9  ;;  %v3654_v50 = vsel %vm478_vm0, %v10225_v38, 0.0  ;;  %v10255_v24 = vpop.xlane.xlu0 %3282  ;;  %v3775_v60 = vmul.f32 %v6352_v4, %v10150_v20 }
 0x495   :  { %5886 = vpow2.f32 %v3501_v56  ;;  %v3892_v10 = vsel %vm478_vm0, %v3774_v11, 0.0  ;;  %v6355_v56 = vld [vmem:[%s11935_s1 + $0x158] sm:$0xff] }
 0x496   :  { %5888 = vpow2.f32 %v3503_v53  ;;  %v3895_v15 = vsel %vm478_vm0, %v3775_v60, 0.0  ;;  %v3342_v30 = vsub.f32 %v6355_v56, %v10100_v28  ;;  %v6357_v28 = vld [vmem:[%s11935_s1 + $0x160] sm:$0xff]  ;;  %v6359_v60 = vld [vmem:[%s11935_s1 + $0x168] sm:$0xff] }
 0x497   :  { %3643 = vadd.xlane.f32.xlu0 %v3642_v40  ;;  %v3889_v40 = vsel %vm478_vm0, %v3773_v17, 0.0  ;;  %5890 = vpow2.f32 %v3505_v63  ;;  %v3777_v17 = vmul.f32 %v6356_v25, %v10178_v1  ;;  %v3343_v55 = vsub.f32 %v6357_v28, %v10105_v33  ;;  %v6362_v56 = vld [vmem:[%s11934_s0 + $0x108] sm:$0xff] }
 0x498   :  { %3878 = vadd.xlane.f32.xlu1 %v3877_v46  ;;  %v10236_v46 = vpop.eup %5880  ;;  %v10251_v19 = vpop.xlane.xlu1 %3279  ;;  %5892 = vpow2.f32 %v3507_v21  ;;  %v3406_v61 = vmul.f32 %v3342_v30, %v9038_v41  ;;  %v3344_v21 = vsub.f32 %v6359_v60, %v10121_v0  ;;  %v6361_v0 = vld [vmem:[%s11935_s1 + $0x170] sm:$0xff]  ;;  %v3780_v30 = vmul.f32 %v6362_v56, %v10225_v38  ;;  %v6366_v56 = vld [vmem:[%s11934_s0 + $0x128] sm:$0xff] }
 0x499   :  { %v3657_v31 = vsel %vm478_vm0, %v10236_v46, 0.0  ;;  %v10257_v26 = vpop.eup %5882  ;;  %v3901_v11 = vsel %vm478_vm0, %v3777_v17, 0.0  ;;  %v6363_v38 = vld [vmem:[%s11934_s0 + $0x110] sm:$0xff] }
 0x49a   :  { %v3513_v4 = vmul.f32 1.442695, %v3406_v61  ;;  %v3781_v61 = vmul.f32 %v6363_v38, %v10236_v46  ;;  %v6367_v38 = vld [vmem:[%s11934_s0 + $0x130] sm:$0xff] }
 0x49b   :  { %3646 = vadd.xlane.f32.xlu0 %v3645_v47  ;;  %v3340_v47 = vsub.f32 %v9655_v58, %v10081_v45  ;;  %v6353_v58 = vld [vmem:[%s11935_s1 + $0x150] sm:$0xff] }
 0x49c   :  { %3881 = vadd.xlane.f32.xlu1 %v3880_v57  ;;  %v10264_v57 = vpop.eup %5884  ;;  %v3341_v45 = vsub.f32 %v6353_v58, %v10085_v52  ;;  %v10274_v20 = vpop.xlane.xlu1 %3285 }
 0x49d   :  { %v3404_v34 = vmul.f32 %v3340_v47, %v9038_v41  ;;  %v3663_v52 = vsel %vm478_vm0, %v10264_v57, 0.0  ;;  %v3407_v47 = vmul.f32 %v3343_v55, %v9038_v41 }
 0x49e   :  { %v3405_v9 = vmul.f32 %v3341_v45, %v9038_v41  ;;  %v6360_v45 = vld [vmem:[%s11934_s0 + $0x100] sm:$0xff] }
 0x49f   :  { %3649 = vadd.xlane.f32.xlu0 %v3648_v3  ;;  %v6354_v3 = vld [vmem:[%s11934_s0 + $0xe8] sm:$0xff] }
 0x4a0   :  { %3884 = vadd.xlane.f32.xlu1 %v3883_v27  ;;  %v3660_v27 = vsel %vm478_vm0, %v10257_v26, 0.0  ;;  %v3776_v32 = vmul.f32 %v6354_v3, %v10173_v8 }
 0x4a2   :  { %v3898_v8 = vsel %vm478_vm0, %v3776_v32, 0.0  ;;  %v3345_v32 = vsub.f32 %v6361_v0, %v10126_v62 }
 0x4a3   :  { %3652 = vadd.xlane.f32.xlu0 %v3651_v42  ;;  %v3509_v42 = vmul.f32 1.442695, %v3404_v34  ;;  %v3779_v34 = vmul.f32 %v6360_v45, %v10206_v59 }
 0x4a4   :  { %3887 = vadd.xlane.f32.xlu1 %v3886_v36  ;;  %v10289_v36 = vpop.eup %5886  ;;  %v3409_v25 = vmul.f32 %v3345_v32, %v9038_v41 }
 0x4a5   :  { %v10298_v6 = vpop.eup %5888  ;;  %5894 = vpow2.f32 %v3509_v42  ;;  %v3666_v1 = vsel %vm478_vm0, %v10289_v36, 0.0  ;;  %v3907_v59 = vsel %vm478_vm0, %v3779_v34, 0.0 }
 0x4a6   :  { %v3669_v63 = vsel %vm478_vm0, %v10298_v6, 0.0  ;;  %v10325_v58 = vpop.eup %5890 }
 0x4a7   :  { %3655 = vadd.xlane.f32.xlu0 %v3654_v50  ;;  %v10343_v42 = vpop.eup %5892 }
 0x4a8   :  { %3890 = vadd.xlane.f32.xlu1 %v3889_v40  ;;  %v3511_v40 = vmul.f32 1.442695, %v3405_v9  ;;  %v3672_v9 = vsel %vm478_vm0, %v10325_v58, 0.0  ;;  %v3675_v28 = vsel %vm478_vm0, %v10343_v42, 0.0 }
 0x4aa   :  { %5896 = vpow2.f32 %v3511_v40  ;;  %v3910_v40 = vsel %vm478_vm0, %v3780_v30, 0.0  ;;  %v3784_v30 = vmul.f32 %v6366_v56, %v10289_v36 }
 0x4ab   :  { %3658 = vadd.xlane.f32.xlu0 %v3657_v31  ;;  %v6358_v31 = vld [vmem:[%s11934_s0 + $0xf8] sm:$0xff]  ;;  %5898 = vpow2.f32 %v3513_v4 }
 0x4ac   :  { %3893 = vadd.xlane.f32.xlu1 %v3892_v10  ;;  %v3778_v7 = vmul.f32 %v6358_v31, %v10201_v18  ;;  %v3519_v31 = vmul.f32 1.442695, %v3409_v25  ;;  %v6364_v4 = vld [vmem:[%s11934_s0 + $0x118] sm:$0xff] }
 0x4ad   :  { %v3782_v46 = vmul.f32 %v6364_v4, %v10257_v26 }
 0x4ae   :  { %v3904_v18 = vsel %vm478_vm0, %v3778_v7, 0.0 }
 0x4af   :  { %3661 = vadd.xlane.f32.xlu0 %v3660_v27  ;;  %v3916_v34 = vsel %vm478_vm0, %v3782_v46, 0.0 }
 0x4b0   :  { %3896 = vadd.xlane.f32.xlu1 %v3895_v15  ;;  %v10280_v35 = vpop.xlane.xlu0 %3556  ;;  %v3515_v15 = vmul.f32 1.442695, %v3407_v47  ;;  %v3913_v47 = vsel %vm478_vm0, %v3781_v61, 0.0  ;;  %v3785_v61 = vmul.f32 %v6367_v38, %v10298_v6 }
 0x4b2   :  { %5900 = vpow2.f32 %v3515_v15  ;;  %v10357_v55 = vpop.eup %5894  ;;  %v6365_v15 = vld [vmem:[%s11934_s0 + $0x120] sm:$0xff]  ;;  %v3925_v4 = vsel %vm478_vm0, %v3785_v61, 0.0 }
 0x4b3   :  { %3664 = vadd.xlane.f32.xlu0 %v3663_v52  ;;  %v3408_v52 = vmul.f32 %v3344_v21, %v9038_v41  ;;  %v3678_v7 = vsel %vm478_vm0, %v10357_v55, 0.0  ;;  %v3783_v26 = vmul.f32 %v6365_v15, %v10264_v57 }
 0x4b4   :  { %3899 = vadd.xlane.f32.xlu1 %v3898_v8  ;;  %v10296_v53 = vpop.xlane.xlu0 %3562 }
 0x4b5   :  { %v10304_v50 = vpop.xlane.xlu1 %3559  ;;  %v3517_v17 = vmul.f32 1.442695, %v3408_v52 }
 0x4b7   :  { %3667 = vadd.xlane.f32.xlu0 %v3666_v1  ;;  %5902 = vpow2.f32 %v3517_v17 }
 0x4b8   :  { %3902 = vadd.xlane.f32.xlu1 %v3901_v11  ;;  %v10314_v33 = vpop.xlane.xlu0 %3568  ;;  %5904 = vpow2.f32 %v3519_v31 }
 0x4b9   :  { %v10319_v10 = vpop.xlane.xlu1 %3565  ;;  %5906 = vlog2.f32 %v9337_v44  ;;  %v6368_v44 = vld [vmem:[%s11934_s0 + $0x138] sm:$0xff] }
 0x4ba   :  { %5908 = vlog2.f32 %v9355_v39  ;;  %v3786_v6 = vmul.f32 %v6368_v44, %v10325_v58 }
 0x4bb   :  { %3670 = vadd.xlane.f32.xlu0 %v3669_v63  ;;  %v10370_v63 = vpop.eup %5896  ;;  %5910 = vrcp.f32 %v10280_v35 }
 0x4bc   :  { %3905 = vadd.xlane.f32.xlu1 %v3904_v18  ;;  %v10332_v27 = vpop.xlane.xlu0 %3574  ;;  %v3681_v18 = vsel %vm478_vm0, %v10370_v63, 0.0  ;;  %v10383_v45 = vpop.eup %5898  ;;  %5912 = vrcp.f32 %v10304_v50  ;;  %v3928_v35 = vsel %vm478_vm0, %v3786_v6, 0.0  ;;  %v2979_v6 = vmul.f32 %v9038_v41, %v7002_v14  ;;  %v6370_v14 = vld [vmem:[%s11936_s2 + $0x8] sm:$0xff] }
 0x4bd   :  { %v10334_v3 = vpop.xlane.xlu1 %3571  ;;  %v3684_v52 = vsel %vm478_vm0, %v10383_v45, 0.0 }
 0x4bf   :  { %3673 = vadd.xlane.f32.xlu0 %v3672_v9  ;;  %v10396_v9 = vpop.eup %5900 }
 0x4c0   :  { %3908 = vadd.xlane.f32.xlu1 %v3907_v59  ;;  %v10350_v8 = vpop.xlane.xlu0 %3812  ;;  %v3919_v59 = vsel %vm478_vm0, %v3783_v26, 0.0  ;;  %v3687_v17 = vsel %vm478_vm0, %v10396_v9, 0.0 }
 0x4c1   :  { %v10352_v62 = vpop.xlane.xlu1 %3577 }
 0x4c3   :  { %3676 = vadd.xlane.f32.xlu0 %v3675_v28 }
 0x4c4   :  { %3911 = vadd.xlane.f32.xlu1 %v3910_v40  ;;  %v10364_v1 = vpop.xlane.xlu0 %3580  ;;  %v10409_v28 = vpop.eup %5902  ;;  %v3922_v40 = vsel %vm478_vm0, %v3784_v30, 0.0 }
 0x4c5   :  { %v10366_v11 = vpop.xlane.xlu1 %3815 }
 0x4c7   :  { %3679 = vadd.xlane.f32.xlu0 %v3678_v7  ;;  %v3690_v7 = vsel %vm478_vm0, %v10409_v28, 0.0 }
 0x4c8   :  { %3914 = vadd.xlane.f32.xlu1 %v3913_v47  ;;  %v10377_v60 = vpop.xlane.xlu0 %3583  ;;  %v10424_v47 = vpop.eup %5904 }
 0x4c9   :  { %v10379_v21 = vpop.xlane.xlu1 %3818 }
 0x4cb   :  { %3682 = vadd.xlane.f32.xlu0 %v3681_v18  ;;  %v3693_v18 = vsel %vm478_vm0, %v10424_v47, 0.0 }
 0x4cc   :  { %3917 = vadd.xlane.f32.xlu1 %v3916_v34  ;;  %v10390_v0 = vpop.xlane.xlu0 %3586  ;;  %v6369_v34 = vld [vmem:[%s11934_s0 + $0x140] sm:$0xff] }
 0x4cd   :  { %v10392_v32 = vpop.xlane.xlu1 %3821  ;;  %v3787_v15 = vmul.f32 %v6369_v34, %v10343_v42  ;;  %v4004_v42 = vmul.f32 %v10366_v11, %v9038_v41 }
 0x4cf   :  { %3685 = vadd.xlane.f32.xlu0 %v3684_v52  ;;  %v3931_v50 = vsel %vm478_vm0, %v3787_v15, 0.0 }
 0x4d0   :  { %3920 = vadd.xlane.f32.xlu1 %v3919_v59  ;;  %v10403_v57 = vpop.xlane.xlu0 %3589  ;;  %v5907_v59 = vpop.eup %5906 }
 0x4d1   :  { %v10405_v25 = vpop.xlane.xlu1 %3824  ;;  %v5909_v30 = vpop.eup %5908  ;;  %v2854_v61 = vmul.f32 0.6931472, %v5907_v59 }
 0x4d3   :  { %3688 = vadd.xlane.f32.xlu0 %v3687_v17  ;;  %v4003_v17 = vmul.f32 %v10350_v8, %v9038_v41 }
 0x4d4   :  { %3923 = vadd.xlane.f32.xlu1 %v3922_v40  ;;  %v10417_v36 = vpop.xlane.xlu0 %3592  ;;  %v5911_v40 = vpop.eup %5910 }
 0x4d5   :  { %v10420_v31 = vpop.xlane.xlu1 %3827  ;;  %v5913_v44 = vpop.eup %5912 }
 0x4d6   :  { %v4132_v34 = vmul.f32 %v5913_v44, %v4004_v42  ;;  %v6372_v44 = vld [vmem:[%s11935_s1 + $0x178] sm:$0xff] }
 0x4d7   :  { %3691 = vadd.xlane.f32.xlu0 %v3690_v7  ;;  %v2852_v7 = vmul.f32 0.6931472, %v5909_v30 }
 0x4d8   :  { %3926 = vadd.xlane.f32.xlu1 %v3925_v4  ;;  %v10432_v39 = vpop.xlane.xlu0 %3595 }
 0x4d9   :  { %v10435_v46 = vpop.xlane.xlu1 %3830  ;;  %v3043_v11 = vadd.f32 %v2979_v6, %v2852_v7  ;;  %v3346_v6 = vsub.f32 %v6372_v44, %v10144_v12 }
 0x4db   :  { %3694 = vadd.xlane.f32.xlu0 %v3693_v18  ;;  %v2980_v18 = vmul.f32 %v9038_v41, %v7016_v54  ;;  %v6371_v54 = vld [vmem:[%s11936_s2] sm:$0xff] }
 0x4dc   :  { %3929 = vadd.xlane.f32.xlu1 %v3928_v35  ;;  %v10444_v58 = vpop.xlane.xlu0 %3598  ;;  %v4131_v35 = vmul.f32 %v5911_v40, %v4003_v17 }
 0x4dd   :  { %12523 = vst [vmem:[#allocation61_spill] sm:$0xff] %v10444_v58  ;;  %v10446_v26 = vpop.xlane.xlu1 %3833  ;;  %v3044_v15 = vadd.f32 %v2980_v18, %v2854_v61 }
 0x4df   :  { %v4196_v59 = vsub.f32 %v3044_v15, %v4132_v34  ;;  %v3410_v34 = vmul.f32 %v3346_v6, %v9038_v41 }
 0x4e0   :  { %3932 = vadd.xlane.f32.xlu1 %v3931_v50  ;;  %v10449_v52 = vpop.xlane.xlu0 %3288 }
 0x4e1   :  { %12524 = vst [vmem:[#allocation64_spill] sm:$0xff] %v10449_v52  ;;  %v10451_v56 = vpop.xlane.xlu1 %3836  ;;  %v4195_v52 = vsub.f32 %v3043_v11, %v4131_v35  ;;  %v4324_v58 = vmul.f32 %v6370_v14, %v4196_v59  ;;  %v3521_v14 = vmul.f32 1.442695, %v3410_v34 }
 0x4e3   :  { %v4323_v17 = vmul.f32 %v6371_v54, %v4195_v52  ;;  %5914 = vpow2.f32 %v3521_v14 }
 0x4e4   :  { %v10457_v38 = vpop.xlane.xlu0 %3839 }
 0x4e5   :  { %v10459_v4 = vpop.xlane.xlu1 %3601 }
 0x4e6   :  { %12525 = vst [vmem:[#allocation65_spill] sm:$0xff] %v10459_v4 }
 0x4e8   :  { %v10465_v8 = vpop.xlane.xlu0 %3604 }
 0x4e9   :  { %v10467_v50 = vpop.xlane.xlu1 %3291 }
 0x4ec   :  { %v10469_v30 = vpop.xlane.xlu0 %3294 }
 0x4ed   :  { %v10471_v4 = vpop.xlane.xlu1 %3842 }
 0x4f0   :  { %v10479_v42 = vpop.xlane.xlu0 %3845 }
 0x4f1   :  { %4453 = vrot.lane.b32.xlu1 %v4324_v58, %s6521_s27  ;;  %v10482_v40 = vpop.xlane.xlu1 %3607  ;;  %4451 = vrot.lane.b32.xlu0 %v4323_v17, %s6521_s27  ;;  %v6373_v58 = vld [vmem:[%s11935_s1 + $0x180] sm:$0xff] }
 0x4f2   :  { %v3347_v35 = vsub.f32 %v6373_v58, %v10148_v51  ;;  %v6374_v58 = vld [vmem:[%s11934_s0 + $0x148] sm:$0xff] }
 0x4f4   :  { %v10485_v61 = vpop.xlane.xlu0 %3610  ;;  %v3411_v59 = vmul.f32 %v3347_v35, %v9038_v41  ;;  %v3788_v35 = vmul.f32 %v6374_v58, %v10357_v55 }
 0x4f5   :  { %12526 = vst [vmem:[#allocation68_spill] sm:$0xff] %v10485_v61  ;;  %v10487_v7 = vpop.xlane.xlu1 %3297 }
 0x4f6   :  { %12527 = vst [vmem:[#allocation69_spill] sm:$0xff] %v10487_v7  ;;  %v3523_v17 = vmul.f32 1.442695, %v3411_v59  ;;  %v3934_v14 = vsel %vm478_vm0, %v3788_v35, 0.0 }
 0x4f8   :  { %v10493_v52 = vpop.xlane.xlu0 %3613  ;;  %5916 = vpow2.f32 %v3523_v17 }
 0x4f9   :  { %12528 = vst [vmem:[#allocation72_spill] sm:$0xff] %v10493_v52  ;;  %v10495_v18 = vpop.xlane.xlu1 %3848  ;;  %5918 = vlog2.f32 %v9353_v37 }
 0x4fa   :  { %5920 = vrcp.f32 %v10296_v53 }
 0x4fb   :  { %5922 = vlog2.f32 %v9373_v2 }
 0x4fc   :  { %v10502_v15 = vpop.xlane.xlu0 %3616  ;;  %5924 = vrcp.f32 %v10319_v10 }
 0x4fd   :  { %12529 = vst [vmem:[#allocation73_spill] sm:$0xff] %v10502_v15  ;;  %v10504_v11 = vpop.xlane.xlu1 %3851 }
 0x500   :  { %v10507_v12 = vpop.xlane.xlu0 %3619 }
 0x501   :  { %12530 = vst [vmem:[#allocation76_spill] sm:$0xff] %v10507_v12  ;;  %v10509_v54 = vpop.xlane.xlu1 %3854  ;;  %v2981_v12 = vmul.f32 %v9038_v41, %v12309_v13 }
 0x504   :  { %v10511_v44 = vpop.xlane.xlu0 %3622 }
 0x505   :  { %12531 = vst [vmem:[#allocation77_spill] sm:$0xff] %v10511_v44  ;;  %v10513_v52 = vpop.xlane.xlu1 %3857 }
 0x508   :  { %v10515_v51 = vpop.xlane.xlu0 %3625 }
 0x509   :  { %12532 = vst [vmem:[#allocation80_spill] sm:$0xff] %v10515_v51  ;;  %v10517_v6 = vpop.xlane.xlu1 %3860  ;;  %v10532_v51 = vpop.eup %5914 }
 0x50a   :  { %v3696_v53 = vsel %vm478_vm0, %v10532_v51, 0.0  ;;  %v10541_v55 = vpop.eup %5916 }
 0x50b   :  { %v5919_v35 = vpop.eup %5918  ;;  %v3699_v2 = vsel %vm478_vm0, %v10541_v55, 0.0 }
 0x50c   :  { %v10525_v34 = vpop.xlane.xlu0 %3628  ;;  %v2856_v10 = vmul.f32 0.6931472, %v5919_v35 }
 0x50d   :  { %12533 = vst [vmem:[#allocation81_spill] sm:$0xff] %v10525_v34  ;;  %v10527_v59 = vpop.xlane.xlu1 %3863 }
 0x50e   :  { %12534 = vst [vmem:[#allocation84_spill] sm:$0xff] %v10527_v59  ;;  %v3045_v61 = vadd.f32 %v2981_v12, %v2856_v10  ;;  %v6376_v12 = vld [vmem:[%s11936_s2 + $0x10] sm:$0xff] }
 0x510   :  { %v10530_v17 = vpop.xlane.xlu0 %3631  ;;  %3935 = vadd.xlane.f32.xlu0 %v3934_v14  ;;  %v4005_v14 = vmul.f32 %v10379_v21, %v9038_v41 }
 0x511   :  { %12535 = vst [vmem:[#allocation85_spill] sm:$0xff] %v10530_v17  ;;  %v10534_v37 = vpop.xlane.xlu1 %3866 }
 0x512   :  { %12536 = vst [vmem:[#allocation88_spill] sm:$0xff] %v10534_v37 }
 0x514   :  { %v10537_v44 = vpop.xlane.xlu0 %3634 }
 0x515   :  { %12537 = vst [vmem:[#allocation89_spill] sm:$0xff] %v10537_v44  ;;  %3697 = vadd.xlane.f32.xlu1 %v3696_v53  ;;  %v10543_v58 = vpop.xlane.xlu1 %3869  ;;  %v6375_v44 = vld [vmem:[%s11934_s0 + $0x150] sm:$0xff]  ;;  %v5921_v53 = vpop.eup %5920 }
 0x516   :  { %12538 = vst [vmem:[#allocation92_spill] sm:$0xff] %v10543_v58  ;;  %v3789_v34 = vmul.f32 %v6375_v44, %v10370_v63  ;;  %v4133_v21 = vmul.f32 %v5921_v53, %v4005_v14  ;;  %v5923_v7 = vpop.eup %5922  ;;  %v4006_v63 = vmul.f32 %v10392_v32, %v9038_v41  ;;  %v12541_v14 = vld [vmem:[#allocation23_spill] sm:$0xff] }
 0x517   :  { %v5925_v13 = vpop.eup %5924  ;;  %v2982_v53 = vmul.f32 %v9038_v41, %v12541_v14 }
 0x518   :  { %v10548_v17 = vpop.xlane.xlu0 %3637  ;;  %v4197_v59 = vsub.f32 %v3045_v61, %v4133_v21 }
 0x519   :  { %12539 = vst [vmem:[#allocation93_spill] sm:$0xff] %v10548_v17  ;;  %3700 = vadd.xlane.f32.xlu1 %v3699_v2  ;;  %v10556_v58 = vpop.xlane.xlu1 %3872  ;;  %v3937_v17 = vsel %vm478_vm0, %v3789_v34, 0.0  ;;  %v2858_v2 = vmul.f32 0.6931472, %v5923_v7  ;;  %v6377_v7 = vld [vmem:[%s11935_s1 + $0x188] sm:$0xff] }
 0x51a   :  { %v4325_v61 = vmul.f32 %v6376_v12, %v4197_v59  ;;  %v3348_v10 = vsub.f32 %v6377_v7, %v10167_v23  ;;  %v6378_v59 = vld [vmem:[%s11936_s2 + $0x18] sm:$0xff] }
 0x51b   :  { %v3046_v32 = vadd.f32 %v2982_v53, %v2858_v2 }
 0x51c   :  { %v10560_v37 = vpop.xlane.xlu0 %3640  ;;  %v3412_v14 = vmul.f32 %v3348_v10, %v9038_v41  ;;  %v6379_v10 = vld [vmem:[%s11935_s1 + $0x190] sm:$0xff] }
 0x51d   :  { %12540 = vst [vmem:[#allocation96_spill] sm:$0xff] %v10560_v37  ;;  %3938 = vadd.xlane.f32.xlu1 %v3937_v17  ;;  %v10563_v15 = vpop.xlane.xlu1 %3875  ;;  %v4134_v37 = vmul.f32 %v5925_v13, %v4006_v63 }
 0x51e   :  { %v3525_v12 = vmul.f32 1.442695, %v3412_v14 }
 0x51f   :  { %v4198_v21 = vsub.f32 %v3046_v32, %v4134_v37 }
 0x520   :  { %v10567_v44 = vpop.xlane.xlu0 %3643  ;;  %5926 = vpow2.f32 %v3525_v12  ;;  %v12553_v12 = vld [vmem:[#allocation20_spill] sm:$0xff] }
 0x521   :  { %v10569_v35 = vpop.xlane.xlu1 %3878  ;;  %v4326_v2 = vmul.f32 %v6378_v59, %v4198_v21  ;;  %v3349_v21 = vsub.f32 %v6379_v10, %v10171_v29  ;;  %5928 = vlog2.f32 %v12553_v12 }
 0x522   :  { %5930 = vrcp.f32 %v10314_v33  ;;  %v4007_v33 = vmul.f32 %v10405_v25, %v9038_v41 }
 0x524   :  { %v10573_v34 = vpop.xlane.xlu0 %3646 }
 0x525   :  { %12542 = vst [vmem:[#allocation97_spill] sm:$0xff] %v10573_v34  ;;  %v10578_v17 = vpop.xlane.xlu1 %3881 }
 0x526   :  { %4455 = vrot.lane.b32.xlu0 %v4325_v61, %s6521_s27 }
 0x528   :  { %v10585_v63 = vpop.xlane.xlu0 %3649 }
 0x529   :  { %12543 = vst [vmem:[#allocation100_spill] sm:$0xff] %v10585_v63  ;;  %v10587_v13 = vpop.xlane.xlu1 %3884 }
 0x52c   :  { %v10590_v34 = vpop.xlane.xlu0 %3652 }
 0x52d   :  { %12544 = vst [vmem:[#allocation101_spill] sm:$0xff] %v10590_v34  ;;  %v10595_v53 = vpop.xlane.xlu1 %3887 }
 0x52e   :  { %12545 = vst [vmem:[#allocation104_spill] sm:$0xff] %v10595_v53  ;;  %4457 = vrot.lane.b32.xlu1 %v4326_v2, %s6521_s27  ;;  %v3413_v2 = vmul.f32 %v3349_v21, %v9038_v41 }
 0x530   :  { %v10598_v23 = vpop.xlane.xlu0 %3655 }
 0x531   :  { %12546 = vst [vmem:[#allocation105_spill] sm:$0xff] %v10598_v23  ;;  %v10600_v37 = vpop.xlane.xlu1 %3890  ;;  %v10622_v23 = vpop.eup %5926 }
 0x532   :  { %v3702_v10 = vsel %vm478_vm0, %v10622_v23, 0.0 }
 0x534   :  { %v10602_v61 = vpop.xlane.xlu0 %3658 }
 0x535   :  { %12547 = vst [vmem:[#allocation108_spill] sm:$0xff] %v10602_v61  ;;  %v10604_v32 = vpop.xlane.xlu1 %3893 }
 0x536   :  { %12548 = vst [vmem:[#allocation109_spill] sm:$0xff] %v10604_v32 }
 0x538   :  { %v10606_v7 = vpop.xlane.xlu0 %3661 }
 0x539   :  { %12549 = vst [vmem:[#allocation112_spill] sm:$0xff] %v10606_v7  ;;  %v10612_v59 = vpop.xlane.xlu1 %3896  ;;  %v3527_v7 = vmul.f32 1.442695, %v3413_v2 }
 0x53a   :  { %12550 = vst [vmem:[#allocation113_spill] sm:$0xff] %v10612_v59 }
 0x53b   :  { %5932 = vpow2.f32 %v3527_v7 }
 0x53c   :  { %v10614_v14 = vpop.xlane.xlu0 %3664 }
 0x53d   :  { %12551 = vst [vmem:[#allocation116_spill] sm:$0xff] %v10614_v14  ;;  %v10617_v53 = vpop.xlane.xlu1 %3899 }
 0x53e   :  { %12552 = vst [vmem:[#allocation117_spill] sm:$0xff] %v10617_v53 }
 0x540   :  { %v10620_v61 = vpop.xlane.xlu0 %3667 }
 0x541   :  { %12554 = vst [vmem:[#allocation120_spill] sm:$0xff] %v10620_v61  ;;  %v10625_v34 = vpop.xlane.xlu1 %3902  ;;  %v5929_v61 = vpop.eup %5928 }
 0x542   :  { %12555 = vst [vmem:[#allocation121_spill] sm:$0xff] %v10625_v34  ;;  %v12562_v34 = vld [vmem:[#allocation138_spill] sm:$0xff] }
 0x543   :  { %5934 = vlog2.f32 %v12562_v34 }
 0x544   :  { %v10627_v29 = vpop.xlane.xlu0 %3670  ;;  %5936 = vrcp.f32 %v10334_v3 }
 0x545   :  { %12556 = vst [vmem:[#allocation124_spill] sm:$0xff] %v10627_v29  ;;  %v10631_v21 = vpop.xlane.xlu1 %3905  ;;  %3703 = vadd.xlane.f32.xlu0 %v3702_v10  ;;  %v6380_v29 = vld [vmem:[%s11934_s0 + $0x158] sm:$0xff]  ;;  %v2860_v10 = vmul.f32 0.6931472, %v5929_v61 }
 0x546   :  { %12557 = vst [vmem:[#allocation125_spill] sm:$0xff] %v10631_v21  ;;  %v3790_v7 = vmul.f32 %v6380_v29, %v10383_v45  ;;  %v5931_v21 = vpop.eup %5930 }
 0x547   :  { %v4135_v59 = vmul.f32 %v5931_v21, %v4007_v33  ;;  %v6381_v21 = vld [vmem:[%s11934_s0 + $0x160] sm:$0xff] }
 0x548   :  { %v10633_v14 = vpop.xlane.xlu0 %3673  ;;  %v3940_v25 = vsel %vm478_vm0, %v3790_v7, 0.0 }
 0x549   :  { %12558 = vst [vmem:[#allocation11_spill] sm:$0xff] %v10633_v14  ;;  %v10635_v12 = vpop.xlane.xlu1 %3908 }
 0x54a   :  { %12559 = vst [vmem:[#allocation12_spill] sm:$0xff] %v10635_v12  ;;  %v12564_v12 = vld [vmem:[#allocation26_spill] sm:$0xff] }
 0x54c   :  { %v10637_v53 = vpop.xlane.xlu0 %3676 }
 0x54d   :  { %12560 = vst [vmem:[#allocation13_spill] sm:$0xff] %v10637_v53  ;;  %v10641_v2 = vpop.xlane.xlu1 %3911  ;;  %v2983_v53 = vmul.f32 %v9038_v41, %v12564_v12  ;;  %v3791_v12 = vmul.f32 %v6381_v21, %v10396_v9  ;;  %v6383_v9 = vld [vmem:[%s11935_s1 + $0x198] sm:$0xff] }
 0x54e   :  { %12561 = vst [vmem:[#allocation14_spill] sm:$0xff] %v10641_v2  ;;  %v10655_v2 = vpop.eup %5932 }
 0x54f   :  { %v3047_v32 = vadd.f32 %v2983_v53, %v2860_v10  ;;  %v3705_v29 = vsel %vm478_vm0, %v10655_v2, 0.0  ;;  %v3943_v3 = vsel %vm478_vm0, %v3791_v12, 0.0 }
 0x550   :  { %v10648_v14 = vpop.xlane.xlu0 %3679  ;;  %v5935_v7 = vpop.eup %5934 }
 0x551   :  { %12563 = vst [vmem:[#allocation15_spill] sm:$0xff] %v10648_v14  ;;  %v10652_v63 = vpop.xlane.xlu1 %3914  ;;  %v4199_v61 = vsub.f32 %v3047_v32, %v4135_v59  ;;  %v6382_v32 = vld [vmem:[%s11936_s2 + $0x20] sm:$0xff]  ;;  %v2862_v12 = vmul.f32 0.6931472, %v5935_v7 }
 0x552   :  { %3941 = vadd.xlane.f32.xlu1 %v3940_v25  ;;  %v3350_v25 = vsub.f32 %v6383_v9, %v10188_v5 }
 0x553   :  { %v4327_v59 = vmul.f32 %v6382_v32, %v4199_v61 }
 0x554   :  { %v10658_v45 = vpop.xlane.xlu0 %3682 }
 0x555   :  { %12565 = vst [vmem:[#allocation16_spill] sm:$0xff] %v10658_v45  ;;  %v10660_v34 = vpop.xlane.xlu1 %3917 }
 0x556   :  { %12566 = vst [vmem:[#allocation17_spill] sm:$0xff] %v10660_v34  ;;  %3706 = vadd.xlane.f32.xlu1 %v3705_v29  ;;  %v4008_v29 = vmul.f32 %v10420_v31, %v9038_v41 }
 0x558   :  { %v10668_v33 = vpop.xlane.xlu0 %3685 }
 0x559   :  { %12567 = vst [vmem:[#allocation18_spill] sm:$0xff] %v10668_v33  ;;  %v10670_v53 = vpop.xlane.xlu1 %3920  ;;  %v5937_v33 = vpop.eup %5936 }
 0x55a   :  { %12568 = vst [vmem:[#allocation19_spill] sm:$0xff] %v10670_v53  ;;  %3944 = vadd.xlane.f32.xlu1 %v3943_v3  ;;  %v12572_v3 = vld [vmem:[#allocation27_spill] sm:$0xff] }
 0x55b   :  { %4459 = vrot.lane.b32.xlu0 %v4327_v59, %s6521_s27  ;;  %v2984_v32 = vmul.f32 %v9038_v41, %v12572_v3  ;;  %v3414_v59 = vmul.f32 %v3350_v25, %v9038_v41  ;;  %v6384_v25 = vld [vmem:[%s11936_s2 + $0x28] sm:$0xff] }
 0x55c   :  { %v10677_v10 = vpop.xlane.xlu0 %3688 }
 0x55d   :  { %12569 = vst [vmem:[#allocation136_spill] sm:$0xff] %v10677_v10  ;;  %v10685_v21 = vpop.xlane.xlu1 %3923  ;;  %v4136_v10 = vmul.f32 %v5937_v33, %v4008_v29  ;;  %v3048_v53 = vadd.f32 %v2984_v32, %v2862_v12  ;;  %v3529_v5 = vmul.f32 1.442695, %v3414_v59  ;;  %v4260_v29 = vld [vmem:[#allocation3 + $0x8] sm:$0xff] }
 0x55e   :  { %12570 = vst [vmem:[#allocation23_spill] sm:$0xff] %v10685_v21  ;;  %v4259_v21 = vld [vmem:[#allocation3] sm:$0xff] }
 0x55f   :  { %v4200_v9 = vsub.f32 %v3048_v53, %v4136_v10  ;;  %5938 = vpow2.f32 %v3529_v5  ;;  %v12573_v10 = vld [vmem:[#allocation137_spill] sm:$0xff] }
 0x560   :  { %v10687_v61 = vpop.xlane.xlu0 %3691  ;;  %5940 = vlog2.f32 %v12573_v10 }
 0x561   :  { %12571 = vst [vmem:[#allocation20_spill] sm:$0xff] %v10687_v61  ;;  %v10692_v45 = vpop.xlane.xlu1 %3926  ;;  %v4328_v33 = vmul.f32 %v6384_v25, %v4200_v9  ;;  %5942 = vrcp.f32 %v10332_v27  ;;  %v12575_v27 = vld [vmem:[#allocation140_spill] sm:$0xff] }
 0x564   :  { %v10694_v14 = vpop.xlane.xlu0 %3694 }
 0x565   :  { %v10696_v31 = vpop.xlane.xlu1 %3929 }
 0x568   :  { %v4452_v7 = vpop.permute.xlu0 %4451 }
 0x569   :  { %v4643_v34 = vadd.f32 %v4452_v7, %v4259_v21  ;;  %v10698_v61 = vpop.xlane.xlu1 %3932  ;;  %v6385_v21 = vld [vmem:[%s11935_s1 + $0x1a0] sm:$0xff]  ;;  %v4009_v7 = vmul.f32 %v10435_v46, %v9038_v41 }
 0x56a   :  { %v3351_v32 = vsub.f32 %v6385_v21, %v10193_v22  ;;  %v6386_v21 = vld [vmem:[%s11934_s0 + $0x168] sm:$0xff] }
 0x56b   :  { %4707 = vst.msk [vmem:[#allocation3] sm:$0xff] %vm92_vm5, %v4643_v34  ;;  %4461 = vrot.lane.b32.xlu1 %v4328_v33, %s6521_s27 }
 0x56c   :  { %v10707_v3 = vpop.eup %5938  ;;  %v3415_v59 = vmul.f32 %v3351_v32, %v9038_v41  ;;  %v3792_v32 = vmul.f32 %v6386_v21, %v10409_v28 }
 0x56d   :  { %v4454_v12 = vpop.permute.xlu1 %4453  ;;  %v3708_v34 = vsel %vm478_vm0, %v10707_v3, 0.0  ;;  %v5941_v9 = vpop.eup %5940 }
 0x56e   :  { %v4644_v53 = vadd.f32 %v4454_v12, %v4260_v29  ;;  %v3531_v5 = vmul.f32 1.442695, %v3415_v59  ;;  %v5943_v25 = vpop.eup %5942  ;;  %v2864_v33 = vmul.f32 0.6931472, %v5941_v9  ;;  %v12574_v29 = vld [vmem:[#allocation30_spill] sm:$0xff]  ;;  %v3946_v46 = vsel %vm478_vm0, %v3792_v32, 0.0 }
 0x56f   :  { %v2985_v12 = vmul.f32 %v9038_v41, %v12574_v29  ;;  %v4137_v22 = vmul.f32 %v5943_v25, %v4009_v7  ;;  %v12576_v29 = vld [vmem:[#allocation31_spill] sm:$0xff] }
 0x570   :  { %4708 = vst.msk [vmem:[#allocation3 + $0x8] sm:$0xff] %vm92_vm5, %v4644_v53  ;;  %5944 = vpow2.f32 %v3531_v5 }
 0x571   :  { %v3049_v53 = vadd.f32 %v2985_v12, %v2864_v33  ;;  %5946 = vlog2.f32 %v12575_v27  ;;  %v2986_v12 = vmul.f32 %v9038_v41, %v12576_v29  ;;  %v6390_v29 = vld [vmem:[%s11935_s1 + $0x1a8] sm:$0xff] }
 0x572   :  { %5948 = vrcp.f32 %v10352_v62  ;;  %v4010_v62 = vmul.f32 %v10446_v26, %v9038_v41  ;;  %v6388_v26 = vld [vmem:[%s11936_s2 + $0x38] sm:$0xff] }
 0x573   :  { %v4201_v10 = vsub.f32 %v3049_v53, %v4137_v22  ;;  %v4261_v53 = vld [vmem:[#allocation3 + $0x10] sm:$0xff] }
 0x57a   :  { %3709 = vadd.xlane.f32.xlu0 %v3708_v34  ;;  %v6387_v34 = vld [vmem:[%s11936_s2 + $0x30] sm:$0xff] }
 0x57b   :  { %v4329_v59 = vmul.f32 %v6387_v34, %v4201_v10 }
 0x57d   :  { %v10731_v5 = vpop.eup %5944 }
 0x57e   :  { %v3711_v9 = vsel %vm478_vm0, %v10731_v5, 0.0  ;;  %v5947_v7 = vpop.eup %5946 }
 0x57f   :  { %v2866_v28 = vmul.f32 0.6931472, %v5947_v7  ;;  %v5949_v25 = vpop.eup %5948  ;;  %v4262_v7 = vld [vmem:[#allocation3 + $0x18] sm:$0xff] }
 0x580   :  { %v4138_v22 = vmul.f32 %v5949_v25, %v4010_v62 }
 0x581   :  { %v3050_v27 = vadd.f32 %v2986_v12, %v2866_v28  ;;  %v6389_v28 = vld [vmem:[%s11934_s0 + $0x170] sm:$0xff]  ;;  %v3352_v12 = vsub.f32 %v6390_v29, %v10209_v49  ;;  %v12578_v29 = vld [vmem:[#allocation34_spill] sm:$0xff] }
 0x582   :  { %v3793_v25 = vmul.f32 %v6389_v28, %v10424_v47  ;;  %v6392_v47 = vld [vmem:[%s11935_s1 + $0x1b0] sm:$0xff]  ;;  %v4011_v28 = vmul.f32 %v10451_v56, %v9038_v41  ;;  %v6393_v56 = vld [vmem:[%s11936_s2 + $0x40] sm:$0xff] }
 0x583   :  { %v4202_v21 = vsub.f32 %v3050_v27, %v4138_v22  ;;  %v3416_v49 = vmul.f32 %v3352_v12, %v9038_v41  ;;  %v2987_v12 = vmul.f32 %v9038_v41, %v12578_v29 }
 0x584   :  { %v3949_v27 = vsel %vm478_vm0, %v3793_v25, 0.0 }
 0x58f   :  { %3947 = vadd.xlane.f32.xlu1 %v3946_v46 }
 0x590   :  { %4463 = vrot.lane.b32.xlu0 %v4329_v59, %s6521_s27  ;;  %v4330_v59 = vmul.f32 %v6388_v26, %v4202_v21 }
 0x593   :  { %3712 = vadd.xlane.f32.xlu1 %v3711_v9 }
 0x599   :  { %v10738_v33 = vpop.xlane.xlu0 %3935 }
 0x59d   :  { %v4456_v10 = vpop.permute.xlu0 %4455 }
 0x59e   :  { %v4645_v32 = vadd.f32 %v4456_v10, %v4261_v53  ;;  %v10742_v46 = vpop.xlane.xlu1 %3697  ;;  %v12577_v53 = vld [vmem:[#allocation139_spill] sm:$0xff]  ;;  %v6391_v10 = vld [vmem:[%s11934_s0 + $0x178] sm:$0xff] }
 0x59f   :  { %5950 = vlog2.f32 %v12577_v53  ;;  %v3794_v21 = vmul.f32 %v6391_v10, %v10532_v51  ;;  %v12579_v53 = vld [vmem:[#allocation142_spill] sm:$0xff] }
 0x5a0   :  { %4709 = vst.msk [vmem:[#allocation3 + $0x10] sm:$0xff] %vm92_vm5, %v4645_v32  ;;  %v3353_v32 = vsub.f32 %v6392_v47, %v10214_v48  ;;  %5952 = vrcp.f32 %v10364_v1 }
 0x5a1   :  { %v3952_v26 = vsel %vm478_vm0, %v3794_v21, 0.0 }
 0x5a2   :  { %v10745_v34 = vpop.xlane.xlu1 %3700 }
 0x5a4   :  { %4465 = vrot.lane.b32.xlu1 %v4330_v59, %s6521_s27  ;;  %v3417_v59 = vmul.f32 %v3353_v32, %v9038_v41 }
 0x5a6   :  { %v10751_v9 = vpop.xlane.xlu1 %3938 }
 0x5aa   :  { %v4458_v62 = vpop.permute.xlu1 %4457 }
 0x5ab   :  { %v4646_v22 = vadd.f32 %v4458_v62, %v4262_v7  ;;  %v3533_v7 = vmul.f32 1.442695, %v3416_v49  ;;  %v3535_v62 = vmul.f32 1.442695, %v3417_v59  ;;  %v4012_v59 = vmul.f32 %v10457_v38, %v9038_v41 }
 0x5ac   :  { %v5951_v51 = vpop.eup %5950 }
 0x5ad   :  { %4710 = vst.msk [vmem:[#allocation3 + $0x18] sm:$0xff] %vm92_vm5, %v4646_v22  ;;  %5954 = vpow2.f32 %v3533_v7  ;;  %v5953_v25 = vpop.eup %5952  ;;  %v2868_v48 = vmul.f32 0.6931472, %v5951_v51 }
 0x5ae   :  { %5956 = vpow2.f32 %v3535_v62  ;;  %v4139_v1 = vmul.f32 %v5953_v25, %v4011_v28  ;;  %v4263_v62 = vld [vmem:[#allocation3 + $0x20] sm:$0xff]  ;;  %v12581_v25 = vld [vmem:[#allocation35_spill] sm:$0xff] }
 0x5af   :  { %3950 = vadd.xlane.f32.xlu0 %v3949_v27  ;;  %v3051_v22 = vadd.f32 %v2987_v12, %v2868_v48  ;;  %5958 = vlog2.f32 %v12579_v53  ;;  %v2988_v48 = vmul.f32 %v9038_v41, %v12581_v25  ;;  %v6397_v25 = vld [vmem:[%s11934_s0 + $0x188] sm:$0xff] }
 0x5b0   :  { %5960 = vrcp.f32 %v10377_v60 }
 0x5b1   :  { %v4203_v27 = vsub.f32 %v3051_v22, %v4139_v1 }
 0x5b3   :  { %3953 = vadd.xlane.f32.xlu0 %v3952_v26  ;;  %v4331_v47 = vmul.f32 %v6393_v56, %v4203_v27  ;;  %v6394_v27 = vld [vmem:[%s11936_s2 + $0x48] sm:$0xff] }
 0x5ba   :  { %v10782_v10 = vpop.eup %5954 }
 0x5bb   :  { %v3714_v21 = vsel %vm478_vm0, %v10782_v10, 0.0  ;;  %v10789_v32 = vpop.eup %5956 }
 0x5bc   :  { %v3717_v49 = vsel %vm478_vm0, %v10789_v32, 0.0  ;;  %v5959_v60 = vpop.eup %5958 }
 0x5bd   :  { %v5961_v7 = vpop.eup %5960  ;;  %v2870_v51 = vmul.f32 0.6931472, %v5959_v60  ;;  %v6396_v60 = vld [vmem:[%s11935_s1 + $0x1b8] sm:$0xff] }
 0x5be   :  { %v4140_v29 = vmul.f32 %v5961_v7, %v4012_v59  ;;  %v3354_v59 = vsub.f32 %v6396_v60, %v10232_v43  ;;  %v4264_v7 = vld [vmem:[#allocation3 + $0x28] sm:$0xff] }
 0x5bf   :  { %v3052_v1 = vadd.f32 %v2988_v48, %v2870_v51  ;;  %v3796_v48 = vmul.f32 %v6397_v25, %v10622_v23 }
 0x5c0   :  { %v3418_v43 = vmul.f32 %v3354_v59, %v9038_v41 }
 0x5c1   :  { %v4204_v22 = vsub.f32 %v3052_v1, %v4140_v29  ;;  %v3958_v1 = vsel %vm478_vm0, %v3796_v48, 0.0 }
 0x5c3   :  { %v4332_v38 = vmul.f32 %v6394_v27, %v4204_v22  ;;  %v3537_v27 = vmul.f32 1.442695, %v3418_v43 }
 0x5c8   :  { %3715 = vadd.xlane.f32.xlu1 %v3714_v21 }
 0x5c9   :  { %4467 = vrot.lane.b32.xlu0 %v4331_v47, %s6521_s27  ;;  %v6395_v47 = vld [vmem:[%s11934_s0 + $0x180] sm:$0xff] }
 0x5cc   :  { %3718 = vadd.xlane.f32.xlu1 %v3717_v49  ;;  %v3795_v49 = vmul.f32 %v6395_v47, %v10541_v55  ;;  %v6398_v55 = vld [vmem:[%s11935_s1 + $0x1c0] sm:$0xff] }
 0x5cd   :  { %v3355_v29 = vsub.f32 %v6398_v55, %v10234_v16  ;;  %v4013_v16 = vmul.f32 %v10471_v4, %v9038_v41  ;;  %v6399_v4 = vld [vmem:[%s11936_s2 + $0x50] sm:$0xff] }
 0x5ce   :  { %v10794_v26 = vpop.xlane.xlu0 %3703 }
 0x5cf   :  { %12580 = vst [vmem:[#allocation138_spill] sm:$0xff] %v10794_v26  ;;  %v3419_v22 = vmul.f32 %v3355_v29, %v9038_v41 }
 0x5d1   :  { %v3539_v23 = vmul.f32 1.442695, %v3419_v22  ;;  %v4014_v22 = vmul.f32 %v10479_v42, %v9038_v41 }
 0x5d2   :  { %v4460_v28 = vpop.permute.xlu0 %4459 }
 0x5d3   :  { %v4647_v12 = vadd.f32 %v4460_v28, %v4263_v62  ;;  %v12583_v62 = vld [vmem:[#allocation141_spill] sm:$0xff]  ;;  %v3955_v28 = vsel %vm478_vm0, %v3795_v49, 0.0 }
 0x5d4   :  { %5962 = vlog2.f32 %v12583_v62  ;;  %v12585_v62 = vld [vmem:[#allocation144_spill] sm:$0xff] }
 0x5d5   :  { %4711 = vst.msk [vmem:[#allocation3 + $0x20] sm:$0xff] %vm92_vm5, %v4647_v12  ;;  %5964 = vrcp.f32 %v10390_v0  ;;  %v12584_v0 = vld [vmem:[#allocation38_spill] sm:$0xff] }
 0x5d6   :  { %5966 = vpow2.f32 %v3537_v27  ;;  %v2989_v60 = vmul.f32 %v9038_v41, %v12584_v0 }
 0x5d7   :  { %5968 = vpow2.f32 %v3539_v23 }
 0x5d8   :  { %5970 = vlog2.f32 %v12585_v62 }
 0x5d9   :  { %5972 = vrcp.f32 %v10403_v57  ;;  %v4265_v57 = vld [vmem:[#allocation3 + $0x30] sm:$0xff] }
 0x5db   :  { %v10801_v53 = vpop.xlane.xlu1 %3941 }
 0x5dd   :  { %4469 = vrot.lane.b32.xlu1 %v4332_v38, %s6521_s27 }
 0x5df   :  { %v10807_v21 = vpop.xlane.xlu1 %3706 }
 0x5e1   :  { %v5963_v38 = vpop.eup %5962 }
 0x5e2   :  { %v5965_v47 = vpop.eup %5964  ;;  %v2872_v49 = vmul.f32 0.6931472, %v5963_v38 }
 0x5e3   :  { %v10809_v56 = vpop.xlane.xlu1 %3944  ;;  %v4141_v59 = vmul.f32 %v5965_v47, %v4013_v16  ;;  %v12586_v16 = vld [vmem:[#allocation39_spill] sm:$0xff] }
 0x5e4   :  { %12582 = vst [vmem:[#allocation26_spill] sm:$0xff] %v10809_v56  ;;  %v2990_v47 = vmul.f32 %v9038_v41, %v12586_v16  ;;  %v12700_v56 = vld [vmem:[#allocation25_spill] sm:$0xff] }
 0x5e7   :  { %v4462_v51 = vpop.permute.xlu1 %4461 }
 0x5e8   :  { %v4648_v12 = vadd.f32 %v4462_v51, %v4264_v7  ;;  %3956 = vadd.xlane.f32.xlu0 %v3955_v28  ;;  %v3053_v7 = vadd.f32 %v2989_v60, %v2872_v49  ;;  %v10839_v28 = vpop.eup %5966 }
 0x5e9   :  { %v3720_v25 = vsel %vm478_vm0, %v10839_v28, 0.0  ;;  %v10847_v55 = vpop.eup %5968 }
 0x5ea   :  { %4712 = vst.msk [vmem:[#allocation3 + $0x28] sm:$0xff] %vm92_vm5, %v4648_v12  ;;  %v4205_v51 = vsub.f32 %v3053_v7, %v4141_v59  ;;  %v3723_v43 = vsel %vm478_vm0, %v10847_v55, 0.0  ;;  %v5971_v12 = vpop.eup %5970  ;;  %v6400_v59 = vld [vmem:[%s11936_s2 + $0x58] sm:$0xff] }
 0x5eb   :  { %v2874_v23 = vmul.f32 0.6931472, %v5971_v12  ;;  %v5973_v38 = vpop.eup %5972 }
 0x5ec   :  { %3959 = vadd.xlane.f32.xlu0 %v3958_v1  ;;  %v4333_v48 = vmul.f32 %v6399_v4, %v4205_v51  ;;  %v4142_v49 = vmul.f32 %v5973_v38, %v4014_v22  ;;  %v6401_v51 = vld [vmem:[%s11934_s0 + $0x190] sm:$0xff]  ;;  %v6402_v4 = vld [vmem:[%s11935_s1 + $0x1c8] sm:$0xff]  ;;  %v6403_v22 = vld [vmem:[%s11934_s0 + $0x198] sm:$0xff] }
 0x5ed   :  { %v3054_v0 = vadd.f32 %v2990_v47, %v2874_v23 }
 0x5ef   :  { %v4206_v60 = vsub.f32 %v3054_v0, %v4142_v49 }
 0x5f1   :  { %v4334_v7 = vmul.f32 %v6400_v59, %v4206_v60 }
 0x601   :  { %3721 = vadd.xlane.f32.xlu1 %v3720_v25  ;;  %v3797_v25 = vmul.f32 %v6401_v51, %v10655_v2  ;;  %v6404_v2 = vld [vmem:[%s11935_s1 + $0x1d0] sm:$0xff] }
 0x602   :  { %4471 = vrot.lane.b32.xlu0 %v4333_v48, %s6521_s27  ;;  %v3356_v48 = vsub.f32 %v6402_v4, %v10251_v19  ;;  %v3357_v23 = vsub.f32 %v6404_v2, %v10255_v24  ;;  %v4015_v24 = vmul.f32 %v10495_v18, %v9038_v41  ;;  %v12590_v4 = vld [vmem:[#allocation146_spill] sm:$0xff]  ;;  %v6405_v18 = vld [vmem:[%s11936_s2 + $0x60] sm:$0xff] }
 0x603   :  { %v10850_v29 = vpop.xlane.xlu0 %3709  ;;  %v4267_v2 = vld [vmem:[#allocation3 + $0x40] sm:$0xff] }
 0x604   :  { %v3420_v19 = vmul.f32 %v3356_v48, %v9038_v41  ;;  %v3421_v47 = vmul.f32 %v3357_v23, %v9038_v41 }
 0x605   :  { %3724 = vadd.xlane.f32.xlu1 %v3723_v43  ;;  %v4266_v43 = vld [vmem:[#allocation3 + $0x38] sm:$0xff] }
 0x606   :  { %v3541_v49 = vmul.f32 1.442695, %v3420_v19 }
 0x607   :  { %v4464_v1 = vpop.permute.xlu0 %4463 }
 0x608   :  { %v4649_v27 = vadd.f32 %v4464_v1, %v4265_v57  ;;  %v12588_v57 = vld [vmem:[#allocation143_spill] sm:$0xff]  ;;  %v3961_v1 = vsel %vm478_vm0, %v3797_v25, 0.0 }
 0x609   :  { %5974 = vlog2.f32 %v12588_v57 }
 0x60a   :  { %4713 = vst.msk [vmem:[#allocation3 + $0x30] sm:$0xff] %vm92_vm5, %v4649_v27  ;;  %v3798_v27 = vmul.f32 %v6403_v22, %v10707_v3  ;;  %5976 = vrcp.f32 %v10417_v36  ;;  %v3543_v3 = vmul.f32 1.442695, %v3421_v47  ;;  %v12589_v36 = vld [vmem:[#allocation42_spill] sm:$0xff] }
 0x60b   :  { %5978 = vpow2.f32 %v3541_v49 }
 0x60c   :  { %v3964_v16 = vsel %vm478_vm0, %v3798_v27, 0.0  ;;  %5980 = vpow2.f32 %v3543_v3  ;;  %v12593_v3 = vld [vmem:[#allocation43_spill] sm:$0xff] }
 0x60d   :  { %5982 = vlog2.f32 %v12590_v4 }
 0x60e   :  { %5984 = vrcp.f32 %v10432_v39 }
 0x616   :  { %4473 = vrot.lane.b32.xlu1 %v4334_v7, %s6521_s27  ;;  %v5975_v0 = vpop.eup %5974  ;;  %v2991_v7 = vmul.f32 %v9038_v41, %v12589_v36  ;;  %v6406_v36 = vld [vmem:[%s11936_s2 + $0x68] sm:$0xff] }
 0x617   :  { %v5977_v60 = vpop.eup %5976  ;;  %v2876_v59 = vmul.f32 0.6931472, %v5975_v0  ;;  %v2992_v0 = vmul.f32 %v9038_v41, %v12593_v3 }
 0x618   :  { %v10863_v62 = vpop.xlane.xlu1 %3947  ;;  %v4143_v51 = vmul.f32 %v5977_v60, %v4015_v24 }
 0x619   :  { %12587 = vst [vmem:[#allocation27_spill] sm:$0xff] %v10863_v62  ;;  %v3055_v25 = vadd.f32 %v2991_v7, %v2876_v59 }
 0x61b   :  { %v4207_v48 = vsub.f32 %v3055_v25, %v4143_v51  ;;  %v6407_v25 = vld [vmem:[%s11934_s0 + $0x1a0] sm:$0xff] }
 0x61c   :  { %v10865_v42 = vpop.xlane.xlu1 %3712  ;;  %v3799_v4 = vmul.f32 %v6407_v25, %v10731_v5  ;;  %v12598_v25 = vld [vmem:[#allocation46_spill] sm:$0xff] }
 0x620   :  { %v4466_v12 = vpop.permute.xlu1 %4465 }
 0x621   :  { %v4650_v38 = vadd.f32 %v4466_v12, %v4266_v43  ;;  %3962 = vadd.xlane.f32.xlu0 %v3961_v1  ;;  %v10895_v43 = vpop.eup %5978  ;;  %v4335_v1 = vmul.f32 %v6405_v18, %v4207_v48  ;;  %v6408_v48 = vld [vmem:[%s11935_s1 + $0x1d8] sm:$0xff]  ;;  %v4268_v18 = vld [vmem:[#allocation3 + $0x48] sm:$0xff] }
 0x622   :  { %v3726_v12 = vsel %vm478_vm0, %v10895_v43, 0.0  ;;  %v10905_v22 = vpop.eup %5980 }
 0x623   :  { %4714 = vst.msk [vmem:[#allocation3 + $0x38] sm:$0xff] %vm92_vm5, %v4650_v38  ;;  %v3729_v39 = vsel %vm478_vm0, %v10905_v22, 0.0  ;;  %v5983_v23 = vpop.eup %5982  ;;  %v4016_v38 = vmul.f32 %v10504_v11, %v9038_v41 }
 0x624   :  { %v2878_v47 = vmul.f32 0.6931472, %v5983_v23  ;;  %v5985_v49 = vpop.eup %5984  ;;  %v6409_v23 = vld [vmem:[%s11934_s0 + $0x1a8] sm:$0xff] }
 0x625   :  { %3965 = vadd.xlane.f32.xlu0 %v3964_v16  ;;  %v4144_v24 = vmul.f32 %v5985_v49, %v4016_v38  ;;  %v12596_v38 = vld [vmem:[#allocation61_spill] sm:$0xff] }
 0x626   :  { %v3056_v60 = vadd.f32 %v2992_v0, %v2878_v47 }
 0x628   :  { %v4208_v59 = vsub.f32 %v3056_v60, %v4144_v24 }
 0x62a   :  { %v4336_v7 = vmul.f32 %v6406_v36, %v4208_v59  ;;  %v4017_v59 = vmul.f32 %v10509_v54, %v9038_v41  ;;  %v6411_v54 = vld [vmem:[%s11936_s2 + $0x70] sm:$0xff] }
 0x638   :  { %v10898_v57 = vpop.xlane.xlu0 %3950 }
 0x639   :  { %12591 = vst [vmem:[#allocation137_spill] sm:$0xff] %v10898_v57 }
 0x63a   :  { %3727 = vadd.xlane.f32.xlu1 %v3726_v12  ;;  %v3358_v12 = vsub.f32 %v6408_v48, %v10274_v20  ;;  %v6410_v20 = vld [vmem:[%s11935_s1 + $0x1e0] sm:$0xff] }
 0x63b   :  { %4475 = vrot.lane.b32.xlu0 %v4335_v1, %s6521_s27  ;;  %v12595_v1 = vld [vmem:[#allocation145_spill] sm:$0xff] }
 0x63c   :  { %v10908_v27 = vpop.xlane.xlu0 %3953  ;;  %5986 = vlog2.f32 %v12595_v1  ;;  %v3422_v5 = vmul.f32 %v3358_v12, %v9038_v41 }
 0x63d   :  { %12592 = vst [vmem:[#allocation30_spill] sm:$0xff] %v10908_v27  ;;  %5988 = vrcp.f32 %v12596_v38 }
 0x63e   :  { %3730 = vadd.xlane.f32.xlu1 %v3729_v39  ;;  %v3545_v0 = vmul.f32 1.442695, %v3422_v5 }
 0x640   :  { %v4468_v19 = vpop.permute.xlu0 %4467  ;;  %5990 = vpow2.f32 %v3545_v0  ;;  %v4018_v0 = vmul.f32 %v10513_v52, %v9038_v41 }
 0x641   :  { %v4651_v16 = vadd.f32 %v4468_v19, %v4267_v2  ;;  %v3967_v2 = vsel %vm478_vm0, %v3799_v4, 0.0  ;;  %v3800_v19 = vmul.f32 %v6409_v23, %v10782_v10  ;;  %v2993_v4 = vmul.f32 %v9038_v41, %v12598_v25 }
 0x643   :  { %4715 = vst.msk [vmem:[#allocation3 + $0x40] sm:$0xff] %vm92_vm5, %v4651_v16  ;;  %v12597_v16 = vld [vmem:[#allocation64_spill] sm:$0xff]  ;;  %v3970_v3 = vsel %vm478_vm0, %v3800_v19, 0.0 }
 0x644   :  { %v3359_v47 = vsub.f32 %v6410_v20, %v12597_v16 }
 0x646   :  { %v3423_v24 = vmul.f32 %v3359_v47, %v9038_v41  ;;  %v4269_v47 = vld [vmem:[#allocation3 + $0x50] sm:$0xff] }
 0x648   :  { %v3547_v10 = vmul.f32 1.442695, %v3423_v24 }
 0x649   :  { %v5987_v60 = vpop.eup %5986 }
 0x64a   :  { %5992 = vpow2.f32 %v3547_v10  ;;  %v5989_v36 = vpop.eup %5988 }
 0x64b   :  { %v4145_v48 = vmul.f32 %v5989_v36, %v4017_v59  ;;  %v12603_v59 = vld [vmem:[#allocation47_spill] sm:$0xff] }
 0x64c   :  { %v2994_v36 = vmul.f32 %v9038_v41, %v12603_v59 }
 0x64f   :  { %4477 = vrot.lane.b32.xlu1 %v4336_v7, %s6521_s27  ;;  %v2880_v7 = vmul.f32 0.6931472, %v5987_v60 }
 0x651   :  { %v10921_v51 = vpop.xlane.xlu1 %3715  ;;  %v3057_v12 = vadd.f32 %v2993_v4, %v2880_v7 }
 0x653   :  { %v4209_v1 = vsub.f32 %v3057_v12, %v4145_v48  ;;  %v6412_v48 = vld [vmem:[%s11936_s2 + $0x78] sm:$0xff] }
 0x655   :  { %v10923_v11 = vpop.xlane.xlu1 %3718  ;;  %v4337_v5 = vmul.f32 %v6411_v54, %v4209_v1  ;;  %v6413_v1 = vld [vmem:[%s11934_s0 + $0x1b0] sm:$0xff] }
 0x656   :  { %12594 = vst [vmem:[#allocation140_spill] sm:$0xff] %v10923_v11 }
 0x659   :  { %v4470_v39 = vpop.permute.xlu1 %4469 }
 0x65a   :  { %v4652_v49 = vadd.f32 %v4470_v39, %v4268_v18  ;;  %3968 = vadd.xlane.f32.xlu0 %v3967_v2  ;;  %v12599_v18 = vld [vmem:[#allocation148_spill] sm:$0xff]  ;;  %v10953_v39 = vpop.eup %5990  ;;  %v12600_v2 = vld [vmem:[#allocation65_spill] sm:$0xff] }
 0x65b   :  { %5994 = vlog2.f32 %v12599_v18  ;;  %v3732_v19 = vsel %vm478_vm0, %v10953_v39, 0.0  ;;  %v10963_v38 = vpop.eup %5992 }
 0x65c   :  { %4716 = vst.msk [vmem:[#allocation3 + $0x48] sm:$0xff] %vm92_vm5, %v4652_v49  ;;  %5996 = vrcp.f32 %v12600_v2  ;;  %v3735_v16 = vsel %vm478_vm0, %v10963_v38, 0.0  ;;  %v3801_v2 = vmul.f32 %v6413_v1, %v10789_v32  ;;  %v6416_v32 = vld [vmem:[%s11934_s0 + $0x1b8] sm:$0xff] }
 0x65e   :  { %3971 = vadd.xlane.f32.xlu0 %v3970_v3 }
 0x668   :  { %v5995_v49 = vpop.eup %5994 }
 0x669   :  { %v2882_v10 = vmul.f32 0.6931472, %v5995_v49  ;;  %v5997_v60 = vpop.eup %5996 }
 0x66a   :  { %v4146_v7 = vmul.f32 %v5997_v60, %v4018_v0  ;;  %v3973_v0 = vsel %vm478_vm0, %v3801_v2, 0.0 }
 0x66b   :  { %v3058_v25 = vadd.f32 %v2994_v36, %v2882_v10 }
 0x66d   :  { %v4210_v4 = vsub.f32 %v3058_v25, %v4146_v7  ;;  %v4775_v7 = vld [vmem:[#allocation2 + $0x8] sm:$0xff] }
 0x66f   :  { %v4338_v12 = vmul.f32 %v6412_v48, %v4210_v4  ;;  %v4776_v4 = vld [vmem:[#allocation2 + $0x10] sm:$0xff] }
 0x671   :  { %v10956_v23 = vpop.xlane.xlu0 %3956 }
 0x672   :  { %12601 = vst [vmem:[#allocation31_spill] sm:$0xff] %v10956_v23  ;;  %v12649_v23 = vld [vmem:[#allocation166_spill] sm:$0xff] }
 0x673   :  { %3733 = vadd.xlane.f32.xlu1 %v3732_v19  ;;  %v6414_v19 = vld [vmem:[%s11935_s1 + $0x1e8] sm:$0xff] }
 0x674   :  { %4479 = vrot.lane.b32.xlu0 %v4337_v5, %s6521_s27  ;;  %v3360_v54 = vsub.f32 %v6414_v19, %v10467_v50  ;;  %v4270_v5 = vld [vmem:[#allocation3 + $0x58] sm:$0xff]  ;;  %v4841_v19 = vsel %vm92_vm5, %v4776_v4, 0.0  ;;  %v4779_v4 = vld [vmem:[#allocation2 + $0x28] sm:$0xff] }
 0x675   :  { %v10966_v20 = vpop.xlane.xlu0 %3959 }
 0x676   :  { %12602 = vst [vmem:[#allocation139_spill] sm:$0xff] %v10966_v20  ;;  %v3424_v50 = vmul.f32 %v3360_v54, %v9038_v41  ;;  %v12607_v54 = vld [vmem:[#allocation50_spill] sm:$0xff] }
 0x677   :  { %3736 = vadd.xlane.f32.xlu1 %v3735_v16  ;;  %v12606_v16 = vld [vmem:[#allocation147_spill] sm:$0xff] }
 0x678   :  { %5998 = vlog2.f32 %v12606_v16  ;;  %v3549_v59 = vmul.f32 1.442695, %v3424_v50 }
 0x679   :  { %v4472_v3 = vpop.permute.xlu0 %4471  ;;  %6000 = vrcp.f32 %v10465_v8  ;;  %v4019_v8 = vmul.f32 %v10517_v6, %v9038_v41 }
 0x67a   :  { %v4653_v24 = vadd.f32 %v4472_v3, %v4269_v47  ;;  %v6415_v47 = vld [vmem:[%s11935_s1 + $0x1f0] sm:$0xff]  ;;  %6002 = vpow2.f32 %v3549_v59 }
 0x67b   :  { %v3361_v49 = vsub.f32 %v6415_v47, %v10469_v30 }
 0x67c   :  { %4717 = vst.msk [vmem:[#allocation3 + $0x50] sm:$0xff] %vm92_vm5, %v4653_v24  ;;  %v3802_v24 = vmul.f32 %v6416_v32, %v10839_v28  ;;  %v4774_v28 = vld [vmem:[#allocation2] sm:$0xff] }
 0x67d   :  { %v3425_v60 = vmul.f32 %v3361_v49, %v9038_v41  ;;  %v4838_v2 = vsel %vm92_vm5, %v4774_v28, 0.0  ;;  %v4777_v49 = vld [vmem:[#allocation2 + $0x18] sm:$0xff] }
 0x67e   :  { %v3976_v30 = vsel %vm478_vm0, %v3802_v24, 0.0  ;;  %v4843_v50 = vsel %vm92_vm5, %v4777_v49, 0.0 }
 0x67f   :  { %v3551_v36 = vmul.f32 1.442695, %v3425_v60 }
 0x681   :  { %6004 = vpow2.f32 %v3551_v36 }
 0x682   :  { %6006 = vrcp.f32 %v10807_v21  ;;  %v4778_v21 = vld [vmem:[#allocation2 + $0x20] sm:$0xff] }
 0x683   :  { %6008 = vrcp.f32 %v10850_v29  ;;  %v4845_v60 = vsel %vm92_vm5, %v4778_v21, 0.0 }
 0x685   :  { %v5999_v25 = vpop.eup %5998 }
 0x686   :  { %v6001_v48 = vpop.eup %6000  ;;  %v2884_v1 = vmul.f32 0.6931472, %v5999_v25 }
 0x687   :  { %v4147_v47 = vmul.f32 %v6001_v48, %v4019_v8  ;;  %v11016_v24 = vpop.eup %6002 }
 0x688   :  { %4481 = vrot.lane.b32.xlu1 %v4338_v12, %s6521_s27  ;;  %v4839_v12 = vsel %vm92_vm5, %v4775_v7, 0.0  ;;  %v3738_v36 = vsel %vm478_vm0, %v11016_v24, 0.0  ;;  %v6417_v7 = vld [vmem:[%s11936_s2 + $0x80] sm:$0xff] }
 0x689   :  { %v4840_v16 = vadd.f32 %v4839_v12, %v4838_v2  ;;  %v4780_v12 = vld [vmem:[#allocation2 + $0x30] sm:$0xff] }
 0x68a   :  { %v10979_v18 = vpop.xlane.xlu1 %3721 }
 0x68b   :  { %12604 = vst [vmem:[#allocation34_spill] sm:$0xff] %v10979_v18 }
 0x68e   :  { %v10981_v52 = vpop.xlane.xlu1 %3724  ;;  %v11021_v59 = vpop.eup %6004 }
 0x68f   :  { %12605 = vst [vmem:[#allocation142_spill] sm:$0xff] %v10981_v52  ;;  %v6007_v28 = vpop.eup %6006  ;;  %v3741_v2 = vsel %vm478_vm0, %v11021_v59, 0.0 }
 0x692   :  { %v4474_v3 = vpop.permute.xlu1 %4473 }
 0x693   :  { %v4654_v10 = vadd.f32 %v4474_v3, %v4270_v5  ;;  %3974 = vadd.xlane.f32.xlu0 %v3973_v0  ;;  %v2995_v5 = vmul.f32 %v9038_v41, %v12607_v54  ;;  %v4842_v3 = vadd.f32 %v4841_v19, %v4840_v16  ;;  %v12608_v0 = vld [vmem:[#allocation150_spill] sm:$0xff]  ;;  %v6009_v19 = vpop.eup %6008  ;;  %v4847_v54 = vsel %vm92_vm5, %v4779_v4, 0.0 }
 0x694   :  { %6010 = vlog2.f32 %v12608_v0  ;;  %v12611_v0 = vld [vmem:[#allocation84_spill] sm:$0xff] }
 0x695   :  { %4718 = vst.msk [vmem:[#allocation3 + $0x58] sm:$0xff] %vm92_vm5, %v4654_v10  ;;  %v3059_v6 = vadd.f32 %v2995_v5, %v2884_v1  ;;  %v4844_v10 = vadd.f32 %v4843_v50, %v4842_v3  ;;  %6012 = vrcp.f32 %v10482_v40  ;;  %v4271_v5 = vld [vmem:[#allocation3 + $0x60] sm:$0xff]  ;;  %v4849_v3 = vsel %vm92_vm5, %v4780_v12, 0.0  ;;  %v4781_v50 = vld [vmem:[#allocation2 + $0x38] sm:$0xff] }
 0x696   :  { %v4020_v21 = vmul.f32 %v12611_v0, %v9038_v41  ;;  %v4785_v0 = vld [vmem:[#allocation2 + $0x58] sm:$0xff] }
 0x697   :  { %3977 = vadd.xlane.f32.xlu0 %v3976_v30  ;;  %v4211_v32 = vsub.f32 %v3059_v6, %v4147_v47  ;;  %v4846_v8 = vadd.f32 %v4845_v60, %v4844_v10 }
 0x699   :  { %v4339_v25 = vmul.f32 %v6417_v7, %v4211_v32  ;;  %v4848_v16 = vadd.f32 %v4847_v54, %v4846_v8  ;;  %v4782_v7 = vld [vmem:[#allocation2 + $0x40] sm:$0xff]  ;;  %v6418_v54 = vld [vmem:[%s11936_s2 + $0x88] sm:$0xff] }
 0x69b   :  { %v4850_v10 = vadd.f32 %v4849_v3, %v4848_v16 }
 0x6a1   :  { %v6011_v49 = vpop.eup %6010 }
 0x6a2   :  { %v2886_v60 = vmul.f32 0.6931472, %v6011_v49 }
 0x6aa   :  { %v3963_v30 = vpop.xlane.xlu0 %3962 }
 0x6ab   :  { %v4053_v29 = vmul.f32 %v3963_v30, %v9038_v41  ;;  %v6013_v30 = vpop.eup %6012 }
 0x6ac   :  { %3739 = vadd.xlane.f32.xlu1 %v3738_v36 }
 0x6ad   :  { %v11029_v40 = vmul.f32 %v6007_v28, %v4053_v29  ;;  %4483 = vrot.lane.b32.xlu0 %v4339_v25, %s6521_s27  ;;  %v12612_v29 = vld [vmem:[#allocation51_spill] sm:$0xff]  ;;  %v4148_v25 = vmul.f32 %v6013_v30, %v4020_v21  ;;  %v4851_v28 = vsel %vm92_vm5, %v4781_v50, 0.0  ;;  %v6419_v50 = vld [vmem:[%s11935_s1 + $0x1f8] sm:$0xff] }
 0x6ae   :  { %v3966_v48 = vpop.xlane.xlu0 %3965  ;;  %v2996_v36 = vmul.f32 %v9038_v41, %v12612_v29  ;;  %v4852_v4 = vadd.f32 %v4851_v28, %v4850_v10  ;;  %v12614_v10 = vld [vmem:[#allocation69_spill] sm:$0xff]  ;;  %v4272_v28 = vld [vmem:[#allocation3 + $0x68] sm:$0xff] }
 0x6af   :  { %12609 = vst [vmem:[#allocation35_spill] sm:$0xff] %v11029_v40  ;;  %v4054_v1 = vmul.f32 %v3966_v48, %v9038_v41  ;;  %v4853_v48 = vsel %vm92_vm5, %v4782_v7, 0.0  ;;  %v6420_v29 = vld [vmem:[%s11934_s0 + $0x1c0] sm:$0xff]  ;;  %v4859_v7 = vsel %vm92_vm5, %v4785_v0, 0.0  ;;  %v12648_v40 = vld [vmem:[#allocation67_spill] sm:$0xff] }
 0x6b0   :  { %3742 = vadd.xlane.f32.xlu1 %v3741_v2  ;;  %v3060_v8 = vadd.f32 %v2996_v36, %v2886_v60  ;;  %v4854_v2 = vadd.f32 %v4853_v48, %v4852_v4  ;;  %v3362_v60 = vsub.f32 %v6419_v50, %v12614_v10  ;;  %v3803_v36 = vmul.f32 %v6420_v29, %v10847_v55  ;;  %v12617_v48 = vld [vmem:[#allocation151_spill] sm:$0xff]  ;;  %v12620_v0 = vld [vmem:[#allocation153_spill] sm:$0xff] }
 0x6b1   :  { %v11036_v47 = vmul.f32 %v6009_v19, %v4054_v1  ;;  %v4783_v1 = vld [vmem:[#allocation2 + $0x48] sm:$0xff]  ;;  %v4784_v19 = vld [vmem:[#allocation2 + $0x50] sm:$0xff]  ;;  %v11161_v18 = vmul.f32 %v9038_v41, %v12648_v40 }
 0x6b2   :  { %v4476_v6 = vpop.permute.xlu0 %4475  ;;  %v4212_v12 = vsub.f32 %v3060_v8, %v4148_v25  ;;  %v4855_v16 = vsel %vm92_vm5, %v4783_v1, 0.0  ;;  %v4857_v3 = vsel %vm92_vm5, %v4784_v19, 0.0  ;;  %v12616_v8 = vld [vmem:[#allocation149_spill] sm:$0xff]  ;;  %v6421_v19 = vld [vmem:[%s11934_s0 + $0x1c8] sm:$0xff] }
 0x6b3   :  { %12610 = vst [vmem:[#allocation141_spill] sm:$0xff] %v11036_v47  ;;  %v4655_v32 = vadd.f32 %v4476_v6, %v4271_v5  ;;  %v4856_v49 = vadd.f32 %v4855_v16, %v4854_v2  ;;  %6014 = vlog2.f32 %v12616_v8  ;;  %v3979_v2 = vsel %vm478_vm0, %v3803_v36, 0.0  ;;  %v4787_v16 = vld [vmem:[#allocation2 + $0x68] sm:$0xff]  ;;  %v12623_v36 = vld [vmem:[#allocation156_spill] sm:$0xff] }
 0x6b4   :  { %v4340_v5 = vmul.f32 %v6418_v54, %v4212_v12  ;;  %6016 = vlog2.f32 %v12617_v48  ;;  %v3426_v12 = vmul.f32 %v3362_v60, %v9038_v41  ;;  %v3804_v55 = vmul.f32 %v6421_v19, %v10895_v43  ;;  %v12618_v54 = vld [vmem:[#allocation68_spill] sm:$0xff]  ;;  %v12622_v60 = vld [vmem:[#allocation155_spill] sm:$0xff]  ;;  %v12626_v48 = vld [vmem:[#allocation157_spill] sm:$0xff] }
 0x6b5   :  { %4719 = vst.msk [vmem:[#allocation3 + $0x60] sm:$0xff] %vm92_vm5, %v4655_v32  ;;  %v4858_v21 = vadd.f32 %v4857_v3, %v4856_v49  ;;  %v4786_v32 = vld [vmem:[#allocation2 + $0x60] sm:$0xff]  ;;  %6018 = vrcp.f32 %v12618_v54  ;;  %v12619_v3 = vld [vmem:[#allocation152_spill] sm:$0xff]  ;;  %v4863_v43 = vsel %vm92_vm5, %v4787_v16, 0.0  ;;  %v12628_v19 = vld [vmem:[#allocation159_spill] sm:$0xff] }
 0x6b6   :  { %v4861_v4 = vsel %vm92_vm5, %v4786_v32, 0.0  ;;  %6020 = vlog2.f32 %v12619_v3  ;;  %v12621_v32 = vld [vmem:[#allocation154_spill] sm:$0xff]  ;;  %v3553_v50 = vmul.f32 1.442695, %v3426_v12  ;;  %v3982_v10 = vsel %vm478_vm0, %v3804_v55, 0.0 }
 0x6b7   :  { %v4860_v25 = vadd.f32 %v4859_v7, %v4858_v21  ;;  %6022 = vlog2.f32 %v12620_v0  ;;  %v4788_v21 = vld [vmem:[#allocation2 + $0x70] sm:$0xff]  ;;  %v12627_v12 = vld [vmem:[#allocation158_spill] sm:$0xff]  ;;  %v12630_v0 = vld [vmem:[#allocation76_spill] sm:$0xff] }
 0x6b8   :  { %6024 = vlog2.f32 %v12621_v32  ;;  %v4865_v7 = vsel %vm92_vm5, %v4788_v21, 0.0 }
 0x6b9   :  { %v4862_v49 = vadd.f32 %v4861_v4, %v4860_v25  ;;  %6026 = vlog2.f32 %v12622_v60  ;;  %v12624_v25 = vld [vmem:[#allocation72_spill] sm:$0xff]  ;;  %v12632_v60 = vld [vmem:[#allocation77_spill] sm:$0xff] }
 0x6ba   :  { %6028 = vlog2.f32 %v12623_v36  ;;  %v4789_v4 = vld [vmem:[#allocation2 + $0x78] sm:$0xff]  ;;  %v12633_v36 = vld [vmem:[#allocation54_spill] sm:$0xff] }
 0x6bb   :  { %v4864_v29 = vadd.f32 %v4863_v43, %v4862_v49  ;;  %6030 = vrcp.f32 %v12624_v25  ;;  %v4867_v54 = vsel %vm92_vm5, %v4789_v4, 0.0  ;;  %v4791_v25 = vld [vmem:[#allocation2 + $0x88] sm:$0xff] }
 0x6bc   :  { %6032 = vpow2.f32 %v3553_v50 }
 0x6bd   :  { %v4866_v8 = vadd.f32 %v4865_v7, %v4864_v29  ;;  %v2997_v7 = vmul.f32 %v9038_v41, %v12633_v36  ;;  %v12640_v36 = vld [vmem:[#allocation62_spill] sm:$0xff] }
 0x6bf   :  { %v4868_v3 = vadd.f32 %v4867_v54, %v4866_v8  ;;  %v12637_v54 = vld [vmem:[#allocation58_spill] sm:$0xff] }
 0x6c1   :  { %4485 = vrot.lane.b32.xlu1 %v4340_v5, %s6521_s27 }
 0x6c3   :  { %v11052_v6 = vpop.xlane.xlu1 %3727 }
 0x6c4   :  { %12613 = vst [vmem:[#allocation38_spill] sm:$0xff] %v11052_v6 }
 0x6c7   :  { %v11058_v30 = vpop.xlane.xlu1 %3730 }
 0x6c8   :  { %12615 = vst [vmem:[#allocation144_spill] sm:$0xff] %v11058_v30 }
 0x6cb   :  { %v4478_v1 = vpop.permute.xlu1 %4477 }
 0x6cc   :  { %v4656_v5 = vadd.f32 %v4478_v1, %v4272_v28  ;;  %3980 = vadd.xlane.f32.xlu0 %v3979_v2  ;;  %v12625_v28 = vld [vmem:[#allocation73_spill] sm:$0xff]  ;;  %v6015_v1 = vpop.eup %6014 }
 0x6cd   :  { %6034 = vrcp.f32 %v12625_v28  ;;  %v4790_v2 = vld [vmem:[#allocation2 + $0x80] sm:$0xff]  ;;  %v6017_v55 = vpop.eup %6016  ;;  %v2888_v50 = vmul.f32 0.6931472, %v6015_v1  ;;  %v12634_v28 = vld [vmem:[#allocation92_spill] sm:$0xff] }
 0x6ce   :  { %4720 = vst.msk [vmem:[#allocation3 + $0x68] sm:$0xff] %vm92_vm5, %v4656_v5  ;;  %6036 = vlog2.f32 %v12626_v48  ;;  %v12629_v5 = vld [vmem:[#allocation88_spill] sm:$0xff]  ;;  %v6019_v49 = vpop.eup %6018  ;;  %v4869_v32 = vsel %vm92_vm5, %v4790_v2, 0.0  ;;  %v4022_v4 = vmul.f32 %v12634_v28, %v9038_v41  ;;  %v12635_v48 = vld [vmem:[#allocation55_spill] sm:$0xff]  ;;  %v12636_v2 = vld [vmem:[#allocation161_spill] sm:$0xff]  ;;  %v11120_v28 = vmul.f32 %v9038_v41, %v12640_v36 }
 0x6cf   :  { %6038 = vlog2.f32 %v12627_v12  ;;  %v4021_v16 = vmul.f32 %v12629_v5, %v9038_v41  ;;  %v6021_v21 = vpop.eup %6020  ;;  %v2998_v12 = vmul.f32 %v9038_v41, %v12635_v48  ;;  %v4870_v1 = vadd.f32 %v4869_v32, %v4868_v3  ;;  %v4792_v32 = vld [vmem:[#allocation2 + $0x90] sm:$0xff]  ;;  %v12644_v36 = vld [vmem:[#allocation66_spill] sm:$0xff] }
 0x6d0   :  { %3983 = vadd.xlane.f32.xlu0 %v3982_v10  ;;  %6040 = vlog2.f32 %v12628_v19  ;;  %v12631_v10 = vld [vmem:[#allocation160_spill] sm:$0xff]  ;;  %v11096_v43 = vpop.eup %6022  ;;  %v2999_v5 = vmul.f32 %v9038_v41, %v12637_v54  ;;  %v4871_v3 = vsel %vm92_vm5, %v4791_v25, 0.0  ;;  %v12641_v48 = vld [vmem:[#allocation163_spill] sm:$0xff]  ;;  %v4023_v54 = vmul.f32 %v10556_v58, %v9038_v41 }
 0x6d1   :  { %6042 = vrcp.f32 %v10865_v42  ;;  %v6025_v29 = vpop.eup %6024  ;;  %v4149_v42 = vmul.f32 %v6019_v49, %v4021_v16  ;;  %v2890_v16 = vmul.f32 0.6931472, %v6021_v21  ;;  %v12638_v49 = vld [vmem:[#allocation162_spill] sm:$0xff]  ;;  %v11135_v25 = vmul.f32 %v9038_v41, %v12644_v36 }
 0x6d2   :  { %6044 = vrcp.f32 %v12630_v0  ;;  %v11104_v8 = vpop.eup %6026  ;;  %v3061_v0 = vadd.f32 %v2997_v7, %v2888_v50  ;;  %v12642_v50 = vld [vmem:[#allocation164_spill] sm:$0xff]  ;;  %v4872_v6 = vadd.f32 %v4871_v3, %v4870_v1  ;;  %v4024_v36 = vmul.f32 %v10563_v15, %v9038_v41  ;;  %v6422_v3 = vld [vmem:[%s11934_s0 + $0x1d0] sm:$0xff] }
 0x6d3   :  { %6046 = vlog2.f32 %v12631_v10  ;;  %v11109_v19 = vpop.eup %6028  ;;  %v6423_v15 = vld [vmem:[%s11936_s2 + $0x90] sm:$0xff]  ;;  %v2894_v20 = vmul.f32 0.6931472, %v6025_v29 }
 0x6d4   :  { %6048 = vrcp.f32 %v12632_v60  ;;  %v6031_v10 = vpop.eup %6030  ;;  %v12639_v60 = vld [vmem:[#allocation59_spill] sm:$0xff]  ;;  %v4213_v21 = vsub.f32 %v3061_v0, %v4149_v42  ;;  %v4873_v42 = vsel %vm92_vm5, %v4792_v32, 0.0  ;;  %v3062_v0 = vadd.f32 %v2998_v12, %v2890_v16 }
 0x6d5   :  { %6050 = vrcp.f32 %v10921_v51  ;;  %v11116_v51 = vmul.f32 %v9038_v41, %v12639_v60  ;;  %v4150_v7 = vmul.f32 %v6031_v10, %v4022_v4  ;;  %v12643_v60 = vld [vmem:[#allocation63_spill] sm:$0xff]  ;;  %v2892_v4 = vmul.f32 0.6931472, %v6017_v55  ;;  %v12646_v10 = vld [vmem:[#allocation80_spill] sm:$0xff] }
 0x6d6   :  { %6052 = vlog2.f32 %v12636_v2  ;;  %v11124_v2 = vpop.eup %6032  ;;  %v11131_v30 = vmul.f32 %v9038_v41, %v12643_v60  ;;  %v12647_v60 = vld [vmem:[#allocation81_spill] sm:$0xff]  ;;  %v3805_v55 = vmul.f32 %v6422_v3, %v10905_v22  ;;  %v4874_v11 = vadd.f32 %v4873_v42, %v4872_v6 }
 0x6d7   :  { %6054 = vlog2.f32 %v12638_v49  ;;  %v3744_v1 = vsel %vm478_vm0, %v11124_v2, 0.0  ;;  %v4214_v16 = vsub.f32 %v3062_v0, %v4150_v7  ;;  %v4794_v0 = vld [vmem:[#allocation2 + $0xa0] sm:$0xff]  ;;  %v4025_v6 = vmul.f32 %v10569_v35, %v9038_v41 }
 0x6d8   :  { %6056 = vlog2.f32 %v12641_v48  ;;  %v12645_v48 = vld [vmem:[#allocation165_spill] sm:$0xff]  ;;  %v3985_v29 = vsel %vm478_vm0, %v3805_v55, 0.0 }
 0x6d9   :  { %6058 = vlog2.f32 %v12642_v50  ;;  %v4793_v50 = vld [vmem:[#allocation2 + $0x98] sm:$0xff] }
 0x6da   :  { %v6035_v49 = vpop.eup %6034  ;;  %6060 = vlog2.f32 %v12645_v48  ;;  %v4875_v7 = vsel %vm92_vm5, %v4793_v50, 0.0  ;;  %v12652_v50 = vld [vmem:[#allocation89_spill] sm:$0xff] }
 0x6db   :  { %v11138_v52 = vpop.eup %6036  ;;  %6062 = vrcp.f32 %v12646_v10  ;;  %v4151_v32 = vmul.f32 %v6035_v49, %v4023_v54  ;;  %v4341_v10 = vmul.f32 %v6423_v15, %v4213_v21  ;;  %v3063_v54 = vadd.f32 %v2999_v5, %v2892_v4  ;;  %v6424_v5 = vld [vmem:[%s11934_s0 + $0x1d8] sm:$0xff]  ;;  %v12653_v15 = vld [vmem:[#allocation70_spill] sm:$0xff] }
 0x6dc   :  { %v11142_v58 = vpop.eup %6038  ;;  %6064 = vrcp.f32 %v12647_v60  ;;  %v3806_v42 = vmul.f32 %v6424_v5, %v10953_v39  ;;  %v11187_v55 = vmul.f32 %v9038_v41, %v12653_v15  ;;  %v12654_v39 = vld [vmem:[#allocation168_spill] sm:$0xff]  ;;  %v12660_v15 = vld [vmem:[#allocation75_spill] sm:$0xff] }
 0x6dd   :  { %v11153_v12 = vpop.eup %6040  ;;  %6066 = vlog2.f32 %v12649_v23 }
 0x6de   :  { %v6043_v60 = vpop.eup %6042 }
 0x6df   :  { %v6045_v22 = vpop.eup %6044 }
 0x6e0   :  { %v11169_v21 = vpop.eup %6046  ;;  %v11171_v40 = vmul.f32 %v6045_v22, %v4024_v36  ;;  %v6425_v36 = vld [vmem:[%s11936_s2 + $0x98] sm:$0xff]  ;;  %v4273_v22 = vld [vmem:[#allocation3 + $0x70] sm:$0xff] }
 0x6e1   :  { %v6049_v4 = vpop.eup %6048  ;;  %v4342_v35 = vmul.f32 %v6425_v36, %v4214_v16 }
 0x6e3   :  { %v3969_v47 = vpop.xlane.xlu0 %3968 }
 0x6e4   :  { %v4055_v48 = vmul.f32 %v3969_v47, %v9038_v41  ;;  %v12650_v47 = vld [vmem:[#allocation167_spill] sm:$0xff] }
 0x6e5   :  { %3745 = vadd.xlane.f32.xlu1 %v3744_v1  ;;  %6068 = vlog2.f32 %v12650_v47  ;;  %v4215_v1 = vsub.f32 %v3063_v54, %v4151_v32  ;;  %v4877_v54 = vsel %vm92_vm5, %v4794_v0, 0.0  ;;  %v2896_v47 = vmul.f32 0.6931472, %v11096_v43 }
 0x6e6   :  { %v11166_v49 = vmul.f32 %v6043_v60, %v4055_v48  ;;  %4487 = vrot.lane.b32.xlu0 %v4341_v10, %s6521_s27  ;;  %6070 = vrcp.f32 %v12652_v50  ;;  %v6051_v48 = vpop.eup %6050  ;;  %v4876_v10 = vadd.f32 %v4875_v7, %v4874_v11  ;;  %v3064_v60 = vadd.f32 %v11116_v51, %v2894_v20  ;;  %v12657_v11 = vld [vmem:[#allocation170_spill] sm:$0xff] }
 0x6e7   :  { %v3972_v23 = vpop.xlane.xlu0 %3971  ;;  %6072 = vlog2.f32 %v12654_v39  ;;  %v11191_v32 = vpop.eup %6052  ;;  %v4153_v51 = vmul.f32 %v6049_v4, %v4025_v6  ;;  %v4026_v43 = vmul.f32 %v10578_v17, %v9038_v41 }
 0x6e8   :  { %12651 = vst [vmem:[#allocation39_spill] sm:$0xff] %v11166_v49  ;;  %v4056_v3 = vmul.f32 %v3972_v23, %v9038_v41  ;;  %v12655_v23 = vld [vmem:[#allocation169_spill] sm:$0xff]  ;;  %v11199_v5 = vpop.eup %6054  ;;  %v4216_v20 = vsub.f32 %v3064_v60, %v11171_v40  ;;  %v11227_v60 = vmul.f32 %v9038_v41, %v12660_v15  ;;  %v6429_v15 = vld [vmem:[%s11936_s2 + $0xa8] sm:$0xff] }
 0x6e9   :  { %3986 = vadd.xlane.f32.xlu1 %v3985_v29  ;;  %6074 = vlog2.f32 %v12655_v23  ;;  %v3988_v29 = vsel %vm478_vm0, %v3806_v42, 0.0  ;;  %v11204_v50 = vpop.eup %6056  ;;  %v12658_v42 = vld [vmem:[#allocation71_spill] sm:$0xff]  ;;  %v3065_v23 = vadd.f32 %v11120_v28, %v2896_v47  ;;  %v12682_v49 = vld [vmem:[#allocation101_spill] sm:$0xff] }
 0x6ea   :  { %v11196_v16 = vmul.f32 %v6051_v48, %v4056_v3  ;;  %4489 = vrot.lane.b32.xlu0 %v4342_v35, %s6521_s27  ;;  %6076 = vlog2.f32 %v12657_v11  ;;  %v6426_v3 = vld [vmem:[%s11936_s2 + $0xa0] sm:$0xff]  ;;  %v11215_v6 = vpop.eup %6058  ;;  %v11219_v4 = vmul.f32 %v9038_v41, %v12658_v42  ;;  %v12659_v48 = vld [vmem:[#allocation74_spill] sm:$0xff]  ;;  %v2898_v11 = vmul.f32 0.6931472, %v11109_v19  ;;  %v4796_v47 = vld [vmem:[#allocation2 + $0xb0] sm:$0xff] }
 0x6eb   :  { %v4480_v7 = vpop.permute.xlu0 %4479  ;;  %v4343_v36 = vmul.f32 %v6426_v3, %v4215_v1  ;;  %v6427_v35 = vld [vmem:[%s11934_s0 + $0x1e0] sm:$0xff]  ;;  %v11223_v17 = vmul.f32 %v9038_v41, %v12659_v48  ;;  %v12661_v1 = vld [vmem:[#allocation171_spill] sm:$0xff]  ;;  %v11230_v39 = vpop.eup %6060  ;;  %v6428_v19 = vld [vmem:[%s11934_s0 + $0x1e8] sm:$0xff] }
 0x6ec   :  { %12656 = vst [vmem:[#allocation143_spill] sm:$0xff] %v11196_v16  ;;  %v4657_v0 = vadd.f32 %v4480_v7, %v4273_v22  ;;  %v3807_v40 = vmul.f32 %v6427_v35, %v10963_v38  ;;  %6078 = vlog2.f32 %v12661_v1  ;;  %v4795_v38 = vld [vmem:[#allocation2 + $0xa8] sm:$0xff]  ;;  %v4878_v22 = vadd.f32 %v4877_v54, %v4876_v10  ;;  %v12662_v7 = vld [vmem:[#allocation93_spill] sm:$0xff]  ;;  %v6063_v3 = vpop.eup %6062 }
 0x6ed   :  { %3989 = vadd.xlane.f32.xlu1 %v3988_v29  ;;  %6080 = vrcp.f32 %v12662_v7  ;;  %v12663_v35 = vld [vmem:[#allocation78_spill] sm:$0xff]  ;;  %v12664_v29 = vld [vmem:[#allocation96_spill] sm:$0xff]  ;;  %v4027_v10 = vmul.f32 %v10587_v13, %v9038_v41  ;;  %v3808_v28 = vmul.f32 %v6428_v19, %v11016_v24  ;;  %v6065_v54 = vpop.eup %6064  ;;  %v4344_v1 = vmul.f32 %v6429_v15, %v4216_v20  ;;  %v12665_v7 = vld [vmem:[#allocation79_spill] sm:$0xff] }
 0x6ee   :  { %4721 = vst.msk [vmem:[#allocation3 + $0x70] sm:$0xff] %vm92_vm5, %v4657_v0  ;;  %4491 = vrot.lane.b32.xlu0 %v4343_v36, %s6521_s27  ;;  %v11239_v42 = vmul.f32 %v9038_v41, %v12663_v35  ;;  %6082 = vrcp.f32 %v12664_v29  ;;  %v4217_v0 = vsub.f32 %v3065_v23, %v4153_v51  ;;  %v4154_v36 = vmul.f32 %v6063_v3, %v4026_v43  ;;  %v12666_v24 = vld [vmem:[#allocation172_spill] sm:$0xff]  ;;  %v11259_v51 = vpop.eup %6066  ;;  %v12667_v43 = vld [vmem:[#allocation82_spill] sm:$0xff]  ;;  %v12668_v3 = vld [vmem:[#allocation173_spill] sm:$0xff] }
 0x6ef   :  { %v3991_v48 = vsel %vm478_vm0, %v3807_v40, 0.0  ;;  %v11254_v13 = vmul.f32 %v9038_v41, %v12665_v7  ;;  %v4879_v35 = vsel %vm92_vm5, %v4795_v38, 0.0  ;;  %v2900_v29 = vmul.f32 0.6931472, %v11104_v8  ;;  %v12669_v38 = vld [vmem:[#allocation85_spill] sm:$0xff] }
 0x6f0   :  { %6084 = vlog2.f32 %v12666_v24  ;;  %v11263_v40 = vmul.f32 %v9038_v41, %v12667_v43  ;;  %v4880_v23 = vadd.f32 %v4879_v35, %v4878_v22  ;;  %v3066_v20 = vadd.f32 %v11131_v30, %v2898_v11  ;;  %v6430_v30 = vld [vmem:[%s11936_s2 + $0xb0] sm:$0xff] }
 0x6f1   :  { %3992 = vadd.xlane.f32.xlu1 %v3991_v48  ;;  %6086 = vlog2.f32 %v12668_v3  ;;  %v4881_v8 = vsel %vm92_vm5, %v4796_v47, 0.0  ;;  %v4155_v48 = vmul.f32 %v6065_v54, %v4027_v10  ;;  %v3994_v15 = vsel %vm478_vm0, %v3808_v28, 0.0  ;;  %v6431_v11 = vld [vmem:[%s11934_s0 + $0x1f0] sm:$0xff]  ;;  %v12671_v28 = vld [vmem:[#allocation86_spill] sm:$0xff] }
 0x6f2   :  { %4493 = vrot.lane.b32.xlu0 %v4344_v1, %s6521_s27  ;;  %v11268_v19 = vpop.eup %6068  ;;  %6088 = vrcp.f32 %v12669_v38  ;;  %v4218_v7 = vsub.f32 %v3066_v20, %v4154_v36  ;;  %v4029_v24 = vmul.f32 %v10600_v37, %v9038_v41  ;;  %v4345_v22 = vmul.f32 %v6430_v30, %v4217_v0  ;;  %v12670_v35 = vld [vmem:[#allocation83_spill] sm:$0xff]  ;;  %v12674_v38 = vld [vmem:[#allocation174_spill] sm:$0xff] }
 0x6f3   :  { %v3809_v47 = vmul.f32 %v6431_v11, %v11021_v59  ;;  %v6071_v1 = vpop.eup %6070  ;;  %v11284_v10 = vmul.f32 %v9038_v41, %v12670_v35  ;;  %v11288_v54 = vmul.f32 %v9038_v41, %v12671_v28  ;;  %v3067_v37 = vadd.f32 %v11135_v25, %v2900_v29  ;;  %v12672_v36 = vld [vmem:[#allocation87_spill] sm:$0xff]  ;;  %v12673_v59 = vld [vmem:[#allocation90_spill] sm:$0xff]  ;;  %v6432_v11 = vld [vmem:[%s11934_s0 + $0x1f8] sm:$0xff] }
 0x6f4   :  { %6090 = vrcp.f32 %v10567_v44  ;;  %v11292_v0 = vpop.eup %6072  ;;  %v11296_v43 = vmul.f32 %v9038_v41, %v12672_v36  ;;  %v11300_v20 = vmul.f32 %v9038_v41, %v12673_v59  ;;  %v2904_v3 = vmul.f32 0.6931472, %v11138_v52  ;;  %v4797_v44 = vld [vmem:[#allocation2 + $0xb8] sm:$0xff]  ;;  %v4798_v52 = vld [vmem:[#allocation2 + $0xc0] sm:$0xff] }
 0x6f5   :  { %3995 = vadd.xlane.f32.xlu1 %v3994_v15  ;;  %6092 = vlog2.f32 %v12674_v38  ;;  %v4882_v29 = vadd.f32 %v4881_v8, %v4880_v23  ;;  %v12675_v15 = vld [vmem:[#allocation97_spill] sm:$0xff]  ;;  %v4219_v30 = vsub.f32 %v3067_v37, %v4155_v48  ;;  %v3810_v35 = vmul.f32 %v6432_v11, %v11124_v2  ;;  %v6433_v23 = vld [vmem:[%s11936_s2 + $0xb8] sm:$0xff]  ;;  %v12677_v48 = vld [vmem:[#allocation91_spill] sm:$0xff] }
 0x6f6   :  { %4495 = vrot.lane.b32.xlu0 %v4345_v22, %s6521_s27  ;;  %v11305_v25 = vpop.eup %6074  ;;  %6094 = vrcp.f32 %v12675_v15  ;;  %v4157_v36 = vmul.f32 %v6071_v1, %v4029_v24  ;;  %v12676_v59 = vld [vmem:[#allocation109_spill] sm:$0xff]  ;;  %v3997_v38 = vsel %vm478_vm0, %v3809_v47, 0.0  ;;  %v4346_v8 = vmul.f32 %v6433_v23, %v4218_v7  ;;  %v12678_v15 = vld [vmem:[#allocation94_spill] sm:$0xff]  ;;  %v12679_v11 = vld [vmem:[#allocation95_spill] sm:$0xff] }
 0x6f7   :  { %v11312_v28 = vpop.eup %6076  ;;  %v4030_v22 = vmul.f32 %v12676_v59, %v9038_v41  ;;  %v11322_v37 = vmul.f32 %v9038_v41, %v12677_v48  ;;  %v11326_v2 = vmul.f32 %v9038_v41, %v12678_v15  ;;  %v11330_v24 = vmul.f32 %v9038_v41, %v12679_v11  ;;  %v12680_v1 = vld [vmem:[#allocation24_spill] sm:$0xff] }
 0x6f8   :  { %6096 = vlog2.f32 %v12680_v1  ;;  %v4883_v59 = vsel %vm92_vm5, %v4797_v44, 0.0  ;;  %v3069_v7 = vadd.f32 %v11187_v55, %v2904_v3  ;;  %v2906_v23 = vmul.f32 0.6931472, %v11169_v21  ;;  %v12681_v48 = vld [vmem:[#allocation100_spill] sm:$0xff]  ;;  %v12683_v44 = vld [vmem:[#allocation113_spill] sm:$0xff] }
 0x6f9   :  { %3998 = vadd.xlane.f32.xlu1 %v3997_v38  ;;  %v11333_v47 = vpop.eup %6078  ;;  %6098 = vrcp.f32 %v12681_v48  ;;  %v4884_v16 = vadd.f32 %v4883_v59, %v4882_v29  ;;  %v4885_v11 = vsel %vm92_vm5, %v4798_v52, 0.0  ;;  %v4000_v38 = vsel %vm478_vm0, %v3810_v35, 0.0  ;;  %v6434_v21 = vld [vmem:[%s11936_s2 + $0xc0] sm:$0xff]  ;;  %v12685_v29 = vld [vmem:[#allocation98_spill] sm:$0xff]  ;;  %v12690_v48 = vld [vmem:[#allocation103_spill] sm:$0xff] }
 0x6fa   :  { %4497 = vrot.lane.b32.xlu0 %v4346_v8, %s6521_s27  ;;  %v6081_v15 = vpop.eup %6080  ;;  %6100 = vrcp.f32 %v12682_v49  ;;  %v4221_v27 = vsub.f32 %v3069_v7, %v4157_v36  ;;  %v4031_v55 = vmul.f32 %v12683_v44, %v9038_v41  ;;  %v4347_v8 = vmul.f32 %v6434_v21, %v4219_v30  ;;  %v12686_v49 = vld [vmem:[#allocation99_spill] sm:$0xff]  ;;  %v12688_v36 = vld [vmem:[#allocation102_spill] sm:$0xff]  ;;  %v12689_v59 = vld [vmem:[#allocation105_spill] sm:$0xff] }
 0x6fb   :  { %v6083_v1 = vpop.eup %6082  ;;  %v4158_v57 = vmul.f32 %v6081_v15, %v4030_v22  ;;  %v11352_v52 = vmul.f32 %v9038_v41, %v12685_v29  ;;  %v11356_v35 = vmul.f32 %v9038_v41, %v12686_v49  ;;  %v11360_v22 = vmul.f32 %v9038_v41, %v12688_v36  ;;  %v12692_v21 = vld [vmem:[#allocation21_spill] sm:$0xff]  ;;  %v4799_v49 = vld [vmem:[#allocation2 + $0xc8] sm:$0xff] }
 0x6fc   :  { %v11345_v3 = vpop.xlane.xlu1 %3733  ;;  %6102 = vrcp.f32 %v12689_v59  ;;  %v11367_v30 = vmul.f32 %v9038_v41, %v12690_v48  ;;  %v2908_v15 = vmul.f32 0.6931472, %v11153_v12  ;;  %v3070_v44 = vadd.f32 %v11219_v4, %v2906_v23  ;;  %v12693_v59 = vld [vmem:[#allocation22_spill] sm:$0xff]  ;;  %v12695_v48 = vld [vmem:[#allocation117_spill] sm:$0xff]  ;;  %v12696_v12 = vld [vmem:[#allocation108_spill] sm:$0xff] }
 0x6fd   :  { %12684 = vst [vmem:[#allocation42_spill] sm:$0xff] %v11345_v3  ;;  %12687 = vst [vmem:[#allocation146_spill] sm:$0xff] %v11356_v35  ;;  %4001 = vadd.xlane.f32.xlu1 %v4000_v38  ;;  %v11363_v7 = vpop.eup %6084  ;;  %6104 = vlog2.f32 %v12692_v21  ;;  %v4886_v36 = vadd.f32 %v4885_v11, %v4884_v16  ;;  %v12694_v38 = vld [vmem:[#allocation104_spill] sm:$0xff]  ;;  %v4159_v23 = vmul.f32 %v6083_v1, %v4031_v55  ;;  %v12698_v11 = vld [vmem:[#allocation106_spill] sm:$0xff]  ;;  %v4887_v55 = vsel %vm92_vm5, %v4799_v49, 0.0 }
 0x6fe   :  { %12691 = vst [vmem:[#allocation43_spill] sm:$0xff] %v11367_v30  ;;  %4499 = vrot.lane.b32.xlu0 %v4347_v8, %s6521_s27  ;;  %v11373_v29 = vpop.eup %6086  ;;  %6106 = vlog2.f32 %v12693_v59  ;;  %v4028_v3 = vmul.f32 %v12694_v38, %v9038_v41  ;;  %v4032_v30 = vmul.f32 %v12695_v48, %v9038_v41  ;;  %v4222_v4 = vsub.f32 %v3070_v44, %v4158_v57  ;;  %v6435_v8 = vld [vmem:[%s11936_s2 + $0xd0] sm:$0xff]  ;;  %v12705_v49 = vld [vmem:[#allocation121_spill] sm:$0xff] }
 0x6ff   :  { %v6089_v62 = vpop.eup %6088  ;;  %6108 = vrcp.f32 %v12696_v12  ;;  %v4349_v16 = vmul.f32 %v6435_v8, %v4221_v27  ;;  %v11388_v59 = vmul.f32 %v9038_v41, %v12698_v11  ;;  %v2902_v38 = vmul.f32 0.6931472, %v11142_v58  ;;  %v12701_v57 = vld [vmem:[#allocation107_spill] sm:$0xff]  ;;  %v12703_v27 = vld [vmem:[#allocation112_spill] sm:$0xff] }
 0x700   :  { %v11381_v21 = vpop.xlane.xlu1 %3736  ;;  %v2910_v48 = vmul.f32 0.6931472, %v11199_v5  ;;  %6110 = vlog2.f32 %v12700_v56  ;;  %v11395_v1 = vmul.f32 %v9038_v41, %v12701_v57  ;;  %v3071_v44 = vadd.f32 %v11223_v17, %v2908_v15  ;;  %v4274_v8 = vld [vmem:[#allocation3 + $0x78] sm:$0xff]  ;;  %v4800_v58 = vld [vmem:[#allocation2 + $0xd0] sm:$0xff]  ;;  %v12706_v17 = vld [vmem:[#allocation125_spill] sm:$0xff] }
 0x701   :  { %12697 = vst [vmem:[#allocation145_spill] sm:$0xff] %v11381_v21  ;;  %12699 = vst [vmem:[#allocation61_spill] sm:$0xff] %v11388_v59  ;;  %v6091_v12 = vpop.eup %6090  ;;  %6112 = vrcp.f32 %v12703_v27  ;;  %v11403_v5 = vadd.f32 %v4887_v55, %v4886_v36  ;;  %v4156_v56 = vmul.f32 %v6089_v62, %v4028_v3  ;;  %v12704_v21 = vld [vmem:[#allocation116_spill] sm:$0xff]  ;;  %v4033_v26 = vmul.f32 %v12705_v49, %v9038_v41 }
 0x702   :  { %12702 = vst [vmem:[#allocation64_spill] sm:$0xff] %v11395_v1  ;;  %4503 = vrot.lane.b32.xlu0 %v4349_v16, %s6521_s27  ;;  %v11401_v11 = vpop.eup %6092  ;;  %6114 = vrcp.f32 %v12704_v21  ;;  %v4160_v59 = vmul.f32 %v6091_v12, %v4032_v30  ;;  %v4223_v1 = vsub.f32 %v3071_v44, %v4159_v23  ;;  %v4034_v15 = vmul.f32 %v12706_v17, %v9038_v41  ;;  %v6436_v16 = vld [vmem:[%s11936_s2 + $0xd8] sm:$0xff] }
 0x703   :  { %v6095_v57 = vpop.eup %6094  ;;  %v4350_v35 = vmul.f32 %v6436_v16, %v4222_v4  ;;  %v3068_v36 = vadd.f32 %v11161_v18, %v2902_v38  ;;  %v3072_v62 = vadd.f32 %v11227_v60, %v2910_v48  ;;  %v12707_v3 = vld [vmem:[#allocation120_spill] sm:$0xff]  ;;  %v11419_v21 = vsel %vm92_vm5, %v4800_v58, 0.0 }
 0x704   :  { %v4482_v27 = vpop.permute.xlu1 %4481  ;;  %6116 = vrcp.f32 %v12707_v3  ;;  %v2912_v12 = vmul.f32 0.6931472, %v11191_v32  ;;  %v2914_v55 = vmul.f32 0.6931472, %v11215_v6  ;;  %v12708_v44 = vld [vmem:[#allocation28_spill] sm:$0xff]  ;;  %v4161_v17 = vmul.f32 %v6095_v57, %v4033_v26  ;;  %v12713_v57 = vld [vmem:[#allocation29_spill] sm:$0xff] }
 0x705   :  { %v4658_v30 = vadd.f32 %v4482_v27, %v4274_v8  ;;  %v11416_v23 = vpop.eup %6096  ;;  %6118 = vlog2.f32 %v12708_v44  ;;  %v4220_v18 = vsub.f32 %v3068_v36, %v4156_v56  ;;  %v4224_v38 = vsub.f32 %v3072_v62, %v4160_v59  ;;  %v12709_v60 = vld [vmem:[#allocation12_spill] sm:$0xff]  ;;  %v12710_v8 = vld [vmem:[#allocation14_spill] sm:$0xff]  ;;  %v12712_v36 = vld [vmem:[#allocation11_spill] sm:$0xff] }
 0x706   :  { %4505 = vrot.lane.b32.xlu0 %v4350_v35, %s6521_s27  ;;  %v6099_v4 = vpop.eup %6098  ;;  %v4035_v48 = vmul.f32 %v12709_v60, %v9038_v41  ;;  %v4036_v49 = vmul.f32 %v12710_v8, %v9038_v41  ;;  %v12711_v32 = vld [vmem:[#allocation124_spill] sm:$0xff]  ;;  %v6437_v35 = vld [vmem:[%s11936_s2 + $0xe0] sm:$0xff]  ;;  %v2916_v59 = vmul.f32 0.6931472, %v11204_v50  ;;  %v2920_v56 = vmul.f32 0.6931472, %v11230_v39 }
 0x707   :  { %4722 = vst.msk [vmem:[#allocation3 + $0x78] sm:$0xff] %vm92_vm5, %v4658_v30  ;;  %v6101_v58 = vpop.eup %6100  ;;  %6120 = vrcp.f32 %v12711_v32  ;;  %v4162_v6 = vmul.f32 %v6099_v4, %v4034_v15  ;;  %v4351_v27 = vmul.f32 %v6437_v35, %v4223_v1  ;;  %v2918_v16 = vmul.f32 0.6931472, %v11259_v51  ;;  %v12714_v50 = vld [vmem:[#allocation32_spill] sm:$0xff]  ;;  %v6438_v30 = vld [vmem:[%s11936_s2 + $0xc8] sm:$0xff]  ;;  %v12715_v44 = vld [vmem:[#allocation17_spill] sm:$0xff] }
 0x708   :  { %6122 = vrcp.f32 %v12712_v36  ;;  %v3073_v3 = vadd.f32 %v11239_v42, %v2912_v12  ;;  %v3074_v26 = vadd.f32 %v11254_v13, %v2914_v55  ;;  %v4037_v15 = vmul.f32 %v10652_v63, %v9038_v41  ;;  %v6439_v4 = vld [vmem:[%s11936_s2 + $0xe8] sm:$0xff]  ;;  %v4801_v32 = vld [vmem:[#allocation2 + $0xd8] sm:$0xff] }
 0x709   :  { %v6103_v62 = vpop.eup %6102  ;;  %6124 = vlog2.f32 %v12713_v57  ;;  %v4163_v39 = vmul.f32 %v6101_v58, %v4035_v48  ;;  %v4348_v42 = vmul.f32 %v6438_v30, %v4220_v18  ;;  %v4038_v63 = vmul.f32 %v12715_v44, %v9038_v41  ;;  %v12716_v58 = vld [vmem:[#allocation13_spill] sm:$0xff]  ;;  %v6441_v57 = vld [vmem:[%s11936_s2 + $0xf8] sm:$0xff]  ;;  %v12721_v30 = vld [vmem:[#allocation18_spill] sm:$0xff] }
 0x70a   :  { %4507 = vrot.lane.b32.xlu0 %v4351_v27, %s6521_s27  ;;  %v11444_v1 = vpop.eup %6104  ;;  %6126 = vlog2.f32 %v12714_v50  ;;  %v4164_v51 = vmul.f32 %v6103_v62, %v4036_v49  ;;  %v4225_v13 = vsub.f32 %v3073_v3, %v4161_v17  ;;  %v4226_v55 = vsub.f32 %v3074_v26, %v4162_v6  ;;  %v12717_v27 = vld [vmem:[#allocation15_spill] sm:$0xff] }
 0x70b   :  { %v11450_v12 = vpop.eup %6106  ;;  %v4352_v60 = vmul.f32 %v6439_v4, %v4224_v38  ;;  %v3075_v48 = vadd.f32 %v11263_v40, %v2916_v59  ;;  %v11459_v49 = vadd.f32 %v11288_v54, %v2920_v56  ;;  %v3076_v18 = vadd.f32 %v11284_v10, %v2918_v16  ;;  %v12718_v10 = vld [vmem:[#allocation19_spill] sm:$0xff] }
 0x70c   :  { %v6109_v8 = vpop.eup %6108  ;;  %6128 = vrcp.f32 %v12716_v58  ;;  %v2924_v6 = vmul.f32 0.6931472, %v11268_v19  ;;  %v2922_v35 = vmul.f32 0.6931472, %v11292_v0  ;;  %v4039_v56 = vmul.f32 %v12718_v10, %v9038_v41  ;;  %v12719_v16 = vld [vmem:[#allocation23_spill] sm:$0xff]  ;;  %v12720_v19 = vld [vmem:[#allocation16_spill] sm:$0xff] }
 0x70d   :  { %v11463_v17 = vpop.eup %6110  ;;  %6130 = vrcp.f32 %v12717_v27  ;;  %v4165_v38 = vmul.f32 %v6109_v8, %v4037_v15  ;;  %v4227_v54 = vsub.f32 %v3075_v48, %v4163_v39  ;;  %v4228_v59 = vsub.f32 %v3076_v18, %v4164_v51  ;;  %v6440_v3 = vld [vmem:[%s11936_s2 + $0xf0] sm:$0xff]  ;;  %v6442_v8 = vld [vmem:[%s11936_s2 + $0x100] sm:$0xff]  ;;  %v12725_v27 = vld [vmem:[#allocation110_spill] sm:$0xff] }
 0x70e   :  { %4501 = vrot.lane.b32.xlu1 %v4348_v42, %s6521_s27  ;;  %4509 = vrot.lane.b32.xlu0 %v4352_v60, %s6521_s27  ;;  %v6113_v40 = vpop.eup %6112  ;;  %v4040_v36 = vmul.f32 %v12719_v16, %v9038_v41  ;;  %6132 = vrcp.f32 %v12720_v19  ;;  %v4353_v26 = vmul.f32 %v6440_v3, %v4225_v13  ;;  %v4354_v15 = vmul.f32 %v6441_v57, %v4226_v55  ;;  %v4802_v10 = vld [vmem:[#allocation2 + $0xe0] sm:$0xff]  ;;  %v6444_v3 = vld [vmem:[%s11936_s2 + $0x110] sm:$0xff]  ;;  %v6445_v57 = vld [vmem:[%s11936_s2 + $0x118] sm:$0xff] }
 0x70f   :  { %v6115_v62 = vpop.eup %6114  ;;  %v4166_v0 = vmul.f32 %v6113_v40, %v4038_v63  ;;  %v4891_v50 = vsel %vm92_vm5, %v4801_v32, 0.0  ;;  %v4890_v39 = vadd.f32 %v11419_v21, %v11403_v5  ;;  %v2926_v51 = vmul.f32 0.6931472, %v11312_v28  ;;  %v12722_v63 = vld [vmem:[#allocation33_spill] sm:$0xff]  ;;  %v12726_v40 = vld [vmem:[#allocation111_spill] sm:$0xff] }
 0x710   :  { %6134 = vrcp.f32 %v12721_v30  ;;  %v11487_v44 = vadd.f32 %v11300_v20, %v2924_v6  ;;  %v3078_v13 = vadd.f32 %v11296_v43, %v2922_v35  ;;  %v4229_v4 = vsub.f32 %v11459_v49, %v4165_v38  ;;  %v12723_v43 = vld [vmem:[#allocation136_spill] sm:$0xff]  ;;  %v6443_v49 = vld [vmem:[%s11936_s2 + $0x108] sm:$0xff] }
 0x711   :  { %v6117_v42 = vpop.eup %6116  ;;  %6136 = vlog2.f32 %v12722_v63  ;;  %v4167_v5 = vmul.f32 %v6115_v62, %v4039_v56  ;;  %v4041_v21 = vmul.f32 %v10692_v45, %v9038_v41  ;;  %v4042_v20 = vmul.f32 %v10696_v31, %v9038_v41  ;;  %v12724_v6 = vld [vmem:[#allocation20_spill] sm:$0xff]  ;;  %v12727_v56 = vld [vmem:[#allocation37_spill] sm:$0xff] }
 0x712   :  { %4511 = vrot.lane.b32.xlu1 %v4353_v26, %s6521_s27  ;;  %4513 = vrot.lane.b32.xlu0 %v4354_v15, %s6521_s27  ;;  %v11494_v55 = vpop.eup %6118  ;;  %v4168_v28 = vmul.f32 %v6117_v42, %v4040_v36  ;;  %v4230_v60 = vsub.f32 %v3078_v13, %v4166_v0  ;;  %6138 = vrcp.f32 %v12723_v43  ;;  %v4355_v48 = vmul.f32 %v6442_v8, %v4227_v54 }
 0x713   :  { %v4356_v18 = vmul.f32 %v6443_v49, %v4228_v59  ;;  %v2928_v32 = vmul.f32 0.6931472, %v11305_v25  ;;  %v3080_v45 = vadd.f32 %v11322_v37, %v2926_v51  ;;  %v2930_v31 = vmul.f32 0.6931472, %v11363_v7 }
 0x714   :  { %v6121_v58 = vpop.eup %6120  ;;  %6140 = vrcp.f32 %v12724_v6  ;;  %v11513_v38 = vmul.f32 %v9038_v41, %v12725_v27  ;;  %v11517_v54 = vmul.f32 %v9038_v41, %v12726_v40  ;;  %v4892_v59 = vadd.f32 %v4891_v50, %v4890_v39  ;;  %v4803_v50 = vld [vmem:[#allocation2 + $0xe8] sm:$0xff]  ;;  %v6448_v40 = vld [vmem:[%s11936_s2 + $0x130] sm:$0xff] }
 0x715   :  { %v6123_v35 = vpop.eup %6122  ;;  %6142 = vlog2.f32 %v12727_v56  ;;  %v4231_v37 = vsub.f32 %v11487_v44, %v4167_v5  ;;  %v4232_v7 = vsub.f32 %v3080_v45, %v4168_v28  ;;  %v4169_v16 = vmul.f32 %v6121_v58, %v4041_v21  ;;  %v6447_v5 = vld [vmem:[%s11936_s2 + $0x128] sm:$0xff] }
 0x716   :  { %4515 = vrot.lane.b32.xlu1 %v4355_v48, %s6521_s27  ;;  %4517 = vrot.lane.b32.xlu0 %v4356_v18, %s6521_s27  ;;  %v11522_v25 = vpop.eup %6124  ;;  %v4170_v36 = vmul.f32 %v6123_v35, %v4042_v20  ;;  %v4043_v19 = vmul.f32 %v10698_v61, %v9038_v41  ;;  %v4044_v0 = vmul.f32 %v10738_v33, %v9038_v41  ;;  %v4893_v39 = vsel %vm92_vm5, %v4802_v10, 0.0  ;;  %v12728_v48 = vld [vmem:[#allocation146_spill] sm:$0xff] }
 0x717   :  { %v11525_v62 = vpop.eup %6126  ;;  %v4357_v26 = vmul.f32 %v6444_v3, %v4229_v4  ;;  %v4358_v15 = vmul.f32 %v6445_v57, %v4230_v60  ;;  %v3081_v51 = vadd.f32 %v11326_v2, %v2928_v32  ;;  %v3082_v61 = vadd.f32 %v11330_v24, %v2930_v31  ;;  %v12729_v18 = vld [vmem:[#allocation138_spill] sm:$0xff]  ;;  %v4804_v32 = vld [vmem:[#allocation2 + $0xf0] sm:$0xff] }
 0x718   :  { %6144 = vrcp.f32 %v10694_v14  ;;  %v2932_v30 = vmul.f32 0.6931472, %v11333_v47  ;;  %v2936_v42 = vmul.f32 0.6931472, %v11373_v29  ;;  %v2934_v44 = vmul.f32 0.6931472, %v11401_v11 }
 0x719   :  { %v6129_v33 = vpop.eup %6128  ;;  %6146 = vrcp.f32 %v10742_v46  ;;  %v4233_v63 = vsub.f32 %v3081_v51, %v4169_v16  ;;  %v4234_v2 = vsub.f32 %v3082_v61, %v4170_v36  ;;  %v4045_v24 = vmul.f32 %v10751_v9, %v9038_v41  ;;  %v6446_v46 = vld [vmem:[%s11936_s2 + $0x120] sm:$0xff]  ;;  %v12732_v36 = vld [vmem:[#allocation36_spill] sm:$0xff] }
 0x71a   :  { %4519 = vrot.lane.b32.xlu1 %v4357_v26, %s6521_s27  ;;  %4521 = vrot.lane.b32.xlu0 %v4358_v15, %s6521_s27  ;;  %v6131_v13 = vpop.eup %6130  ;;  %v4046_v14 = vmul.f32 %v10801_v53, %v9038_v41  ;;  %v4171_v47 = vmul.f32 %v6129_v33, %v4043_v19  ;;  %v4359_v11 = vmul.f32 %v6446_v46, %v4231_v37  ;;  %v4895_v9 = vsel %vm92_vm5, %v4803_v50, 0.0  ;;  %v12733_v19 = vld [vmem:[#allocation43_spill] sm:$0xff]  ;;  %v12734_v26 = vld [vmem:[#allocation114_spill] sm:$0xff]  ;;  %v12738_v46 = vld [vmem:[#allocation40_spill] sm:$0xff] }
 0x71b   :  { %v4172_v4 = vmul.f32 %v6131_v13, %v4044_v0  ;;  %v4360_v28 = vmul.f32 %v6447_v5, %v4232_v7  ;;  %v6133_v21 = vpop.eup %6132  ;;  %v4894_v20 = vadd.f32 %v4893_v39, %v4892_v59  ;;  %v2938_v53 = vmul.f32 0.6931472, %v11444_v1  ;;  %v6449_v59 = vld [vmem:[%s11936_s2 + $0x138] sm:$0xff]  ;;  %v12735_v39 = vld [vmem:[#allocation41_spill] sm:$0xff]  ;;  %v12737_v13 = vld [vmem:[#allocation30_spill] sm:$0xff] }
 0x71c   :  { %v11551_v29 = vpop.xlane.xlu0 %3974  ;;  %6148 = vrcp.f32 %v10745_v34  ;;  %v3083_v43 = vadd.f32 %v11352_v52, %v2932_v30  ;;  %v11564_v8 = vadd.f32 %v11360_v22, %v2936_v42  ;;  %v3084_v49 = vadd.f32 %v12728_v48, %v2934_v44  ;;  %v12730_v34 = vld [vmem:[#allocation26_spill] sm:$0xff]  ;;  %v12731_v52 = vld [vmem:[#allocation27_spill] sm:$0xff]  ;;  %v12736_v42 = vld [vmem:[#allocation137_spill] sm:$0xff] }
 0x71d   :  { %v6135_v60 = vpop.eup %6134  ;;  %6150 = vrcp.f32 %v12729_v18  ;;  %v4173_v1 = vmul.f32 %v6133_v21, %v4045_v24  ;;  %v4047_v31 = vmul.f32 %v12730_v34, %v9038_v41  ;;  %v4048_v22 = vmul.f32 %v12731_v52, %v9038_v41  ;;  %v6450_v24 = vld [vmem:[%s11936_s2 + $0x140] sm:$0xff]  ;;  %v6452_v18 = vld [vmem:[%s11936_s2 + $0x158] sm:$0xff] }
 0x71e   :  { %4523 = vrot.lane.b32.xlu1 %v4359_v11, %s6521_s27  ;;  %4525 = vrot.lane.b32.xlu0 %v4360_v28, %s6521_s27  ;;  %v11570_v58 = vpop.eup %6136  ;;  %v4174_v45 = vmul.f32 %v6135_v60, %v4046_v14  ;;  %v4235_v6 = vsub.f32 %v3083_v43, %v4171_v47  ;;  %v4236_v35 = vsub.f32 %v3084_v49, %v4172_v4  ;;  %v2940_v7 = vmul.f32 0.6931472, %v11416_v23  ;;  %v4275_v23 = vld [vmem:[#allocation3 + $0x80] sm:$0xff]  ;;  %v6451_v47 = vld [vmem:[%s11936_s2 + $0x148] sm:$0xff]  ;;  %v12740_v28 = vld [vmem:[#allocation64_spill] sm:$0xff] }
 0x71f   :  { %v4361_v10 = vmul.f32 %v6448_v40, %v4233_v63  ;;  %v4362_v56 = vmul.f32 %v6449_v59, %v4234_v2  ;;  %v6139_v37 = vpop.eup %6138  ;;  %v2942_v16 = vmul.f32 0.6931472, %v11463_v17  ;;  %6152 = vlog2.f32 %v12732_v36  ;;  %v12739_v11 = vld [vmem:[#allocation61_spill] sm:$0xff] }
 0x720   :  { %v11576_v27 = vpop.xlane.xlu0 %3977  ;;  %v3086_v0 = vadd.f32 %v12733_v19, %v2938_v53  ;;  %v11590_v57 = vmul.f32 %v9038_v41, %v12734_v26  ;;  %v4896_v15 = vadd.f32 %v4895_v9, %v4894_v20  ;;  %v4897_v50 = vsel %vm92_vm5, %v4804_v32, 0.0  ;;  %v4805_v53 = vld [vmem:[#allocation2 + $0xf8] sm:$0xff]  ;;  %v12741_v48 = vld [vmem:[#allocation45_spill] sm:$0xff] }
 0x721   :  { %v6141_v3 = vpop.eup %6140  ;;  %6154 = vlog2.f32 %v12735_v39  ;;  %v4237_v51 = vsub.f32 %v11564_v8, %v4173_v1  ;;  %v4175_v33 = vmul.f32 %v6139_v37, %v4047_v31  ;;  %v4049_v44 = vmul.f32 %v12736_v42, %v9038_v41  ;;  %v4806_v34 = vld [vmem:[#allocation2 + $0x100] sm:$0xff] }
 0x722   :  { %4527 = vrot.lane.b32.xlu1 %v4361_v10, %s6521_s27  ;;  %4529 = vrot.lane.b32.xlu0 %v4362_v56, %s6521_s27  ;;  %v6143_v17 = vpop.eup %6142  ;;  %v4238_v61 = vsub.f32 %v3086_v0, %v4174_v45  ;;  %v4176_v30 = vmul.f32 %v6141_v3, %v4048_v22  ;;  %v4050_v63 = vmul.f32 %v12737_v13, %v9038_v41  ;;  %6156 = vlog2.f32 %v12738_v46  ;;  %v12742_v22 = vld [vmem:[#allocation31_spill] sm:$0xff]  ;;  %v12746_v3 = vld [vmem:[#allocation34_spill] sm:$0xff] }
 0x723   :  { %v4363_v14 = vmul.f32 %v6450_v24, %v4235_v6  ;;  %v4364_v4 = vmul.f32 %v6451_v47, %v4236_v35  ;;  %v3087_v5 = vadd.f32 %v12739_v11, %v2940_v7  ;;  %v3088_v21 = vadd.f32 %v12740_v28, %v2942_v16  ;;  %v12743_v35 = vld [vmem:[#allocation139_spill] sm:$0xff]  ;;  %v12745_v7 = vld [vmem:[#allocation140_spill] sm:$0xff] }
 0x724   :  { %v4484_v2 = vpop.permute.xlu0 %4483  ;;  %v4898_v60 = vadd.f32 %v4897_v50, %v4896_v15  ;;  %v2944_v43 = vmul.f32 0.6931472, %v11450_v12  ;;  %v2946_v8 = vmul.f32 0.6931472, %v11522_v25  ;;  %6158 = vlog2.f32 %v12741_v48  ;;  %v6453_v12 = vld [vmem:[%s11936_s2 + $0x150] sm:$0xff] }
 0x725   :  { %v4659_v9 = vadd.f32 %v4484_v2, %v4275_v23  ;;  %v6145_v20 = vpop.eup %6144  ;;  %v4366_v32 = vmul.f32 %v6452_v18, %v4238_v61  ;;  %v4239_v1 = vsub.f32 %v3087_v5, %v4175_v33  ;;  %v4240_v45 = vsub.f32 %v3088_v21, %v4176_v30  ;;  %v12744_v10 = vld [vmem:[#allocation115_spill] sm:$0xff]  ;;  %v12747_v2 = vld [vmem:[#allocation118_spill] sm:$0xff] }
 0x726   :  { %4531 = vrot.lane.b32.xlu1 %v4363_v14, %s6521_s27  ;;  %4533 = vrot.lane.b32.xlu0 %v4364_v4, %s6521_s27  ;;  %v6147_v49 = vpop.eup %6146  ;;  %v4365_v25 = vmul.f32 %v6453_v12, %v4237_v51  ;;  %v4177_v31 = vmul.f32 %v6145_v20, %v4049_v44  ;;  %v4051_v6 = vmul.f32 %v12742_v22, %v9038_v41  ;;  %v4899_v56 = vsel %vm92_vm5, %v4805_v53, 0.0  ;;  %v12748_v14 = vld [vmem:[#allocation119_spill] sm:$0xff]  ;;  %v4807_v4 = vld [vmem:[#allocation2 + $0x108] sm:$0xff]  ;;  %v6458_v22 = vld [vmem:[%s11936_s2 + $0x180] sm:$0xff] }
 0x727   :  { %4723 = vst.msk [vmem:[#allocation3 + $0x80] sm:$0xff] %vm92_vm5, %v4659_v9  ;;  %v4178_v52 = vmul.f32 %v6147_v49, %v4050_v63  ;;  %v4052_v40 = vmul.f32 %v12743_v35, %v9038_v41  ;;  %v3028_v59 = vmul.f32 %v9038_v41, %v12744_v10  ;;  %v2948_v37 = vmul.f32 0.6931472, %v11494_v55  ;;  %v6454_v55 = vld [vmem:[%s11936_s2 + $0x160] sm:$0xff]  ;;  %v4808_v11 = vld [vmem:[#allocation2 + $0x110] sm:$0xff]  ;;  %v12749_v9 = vld [vmem:[#allocation122_spill] sm:$0xff] }
 0x728   :  { %6160 = vrcp.f32 %v12745_v7  ;;  %v2950_v36 = vmul.f32 0.6931472, %v11570_v58  ;;  %v3089_v19 = vadd.f32 %v11513_v38, %v2944_v43  ;;  %v3090_v0 = vadd.f32 %v11517_v54, %v2946_v8  ;;  %v6455_v38 = vld [vmem:[%s11936_s2 + $0x168] sm:$0xff]  ;;  %v12750_v8 = vld [vmem:[#allocation123_spill] sm:$0xff] }
 0x729   :  { %v6149_v16 = vpop.eup %6148  ;;  %6162 = vrcp.f32 %v12746_v3  ;;  %v4900_v15 = vadd.f32 %v4899_v56, %v4898_v60  ;;  %v4901_v50 = vsel %vm92_vm5, %v4806_v34, 0.0  ;;  %v4367_v39 = vmul.f32 %v6454_v55, %v4239_v1  ;;  %v6459_v35 = vld [vmem:[%s11936_s2 + $0x188] sm:$0xff]  ;;  %v6460_v55 = vld [vmem:[%s11936_s2 + $0x190] sm:$0xff] }
 0x72a   :  { %4535 = vrot.lane.b32.xlu1 %v4365_v25, %s6521_s27  ;;  %4537 = vrot.lane.b32.xlu0 %v4366_v32, %s6521_s27  ;;  %v6151_v26 = vpop.eup %6150  ;;  %v4368_v54 = vmul.f32 %v6455_v38, %v4240_v45  ;;  %v4241_v58 = vsub.f32 %v3089_v19, %v4177_v31  ;;  %v4242_v23 = vsub.f32 %v3090_v0, %v4178_v52  ;;  %v2952_v33 = vmul.f32 0.6931472, %v11525_v62  ;;  %v6456_v62 = vld [vmem:[%s11936_s2 + $0x170] sm:$0xff]  ;;  %v12752_v31 = vld [vmem:[#allocation141_spill] sm:$0xff]  ;;  %v12753_v56 = vld [vmem:[#allocation126_spill] sm:$0xff] }
 0x72b   :  { %v4179_v51 = vmul.f32 %v6149_v16, %v4051_v6  ;;  %v4180_v61 = vmul.f32 %v6151_v26, %v4052_v40  ;;  %v2954_v30 = vmul.f32 0.6931472, %v6143_v17  ;;  %v3091_v44 = vadd.f32 %v11590_v57, %v2948_v37  ;;  %v6457_v17 = vld [vmem:[%s11936_s2 + $0x178] sm:$0xff]  ;;  %v12751_v25 = vld [vmem:[#allocation35_spill] sm:$0xff] }
 0x72c   :  { %v6153_v42 = vpop.eup %6152  ;;  %v3092_v13 = vadd.f32 %v3028_v59, %v2950_v36  ;;  %v3029_v24 = vmul.f32 %v9038_v41, %v12747_v2  ;;  %v3030_v47 = vmul.f32 %v9038_v41, %v12748_v14  ;;  %v4902_v46 = vadd.f32 %v4901_v50, %v4900_v15  ;;  %v12754_v15 = vld [vmem:[#allocation127_spill] sm:$0xff]  ;;  %v4809_v50 = vld [vmem:[#allocation2 + $0x118] sm:$0xff]  ;;  %v4276_v14 = vld [vmem:[#allocation3 + $0x88] sm:$0xff] }
 0x72d   :  { %v4369_v57 = vmul.f32 %v6456_v62, %v4241_v58  ;;  %v4370_v5 = vmul.f32 %v6457_v17, %v4242_v23  ;;  %v4243_v28 = vsub.f32 %v3091_v44, %v4179_v51  ;;  %v3031_v20 = vmul.f32 %v9038_v41, %v12749_v9  ;;  %v6461_v38 = vld [vmem:[%s11936_s2 + $0x198] sm:$0xff]  ;;  %v12755_v58 = vld [vmem:[#allocation39_spill] sm:$0xff] }
 0x72e   :  { %4539 = vrot.lane.b32.xlu1 %v4367_v39, %s6521_s27  ;;  %4541 = vrot.lane.b32.xlu0 %v4368_v54, %s6521_s27  ;;  %v6155_v63 = vpop.eup %6154  ;;  %v4244_v21 = vsub.f32 %v3092_v13, %v4180_v61  ;;  %v3093_v53 = vadd.f32 %v3029_v24, %v2952_v33  ;;  %v3094_v60 = vadd.f32 %v3030_v47, %v2954_v30  ;;  %v4903_v49 = vsel %vm92_vm5, %v4807_v4, 0.0  ;;  %v12756_v51 = vld [vmem:[#allocation143_spill] sm:$0xff]  ;;  %v4810_v13 = vld [vmem:[#allocation2 + $0x120] sm:$0xff] }
 0x72f   :  { %v6157_v43 = vpop.eup %6156  ;;  %v3032_v48 = vmul.f32 %v9038_v41, %v12750_v8  ;;  %v2956_v18 = vmul.f32 0.6931472, %v6153_v42  ;;  %v2958_v32 = vmul.f32 0.6931472, %v6155_v63  ;;  %v4904_v45 = vadd.f32 %v4903_v49, %v4902_v46  ;;  %v6462_v47 = vld [vmem:[%s11936_s2 + $0x1a0] sm:$0xff]  ;;  %v6463_v46 = vld [vmem:[%s11936_s2 + $0x1a8] sm:$0xff] }
 0x730   :  { %v4905_v12 = vsel %vm92_vm5, %v4808_v11, 0.0  ;;  %v4245_v34 = vsub.f32 %v3093_v53, %v12751_v25  ;;  %v4246_v52 = vsub.f32 %v3094_v60, %v12752_v31  ;;  %v4371_v6 = vmul.f32 %v6458_v22, %v4243_v28  ;;  %v6465_v60 = vld [vmem:[%s11936_s2 + $0x1b8] sm:$0xff]  ;;  %v4812_v8 = vld [vmem:[#allocation2 + $0x130] sm:$0xff]  ;;  %v4814_v25 = vld [vmem:[#allocation2 + $0x140] sm:$0xff] }
 0x731   :  { %v6159_v1 = vpop.eup %6158  ;;  %v4372_v40 = vmul.f32 %v6459_v35, %v4244_v21  ;;  %v4057_v10 = vmul.f32 %v11551_v29, %v9038_v41  ;;  %v4058_v59 = vmul.f32 %v11576_v27, %v9038_v41  ;;  %v3033_v37 = vmul.f32 %v9038_v41, %v12753_v56  ;;  %v4811_v21 = vld [vmem:[#allocation2 + $0x128] sm:$0xff] }
 0x732   :  { %4543 = vrot.lane.b32.xlu1 %v4369_v57, %s6521_s27  ;;  %4545 = vrot.lane.b32.xlu0 %v4370_v5, %s6521_s27  ;;  %v2960_v36 = vmul.f32 0.6931472, %v6157_v43  ;;  %v2962_v19 = vmul.f32 0.6931472, %v6159_v1  ;;  %v3095_v0 = vadd.f32 %v3031_v20, %v2956_v18  ;;  %v3096_v3 = vadd.f32 %v3032_v48, %v2958_v32  ;;  %v6464_v20 = vld [vmem:[%s11936_s2 + $0x1b0] sm:$0xff]  ;;  %v12757_v18 = vld [vmem:[#allocation44_spill] sm:$0xff] }
 0x733   :  { %v3034_v29 = vmul.f32 %v9038_v41, %v12754_v15  ;;  %v4906_v27 = vadd.f32 %v4905_v12, %v4904_v45  ;;  %v4373_v39 = vmul.f32 %v6460_v55, %v4245_v34  ;;  %v4374_v54 = vmul.f32 %v6461_v38, %v4246_v52  ;;  %v4813_v1 = vld [vmem:[#allocation2 + $0x138] sm:$0xff]  ;;  %v12758_v12 = vld [vmem:[#allocation49_spill] sm:$0xff]  ;;  %v12759_v34 = vld [vmem:[#allocation142_spill] sm:$0xff] }
 0x734   :  { %v4247_v23 = vsub.f32 %v3095_v0, %v12755_v58  ;;  %v4248_v61 = vsub.f32 %v3096_v3, %v12756_v51  ;;  %v4907_v44 = vsel %vm92_vm5, %v4809_v50, 0.0  ;;  %v3097_v63 = vadd.f32 %v3033_v37, %v2960_v36  ;;  %v4815_v35 = vld [vmem:[#allocation2 + $0x148] sm:$0xff]  ;;  %v12761_v3 = vld [vmem:[#allocation128_spill] sm:$0xff]  ;;  %v12762_v58 = vld [vmem:[#allocation129_spill] sm:$0xff] }
 0x735   :  { %v11680_v7 = vpop.xlane.xlu1 %3739  ;;  %v6161_v16 = vpop.eup %6160  ;;  %v3098_v2 = vadd.f32 %v3034_v29, %v2962_v19  ;;  %v4908_v24 = vadd.f32 %v4907_v44, %v4906_v27  ;;  %v4909_v17 = vsel %vm92_vm5, %v4810_v13, 0.0  ;;  %v4911_v48 = vsel %vm92_vm5, %v4811_v21, 0.0  ;;  %v4817_v50 = vld [vmem:[#allocation2 + $0x158] sm:$0xff]  ;;  %v4818_v51 = vld [vmem:[#allocation2 + $0x160] sm:$0xff]  ;;  %v4277_v13 = vld [vmem:[#allocation3 + $0x90] sm:$0xff] }
 0x736   :  { %4547 = vrot.lane.b32.xlu1 %v4371_v6, %s6521_s27  ;;  %4549 = vrot.lane.b32.xlu0 %v4372_v40, %s6521_s27  ;;  %v6163_v26 = vpop.eup %6162  ;;  %v4185_v33 = vmul.f32 %v6161_v16, %v4057_v10  ;;  %v4375_v4 = vmul.f32 %v6462_v47, %v4247_v23  ;;  %v4376_v11 = vmul.f32 %v6463_v46, %v4248_v61  ;;  %6164 = vlog2.f32 %v12757_v18  ;;  %v12760_v6 = vld [vmem:[#allocation38_spill] sm:$0xff] }
 0x737   :  { %v4186_v30 = vmul.f32 %v6163_v26, %v4058_v59  ;;  %v4910_v9 = vadd.f32 %v4909_v17, %v4908_v24  ;;  %v4913_v32 = vsel %vm92_vm5, %v4812_v8, 0.0  ;;  %6166 = vlog2.f32 %v12758_v12  ;;  %v4816_v59 = vld [vmem:[#allocation2 + $0x150] sm:$0xff]  ;;  %v4819_v17 = vld [vmem:[#allocation2 + $0x168] sm:$0xff]  ;;  %v12764_v12 = vld [vmem:[#allocation53_spill] sm:$0xff] }
 0x738   :  { %v4249_v62 = vsub.f32 %v3097_v63, %v4185_v33  ;;  %6168 = vrcp.f32 %v12759_v34  ;;  %v4915_v31 = vsel %vm92_vm5, %v4813_v1, 0.0  ;;  %v4917_v22 = vsel %vm92_vm5, %v4814_v25, 0.0  ;;  %v6467_v21 = vld [vmem:[%s11936_s2 + $0x1c8] sm:$0xff]  ;;  %v4976_v8 = vld [vmem:[#allocation3 + $0x10] sm:$0xff]  ;;  %v4977_v1 = vld [vmem:[#allocation3 + $0x18] sm:$0xff] }
 0x739   :  { %v11694_v42 = vpop.xlane.xlu1 %3742  ;;  %v4250_v57 = vsub.f32 %v3098_v2, %v4186_v30  ;;  %v4912_v49 = vadd.f32 %v4911_v48, %v4910_v9  ;;  %6170 = vrcp.f32 %v12760_v6  ;;  %v4919_v56 = vsel %vm92_vm5, %v4815_v35, 0.0  ;;  %v6466_v2 = vld [vmem:[%s11936_s2 + $0x1c0] sm:$0xff] }
 0x73a   :  { %4551 = vrot.lane.b32.xlu1 %v4373_v39, %s6521_s27  ;;  %4553 = vrot.lane.b32.xlu0 %v4374_v54, %s6521_s27  ;;  %v4377_v53 = vmul.f32 %v6464_v20, %v4249_v62  ;;  %v4921_v19 = vsel %vm92_vm5, %v4816_v59, 0.0  ;;  %v3035_v26 = vmul.f32 %v9038_v41, %v12761_v3  ;;  %v3036_v23 = vmul.f32 %v9038_v41, %v12762_v58  ;;  %v12763_v20 = vld [vmem:[#allocation48_spill] sm:$0xff]  ;;  %v4978_v6 = vld [vmem:[#allocation3 + $0x20] sm:$0xff]  ;;  %v4280_v59 = vld [vmem:[#allocation3 + $0xa8] sm:$0xff] }
 0x73b   :  { %v4378_v43 = vmul.f32 %v6465_v60, %v4250_v57  ;;  %v4914_v45 = vadd.f32 %v4913_v32, %v4912_v49  ;;  %v4923_v44 = vsel %vm92_vm5, %v4817_v50, 0.0  ;;  %v4278_v57 = vld [vmem:[#allocation3 + $0x98] sm:$0xff]  ;;  %6172 = vlog2.f32 %v12763_v20  ;;  %v4820_v60 = vld [vmem:[#allocation2 + $0x170] sm:$0xff]  ;;  %v4279_v32 = vld [vmem:[#allocation3 + $0xa0] sm:$0xff] }
 0x73c   :  { %v4927_v49 = vsel %vm92_vm5, %v4819_v17, 0.0  ;;  %6174 = vlog2.f32 %v12764_v12  ;;  %v5041_v34 = vsel %vm92_vm5, %v4976_v8, 0.0  ;;  %v4822_v50 = vld [vmem:[#allocation2 + $0x180] sm:$0xff]  ;;  %v4984_v8 = vld [vmem:[#allocation3 + $0x50] sm:$0xff] }
 0x73d   :  { %v4486_v5 = vpop.permute.xlu1 %4485  ;;  %v4916_v52 = vadd.f32 %v4915_v31, %v4914_v45 }
 0x73e   :  { %v4660_v28 = vadd.f32 %v4486_v5, %v4276_v14  ;;  %4555 = vrot.lane.b32.xlu1 %v4375_v4, %s6521_s27  ;;  %4557 = vrot.lane.b32.xlu0 %v4376_v11, %s6521_s27  ;;  %v4925_v4 = vsel %vm92_vm5, %v4818_v51, 0.0 }
 0x73f   :  { %v4918_v40 = vadd.f32 %v4917_v22, %v4916_v52  ;;  %v4929_v52 = vsel %vm92_vm5, %v4820_v60, 0.0 }
 0x740   :  { %4724 = vst.msk [vmem:[#allocation3 + $0x88] sm:$0xff] %vm92_vm5, %v4660_v28  ;;  %v4975_v28 = vld [vmem:[#allocation3 + $0x8] sm:$0xff] }
 0x741   :  { %v4920_v37 = vadd.f32 %v4919_v56, %v4918_v40  ;;  %v5039_v18 = vsel %vm92_vm5, %v4975_v28, 0.0  ;;  %v5043_v40 = vsel %vm92_vm5, %v4977_v1, 0.0  ;;  %v12766_v56 = vld [vmem:[#allocation52_spill] sm:$0xff]  ;;  %v4283_v1 = vld [vmem:[#allocation3 + $0xc0] sm:$0xff] }
 0x742   :  { %4559 = vrot.lane.b32.xlu1 %v4377_v53, %s6521_s27  ;;  %4561 = vrot.lane.b32.xlu0 %v4378_v43, %s6521_s27  ;;  %v4974_v43 = vld [vmem:[#allocation3] sm:$0xff] }
 0x743   :  { %v6165_v10 = vpop.eup %6164  ;;  %v4922_v27 = vadd.f32 %v4921_v19, %v4920_v37  ;;  %v5038_v25 = vsel %vm92_vm5, %v4974_v43, 0.0 }
 0x744   :  { %v2964_v16 = vmul.f32 0.6931472, %v6165_v10  ;;  %v6167_v36 = vpop.eup %6166  ;;  %v5040_v22 = vadd.f32 %v5039_v18, %v5038_v25  ;;  %v12765_v10 = vld [vmem:[#allocation144_spill] sm:$0xff] }
 0x745   :  { %v6169_v29 = vpop.eup %6168  ;;  %v2966_v55 = vmul.f32 0.6931472, %v6167_v36  ;;  %v4924_v63 = vadd.f32 %v4923_v44, %v4922_v27  ;;  %6176 = vrcp.f32 %v12765_v10  ;;  %v4821_v36 = vld [vmem:[#allocation2 + $0x178] sm:$0xff] }
 0x746   :  { %v3099_v39 = vadd.f32 %v3035_v26, %v2964_v16  ;;  %v6171_v30 = vpop.eup %6170  ;;  %6178 = vlog2.f32 %v12766_v56  ;;  %v5042_v37 = vadd.f32 %v5041_v34, %v5040_v22  ;;  %v4979_v16 = vld [vmem:[#allocation3 + $0x28] sm:$0xff]  ;;  %v12772_v25 = vld [vmem:[#allocation60_spill] sm:$0xff]  ;;  %v12773_v56 = vld [vmem:[#allocation131_spill] sm:$0xff] }
 0x747   :  { %v3100_v14 = vadd.f32 %v3036_v23, %v2966_v55  ;;  %v4926_v5 = vadd.f32 %v4925_v4, %v4924_v63  ;;  %v5047_v27 = vsel %vm92_vm5, %v4979_v16, 0.0  ;;  %v12767_v55 = vld [vmem:[#allocation42_spill] sm:$0xff]  ;;  %v4981_v23 = vld [vmem:[#allocation3 + $0x38] sm:$0xff]  ;;  %v4982_v63 = vld [vmem:[#allocation3 + $0x40] sm:$0xff] }
 0x748   :  { %v5044_v26 = vadd.f32 %v5043_v40, %v5042_v37  ;;  %6180 = vrcp.f32 %v12767_v55  ;;  %v6173_v44 = vpop.eup %6172  ;;  %v4282_v4 = vld [vmem:[#allocation3 + $0xb8] sm:$0xff]  ;;  %v5053_v28 = vsel %vm92_vm5, %v4982_v63, 0.0  ;;  %v5057_v40 = vsel %vm92_vm5, %v4984_v8, 0.0 }
 0x749   :  { %v4928_v45 = vadd.f32 %v4927_v49, %v4926_v5  ;;  %v2968_v5 = vmul.f32 0.6931472, %v6173_v44  ;;  %v6175_v20 = vpop.eup %6174  ;;  %v3038_v37 = vmul.f32 %v9038_v41, %v12773_v56  ;;  %v4826_v44 = vld [vmem:[#allocation2 + $0x1a0] sm:$0xff] }
 0x74b   :  { %v4930_v19 = vadd.f32 %v4929_v52, %v4928_v45 }
 0x752   :  { %v6177_v12 = vpop.eup %6176 }
 0x755   :  { %v3981_v0 = vpop.xlane.xlu0 %3980 }
 0x756   :  { %v4059_v15 = vmul.f32 %v3981_v0, %v9038_v41  ;;  %v5045_v0 = vsel %vm92_vm5, %v4978_v6, 0.0  ;;  %v6179_v6 = vpop.eup %6178 }
 0x757   :  { %v5046_v58 = vadd.f32 %v5045_v0, %v5044_v26  ;;  %v2972_v55 = vmul.f32 0.6931472, %v6179_v6  ;;  %v4287_v6 = vld [vmem:[#allocation3 + $0xe0] sm:$0xff] }
 0x758   :  { %v4187_v38 = vmul.f32 %v6169_v29, %v4059_v15  ;;  %v4980_v15 = vld [vmem:[#allocation3 + $0x30] sm:$0xff] }
 0x759   :  { %v3984_v54 = vpop.xlane.xlu0 %3983 }
 0x75a   :  { %v4251_v61 = vsub.f32 %v3099_v39, %v4187_v38  ;;  %v4060_v33 = vmul.f32 %v3984_v54, %v9038_v41  ;;  %v4281_v39 = vld [vmem:[#allocation3 + $0xb0] sm:$0xff]  ;;  %v4931_v38 = vsel %vm92_vm5, %v4821_v36, 0.0  ;;  %v12768_v54 = vld [vmem:[#allocation57_spill] sm:$0xff] }
 0x75b   :  { %6182 = vlog2.f32 %v12768_v54  ;;  %v4932_v51 = vadd.f32 %v4931_v38, %v4930_v19  ;;  %v4986_v36 = vld [vmem:[#allocation3 + $0x60] sm:$0xff]  ;;  %v4987_v38 = vld [vmem:[#allocation3 + $0x68] sm:$0xff] }
 0x75c   :  { %v4379_v24 = vmul.f32 %v6466_v2, %v4251_v61  ;;  %v4188_v47 = vmul.f32 %v6171_v30, %v4060_v33  ;;  %v5049_v61 = vsel %vm92_vm5, %v4980_v15, 0.0  ;;  %v4933_v30 = vsel %vm92_vm5, %v4822_v50, 0.0  ;;  %v4825_v50 = vld [vmem:[#allocation2 + $0x198] sm:$0xff] }
 0x75d   :  { %v4488_v46 = vpop.permute.xlu0 %4487  ;;  %v4934_v17 = vadd.f32 %v4933_v30, %v4932_v51  ;;  %v6468_v51 = vld [vmem:[%s11936_s2 + $0x1d0] sm:$0xff] }
 0x75e   :  { %v4252_v11 = vsub.f32 %v3100_v14, %v4188_v47  ;;  %v4661_v62 = vadd.f32 %v4488_v46, %v4277_v13  ;;  %4563 = vrot.lane.b32.xlu1 %v4379_v24, %s6521_s27  ;;  %v5048_v13 = vadd.f32 %v5047_v27, %v5046_v58  ;;  %v5051_v14 = vsel %vm92_vm5, %v4981_v23, 0.0  ;;  %v12769_v47 = vld [vmem:[#allocation145_spill] sm:$0xff]  ;;  %v12770_v46 = vld [vmem:[#allocation56_spill] sm:$0xff]  ;;  %v6181_v27 = vpop.eup %6180 }
 0x75f   :  { %6184 = vrcp.f32 %v12769_v47  ;;  %v5061_v23 = vsel %vm92_vm5, %v4986_v36, 0.0  ;;  %v6470_v36 = vld [vmem:[%s11936_s2 + $0x1e0] sm:$0xff] }
 0x760   :  { %v4380_v9 = vmul.f32 %v6467_v21, %v4252_v11  ;;  %4725 = vst.msk [vmem:[#allocation3 + $0x90] sm:$0xff] %vm92_vm5, %v4661_v62  ;;  %6186 = vlog2.f32 %v12770_v46  ;;  %v5050_v11 = vadd.f32 %v5049_v61, %v5048_v13  ;;  %v4983_v62 = vld [vmem:[#allocation3 + $0x48] sm:$0xff]  ;;  %v12774_v13 = vld [vmem:[#allocation132_spill] sm:$0xff]  ;;  %v4939_v46 = vsel %vm92_vm5, %v4825_v50, 0.0 }
 0x761   :  { %v4490_v53 = vpop.permute.xlu0 %4489  ;;  %v5055_v18 = vsel %vm92_vm5, %v4983_v62, 0.0  ;;  %6188 = vrcp.f32 %v11680_v7  ;;  %v3039_v63 = vmul.f32 %v9038_v41, %v12774_v13 }
 0x762   :  { %v4662_v48 = vadd.f32 %v4490_v53, %v4278_v57  ;;  %4565 = vrot.lane.b32.xlu0 %v4380_v9, %s6521_s27  ;;  %v4823_v57 = vld [vmem:[#allocation2 + $0x188] sm:$0xff]  ;;  %v4824_v9 = vld [vmem:[#allocation2 + $0x190] sm:$0xff]  ;;  %v5052_v43 = vadd.f32 %v5051_v14, %v5050_v11  ;;  %6190 = vlog2.f32 %v12772_v25  ;;  %v5063_v11 = vsel %vm92_vm5, %v4987_v38, 0.0  ;;  %v12775_v25 = vld [vmem:[#allocation133_spill] sm:$0xff] }
 0x763   :  { %v12771_v53 = vld [vmem:[#allocation130_spill] sm:$0xff]  ;;  %v4935_v45 = vsel %vm92_vm5, %v4823_v57, 0.0  ;;  %v4937_v22 = vsel %vm92_vm5, %v4824_v9, 0.0  ;;  %6192 = vrcp.f32 %v11694_v42  ;;  %v4988_v14 = vld [vmem:[#allocation3 + $0x70] sm:$0xff]  ;;  %v4989_v9 = vld [vmem:[#allocation3 + $0x78] sm:$0xff] }
 0x764   :  { %4726 = vst.msk [vmem:[#allocation3 + $0x98] sm:$0xff] %vm92_vm5, %v4662_v48  ;;  %v3037_v60 = vmul.f32 %v9038_v41, %v12771_v53  ;;  %v5054_v34 = vadd.f32 %v5053_v28, %v5052_v43  ;;  %v4936_v52 = vadd.f32 %v4935_v45, %v4934_v17  ;;  %v4286_v17 = vld [vmem:[#allocation3 + $0xd8] sm:$0xff]  ;;  %v4941_v53 = vsel %vm92_vm5, %v4826_v44, 0.0 }
 0x765   :  { %v4492_v31 = vpop.permute.xlu0 %4491  ;;  %v5065_v43 = vsel %vm92_vm5, %v4988_v14, 0.0  ;;  %v6471_v14 = vld [vmem:[%s11936_s2 + $0x1e8] sm:$0xff] }
 0x766   :  { %v4663_v35 = vadd.f32 %v4492_v31, %v4279_v32  ;;  %v4985_v31 = vld [vmem:[#allocation3 + $0x58] sm:$0xff]  ;;  %v3101_v7 = vadd.f32 %v3037_v60, %v2968_v5  ;;  %v5056_v16 = vadd.f32 %v5055_v18, %v5054_v34  ;;  %v4938_v54 = vadd.f32 %v4937_v22, %v4936_v52 }
 0x767   :  { %v3040_v34 = vmul.f32 %v9038_v41, %v12775_v25  ;;  %v4829_v25 = vld [vmem:[#allocation2 + $0x1b8] sm:$0xff] }
 0x768   :  { %4727 = vst.msk [vmem:[#allocation3 + $0xa0] sm:$0xff] %vm92_vm5, %v4663_v35  ;;  %v2970_v35 = vmul.f32 0.6931472, %v6175_v20  ;;  %v6183_v58 = vpop.eup %6182  ;;  %v4940_v20 = vadd.f32 %v4939_v46, %v4938_v54 }
 0x769   :  { %v4494_v3 = vpop.permute.xlu0 %4493  ;;  %v2974_v28 = vmul.f32 0.6931472, %v6183_v58 }
 0x76a   :  { %v4664_v29 = vadd.f32 %v4494_v3, %v4280_v59  ;;  %v5059_v3 = vsel %vm92_vm5, %v4985_v31, 0.0  ;;  %v3102_v61 = vadd.f32 %v3038_v37, %v2970_v35  ;;  %v5067_v31 = vsel %vm92_vm5, %v4989_v9, 0.0 }
 0x76b   :  { %v4942_v56 = vadd.f32 %v4941_v53, %v4940_v20  ;;  %v4993_v44 = vld [vmem:[#allocation3 + $0x98] sm:$0xff] }
 0x76c   :  { %4728 = vst.msk [vmem:[#allocation3 + $0xa8] sm:$0xff] %vm92_vm5, %v4664_v29  ;;  %v4285_v29 = vld [vmem:[#allocation3 + $0xd0] sm:$0xff]  ;;  %v6185_v5 = vpop.eup %6184  ;;  %v5075_v9 = vsel %vm92_vm5, %v4993_v44, 0.0 }
 0x76d   :  { %v4496_v33 = vpop.permute.xlu0 %4495  ;;  %v6187_v60 = vpop.eup %6186 }
 0x76e   :  { %v4665_v2 = vadd.f32 %v4496_v33, %v4281_v39  ;;  %v11764_v24 = vpop.xlane.xlu1 %3745  ;;  %v5058_v39 = vadd.f32 %v5057_v40, %v5056_v16  ;;  %v6189_v35 = vpop.eup %6188  ;;  %v2976_v40 = vmul.f32 0.6931472, %v6187_v60  ;;  %v4290_v60 = vld [vmem:[#allocation3 + $0xf8] sm:$0xff] }
 0x76f   :  { %6194 = vrcp.f32 %v11764_v24  ;;  %v6469_v24 = vld [vmem:[%s11936_s2 + $0x1d8] sm:$0xff]  ;;  %v6191_v37 = vpop.eup %6190 }
 0x770   :  { %4729 = vst.msk [vmem:[#allocation3 + $0xb0] sm:$0xff] %vm92_vm5, %v4665_v2  ;;  %v5060_v2 = vadd.f32 %v5059_v3, %v5058_v39 }
 0x771   :  { %v4498_v21 = vpop.permute.xlu0 %4497 }
 0x772   :  { %v4666_v48 = vadd.f32 %v4498_v21, %v4282_v4  ;;  %v3987_v49 = vpop.xlane.xlu1 %3986  ;;  %v5062_v21 = vadd.f32 %v5061_v23, %v5060_v2 }
 0x773   :  { %v4061_v32 = vmul.f32 %v3987_v49, %v9038_v41 }
 0x774   :  { %4730 = vst.msk [vmem:[#allocation3 + $0xb8] sm:$0xff] %vm92_vm5, %v4666_v48  ;;  %v3103_v48 = vadd.f32 %v3039_v63, %v2972_v55  ;;  %v4992_v55 = vld [vmem:[#allocation3 + $0x90] sm:$0xff] }
 0x775   :  { %v4189_v10 = vmul.f32 %v6177_v12, %v4061_v32  ;;  %v4500_v59 = vpop.permute.xlu0 %4499  ;;  %v5064_v32 = vadd.f32 %v5063_v11, %v5062_v21  ;;  %v5073_v2 = vsel %vm92_vm5, %v4992_v55, 0.0 }
 0x776   :  { %v4667_v19 = vadd.f32 %v4500_v59, %v4283_v1  ;;  %v3990_v0 = vpop.xlane.xlu1 %3989  ;;  %v4990_v1 = vld [vmem:[#allocation3 + $0x80] sm:$0xff]  ;;  %v4827_v59 = vld [vmem:[#allocation2 + $0x1a8] sm:$0xff] }
 0x777   :  { %v4253_v26 = vsub.f32 %v3101_v7, %v4189_v10  ;;  %v4062_v15 = vmul.f32 %v3990_v0, %v9038_v41  ;;  %v5066_v7 = vadd.f32 %v5065_v43, %v5064_v32  ;;  %v4991_v10 = vld [vmem:[#allocation3 + $0x88] sm:$0xff]  ;;  %v5069_v16 = vsel %vm92_vm5, %v4990_v1, 0.0  ;;  %v6472_v32 = vld [vmem:[%s11936_s2 + $0x1f0] sm:$0xff] }
 0x778   :  { %4731 = vst.msk [vmem:[#allocation3 + $0xc0] sm:$0xff] %vm92_vm5, %v4667_v19  ;;  %v3104_v0 = vadd.f32 %v3040_v34, %v2974_v28  ;;  %v5071_v54 = vsel %vm92_vm5, %v4991_v10, 0.0  ;;  %v12777_v28 = vld [vmem:[#allocation135_spill] sm:$0xff]  ;;  %v4830_v10 = vld [vmem:[#allocation2 + $0x1c0] sm:$0xff] }
 0x779   :  { %v4381_v42 = vmul.f32 %v6468_v51, %v4253_v26  ;;  %v4190_v33 = vmul.f32 %v6181_v27, %v4062_v15  ;;  %v4504_v30 = vpop.permute.xlu0 %4503  ;;  %v4828_v15 = vld [vmem:[#allocation2 + $0x1b0] sm:$0xff]  ;;  %v5068_v27 = vadd.f32 %v5067_v31, %v5066_v7  ;;  %v4288_v51 = vld [vmem:[#allocation3 + $0xe8] sm:$0xff]  ;;  %v3042_v21 = vmul.f32 %v9038_v41, %v12777_v28 }
 0x77a   :  { %v4669_v47 = vadd.f32 %v4504_v30, %v4285_v29  ;;  %v3993_v4 = vpop.xlane.xlu1 %3992  ;;  %v12776_v29 = vld [vmem:[#allocation134_spill] sm:$0xff]  ;;  %v4945_v63 = vsel %vm92_vm5, %v4828_v15, 0.0  ;;  %v4996_v31 = vld [vmem:[#allocation3 + $0xb0] sm:$0xff]  ;;  %v4949_v55 = vsel %vm92_vm5, %v4830_v10, 0.0 }
 0x77b   :  { %v4254_v62 = vsub.f32 %v3102_v61, %v4190_v33  ;;  %v4063_v57 = vmul.f32 %v3993_v4, %v9038_v41  ;;  %4567 = vrot.lane.b32.xlu1 %v4381_v42, %s6521_s27  ;;  %v3041_v50 = vmul.f32 %v9038_v41, %v12776_v29  ;;  %v4943_v42 = vsel %vm92_vm5, %v4827_v59, 0.0  ;;  %v6193_v61 = vpop.eup %6192  ;;  %v4292_v7 = vld [vmem:[#allocation3 + $0x108] sm:$0xff] }
 0x77c   :  { %4733 = vst.msk [vmem:[#allocation3 + $0xd0] sm:$0xff] %vm92_vm5, %v4669_v47  ;;  %v2978_v33 = vmul.f32 0.6931472, %v6191_v37  ;;  %v5070_v30 = vadd.f32 %v5069_v16, %v5068_v27  ;;  %v4944_v13 = vadd.f32 %v4943_v42, %v4942_v56  ;;  %v6195_v43 = vpop.eup %6194  ;;  %v4997_v56 = vld [vmem:[#allocation3 + $0xb8] sm:$0xff]  ;;  %v4289_v37 = vld [vmem:[#allocation3 + $0xf0] sm:$0xff]  ;;  %v4947_v16 = vsel %vm92_vm5, %v4829_v25, 0.0 }
 0x77d   :  { %v4382_v8 = vmul.f32 %v6469_v24, %v4254_v62  ;;  %v4191_v49 = vmul.f32 %v6185_v5, %v4063_v57  ;;  %v4506_v18 = vpop.permute.xlu0 %4505  ;;  %v3105_v4 = vadd.f32 %v3041_v50, %v2976_v40  ;;  %v4994_v57 = vld [vmem:[#allocation3 + $0xa0] sm:$0xff] }
 0x77e   :  { %v4670_v45 = vadd.f32 %v4506_v18, %v4286_v17  ;;  %v3996_v12 = vpop.xlane.xlu1 %3995  ;;  %v5072_v62 = vadd.f32 %v5071_v54, %v5070_v30  ;;  %v5077_v18 = vsel %vm92_vm5, %v4994_v57, 0.0  ;;  %v4294_v54 = vld [vmem:[#allocation3 + $0x118] sm:$0xff] }
 0x77f   :  { %v4255_v52 = vsub.f32 %v3103_v48, %v4191_v49  ;;  %v4064_v22 = vmul.f32 %v3996_v12, %v9038_v41  ;;  %4569 = vrot.lane.b32.xlu0 %v4382_v8, %s6521_s27  ;;  %v4995_v8 = vld [vmem:[#allocation3 + $0xa8] sm:$0xff]  ;;  %v4946_v49 = vadd.f32 %v4945_v63, %v4944_v13  ;;  %v4998_v29 = vld [vmem:[#allocation3 + $0xc0] sm:$0xff] }
 0x780   :  { %4734 = vst.msk [vmem:[#allocation3 + $0xd8] sm:$0xff] %vm92_vm5, %v4670_v45  ;;  %v5074_v24 = vadd.f32 %v5073_v2, %v5072_v62  ;;  %v4284_v48 = vld [vmem:[#allocation3 + $0xc8] sm:$0xff]  ;;  %v3106_v45 = vadd.f32 %v3042_v21, %v2978_v33 }
 0x781   :  { %v4383_v19 = vmul.f32 %v6470_v36, %v4255_v52  ;;  %v4192_v3 = vmul.f32 %v6189_v35, %v4064_v22  ;;  %v4508_v26 = vpop.permute.xlu0 %4507  ;;  %v5081_v36 = vsel %vm92_vm5, %v4996_v31, 0.0  ;;  %v4296_v2 = vld [vmem:[#allocation3 + $0x128] sm:$0xff] }
 0x782   :  { %v4671_v39 = vadd.f32 %v4508_v26, %v4287_v6  ;;  %v3999_v38 = vpop.xlane.xlu1 %3998  ;;  %v5076_v34 = vadd.f32 %v5075_v9, %v5074_v24  ;;  %v5079_v6 = vsel %vm92_vm5, %v4995_v8, 0.0  ;;  %v4948_v26 = vadd.f32 %v4947_v16, %v4946_v49  ;;  %v4298_v24 = vld [vmem:[#allocation3 + $0x138] sm:$0xff]  ;;  %v4295_v49 = vld [vmem:[#allocation3 + $0x120] sm:$0xff] }
 0x783   :  { %v4256_v58 = vsub.f32 %v3104_v0, %v4192_v3  ;;  %v4065_v23 = vmul.f32 %v3999_v38, %v9038_v41  ;;  %4571 = vrot.lane.b32.xlu1 %v4383_v19, %s6521_s27  ;;  %v6473_v19 = vld [vmem:[%s11936_s2 + $0x1f8] sm:$0xff]  ;;  %s6522_s2 = smov [#allocation5]  }
 0x784   :  { %4735 = vst.msk [vmem:[#allocation3 + $0xe0] sm:$0xff] %vm92_vm5, %v4671_v39  ;;  %v5078_v59 = vadd.f32 %v5077_v18, %v5076_v34  ;;  %v5083_v39 = vsel %vm92_vm5, %v4997_v56, 0.0  ;;  %v4950_v33 = vadd.f32 %v4949_v55, %v4948_v26  ;;  %v4299_v55 = vld [vmem:[#allocation3 + $0x140] sm:$0xff] }
 0x785   :  { %v4384_v47 = vmul.f32 %v6471_v14, %v4256_v58  ;;  %v4193_v46 = vmul.f32 %v6193_v61, %v4065_v23  ;;  %v4510_v11 = vpop.permute.xlu0 %4509  ;;  %v4291_v23 = vld [vmem:[#allocation3 + $0x100] sm:$0xff]  ;;  %v4831_v61 = vld [vmem:[#allocation2 + $0x1c8] sm:$0xff]  ;;  %v4832_v14 = vld [vmem:[#allocation2 + $0x1d0] sm:$0xff] }
 0x786   :  { %v4672_v17 = vadd.f32 %v4510_v11, %v4288_v51  ;;  %v4002_v5 = vpop.xlane.xlu1 %4001  ;;  %v5080_v15 = vadd.f32 %v5079_v6, %v5078_v59  ;;  %v5085_v51 = vsel %vm92_vm5, %v4998_v29, 0.0  ;;  %v4293_v11 = vld [vmem:[#allocation3 + $0x110] sm:$0xff]  ;;  %v4951_v62 = vsel %vm92_vm5, %v4831_v61, 0.0  ;;  %v4834_v6 = vld [vmem:[#allocation2 + $0x1e0] sm:$0xff]  ;;  %v4302_v29 = vld [vmem:[#allocation3 + $0x158] sm:$0xff] }
 0x787   :  { %v4257_v20 = vsub.f32 %v3105_v4, %v4193_v46  ;;  %v4066_v53 = vmul.f32 %v4002_v5, %v9038_v41  ;;  %4573 = vrot.lane.b32.xlu0 %v4384_v47, %s6521_s27  ;;  %v5000_v4 = vld [vmem:[#allocation3 + $0xd0] sm:$0xff]  ;;  %v4952_v5 = vadd.f32 %v4951_v62, %v4950_v33  ;;  %v5001_v28 = vld [vmem:[#allocation3 + $0xd8] sm:$0xff] }
 0x788   :  { %4736 = vst.msk [vmem:[#allocation3 + $0xe8] sm:$0xff] %vm92_vm5, %v4672_v17  ;;  %v5082_v58 = vadd.f32 %v5081_v36, %v5080_v15  ;;  %v5091_v18 = vsel %vm92_vm5, %v5001_v28, 0.0 }
 0x789   :  { %v4385_v1 = vmul.f32 %v6472_v32, %v4257_v20  ;;  %v4194_v12 = vmul.f32 %v6195_v43, %v4066_v53  ;;  %v4514_v41 = vpop.permute.xlu0 %4513  ;;  %v4953_v53 = vsel %vm92_vm5, %v4832_v14, 0.0 }
 0x78a   :  { %v4674_v52 = vadd.f32 %v4514_v41, %v4290_v60  ;;  %v4502_v22 = vpop.permute.xlu1 %4501  ;;  %v5084_v30 = vadd.f32 %v5083_v39, %v5082_v58  ;;  %v5089_v60 = vsel %vm92_vm5, %v5000_v4, 0.0 }
 0x78b   :  { %v4258_v35 = vsub.f32 %v3106_v45, %v4194_v12  ;;  %v4668_v40 = vadd.f32 %v4502_v22, %v4284_v48  ;;  %4575 = vrot.lane.b32.xlu1 %v4385_v1, %s6521_s27  ;;  %v5002_v8 = vld [vmem:[#allocation3 + $0xe0] sm:$0xff]  ;;  %v4833_v1 = vld [vmem:[#allocation2 + $0x1d8] sm:$0xff]  ;;  %v4954_v45 = vadd.f32 %v4953_v53, %v4952_v5  ;;  %v4300_v22 = vld [vmem:[#allocation3 + $0x148] sm:$0xff] }
 0x78c   :  { %4738 = vst.msk [vmem:[#allocation3 + $0xf8] sm:$0xff] %vm92_vm5, %v4674_v52  ;;  %v5086_v47 = vadd.f32 %v5085_v51, %v5084_v30  ;;  %v5093_v31 = vsel %vm92_vm5, %v5002_v8, 0.0  ;;  %v4955_v10 = vsel %vm92_vm5, %v4833_v1, 0.0 }
 0x78d   :  { %v4386_v0 = vmul.f32 %v6473_v19, %v4258_v35  ;;  %4732 = vst.msk [vmem:[#allocation3 + $0xc8] sm:$0xff] %vm92_vm5, %v4668_v40  ;;  %v4518_v3 = vpop.permute.xlu0 %4517 }
 0x78e   :  { %v4676_v50 = vadd.f32 %v4518_v3, %v4292_v7  ;;  %v4512_v27 = vpop.permute.xlu1 %4511  ;;  %v4297_v7 = vld [vmem:[#allocation3 + $0x130] sm:$0xff]  ;;  %v4957_v3 = vsel %vm92_vm5, %v4834_v6, 0.0 }
 0x78f   :  { %v4673_v38 = vadd.f32 %v4512_v27, %v4289_v37  ;;  %4577 = vrot.lane.b32.xlu0 %v4386_v0, %s6521_s27  ;;  %v5003_v12 = vld [vmem:[#allocation3 + $0xe8] sm:$0xff]  ;;  %v4956_v37 = vadd.f32 %v4955_v10, %v4954_v45  ;;  %v4305_v45 = vld [vmem:[#allocation3 + $0x170] sm:$0xff]  ;;  %s5184_s27 = sshll.u32 %s6522_s2, 4  ;;  %s5185_s27 = int_to_ptr.vmem [resolvable:$true] %s5184_s27 }
 0x790   :  { %4740 = vst.msk [vmem:[#allocation3 + $0x108] sm:$0xff] %vm92_vm5, %v4676_v50  ;;  %v5095_v59 = vsel %vm92_vm5, %v5003_v12, 0.0  ;;  %s6474_s0 = scalar_lea.vmem %s5185_s27, 128  ;;  %p6479_p1 = scmp.lt.s32.totalorder %s5185_s27, %s5185_s27 }
 0x791   :  { %4737 = vst.msk [vmem:[#allocation3 + $0xf0] sm:$0xff] %vm92_vm5, %v4673_v38  ;;  %v4522_v42 = vpop.permute.xlu0 %4521  ;;  %v4958_v58 = vadd.f32 %v4957_v3, %v4956_v37  ;;  %v4309_v3 = vld [vmem:[#allocation3 + $0x190] sm:$0xff]  ;;  %p6475_p0 = scmp.ne.s32.totalorder %s5185_s27, %s6474_s0  ;;  %p6480_p2 = scmp.lt.s32.totalorder %s6474_s0, %s6474_s0 }
 0x792   :  { %v4678_v44 = vadd.f32 %v4522_v42, %v4294_v54  ;;  %v4516_v13 = vpop.permute.xlu1 %4515  ;;  %v4835_v54 = vld [vmem:[#allocation2 + $0x1e8] sm:$0xff] }
 0x793   :  { %v4675_v63 = vadd.f32 %v4516_v13, %v4291_v23  ;;  %v5005_v16 = vld [vmem:[#allocation3 + $0xf8] sm:$0xff]  ;;  %v4836_v13 = vld [vmem:[#allocation2 + $0x1f0] sm:$0xff]  ;;  %v4959_v14 = vsel %vm92_vm5, %v4835_v54, 0.0  ;;  %v4311_v54 = vld [vmem:[#allocation3 + $0x1a0] sm:$0xff]  ;;  %p6481_p3 = por %p6480_p2, %p6479_p1 }
 0x794   :  { %v4999_v46 = vld [vmem:[#allocation3 + $0xc8] sm:$0xff]  ;;  %4742 = vst.msk [vmem:[#allocation3 + $0x118] sm:$0xff] %vm92_vm5, %v4678_v44  ;;  %v5099_v39 = vsel %vm92_vm5, %v5005_v16, 0.0  ;;  %v4961_v5 = vsel %vm92_vm5, %v4836_v13, 0.0 }
 0x795   :  { %v5087_v57 = vsel %vm92_vm5, %v4999_v46, 0.0  ;;  %4739 = vst.msk [vmem:[#allocation3 + $0x100] sm:$0xff] %vm92_vm5, %v4675_v63  ;;  %v4526_v17 = vpop.permute.xlu0 %4525  ;;  %v4304_v44 = vld [vmem:[#allocation3 + $0x168] sm:$0xff]  ;;  %p6482_p4 = pnand %p6481_p3, %p6475_p0 }
 0x796   :  { %v5088_v21 = vadd.f32 %v5087_v57, %v5086_v47  ;;  %v4680_v9 = vadd.f32 %v4526_v17, %v4296_v2  ;;  %v4520_v20 = vpop.permute.xlu1 %4519  ;;  %v4301_v2 = vld [vmem:[#allocation3 + $0x150] sm:$0xff] }
 0x797   :  { %v4677_v43 = vadd.f32 %v4520_v20, %v4293_v11  ;;  %v5007_v23 = vld [vmem:[#allocation3 + $0x108] sm:$0xff]  ;;  %v4960_v11 = vadd.f32 %v4959_v14, %v4958_v58  ;;  %v4303_v20 = vld [vmem:[#allocation3 + $0x160] sm:$0xff] }
 0x798   :  { %v5090_v48 = vadd.f32 %v5089_v60, %v5088_v21  ;;  %4744 = vst.msk [vmem:[#allocation3 + $0x128] sm:$0xff] %vm92_vm5, %v4680_v9  ;;  %v5004_v35 = vld [vmem:[#allocation3 + $0xf0] sm:$0xff]  ;;  %v5103_v47 = vsel %vm92_vm5, %v5007_v23, 0.0  ;;  %v4306_v21 = vld [vmem:[#allocation3 + $0x178] sm:$0xff] }
 0x799   :  { %4741 = vst.msk [vmem:[#allocation3 + $0x110] sm:$0xff] %vm92_vm5, %v4677_v43  ;;  %v4530_v32 = vpop.permute.xlu0 %4529  ;;  %v5097_v26 = vsel %vm92_vm5, %v5004_v35, 0.0  ;;  %v4962_v8 = vadd.f32 %v4961_v5, %v4960_v11  ;;  %v4310_v35 = vld [vmem:[#allocation3 + $0x198] sm:$0xff] }
 0x79a   :  { %v5092_v41 = vadd.f32 %v5091_v18, %v5090_v48  ;;  %v4682_v25 = vadd.f32 %v4530_v32, %v4298_v24  ;;  %v4524_v34 = vpop.permute.xlu1 %4523  ;;  %v4837_v24 = vld [vmem:[#allocation2 + $0x1f8] sm:$0xff]  ;;  %v4308_v32 = vld [vmem:[#allocation3 + $0x188] sm:$0xff] }
 0x79b   :  { %v4679_v52 = vadd.f32 %v4524_v34, %v4295_v49  ;;  %v5009_v53 = vld [vmem:[#allocation3 + $0x118] sm:$0xff]  ;;  %v4963_v12 = vsel %vm92_vm5, %v4837_v24, 0.0 }
 0x79c   :  { %v5094_v40 = vadd.f32 %v5093_v31, %v5092_v41  ;;  %4746 = vst.msk [vmem:[#allocation3 + $0x138] sm:$0xff] %vm92_vm5, %v4682_v25  ;;  %v5006_v27 = vld [vmem:[#allocation3 + $0x100] sm:$0xff]  ;;  %v5107_v1 = vsel %vm92_vm5, %v5009_v53, 0.0  ;;  %v4964_v31 = vadd.f32 %v4963_v12, %v4962_v8 }
 0x79d   :  { %4743 = vst.msk [vmem:[#allocation3 + $0x120] sm:$0xff] %vm92_vm5, %v4679_v52  ;;  %v4534_v56 = vpop.permute.xlu0 %4533  ;;  %v5101_v33 = vsel %vm92_vm5, %v5006_v27, 0.0  ;;  %v4315_v53 = vld [vmem:[#allocation3 + $0x1c0] sm:$0xff] }
 0x79e   :  { %v5096_v36 = vadd.f32 %v5095_v59, %v5094_v40  ;;  %v4684_v19 = vadd.f32 %v4534_v56, %v4300_v22  ;;  %v4528_v0 = vpop.permute.xlu1 %4527 }
 0x79f   :  { %v4681_v15 = vadd.f32 %v4528_v0, %v4297_v7  ;;  %v4307_v7 = vld [vmem:[#allocation3 + $0x180] sm:$0xff]  ;;  %v5011_v10 = vld [vmem:[#allocation3 + $0x128] sm:$0xff] }
 0x7a0   :  { %v5098_v50 = vadd.f32 %v5097_v26, %v5096_v36  ;;  %4748 = vst.msk [vmem:[#allocation3 + $0x148] sm:$0xff] %vm92_vm5, %v4684_v19  ;;  %v5008_v4 = vld [vmem:[#allocation3 + $0x110] sm:$0xff]  ;;  %v4312_v19 = vld [vmem:[#allocation3 + $0x1a8] sm:$0xff]  ;;  %v5111_v0 = vsel %vm92_vm5, %v5011_v10, 0.0 }
 0x7a1   :  { %4745 = vst.msk [vmem:[#allocation3 + $0x130] sm:$0xff] %vm92_vm5, %v4681_v15  ;;  %v4538_v38 = vpop.permute.xlu0 %4537  ;;  %v5105_v9 = vsel %vm92_vm5, %v5008_v4, 0.0 }
 0x7a2   :  { %v5100_v51 = vadd.f32 %v5099_v39, %v5098_v50  ;;  %v4686_v42 = vadd.f32 %v4538_v38, %v4302_v29  ;;  %v4532_v61 = vpop.permute.xlu1 %4531  ;;  %v4314_v39 = vld [vmem:[#allocation3 + $0x1b8] sm:$0xff] }
 0x7a3   :  { %v4683_v30 = vadd.f32 %v4532_v61, %v4299_v55  ;;  %v5013_v58 = vld [vmem:[#allocation3 + $0x138] sm:$0xff] }
 0x7a4   :  { %v5102_v63 = vadd.f32 %v5101_v33, %v5100_v51  ;;  %4750 = vst.msk [vmem:[#allocation3 + $0x158] sm:$0xff] %vm92_vm5, %v4686_v42  ;;  %v5010_v41 = vld [vmem:[#allocation3 + $0x120] sm:$0xff] }
 0x7a5   :  { %4747 = vst.msk [vmem:[#allocation3 + $0x140] sm:$0xff] %vm92_vm5, %v4683_v30  ;;  %v4542_v46 = vpop.permute.xlu0 %4541  ;;  %v5109_v40 = vsel %vm92_vm5, %v5010_v41, 0.0  ;;  %v5115_v30 = vsel %vm92_vm5, %v5013_v58, 0.0 }
 0x7a6   :  { %v5104_v62 = vadd.f32 %v5103_v47, %v5102_v63  ;;  %v4688_v57 = vadd.f32 %v4542_v46, %v4304_v44  ;;  %v4536_v17 = vpop.permute.xlu1 %4535  ;;  %v4313_v44 = vld [vmem:[#allocation3 + $0x1b0] sm:$0xff] }
 0x7a7   :  { %v4685_v28 = vadd.f32 %v4536_v17, %v4301_v2  ;;  %v5015_v4 = vld [vmem:[#allocation3 + $0x148] sm:$0xff] }
 0x7a8   :  { %4752 = vst.msk [vmem:[#allocation3 + $0x168] sm:$0xff] %vm92_vm5, %v4688_v57  ;;  %v5106_v60 = vadd.f32 %v5105_v9, %v5104_v62  ;;  %v5012_v26 = vld [vmem:[#allocation3 + $0x130] sm:$0xff]  ;;  %v5119_v11 = vsel %vm92_vm5, %v5015_v4, 0.0 }
 0x7a9   :  { %4749 = vst.msk [vmem:[#allocation3 + $0x150] sm:$0xff] %vm92_vm5, %v4685_v28  ;;  %v4546_v43 = vpop.permute.xlu0 %4545  ;;  %v5113_v38 = vsel %vm92_vm5, %v5012_v26, 0.0 }
 0x7aa   :  { %v4690_v48 = vadd.f32 %v4546_v43, %v4306_v21  ;;  %v4540_v49 = vpop.permute.xlu1 %4539  ;;  %v5108_v25 = vadd.f32 %v5107_v1, %v5106_v60 }
 0x7ab   :  { %v4687_v18 = vadd.f32 %v4540_v49, %v4303_v20  ;;  %v5017_v5 = vld [vmem:[#allocation3 + $0x158] sm:$0xff]  ;;  %v4316_v49 = vld [vmem:[#allocation3 + $0x1c8] sm:$0xff] }
 0x7ac   :  { %4754 = vst.msk [vmem:[#allocation3 + $0x178] sm:$0xff] %vm92_vm5, %v4690_v48  ;;  %v5110_v59 = vadd.f32 %v5109_v40, %v5108_v25  ;;  %v5014_v13 = vld [vmem:[#allocation3 + $0x140] sm:$0xff]  ;;  %v5123_v21 = vsel %vm92_vm5, %v5017_v5, 0.0 }
 0x7ad   :  { %4751 = vst.msk [vmem:[#allocation3 + $0x160] sm:$0xff] %vm92_vm5, %v4687_v18  ;;  %v4550_v34 = vpop.permute.xlu0 %4549  ;;  %v5117_v47 = vsel %vm92_vm5, %v5014_v13, 0.0 }
 0x7ae   :  { %v4692_v52 = vadd.f32 %v4550_v34, %v4308_v32  ;;  %v4544_v22 = vpop.permute.xlu1 %4543  ;;  %v5112_v15 = vadd.f32 %v5111_v0, %v5110_v59 }
 0x7af   :  { %v4689_v6 = vadd.f32 %v4544_v22, %v4305_v45  ;;  %4965 = vadd.xlane.f32.xlu1 %v4964_v31  ;;  %v5019_v24 = vld [vmem:[#allocation3 + $0x168] sm:$0xff] }
 0x7b0   :  { %4756 = vst.msk [vmem:[#allocation3 + $0x188] sm:$0xff] %vm92_vm5, %v4692_v52  ;;  %v5114_v23 = vadd.f32 %v5113_v38, %v5112_v15  ;;  %v5016_v62 = vld [vmem:[#allocation3 + $0x150] sm:$0xff]  ;;  %v5127_v18 = vsel %vm92_vm5, %v5019_v24, 0.0 }
 0x7b1   :  { %4753 = vst.msk [vmem:[#allocation3 + $0x170] sm:$0xff] %vm92_vm5, %v4689_v6  ;;  %v4554_v56 = vpop.permute.xlu0 %4553  ;;  %v5121_v17 = vsel %vm92_vm5, %v5016_v62, 0.0 }
 0x7b2   :  { %v4694_v37 = vadd.f32 %v4554_v56, %v4310_v35  ;;  %v4548_v16 = vpop.permute.xlu1 %4547  ;;  %v5116_v63 = vadd.f32 %v5115_v30, %v5114_v23 }
 0x7b3   :  { %v4691_v36 = vadd.f32 %v4548_v16, %v4307_v7  ;;  %v5021_v25 = vld [vmem:[#allocation3 + $0x178] sm:$0xff] }
 0x7b4   :  { %4758 = vst.msk [vmem:[#allocation3 + $0x198] sm:$0xff] %vm92_vm5, %v4694_v37  ;;  %v5118_v46 = vadd.f32 %v5117_v47, %v5116_v63  ;;  %v5018_v9 = vld [vmem:[#allocation3 + $0x160] sm:$0xff]  ;;  %v5131_v31 = vsel %vm92_vm5, %v5021_v25, 0.0  ;;  %v4321_v47 = vld [vmem:[#allocation3 + $0x1f0] sm:$0xff] }
 0x7b5   :  { %4755 = vst.msk [vmem:[#allocation3 + $0x180] sm:$0xff] %vm92_vm5, %v4691_v36  ;;  %v4558_v29 = vpop.permute.xlu0 %4557  ;;  %v5125_v60 = vsel %vm92_vm5, %v5018_v9, 0.0  ;;  %v4317_v36 = vld [vmem:[#allocation3 + $0x1d0] sm:$0xff] }
 0x7b6   :  { %v4696_v50 = vadd.f32 %v4558_v29, %v4312_v19  ;;  %v4552_v27 = vpop.permute.xlu1 %4551  ;;  %v5120_v57 = vadd.f32 %v5119_v11, %v5118_v46  ;;  %v4318_v29 = vld [vmem:[#allocation3 + $0x1d8] sm:$0xff] }
 0x7b7   :  { %v4693_v55 = vadd.f32 %v4552_v27, %v4309_v3  ;;  %v5023_v35 = vld [vmem:[#allocation3 + $0x188] sm:$0xff] }
 0x7b8   :  { %4760 = vst.msk [vmem:[#allocation3 + $0x1a8] sm:$0xff] %vm92_vm5, %v4696_v50  ;;  %v5122_v28 = vadd.f32 %v5121_v17, %v5120_v57  ;;  %v5020_v1 = vld [vmem:[#allocation3 + $0x170] sm:$0xff]  ;;  %v5135_v7 = vsel %vm92_vm5, %v5023_v35, 0.0 }
 0x7b9   :  { %4757 = vst.msk [vmem:[#allocation3 + $0x190] sm:$0xff] %vm92_vm5, %v4693_v55  ;;  %v4562_v51 = vpop.permute.xlu0 %4561  ;;  %v5129_v41 = vsel %vm92_vm5, %v5020_v1, 0.0 }
 0x7ba   :  { %v4698_v42 = vadd.f32 %v4562_v51, %v4314_v39  ;;  %v4556_v61 = vpop.permute.xlu1 %4555  ;;  %v5124_v20 = vadd.f32 %v5123_v21, %v5122_v28  ;;  %v4322_v21 = vld [vmem:[#allocation3 + $0x1f8] sm:$0xff] }
 0x7bb   :  { %v4695_v33 = vadd.f32 %v4556_v61, %v4311_v54  ;;  %v5025_v37 = vld [vmem:[#allocation3 + $0x198] sm:$0xff]  ;;  %v4319_v54 = vld [vmem:[#allocation3 + $0x1e0] sm:$0xff] }
 0x7bc   :  { %4762 = vst.msk [vmem:[#allocation3 + $0x1b8] sm:$0xff] %vm92_vm5, %v4698_v42  ;;  %v5126_v8 = vadd.f32 %v5125_v60, %v5124_v20  ;;  %v5022_v52 = vld [vmem:[#allocation3 + $0x180] sm:$0xff]  ;;  %v5139_v19 = vsel %vm92_vm5, %v5025_v37, 0.0 }
 0x7bd   :  { %4759 = vst.msk [vmem:[#allocation3 + $0x1a0] sm:$0xff] %vm92_vm5, %v4695_v33  ;;  %v5133_v6 = vsel %vm92_vm5, %v5022_v52, 0.0  ;;  %v4320_v33 = vld [vmem:[#allocation3 + $0x1e8] sm:$0xff] }
 0x7be   :  { %v4560_v2 = vpop.permute.xlu1 %4559  ;;  %v5128_v12 = vadd.f32 %v5127_v18, %v5126_v8 }
 0x7bf   :  { %v4697_v14 = vadd.f32 %v4560_v2, %v4313_v44  ;;  %v5027_v55 = vld [vmem:[#allocation3 + $0x1a8] sm:$0xff] }
 0x7c0   :  { %v5130_v34 = vadd.f32 %v5129_v41, %v5128_v12  ;;  %v5024_v10 = vld [vmem:[#allocation3 + $0x190] sm:$0xff]  ;;  %v5143_v58 = vsel %vm92_vm5, %v5027_v55, 0.0 }
 0x7c1   :  { %4761 = vst.msk [vmem:[#allocation3 + $0x1b0] sm:$0xff] %vm92_vm5, %v4697_v14  ;;  %v5137_v56 = vsel %vm92_vm5, %v5024_v10, 0.0 }
 0x7c2   :  { %v5132_v22 = vadd.f32 %v5131_v31, %v5130_v34 }
 0x7c3   :  { %v5029_v13 = vld [vmem:[#allocation3 + $0x1b8] sm:$0xff] }
 0x7c4   :  { %v5134_v40 = vadd.f32 %v5133_v6, %v5132_v22  ;;  %v5026_v3 = vld [vmem:[#allocation3 + $0x1a0] sm:$0xff]  ;;  %v5147_v46 = vsel %vm92_vm5, %v5029_v13, 0.0 }
 0x7c5   :  { %v5141_v50 = vsel %vm92_vm5, %v5026_v3, 0.0 }
 0x7c6   :  { %v5136_v59 = vadd.f32 %v5135_v7, %v5134_v40 }
 0x7c8   :  { %v5138_v16 = vadd.f32 %v5137_v56, %v5136_v59  ;;  %v5028_v51 = vld [vmem:[#allocation3 + $0x1b0] sm:$0xff] }
 0x7c9   :  { %v5145_v30 = vsel %vm92_vm5, %v5028_v51, 0.0 }
 0x7ca   :  { %v5140_v26 = vadd.f32 %v5139_v19, %v5138_v16 }
 0x7cc   :  { %v5142_v39 = vadd.f32 %v5141_v50, %v5140_v26 }
 0x7ce   :  { %v5144_v42 = vadd.f32 %v5143_v58, %v5142_v39 }
 0x7d0   :  { %v4564_v43 = vpop.permute.xlu1 %4563  ;;  %v5146_v2 = vadd.f32 %v5145_v30, %v5144_v42 }
 0x7d1   :  { %v4699_v48 = vadd.f32 %v4564_v43, %v4315_v53 }
 0x7d2   :  { %v5148_v17 = vadd.f32 %v5147_v46, %v5146_v2 }
 0x7d3   :  { %4763 = vst.msk [vmem:[#allocation3 + $0x1c0] sm:$0xff] %vm92_vm5, %v4699_v48 }
 0x7d4   :  { %v4566_v32 = vpop.permute.xlu0 %4565 }
 0x7d5   :  { %v4700_v45 = vadd.f32 %v4566_v32, %v4316_v49 }
 0x7d7   :  { %4764 = vst.msk [vmem:[#allocation3 + $0x1c8] sm:$0xff] %vm92_vm5, %v4700_v45 }
 0x7da   :  { %v5030_v63 = vld [vmem:[#allocation3 + $0x1c0] sm:$0xff] }
 0x7db   :  { %v5149_v11 = vsel %vm92_vm5, %v5030_v63, 0.0 }
 0x7dc   :  { %v5150_v20 = vadd.f32 %v5149_v11, %v5148_v17 }
 0x7de   :  { %v5031_v4 = vld [vmem:[#allocation3 + $0x1c8] sm:$0xff] }
 0x7df   :  { %v5151_v28 = vsel %vm92_vm5, %v5031_v4, 0.0 }
 0x7e0   :  { %v5152_v24 = vadd.f32 %v5151_v28, %v5150_v20 }
 0x7ed   :  { %v4568_v0 = vpop.permute.xlu1 %4567 }
 0x7ee   :  { %v4701_v15 = vadd.f32 %v4568_v0, %v4317_v36 }
 0x7f0   :  { %4765 = vst.msk [vmem:[#allocation3 + $0x1d0] sm:$0xff] %vm92_vm5, %v4701_v15 }
 0x7f1   :  { %v4570_v27 = vpop.permute.xlu0 %4569 }
 0x7f2   :  { %v4702_v38 = vadd.f32 %v4570_v27, %v4318_v29 }
 0x7f4   :  { %4766 = vst.msk [vmem:[#allocation3 + $0x1d8] sm:$0xff] %vm92_vm5, %v4702_v38 }
 0x7f5   :  { %v4572_v23 = vpop.permute.xlu1 %4571 }
 0x7f6   :  { %v4703_v61 = vadd.f32 %v4572_v23, %v4319_v54 }
 0x7f7   :  { %v5032_v57 = vld [vmem:[#allocation3 + $0x1d0] sm:$0xff] }
 0x7f8   :  { %4767 = vst.msk [vmem:[#allocation3 + $0x1e0] sm:$0xff] %vm92_vm5, %v4703_v61  ;;  %v5153_v53 = vsel %vm92_vm5, %v5032_v57, 0.0 }
 0x7f9   :  { %v4574_v44 = vpop.permute.xlu0 %4573  ;;  %v5154_v18 = vadd.f32 %v5153_v53, %v5152_v24 }
 0x7fa   :  { %v4704_v14 = vadd.f32 %v4574_v44, %v4320_v33 }
 0x7fb   :  { %v5033_v9 = vld [vmem:[#allocation3 + $0x1d8] sm:$0xff] }
 0x7fc   :  { %4768 = vst.msk [vmem:[#allocation3 + $0x1e8] sm:$0xff] %vm92_vm5, %v4704_v14  ;;  %v5155_v48 = vsel %vm92_vm5, %v5033_v9, 0.0 }
 0x7fd   :  { %v4576_v62 = vpop.permute.xlu1 %4575  ;;  %v5156_v1 = vadd.f32 %v5155_v48, %v5154_v18 }
 0x7fe   :  { %v4705_v5 = vadd.f32 %v4576_v62, %v4321_v47 }
 0x7ff   :  { %v5034_v43 = vld [vmem:[#allocation3 + $0x1e0] sm:$0xff] }
 0x800   :  { %4769 = vst.msk [vmem:[#allocation3 + $0x1f0] sm:$0xff] %vm92_vm5, %v4705_v5  ;;  %v5157_v32 = vsel %vm92_vm5, %v5034_v43, 0.0 }
 0x801   :  { %v4578_v60 = vpop.permute.xlu0 %4577  ;;  %v5158_v41 = vadd.f32 %v5157_v32, %v5156_v1 }
 0x802   :  { %v4706_v8 = vadd.f32 %v4578_v60, %v4322_v21 }
 0x803   :  { %v5035_v49 = vld [vmem:[#allocation3 + $0x1e8] sm:$0xff] }
 0x804   :  { %4770 = vst.msk [vmem:[#allocation3 + $0x1f8] sm:$0xff] %vm92_vm5, %v4706_v8  ;;  %v5159_v45 = vsel %vm92_vm5, %v5035_v49, 0.0 }
 0x805   :  { %v5160_v34 = vadd.f32 %v5159_v45, %v5158_v41 }
 0x807   :  { %v5036_v12 = vld [vmem:[#allocation3 + $0x1f0] sm:$0xff] }
 0x808   :  { %v5161_v25 = vsel %vm92_vm5, %v5036_v12, 0.0 }
 0x809   :  { %v5162_v52 = vadd.f32 %v5161_v25, %v5160_v34 }
 0x80b   :  { %v5037_v31 = vld [vmem:[#allocation3 + $0x1f8] sm:$0xff] }
 0x80c   :  { %v5163_v22 = vsel %vm92_vm5, %v5037_v31, 0.0 }
 0x80d   :  { %v5164_v6 = vadd.f32 %v5163_v22, %v5162_v52 }
 0x80f   :  { %5165 = vadd.xlane.f32.xlu0 %v5164_v6 }
 0x838   :  { %v4966_v35 = vpop.xlane.xlu1 %4965 }
 0x839   :  { %v4967_v40 = vrot.slane %v4966_v35, 4 }
 0x83b   :  { %v4968_v7 = vadd.f32 %v4967_v40, %v4966_v35 }
 0x83d   :  { %v4969_v10 = vrot.slane %v4968_v7, 2 }
 0x83f   :  { %v4970_v59 = vadd.f32 %v4969_v10, %v4968_v7 }
 0x841   :  { %v4971_v56 = vrot.slane %v4970_v59, 1 }
 0x843   :  { %v4972_v37 = vadd.f32 %v4971_v56, %v4970_v59 }
 0x845   :  { %5416 = vpush %v4972_v37 }
 0x876   :  { %s5417_s24 = spop %5416 }
 0x877   :  { %v5174_v16 = vstv %s5417_s24 }
 0x878   :  { %5175 = vst [vmem:[#allocation5] sm:$0xff] %v5174_v16 }
 0x879   :  { %6485 = shalt.err (!%p6482_p4)
}
 0x87a   :  { %5187 = dma.vmem_to_hbm [thread:$0]  %s5185_s27, 128, %s11938_s4, [#allocation6]  }
 0x87b   :  { %s6523_s26 = smov [#allocation7]  }
 0x87c   :  { %s5194_s28 = sshll.u32 %s6523_s26, 4  ;;  %s5195_s28 = int_to_ptr.vmem [resolvable:$true] %s5194_s28 }
 0x87d   :  { %s6494_s30 = scalar_lea.vmem %s5195_s28, 128  ;;  %p6499_p6 = scmp.lt.s32.totalorder %s5195_s28, %s5195_s28 }
 0x87e   :  { %p6495_p5 = scmp.ne.s32.totalorder %s5195_s28, %s6494_s30  ;;  %p6500_p7 = scmp.lt.s32.totalorder %s6494_s30, %s6494_s30 }
 0x880   :  { %p6501_p8 = por %p6500_p7, %p6499_p6 }
 0x882   :  { %p6502_p9 = pnand %p6501_p8, %p6495_p5 }
 0x898   :  { %v5166_v36 = vpop.xlane.xlu0 %5165 }
 0x899   :  { %v5167_v19 = vrot.slane %v5166_v36, 4 }
 0x89b   :  { %v5168_v0 = vadd.f32 %v5167_v19, %v5166_v36 }
 0x89d   :  { %v5169_v3 = vrot.slane %v5168_v0, 2 }
 0x89f   :  { %v5170_v26 = vadd.f32 %v5169_v3, %v5168_v0 }
 0x8a1   :  { %v5171_v15 = vrot.slane %v5170_v26, 1 }
 0x8a3   :  { %v5172_v29 = vadd.f32 %v5171_v15, %v5170_v26 }
 0x8a5   :  { %5418 = vpush %v5172_v29 }
 0x8d6   :  { %s5419_s29 = spop %5418 }
 0x8d7   :  { %v5176_v50 = vstv %s5419_s29 }
 0x8d8   :  { %5177 = vst [vmem:[#allocation7] sm:$0xff] %v5176_v50 }
 0x8d9   :  { %6505 = shalt.err (!%p6502_p9)
}
 0x8da   :  { %5197 = dma.vmem_to_hbm [thread:$0]  %s5195_s28, 128, %s11939_s5, [#allocation8]  }
 0x8db   :  { %6514 = dma.done.wait [#allocation6], 128  }
 0x8dc   :  { %6515 = vsyncadd [#allocation6], 4294967168 }
 0x8dd   :  { %6516 = dma.done.wait [#allocation8], 128  }
 0x8de   :  { %6517 = vsyncadd [#allocation8], 4294967168 }
 0x8df   :  { %5204 = vsyncpa [#allocation6], 1 }
 0x8e0   :  { %5205 = vsyncpa [#allocation8], 1 }

</bundles_post_ra>
